<compile_context>
chip_gen: v7x
topology: tpu7x:2x2x1
jax: 0.10.0
libtpu: 0.0.40
codegen_flags: <defaults>
</compile_context>

<pallas_src>
import functools

import jax
import jax.numpy as jnp
from jax import lax
from jax.experimental import pallas as pl
from jax.experimental.pallas import tpu as pltpu

BN_EPS = 1e-5


# --------------------------------------------------------------------------------------
# Host-side weight preprocessing: banded matmul weights in the lane-packed layout.
# --------------------------------------------------------------------------------------
def _banded_w(w_kh, w_in, pad_w, w_out_valid, w_out_total, w_off):
    """One kh tap: maps (w_in*Cin) input lanes -> (w_out_total*Cout) output lanes.

    Output column block wo_t corresponds to the 'virtual' output col wo = wo_t - w_off;
    columns with wo outside [0, w_out_valid) are zero, i.e. W-direction zero padding and the
    F.pad columns are folded into the weight instead of into padded activation buffers.
    """
    K, Cin, Cout = w_kh.shape
    wi = jnp.arange(w_in)[:, None]                       # (w_in, 1)
    wo = jnp.arange(w_out_total)[None, :] - w_off        # (1, w_out_total)
    kw = wi - wo + pad_w
    valid = (kw >= 0) & (kw < K) & (wo >= 0) & (wo < w_out_valid)
    t = w_kh[jnp.clip(kw, 0, K - 1)]                     # (w_in, w_out_total, Cin, Cout)
    t = jnp.where(valid[:, :, None, None], t, 0.0)
    t = jnp.transpose(t, (0, 2, 1, 3))                   # (w_in, Cin, w_out_total, Cout)
    return t.reshape(w_in * Cin, w_out_total * Cout).astype(jnp.float32)


def _stage_weight(w_hwio, B, w_in, pad_w, w_out_valid, w_out_total, w_off):
    """(K,K,Cin,Cout) HWIO weights -> (K*B*w_in*Cin, B*w_out_total*Cout) matmul RHS.

    Rows ordered [kh=0 | kh=1 | ...]; each kh block is block-diagonal over batch so ONE dot
    against the lane-packed im2col LHS computes every batch element at once.
    """
    K = w_hwio.shape[0]
    eye_b = jnp.eye(B, dtype=jnp.float32)
    blocks = [jnp.kron(eye_b,
                       _banded_w(w_hwio[kh], w_in, pad_w, w_out_valid, w_out_total, w_off))
              for kh in range(K)]
    return jnp.concatenate(blocks, axis=0)


# --------------------------------------------------------------------------------------
# Fused Pallas kernel
# --------------------------------------------------------------------------------------
def _build_kernel(*, B, K, Cin, Cskip, Cout, H1, W1, Hu, Ho, Wo, off_h):
    assert K == 3, "ConvBlock(padding=1) keeps spatial size only for k_size == 3"
    L1 = B * W1 * Cin        # deconv-input lane width
    L2 = B * Wo * Cskip      # skip (x2) lane width
    Lo = B * Wo * Cout       # conv output lane width (128 for the test shapes)
    pad = 1                  # ConvBlock hardcodes padding=1

    def fill_taps(dst, src, seg_w, a, n, pad_row, h_out, base=0):
        # dst[h, base+kh*seg_w : +seg_w] = V[h - pad_row + kh], where the virtual input V has
        # rows [a, a+n) equal to `src` and zeros elsewhere (conv H-pad rows / F.pad rows).
        # All offsets are static Python ints -> plain ref stores, nothing else is zero-filled.
        for kh in range(K):
            c0 = base + kh * seg_w
            lo = max(0, a + pad_row - kh)
            hi = min(h_out, a + n + pad_row - kh)
            if lo > 0:
                dst[0:lo, c0:c0 + seg_w] = jnp.zeros((lo, seg_w), jnp.float32)
            if hi < h_out:
                dst[hi:h_out, c0:c0 + seg_w] = jnp.zeros((h_out - hi, seg_w), jnp.float32)
            s0 = lo - (a + pad_row - kh)
            dst[lo:hi, c0:c0 + seg_w] = src[s0:s0 + (hi - lo)]

    def kernel(x1_ref, x2_ref, wu_ref, w1_ref, w2_ref, avg_ref, vec_ref,
               o_ref, xu_im, c1_im, c2_im):
        f32 = jnp.float32
        vecs = vec_ref[...]      # (8, Lo): up_b*, c1_b, c1_g, c1_beta, c2_b, c2_g, c2_beta, 0
        avg_m = avg_ref[...]     # (Lo, Lo) per-channel averaging matrix (includes 1/N)

        def bn_relu(y, gamma, beta):
            # Training-mode BatchNorm2d forward (batch stats, biased variance).  sum(y) and
            # sum(y*y) are independent; both channel reductions go through ONE matmul.
            s = jnp.concatenate([jnp.sum(y, axis=0, keepdims=True),
                                 jnp.sum(y * y, axis=0, keepdims=True)], axis=0)
            st = jnp.dot(s, avg_m, preferred_element_type=f32)
            mean = st[0:1]
            var = jnp.maximum(st[1:2] - mean * mean, 0.0)
            return jnp.maximum((y - mean) * lax.rsqrt(var + BN_EPS) * gamma + beta, 0.0)

        # -- ConvTranspose2d(stride=1): one (Hu, K*L1) x (K*L1, Lo) matmul ------------------
        fill_taps(xu_im, x1_ref[...], L1, a=0, n=H1, pad_row=K - 1, h_out=Hu)
        up = jnp.dot(xu_im[...], wu_ref[...], preferred_element_type=f32) + vecs[0:1]
        # `up` already sits on the F.padded W grid (zero weight columns + masked bias), so
        # F.pad and torch.cat([x2, x1_up]) never materialize.

        # -- conv1 + BN + ReLU: concat fused as [x2 taps | x1_up taps] in one contraction ----
        fill_taps(c1_im, x2_ref[...], L2, a=0, n=Ho, pad_row=pad, h_out=Ho, base=0)
        fill_taps(c1_im, up, Lo, a=off_h, n=Hu, pad_row=pad, h_out=Ho, base=K * L2)
        y1 = jnp.dot(c1_im[...], w1_ref[...], preferred_element_type=f32) + vecs[1:2]
        y1 = bn_relu(y1, vecs[2:3], vecs[3:4])

        # -- conv2 + BN + ReLU ----------------------------------------------------------------
        fill_taps(c2_im, y1, Lo, a=0, n=Ho, pad_row=pad, h_out=Ho)
        y2 = jnp.dot(c2_im[...], w2_ref[...], preferred_element_type=f32) + vecs[4:5]
        o_ref[...] = bn_relu(y2, vecs[5:6], vecs[6:7])

    scratch = [
        pltpu.VMEM((Hu, K * L1), jnp.float32),          # deconv im2col LHS
        pltpu.VMEM((Ho, K * (L2 + Lo)), jnp.float32),   # conv1 im2col LHS ([x2 | x1_up] taps)
        pltpu.VMEM((Ho, K * Lo), jnp.float32),          # conv2 im2col LHS
    ]
    return kernel, scratch


# ----------------------------- parameters -----------------------------------
def init_params(key, in_feat, out_feat, k):
    keys = jax.random.split(key, 6)
    s = 0.1
    return {
        # ConvTranspose2d weight layout (torch): (in, out, kH, kW)
        "up_w": s * jax.random.normal(keys[0], (in_feat, out_feat, k, k), jnp.float32),
        "up_b": s * jax.random.normal(keys[1], (out_feat,), jnp.float32),
        # Conv2d weight layout (torch): (out, in, kH, kW)
        "c1_w": s * jax.random.normal(keys[2], (out_feat, in_feat, k, k), jnp.float32),
        "c1_b": s * jax.random.normal(keys[3], (out_feat,), jnp.float32),
        "c1_gamma": jnp.ones((out_feat,), jnp.float32),
        "c1_beta": jnp.zeros((out_feat,), jnp.float32),
        "c2_w": s * jax.random.normal(keys[4], (out_feat, out_feat, k, k), jnp.float32),
        "c2_b": s * jax.random.normal(keys[5], (out_feat,), jnp.float32),
        "c2_gamma": jnp.ones((out_feat,), jnp.float32),
        "c2_beta": jnp.zeros((out_feat,), jnp.float32),
    }


# ----------------------------- forward pass ----------------------------------
@functools.partial(jax.jit, static_argnames=("K",))
def upsample_block_forward(params, x1_nchw, x2_nchw, K):
    B, Cin, H1, W1 = x1_nchw.shape
    _, Cskip, Ho, Wo = x2_nchw.shape
    Cout = params["up_w"].shape[1]
    assert params["c1_w"].shape[1] == Cskip + Cout       # conv1 sees cat([x2, x1_up])

    Hu, Wu = H1 + K - 1, W1 + K - 1                      # ConvTranspose2d (stride 1) output
    diffY, diffX = Ho - Hu, Wo - Wu
    assert diffY >= 0 and diffX >= 0
    off_h, off_w = diffY // 2, diffX // 2

    # NCHW -> lane-packed (rows = H, lanes = b*W*C); output lanes are B*Wo*Cout (= 128 here)
    x1 = jnp.transpose(x1_nchw, (2, 0, 3, 1)).reshape(H1, B * W1 * Cin)
    x2 = jnp.transpose(x2_nchw, (2, 0, 3, 1)).reshape(Ho, B * Wo * Cskip)

    # torch weights -> HWIO; ConvTranspose2d == correlation with the spatially flipped kernel
    w_up = jnp.transpose(params["up_w"][:, :, ::-1, ::-1], (2, 3, 0, 1))
    w1 = jnp.transpose(params["c1_w"], (2, 3, 1, 0))
    w2 = jnp.transpose(params["c2_w"], (2, 3, 1, 0))

    wu_big = _stage_weight(w_up, B, W1, K - 1, Wu, Wo, off_w)       # (K*B*W1*Cin, B*Wo*Cout)
    w1_big = jnp.concatenate(
        [_stage_weight(w1[:, :, :Cskip, :], B, Wo, 1, Wo, Wo, 0),   # x2 (skip) half
         _stage_weight(w1[:, :, Cskip:, :], B, Wo, 1, Wo, Wo, 0)],  # x1_up half
        axis=0)
    w2_big = _stage_weight(w2, B, Wo, 1, Wo, Wo, 0)

    Lo = B * Wo * Cout
    lane = lambda v: jnp.tile(v.astype(jnp.float32), B * Wo)        # (Lo,) in (b,w,c) order
    # deconv bias masked to the valid F.pad columns (F.pad columns must stay exactly zero)
    w_valid = (jnp.arange(Wo) >= off_w) & (jnp.arange(Wo) < off_w + Wu)
    up_b = jnp.tile(jnp.where(w_valid[:, None],
                              params["up_b"][None, :].astype(jnp.float32), 0.0).reshape(-1), B)
    vec_slab = jnp.stack(
        [up_b, lane(params["c1_b"]), lane(params["c1_gamma"]), lane(params["c1_beta"]),
         lane(params["c2_b"]), lane(params["c2_gamma"]), lane(params["c2_beta"]),
         jnp.zeros((Lo,), jnp.float32)], axis=0)                    # (8, Lo)

    # per-channel averaging matrix in the (b*Wo + w)*Cout + c lane layout (includes 1/N)
    avg = jnp.tile(jnp.eye(Cout, dtype=jnp.float32), (B * Wo, B * Wo)) / (B * Ho * Wo)

    kernel, scratch = _build_kernel(B=B, K=K, Cin=Cin, Cskip=Cskip, Cout=Cout,
                                    H1=H1, W1=W1, Hu=Hu, Ho=Ho, Wo=Wo, off_h=off_h)

    out = pl.pallas_call(
        kernel,
        out_shape=jax.ShapeDtypeStruct((Ho, Lo), jnp.float32),
        in_specs=[pl.BlockSpec(memory_space=pltpu.MemorySpace.VMEM)] * 7,
        out_specs=pl.BlockSpec(memory_space=pltpu.MemorySpace.VMEM),
        scratch_shapes=scratch,
    )(x1, x2, wu_big, w1_big, w2_big, avg, vec_slab)

    return jnp.transpose(out.reshape(Ho, B, Wo, Cout), (1, 3, 0, 2))   # -> NCHW


# ----------------------------- pure-JAX reference ----------------------------
def _ref_conv(x_nhwc, w_kkio, bias, pad):
    y = lax.conv_general_dilated(x_nhwc, w_kkio, window_strides=(1, 1), padding=pad,
                                 dimension_numbers=('NHWC', 'HWIO', 'NHWC'))
    return y + bias.reshape(1, 1, 1, -1)


def _ref_bn_relu(x, gamma, beta):
    mean = jnp.mean(x, axis=(0, 1, 2), keepdims=True)
    var = jnp.mean((x - mean) ** 2, axis=(0, 1, 2), keepdims=True)
    x = (x - mean) * lax.rsqrt(var + BN_EPS)
    x = x * gamma.reshape(1, 1, 1, -1) + beta.reshape(1, 1, 1, -1)
    return jnp.maximum(x, 0.0)


def reference_forward(params, x1_nchw, x2_nchw, K):
    x1 = jnp.transpose(x1_nchw, (0, 2, 3, 1))
    x2 = jnp.transpose(x2_nchw, (0, 2, 3, 1))
    w_up = jnp.transpose(params["up_w"][:, :, ::-1, ::-1], (2, 3, 0, 1))
    x1_up = _ref_conv(x1, w_up, params["up_b"], [(K - 1, K - 1), (K - 1, K - 1)])
    diffY = x2.shape[1] - x1_up.shape[1]
    diffX = x2.shape[2] - x1_up.shape[2]
    x1_up = jnp.pad(x1_up, ((0, 0),
                            (diffY // 2, diffY - diffY // 2),
                            (diffX // 2, diffX - diffX // 2),
                            (0, 0)))
    x = jnp.concatenate([x2, x1_up], axis=-1)
    w1 = jnp.transpose(params["c1_w"], (2, 3, 1, 0))
    x = _ref_bn_relu(_ref_conv(x, w1, params["c1_b"], [(1, 1), (1, 1)]),
                     params["c1_gamma"], params["c1_beta"])
    w2 = jnp.transpose(params["c2_w"], (2, 3, 1, 0))
    x = _ref_bn_relu(_ref_conv(x, w2, params["c2_b"], [(1, 1), (1, 1)]),
                     params["c2_gamma"], params["c2_beta"])
    return jnp.transpose(x, (0, 3, 1, 2))


# ----------------------------------- main ------------------------------------
if __name__ == "__main__":
    B, in_feat, out_feat, K = 2, 8, 4, 3
    key = jax.random.PRNGKey(0)
    k1, k2, kp = jax.random.split(key, 3)
    # x1: decoder feature (in_feat channels); x2: skip connection (out_feat channels).
    x1 = jax.random.normal(k1, (B, in_feat, 13, 13), jnp.float32)   # NCHW
    x2 = jax.random.normal(k2, (B, out_feat, 16, 16), jnp.float32)  # NCHW
    params = init_params(kp, in_feat, out_feat, K)

    out = jax.block_until_ready(upsample_block_forward(params, x1, x2, K))
    ref = jax.block_until_ready(reference_forward(params, x1, x2, K))

    assert out.shape == (B, out_feat, 16, 16), out.shape
    err = float(jnp.max(jnp.abs(out - ref)))
    assert err < 2e-4, f"mismatch vs reference: {err}"
    print("KERNEL_OK")
</pallas_src>

<mosaic_0001>
module attributes {stable_mosaic.version = 11 : i64} {
  func.func @kernel(%arg0: memref<13x208xf32, #tpu.memory_space<vmem>>, %arg1: memref<16x128xf32, #tpu.memory_space<vmem>>, %arg2: memref<624x128xf32, #tpu.memory_space<vmem>>, %arg3: memref<768x128xf32, #tpu.memory_space<vmem>>, %arg4: memref<384x128xf32, #tpu.memory_space<vmem>>, %arg5: memref<128x128xf32, #tpu.memory_space<vmem>>, %arg6: memref<8x128xf32, #tpu.memory_space<vmem>>, %arg7: memref<16x128xf32, #tpu.memory_space<vmem>>, %arg8: memref<15x624xf32, #tpu.memory_space<vmem>>, %arg9: memref<16x768xf32, #tpu.memory_space<vmem>>, %arg10: memref<16x384xf32, #tpu.memory_space<vmem>>) attributes {dimension_semantics = [], scalar_prefetch = 0 : i64, scratch_operands = 3 : i64, tpu.core_type = #tpu.core_type<tc>} {
    %c0 = arith.constant 0 : index
    %c0_0 = arith.constant 0 : index
    %0 = vector.load %arg6[%c0, %c0_0] : memref<8x128xf32, #tpu.memory_space<vmem>>, vector<8x128xf32>
    %c0_1 = arith.constant 0 : index
    %c0_2 = arith.constant 0 : index
    %1 = vector.load %arg5[%c0_1, %c0_2] : memref<128x128xf32, #tpu.memory_space<vmem>>, vector<128x128xf32>
    %c0_3 = arith.constant 0 : index
    %c0_4 = arith.constant 0 : index
    %2 = vector.load %arg0[%c0_3, %c0_4] : memref<13x208xf32, #tpu.memory_space<vmem>>, vector<13x208xf32>
    %cst = arith.constant 0.000000e+00 : f32
    %3 = vector.broadcast %cst : f32 to vector<2x208xf32>
    %c0_5 = arith.constant 0 : index
    %c0_6 = arith.constant 0 : index
    %4 = vector.load %arg8[%c0_5, %c0_6] : memref<15x624xf32, #tpu.memory_space<vmem>>, vector<2x208xf32>
    tpu.vector_store %arg8[%c0_5, %c0_6], %3 {strides = array<i32>} : memref<15x624xf32, #tpu.memory_space<vmem>>, vector<2x208xf32>,
    %c2 = arith.constant 2 : index
    %c0_7 = arith.constant 0 : index
    %5 = vector.load %arg8[%c2, %c0_7] : memref<15x624xf32, #tpu.memory_space<vmem>>, vector<13x208xf32>
    tpu.vector_store %arg8[%c2, %c0_7], %2 {strides = array<i32>} : memref<15x624xf32, #tpu.memory_space<vmem>>, vector<13x208xf32>,
    %cst_8 = arith.constant 0.000000e+00 : f32
    %6 = vector.broadcast %cst_8 : f32 to vector<1x208xf32>
    %c0_9 = arith.constant 0 : index
    %c208 = arith.constant 208 : index
    %7 = vector.load %arg8[%c0_9, %c208] : memref<15x624xf32, #tpu.memory_space<vmem>>, vector<1x208xf32>
    tpu.vector_store %arg8[%c0_9, %c208], %6 {strides = array<i32>} : memref<15x624xf32, #tpu.memory_space<vmem>>, vector<1x208xf32>,
    %cst_10 = arith.constant 0.000000e+00 : f32
    %8 = vector.broadcast %cst_10 : f32 to vector<1x208xf32>
    %c14 = arith.constant 14 : index
    %c208_11 = arith.constant 208 : index
    %9 = vector.load %arg8[%c14, %c208_11] : memref<15x624xf32, #tpu.memory_space<vmem>>, vector<1x208xf32>
    tpu.vector_store %arg8[%c14, %c208_11], %8 {strides = array<i32>} : memref<15x624xf32, #tpu.memory_space<vmem>>, vector<1x208xf32>,
    %c1 = arith.constant 1 : index
    %c208_12 = arith.constant 208 : index
    %10 = vector.load %arg8[%c1, %c208_12] : memref<15x624xf32, #tpu.memory_space<vmem>>, vector<13x208xf32>
    tpu.vector_store %arg8[%c1, %c208_12], %2 {strides = array<i32>} : memref<15x624xf32, #tpu.memory_space<vmem>>, vector<13x208xf32>,
    %cst_13 = arith.constant 0.000000e+00 : f32
    %11 = vector.broadcast %cst_13 : f32 to vector<2x208xf32>
    %c13 = arith.constant 13 : index
    %c416 = arith.constant 416 : index
    %12 = vector.load %arg8[%c13, %c416] : memref<15x624xf32, #tpu.memory_space<vmem>>, vector<2x208xf32>
    tpu.vector_store %arg8[%c13, %c416], %11 {strides = array<i32>} : memref<15x624xf32, #tpu.memory_space<vmem>>, vector<2x208xf32>,
    %c0_14 = arith.constant 0 : index
    %c416_15 = arith.constant 416 : index
    %13 = vector.load %arg8[%c0_14, %c416_15] : memref<15x624xf32, #tpu.memory_space<vmem>>, vector<13x208xf32>
    tpu.vector_store %arg8[%c0_14, %c416_15], %2 {strides = array<i32>} : memref<15x624xf32, #tpu.memory_space<vmem>>, vector<13x208xf32>,
    %c0_16 = arith.constant 0 : index
    %c0_17 = arith.constant 0 : index
    %14 = vector.load %arg8[%c0_16, %c0_17] : memref<15x624xf32, #tpu.memory_space<vmem>>, vector<15x624xf32>
    %c0_18 = arith.constant 0 : index
    %c0_19 = arith.constant 0 : index
    %15 = vector.load %arg2[%c0_18, %c0_19] : memref<624x128xf32, #tpu.memory_space<vmem>>, vector<624x128xf32>
    %cst_20 = arith.constant dense<0.000000e+00> : vector<15x128xf32>
    %16 = tpu.matmul %14, %15, %cst_20 {dimension_numbers = #tpu.dot_dimension_numbers<[1], [0], [0], [1], [0, 0, 1, 1], [], []>} : vector<15x624xf32>, vector<624x128xf32>, vector<15x128xf32> -> vector<15x128xf32>
    %17 = vector.extract_strided_slice %0 {offsets = [0, 0], sizes = [1, 128], strides = [1, 1]} : vector<8x128xf32> to vector<1x128xf32>
    %18 = vector.broadcast %17 : vector<1x128xf32> to vector<15x128xf32>
    %19 = arith.addf %16, %18 : vector<15x128xf32>
    %c0_21 = arith.constant 0 : index
    %c0_22 = arith.constant 0 : index
    %20 = vector.load %arg1[%c0_21, %c0_22] : memref<16x128xf32, #tpu.memory_space<vmem>>, vector<16x128xf32>
    %cst_23 = arith.constant 0.000000e+00 : f32
    %21 = vector.broadcast %cst_23 : f32 to vector<1x128xf32>
    %c0_24 = arith.constant 0 : index
    %c0_25 = arith.constant 0 : index
    %22 = vector.load %arg9[%c0_24, %c0_25] : memref<16x768xf32, #tpu.memory_space<vmem>>, vector<1x128xf32>
    tpu.vector_store %arg9[%c0_24, %c0_25], %21 {strides = array<i32>} : memref<16x768xf32, #tpu.memory_space<vmem>>, vector<1x128xf32>,
    %23 = vector.extract_strided_slice %20 {offsets = [0, 0], sizes = [15, 128], strides = [1, 1]} : vector<16x128xf32> to vector<15x128xf32>
    %c1_26 = arith.constant 1 : index
    %c0_27 = arith.constant 0 : index
    %24 = vector.load %arg9[%c1_26, %c0_27] : memref<16x768xf32, #tpu.memory_space<vmem>>, vector<15x128xf32>
    tpu.vector_store %arg9[%c1_26, %c0_27], %23 {strides = array<i32>} : memref<16x768xf32, #tpu.memory_space<vmem>>, vector<15x128xf32>,
    %c0_28 = arith.constant 0 : index
    %c128 = arith.constant 128 : index
    %25 = vector.load %arg9[%c0_28, %c128] : memref<16x768xf32, #tpu.memory_space<vmem>>, vector<16x128xf32>
    tpu.vector_store %arg9[%c0_28, %c128], %20 {strides = array<i32>} : memref<16x768xf32, #tpu.memory_space<vmem>>, vector<16x128xf32>,
    %cst_29 = arith.constant 0.000000e+00 : f32
    %26 = vector.broadcast %cst_29 : f32 to vector<1x128xf32>
    %c15 = arith.constant 15 : index
    %c256 = arith.constant 256 : index
    %27 = vector.load %arg9[%c15, %c256] : memref<16x768xf32, #tpu.memory_space<vmem>>, vector<1x128xf32>
    tpu.vector_store %arg9[%c15, %c256], %26 {strides = array<i32>} : memref<16x768xf32, #tpu.memory_space<vmem>>, vector<1x128xf32>,
    %28 = vector.extract_strided_slice %20 {offsets = [1, 0], sizes = [15, 128], strides = [1, 1]} : vector<16x128xf32> to vector<15x128xf32>
    %c0_30 = arith.constant 0 : index
    %c256_31 = arith.constant 256 : index
    %29 = vector.load %arg9[%c0_30, %c256_31] : memref<16x768xf32, #tpu.memory_space<vmem>>, vector<15x128xf32>
    tpu.vector_store %arg9[%c0_30, %c256_31], %28 {strides = array<i32>} : memref<16x768xf32, #tpu.memory_space<vmem>>, vector<15x128xf32>,
    %cst_32 = arith.constant 0.000000e+00 : f32
    %30 = vector.broadcast %cst_32 : f32 to vector<1x128xf32>
    %c0_33 = arith.constant 0 : index
    %c384 = arith.constant 384 : index
    %31 = vector.load %arg9[%c0_33, %c384] : memref<16x768xf32, #tpu.memory_space<vmem>>, vector<1x128xf32>
    tpu.vector_store %arg9[%c0_33, %c384], %30 {strides = array<i32>} : memref<16x768xf32, #tpu.memory_space<vmem>>, vector<1x128xf32>,
    %c1_34 = arith.constant 1 : index
    %c384_35 = arith.constant 384 : index
    %32 = vector.load %arg9[%c1_34, %c384_35] : memref<16x768xf32, #tpu.memory_space<vmem>>, vector<15x128xf32>
    tpu.vector_store %arg9[%c1_34, %c384_35], %19 {strides = array<i32>} : memref<16x768xf32, #tpu.memory_space<vmem>>, vector<15x128xf32>,
    %cst_36 = arith.constant 0.000000e+00 : f32
    %33 = vector.broadcast %cst_36 : f32 to vector<1x128xf32>
    %c15_37 = arith.constant 15 : index
    %c512 = arith.constant 512 : index
    %34 = vector.load %arg9[%c15_37, %c512] : memref<16x768xf32, #tpu.memory_space<vmem>>, vector<1x128xf32>
    tpu.vector_store %arg9[%c15_37, %c512], %33 {strides = array<i32>} : memref<16x768xf32, #tpu.memory_space<vmem>>, vector<1x128xf32>,
    %c0_38 = arith.constant 0 : index
    %c512_39 = arith.constant 512 : index
    %35 = vector.load %arg9[%c0_38, %c512_39] : memref<16x768xf32, #tpu.memory_space<vmem>>, vector<15x128xf32>
    tpu.vector_store %arg9[%c0_38, %c512_39], %19 {strides = array<i32>} : memref<16x768xf32, #tpu.memory_space<vmem>>, vector<15x128xf32>,
    %cst_40 = arith.constant 0.000000e+00 : f32
    %36 = vector.broadcast %cst_40 : f32 to vector<2x128xf32>
    %c14_41 = arith.constant 14 : index
    %c640 = arith.constant 640 : index
    %37 = vector.load %arg9[%c14_41, %c640] : memref<16x768xf32, #tpu.memory_space<vmem>>, vector<2x128xf32>
    tpu.vector_store %arg9[%c14_41, %c640], %36 {strides = array<i32>} : memref<16x768xf32, #tpu.memory_space<vmem>>, vector<2x128xf32>,
    %38 = vector.extract_strided_slice %19 {offsets = [1, 0], sizes = [14, 128], strides = [1, 1]} : vector<15x128xf32> to vector<14x128xf32>
    %c0_42 = arith.constant 0 : index
    %c640_43 = arith.constant 640 : index
    %39 = vector.load %arg9[%c0_42, %c640_43] : memref<16x768xf32, #tpu.memory_space<vmem>>, vector<14x128xf32>
    tpu.vector_store %arg9[%c0_42, %c640_43], %38 {strides = array<i32>} : memref<16x768xf32, #tpu.memory_space<vmem>>, vector<14x128xf32>,
    %c0_44 = arith.constant 0 : index
    %c0_45 = arith.constant 0 : index
    %40 = vector.load %arg9[%c0_44, %c0_45] : memref<16x768xf32, #tpu.memory_space<vmem>>, vector<16x768xf32>
    %c0_46 = arith.constant 0 : index
    %c0_47 = arith.constant 0 : index
    %41 = vector.load %arg3[%c0_46, %c0_47] : memref<768x128xf32, #tpu.memory_space<vmem>>, vector<768x128xf32>
    %cst_48 = arith.constant dense<0.000000e+00> : vector<16x128xf32>
    %42 = tpu.matmul %40, %41, %cst_48 {dimension_numbers = #tpu.dot_dimension_numbers<[1], [0], [0], [1], [0, 0, 1, 1], [], []>} : vector<16x768xf32>, vector<768x128xf32>, vector<16x128xf32> -> vector<16x128xf32>
    %43 = vector.extract_strided_slice %0 {offsets = [1, 0], sizes = [1, 128], strides = [1, 1]} : vector<8x128xf32> to vector<1x128xf32>
    %44 = vector.broadcast %43 : vector<1x128xf32> to vector<16x128xf32>
    %45 = arith.addf %42, %44 : vector<16x128xf32>
    %46 = vector.extract_strided_slice %0 {offsets = [2, 0], sizes = [1, 128], strides = [1, 1]} : vector<8x128xf32> to vector<1x128xf32>
    %47 = vector.extract_strided_slice %0 {offsets = [3, 0], sizes = [1, 128], strides = [1, 1]} : vector<8x128xf32> to vector<1x128xf32>
    %cst_49 = arith.constant dense<0.000000e+00> : vector<128xf32>
    %48 = vector.multi_reduction <add>, %45, %cst_49 [0] : vector<16x128xf32> to vector<128xf32>
    %49 = vector.shape_cast %48 : vector<128xf32> to vector<1x128xf32>
    %50 = arith.mulf %45, %45 : vector<16x128xf32>
    %cst_50 = arith.constant dense<0.000000e+00> : vector<128xf32>
    %51 = vector.multi_reduction <add>, %50, %cst_50 [0] : vector<16x128xf32> to vector<128xf32>
    %52 = vector.shape_cast %51 : vector<128xf32> to vector<1x128xf32>
    %53 = tpu.concatenate %49, %52 in 0 : vector<1x128xf32>, vector<1x128xf32> -> vector<2x128xf32>
    %cst_51 = arith.constant dense<0.000000e+00> : vector<2x128xf32>
    %54 = tpu.matmul %53, %1, %cst_51 {dimension_numbers = #tpu.dot_dimension_numbers<[1], [0], [0], [1], [0, 0, 1, 1], [], []>} : vector<2x128xf32>, vector<128x128xf32>, vector<2x128xf32> -> vector<2x128xf32>
    %55 = vector.extract_strided_slice %54 {offsets = [0, 0], sizes = [1, 128], strides = [1, 1]} : vector<2x128xf32> to vector<1x128xf32>
    %56 = vector.extract_strided_slice %54 {offsets = [1, 0], sizes = [1, 128], strides = [1, 1]} : vector<2x128xf32> to vector<1x128xf32>
    %57 = arith.mulf %55, %55 : vector<1x128xf32>
    %58 = arith.subf %56, %57 : vector<1x128xf32>
    %cst_52 = arith.constant 0.000000e+00 : f32
    %59 = vector.broadcast %cst_52 : f32 to vector<1x128xf32>
    %60 = arith.maximumf %58, %59 : vector<1x128xf32>
    %61 = vector.broadcast %55 : vector<1x128xf32> to vector<16x128xf32>
    %62 = arith.subf %45, %61 : vector<16x128xf32>
    %cst_53 = arith.constant 9.99999974E-6 : f32
    %63 = vector.broadcast %cst_53 : f32 to vector<1x128xf32>
    %64 = arith.addf %60, %63 : vector<1x128xf32>
    %65 = math.rsqrt %64 : vector<1x128xf32>
    %66 = vector.broadcast %65 : vector<1x128xf32> to vector<16x128xf32>
    %67 = arith.mulf %62, %66 : vector<16x128xf32>
    %68 = vector.broadcast %46 : vector<1x128xf32> to vector<16x128xf32>
    %69 = arith.mulf %67, %68 : vector<16x128xf32>
    %70 = vector.broadcast %47 : vector<1x128xf32> to vector<16x128xf32>
    %71 = arith.addf %69, %70 : vector<16x128xf32>
    %cst_54 = arith.constant 0.000000e+00 : f32
    %72 = vector.broadcast %cst_54 : f32 to vector<16x128xf32>
    %73 = arith.maximumf %71, %72 : vector<16x128xf32>
    %cst_55 = arith.constant 0.000000e+00 : f32
    %74 = vector.broadcast %cst_55 : f32 to vector<1x128xf32>
    %c0_56 = arith.constant 0 : index
    %c0_57 = arith.constant 0 : index
    %75 = vector.load %arg10[%c0_56, %c0_57] : memref<16x384xf32, #tpu.memory_space<vmem>>, vector<1x128xf32>
    tpu.vector_store %arg10[%c0_56, %c0_57], %74 {strides = array<i32>} : memref<16x384xf32, #tpu.memory_space<vmem>>, vector<1x128xf32>,
    %76 = vector.extract_strided_slice %73 {offsets = [0, 0], sizes = [15, 128], strides = [1, 1]} : vector<16x128xf32> to vector<15x128xf32>
    %c1_58 = arith.constant 1 : index
    %c0_59 = arith.constant 0 : index
    %77 = vector.load %arg10[%c1_58, %c0_59] : memref<16x384xf32, #tpu.memory_space<vmem>>, vector<15x128xf32>
    tpu.vector_store %arg10[%c1_58, %c0_59], %76 {strides = array<i32>} : memref<16x384xf32, #tpu.memory_space<vmem>>, vector<15x128xf32>,
    %c0_60 = arith.constant 0 : index
    %c128_61 = arith.constant 128 : index
    %78 = vector.load %arg10[%c0_60, %c128_61] : memref<16x384xf32, #tpu.memory_space<vmem>>, vector<16x128xf32>
    tpu.vector_store %arg10[%c0_60, %c128_61], %73 {strides = array<i32>} : memref<16x384xf32, #tpu.memory_space<vmem>>, vector<16x128xf32>,
    %cst_62 = arith.constant 0.000000e+00 : f32
    %79 = vector.broadcast %cst_62 : f32 to vector<1x128xf32>
    %c15_63 = arith.constant 15 : index
    %c256_64 = arith.constant 256 : index
    %80 = vector.load %arg10[%c15_63, %c256_64] : memref<16x384xf32, #tpu.memory_space<vmem>>, vector<1x128xf32>
    tpu.vector_store %arg10[%c15_63, %c256_64], %79 {strides = array<i32>} : memref<16x384xf32, #tpu.memory_space<vmem>>, vector<1x128xf32>,
    %81 = vector.extract_strided_slice %73 {offsets = [1, 0], sizes = [15, 128], strides = [1, 1]} : vector<16x128xf32> to vector<15x128xf32>
    %c0_65 = arith.constant 0 : index
    %c256_66 = arith.constant 256 : index
    %82 = vector.load %arg10[%c0_65, %c256_66] : memref<16x384xf32, #tpu.memory_space<vmem>>, vector<15x128xf32>
    tpu.vector_store %arg10[%c0_65, %c256_66], %81 {strides = array<i32>} : memref<16x384xf32, #tpu.memory_space<vmem>>, vector<15x128xf32>,
    %c0_67 = arith.constant 0 : index
    %c0_68 = arith.constant 0 : index
    %83 = vector.load %arg10[%c0_67, %c0_68] : memref<16x384xf32, #tpu.memory_space<vmem>>, vector<16x384xf32>
    %c0_69 = arith.constant 0 : index
    %c0_70 = arith.constant 0 : index
    %84 = vector.load %arg4[%c0_69, %c0_70] : memref<384x128xf32, #tpu.memory_space<vmem>>, vector<384x128xf32>
    %cst_71 = arith.constant dense<0.000000e+00> : vector<16x128xf32>
    %85 = tpu.matmul %83, %84, %cst_71 {dimension_numbers = #tpu.dot_dimension_numbers<[1], [0], [0], [1], [0, 0, 1, 1], [], []>} : vector<16x384xf32>, vector<384x128xf32>, vector<16x128xf32> -> vector<16x128xf32>
    %86 = vector.extract_strided_slice %0 {offsets = [4, 0], sizes = [1, 128], strides = [1, 1]} : vector<8x128xf32> to vector<1x128xf32>
    %87 = vector.broadcast %86 : vector<1x128xf32> to vector<16x128xf32>
    %88 = arith.addf %85, %87 : vector<16x128xf32>
    %89 = vector.extract_strided_slice %0 {offsets = [5, 0], sizes = [1, 128], strides = [1, 1]} : vector<8x128xf32> to vector<1x128xf32>
    %90 = vector.extract_strided_slice %0 {offsets = [6, 0], sizes = [1, 128], strides = [1, 1]} : vector<8x128xf32> to vector<1x128xf32>
    %cst_72 = arith.constant dense<0.000000e+00> : vector<128xf32>
    %91 = vector.multi_reduction <add>, %88, %cst_72 [0] : vector<16x128xf32> to vector<128xf32>
    %92 = vector.shape_cast %91 : vector<128xf32> to vector<1x128xf32>
    %93 = arith.mulf %88, %88 : vector<16x128xf32>
    %cst_73 = arith.constant dense<0.000000e+00> : vector<128xf32>
    %94 = vector.multi_reduction <add>, %93, %cst_73 [0] : vector<16x128xf32> to vector<128xf32>
    %95 = vector.shape_cast %94 : vector<128xf32> to vector<1x128xf32>
    %96 = tpu.concatenate %92, %95 in 0 : vector<1x128xf32>, vector<1x128xf32> -> vector<2x128xf32>
    %cst_74 = arith.constant dense<0.000000e+00> : vector<2x128xf32>
    %97 = tpu.matmul %96, %1, %cst_74 {dimension_numbers = #tpu.dot_dimension_numbers<[1], [0], [0], [1], [0, 0, 1, 1], [], []>} : vector<2x128xf32>, vector<128x128xf32>, vector<2x128xf32> -> vector<2x128xf32>
    %98 = vector.extract_strided_slice %97 {offsets = [0, 0], sizes = [1, 128], strides = [1, 1]} : vector<2x128xf32> to vector<1x128xf32>
    %99 = vector.extract_strided_slice %97 {offsets = [1, 0], sizes = [1, 128], strides = [1, 1]} : vector<2x128xf32> to vector<1x128xf32>
    %100 = arith.mulf %98, %98 : vector<1x128xf32>
    %101 = arith.subf %99, %100 : vector<1x128xf32>
    %cst_75 = arith.constant 0.000000e+00 : f32
    %102 = vector.broadcast %cst_75 : f32 to vector<1x128xf32>
    %103 = arith.maximumf %101, %102 : vector<1x128xf32>
    %104 = vector.broadcast %98 : vector<1x128xf32> to vector<16x128xf32>
    %105 = arith.subf %88, %104 : vector<16x128xf32>
    %cst_76 = arith.constant 9.99999974E-6 : f32
    %106 = vector.broadcast %cst_76 : f32 to vector<1x128xf32>
    %107 = arith.addf %103, %106 : vector<1x128xf32>
    %108 = math.rsqrt %107 : vector<1x128xf32>
    %109 = vector.broadcast %108 : vector<1x128xf32> to vector<16x128xf32>
    %110 = arith.mulf %105, %109 : vector<16x128xf32>
    %111 = vector.broadcast %89 : vector<1x128xf32> to vector<16x128xf32>
    %112 = arith.mulf %110, %111 : vector<16x128xf32>
    %113 = vector.broadcast %90 : vector<1x128xf32> to vector<16x128xf32>
    %114 = arith.addf %112, %113 : vector<16x128xf32>
    %cst_77 = arith.constant 0.000000e+00 : f32
    %115 = vector.broadcast %cst_77 : f32 to vector<16x128xf32>
    %116 = arith.maximumf %114, %115 : vector<16x128xf32>
    %c0_78 = arith.constant 0 : index
    %c0_79 = arith.constant 0 : index
    %117 = vector.load %arg7[%c0_78, %c0_79] : memref<16x128xf32, #tpu.memory_space<vmem>>, vector<16x128xf32>
    tpu.vector_store %arg7[%c0_78, %c0_79], %116 {strides = array<i32>} : memref<16x128xf32, #tpu.memory_space<vmem>>, vector<16x128xf32>,
    return
  }
}

</mosaic_0001>

<bundles_post_ra>
// kernel: mul.39
= control target key start
LH: loop header
LB: loop body
LE: loop exit
PB: predicated region body
PF: predicated region fallthrough
CT: control target
= control target key end

     0   :  { %vm6_vm0 = vcmask 1043458   ;;  %s211_s6 = smov 3  ;;  %vm10_vm1 = vcmask 1045508   ;;  %vm14_vm2 = vcmask 1047558   ;;  %s214_s9 = smov 12  ;;  %vm16_vm3 = vcmask 31744   ;;  %s6167_s0 = inlined_call_operand.vmem [shape: f32[16,4,16,4], index: 0, kind: input, shape index: {}]   ;;  %s6168_s1 = inlined_call_operand.vmem [shape: f32[64,64], index: 1, kind: output, shape index: {}]  }
   0x1   :  { %v2954_v0 = vld [vmem:[%s6167_s0 + $0x8f] ss:$16 sm:%s211_s6]   ;;  %s219_s10 = smov 48  ;;  %s224_s15 = smov 192  ;;  %vm185_vm4 = vcmask 523744   ;;  %vm368_vm5 = vcmask 490944  }
   0x2   :  { %v2955_v1 = vld [vmem:[%s6167_s0 + $0x8f] ss:$16 sm:%s214_s9]   ;;  %s166_s16 = smov 3  ;;  %s169_s21 = smov 12  ;;  %vm551_vm6 = vcmask 458144   ;;  %vm734_vm7 = vcmask 425344  }
   0x3   :  { %v2956_v2 = vld [vmem:[%s6167_s0 + $0x8f] ss:$16 sm:%s219_s10]   ;;  %v217_v3 = vsel %vm6_vm0, %v2955_v1, %v2954_v0  ;;  %s174_s22 = smov 48  ;;  %s179_s27 = smov 192  ;;  %vm917_vm8 = vcmask 392544   ;;  %vm1100_vm9 = vcmask 359744  }
   0x4   :  { %v2957_v4 = vld [vmem:[%s6167_s0 + $0x8f] ss:$16 sm:%s224_s15]   ;;  %v222_v6 = vsel %vm10_vm1, %v2956_v2, %v217_v3  ;;  %s234_s28 = smov 3  ;;  %s237_s4 = smov 12  ;;  %vm1283_vm10 = vcmask 326944   ;;  %vm1466_vm11 = vcmask 294144  }
   0x5   :  { %v2945_v5 = vld [vmem:[%s6167_s0 + $0xf] ss:$16 sm:%s166_s16]   ;;  %v227_v9 = vsel %vm14_vm2, %v2957_v4, %v222_v6  ;;  %s242_s5 = smov 48  ;;  %s3545_s6 = smov 60   ;;  %vm1649_vm12 = vcmask 261344   ;;  %vm1832_vm13 = vcmask 228544  }
   0x6   :  { %v2946_v7 = vld [vmem:[%s6167_s0 + $0xf] ss:$16 sm:%s169_s21]   ;;  %228 = vrot.lane.b32.xlu1 %v227_v9, %s3545_s6  ;;  %s247_s9 = smov 192  ;;  %s188_s10 = smov 3  ;;  %vm2015_vm14 = vcmask 195744   ;;  %vm2198_vm15 = vcmask 162944  }
   0x7   :  { %v2947_v8 = vld [vmem:[%s6167_s0 + $0xf] ss:$16 sm:%s174_s22]   ;;  %v172_v10 = vsel %vm6_vm0, %v2946_v7, %v2945_v5  ;;  %s191_s15 = smov 12  ;;  %s196_s16 = smov 48 }
   0x8   :  { %v2948_v11 = vld [vmem:[%s6167_s0 + $0xf] ss:$16 sm:%s179_s27]   ;;  %v177_v13 = vsel %vm10_vm1, %v2947_v8, %v172_v10  ;;  %s201_s19 = smov 192  ;;  %s280_s20 = smov 3 }
   0x9   :  { %v2959_v12 = vld [vmem:[%s6167_s0 + $0x28f] ss:$16 sm:%s234_s28]   ;;  %v182_v15 = vsel %vm14_vm2, %v2948_v11, %v177_v13  ;;  %s283_s25 = smov 12  ;;  %s288_s26 = smov 48 }
   0xa   :  { %v2960_v14 = vld [vmem:[%s6167_s0 + $0x28f] ss:$16 sm:%s237_s4]   ;;  %183 = vrot.lane.b32.xlu0 %v182_v15, %s3545_s6  ;;  %s293_s29 = smov 192  ;;  %s257_s30 = smov 3 }
   0xb   :  { %v240_v16 = vsel %vm6_vm0, %v2960_v14, %v2959_v12  ;;  %v2961_v17 = vld [vmem:[%s6167_s0 + $0x28f] ss:$16 sm:%s242_s5]   ;;  %s260_s7 = smov 12  ;;  %s265_s8 = smov 48 }
   0xc   :  { %v2962_v18 = vld [vmem:[%s6167_s0 + $0x28f] ss:$16 sm:%s247_s9]   ;;  %v245_v19 = vsel %vm10_vm1, %v2961_v17, %v240_v16  ;;  %s270_s13 = smov 192  ;;  %s329_s17 = smov 12 }
   0xd   :  { %v2949_v20 = vld [vmem:[%s6167_s0 + $0x20f] ss:$16 sm:%s188_s10]   ;;  %v250_v21 = vsel %vm14_vm2, %v2962_v18, %v245_v19  ;;  %s334_s22 = smov 48  ;;  %s339_s23 = smov 192 }
   0xe   :  { %v2950_v22 = vld [vmem:[%s6167_s0 + $0x20f] ss:$16 sm:%s191_s15]   ;;  %251 = vrot.lane.b32.xlu1 %v250_v21, %s3545_s6  ;;  %s306_s2 = smov 12  ;;  %s311_s3 = smov 48 }
   0xf   :  { %v2951_v23 = vld [vmem:[%s6167_s0 + $0x20f] ss:$16 sm:%s196_s16]   ;;  %v194_v24 = vsel %vm6_vm0, %v2950_v22, %v2949_v20  ;;  %s326_s16 = smov 3  ;;  %s316_s9 = smov 192 }
  0x10   :  { %v2952_v25 = vld [vmem:[%s6167_s0 + $0x20f] ss:$16 sm:%s201_s19]   ;;  %v199_v26 = vsel %vm10_vm1, %v2951_v23, %v194_v24  ;;  %s371_s12 = smov 3  ;;  %s379_s18 = smov 48 }
  0x11   :  { %v2969_v27 = vld [vmem:[%s6167_s0 + $0x30f] ss:$16 sm:%s280_s20]   ;;  %v204_v29 = vsel %vm14_vm2, %v2952_v25, %v199_v26  ;;  %s384_s19 = smov 192  ;;  %v2988_v55 = vld [vmem:[%s6167_s0 + $0x20e] ss:$16 sm:%s371_s12]   ;;  %s352_s27 = smov 12 }
  0x12   :  { %v2970_v28 = vld [vmem:[%s6167_s0 + $0x30f] ss:$16 sm:%s283_s25]   ;;  %205 = vrot.lane.b32.xlu0 %v204_v29, %s3545_s6  ;;  %s357_s28 = smov 48  ;;  %s362_s4 = smov 192 }
  0x13   :  { %v286_v30 = vsel %vm6_vm0, %v2970_v28, %v2969_v27  ;;  %v2971_v31 = vld [vmem:[%s6167_s0 + $0x30f] ss:$16 sm:%s288_s26]   ;;  %s303_s26 = smov 3  ;;  %v2990_v59 = vld [vmem:[%s6167_s0 + $0x20e] ss:$16 sm:%s379_s18]   ;;  %s430_s14 = smov 192 }
  0x14   :  { %v2972_v32 = vld [vmem:[%s6167_s0 + $0x30f] ss:$16 sm:%s293_s29]   ;;  %v291_v33 = vsel %vm10_vm1, %v2971_v31, %v286_v30  ;;  %v2991_v60 = vld [vmem:[%s6167_s0 + $0x20e] ss:$16 sm:%s384_s19]   ;;  %s3546_s15 = smov 56   ;;  %s394_s18 = smov 3 }
  0x15   :  { %v2964_v34 = vld [vmem:[%s6167_s0 + $0x10f] ss:$16 sm:%s257_s30]   ;;  %v296_v35 = vsel %vm14_vm2, %v2972_v32, %v291_v33  ;;  %v2985_v0 = vld [vmem:[%s6167_s0 + $0xe] ss:$16 sm:%s352_s27]   ;;  %s402_s24 = smov 48  ;;  %s407_s29 = smov 192 }
  0x16   :  { %v2965_v36 = vld [vmem:[%s6167_s0 + $0x10f] ss:$16 sm:%s260_s7]   ;;  %297 = vrot.lane.b32.xlu1 %v296_v35, %s3545_s6  ;;  %s417_s7 = smov 3  ;;  %s476_s10 = smov 192 }
  0x17   :  { %v2966_v37 = vld [vmem:[%s6167_s0 + $0x10f] ss:$16 sm:%s265_s8]   ;;  %v263_v38 = vsel %vm6_vm0, %v2965_v36, %v2964_v34  ;;  %s420_s8 = smov 12  ;;  %v2986_v1 = vld [vmem:[%s6167_s0 + $0xe] ss:$16 sm:%s357_s28]   ;;  %s443_s19 = smov 12 }
  0x18   :  { %v2967_v39 = vld [vmem:[%s6167_s0 + $0x10f] ss:$16 sm:%s270_s13]   ;;  %v268_v40 = vsel %vm10_vm1, %v2966_v37, %v263_v38  ;;  %s374_s13 = smov 12  ;;  %v2987_v3 = vld [vmem:[%s6167_s0 + $0xe] ss:$16 sm:%s362_s4]   ;;  %s466_s4 = smov 12 }
  0x19   :  { %v2979_v41 = vld [vmem:[%s6167_s0 + $0x38f] ss:$16 sm:%s326_s16]   ;;  %v273_v43 = vsel %vm14_vm2, %v2967_v39, %v268_v40  ;;  %v2989_v56 = vld [vmem:[%s6167_s0 + $0x20e] ss:$16 sm:%s374_s13]   ;;  %s425_s13 = smov 48  ;;  %s448_s20 = smov 48 }
  0x1a   :  { %v2980_v42 = vld [vmem:[%s6167_s0 + $0x38f] ss:$16 sm:%s329_s17]   ;;  %274 = vrot.lane.b32.xlu0 %v273_v43, %s3545_s6  ;;  %v377_v58 = vsel %vm6_vm0, %v2989_v56, %v2988_v55  ;;  %s453_s25 = smov 192  ;;  %s509_s28 = smov 3 }
  0x1b   :  { %v332_v44 = vsel %vm6_vm0, %v2980_v42, %v2979_v41  ;;  %v2981_v45 = vld [vmem:[%s6167_s0 + $0x38f] ss:$16 sm:%s334_s22]   ;;  %s349_s22 = smov 3  ;;  %v382_v61 = vsel %vm10_vm1, %v2990_v59, %v377_v58  ;;  %v2998_v5 = vld [vmem:[%s6167_s0 + $0x28e] ss:$16 sm:%s417_s7]   ;;  %s522_s5 = smov 192 }
  0x1c   :  { %v2982_v46 = vld [vmem:[%s6167_s0 + $0x38f] ss:$16 sm:%s339_s23]   ;;  %v337_v47 = vsel %vm10_vm1, %v2981_v45, %v332_v44  ;;  %v2984_v62 = vld [vmem:[%s6167_s0 + $0xe] ss:$16 sm:%s349_s22]   ;;  %v387_v63 = vsel %vm14_vm2, %v2991_v60, %v382_v61  ;;  %s397_s23 = smov 12  ;;  %s494_s16 = smov 48 }
  0x1d   :  { %v2974_v48 = vld [vmem:[%s6167_s0 + $0x18f] ss:$16 sm:%s303_s26]   ;;  %v342_v49 = vsel %vm14_vm2, %v2982_v46, %v337_v47  ;;  %v355_v2 = vsel %vm6_vm0, %v2985_v0, %v2984_v62  ;;  %v2999_v6 = vld [vmem:[%s6167_s0 + $0x28e] ss:$16 sm:%s420_s8]   ;;  %s499_s21 = smov 192  ;;  %s562_s30 = smov 48 }
  0x1e   :  { %v2975_v50 = vld [vmem:[%s6167_s0 + $0x18f] ss:$16 sm:%s306_s2]   ;;  %343 = vrot.lane.b32.xlu1 %v342_v49, %s3545_s6  ;;  %v360_v4 = vsel %vm10_vm1, %v2986_v1, %v355_v2  ;;  %v423_v8 = vsel %vm6_vm0, %v2999_v6, %v2998_v5  ;;  %s567_s2 = smov 192  ;;  %s540_s11 = smov 48 }
  0x1f   :  { %v2976_v51 = vld [vmem:[%s6167_s0 + $0x18f] ss:$16 sm:%s311_s3]   ;;  %v309_v52 = vsel %vm6_vm0, %v2975_v50, %v2974_v48  ;;  %v365_v7 = vsel %vm14_vm2, %v2987_v3, %v360_v4  ;;  %v3000_v9 = vld [vmem:[%s6167_s0 + $0x28e] ss:$16 sm:%s425_s13]   ;;  %s463_s3 = smov 3  ;;  %s440_s13 = smov 3 }
  0x20   :  { %v2977_v53 = vld [vmem:[%s6167_s0 + $0x18f] ss:$16 sm:%s316_s9]   ;;  %v314_v54 = vsel %vm10_vm1, %v2976_v51, %v309_v52  ;;  %v3001_v10 = vld [vmem:[%s6167_s0 + $0x28e] ss:$16 sm:%s430_s14]   ;;  %v428_v11 = vsel %vm10_vm1, %v3000_v9, %v423_v8  ;;  %s471_s9 = smov 48  ;;  %s489_s14 = smov 12 }
  0x21   :  { %v319_v57 = vsel %vm14_vm2, %v2977_v53, %v314_v54  ;;  %v2993_v12 = vld [vmem:[%s6167_s0 + $0x8e] ss:$16 sm:%s394_s18]   ;;  %v433_v13 = vsel %vm14_vm2, %v3001_v10, %v428_v11  ;;  %v3029_v51 = vld [vmem:[%s6167_s0 + $0x20d] ss:$16 sm:%s562_s30]   ;;  %s545_s17 = smov 192  ;;  %s613_s26 = smov 192 }
  0x22   :  { %320 = vrot.lane.b32.xlu0 %v319_v57, %s3545_s6  ;;  %388 = vrot.lane.b32.xlu1 %v387_v63, %s3546_s15  ;;  %v2994_v14 = vld [vmem:[%s6167_s0 + $0x8e] ss:$16 sm:%s397_s23]   ;;  %s517_s6 = smov 48  ;;  %s3547_s27 = smov 52  }
  0x23   :  { %v2995_v15 = vld [vmem:[%s6167_s0 + $0x8e] ss:$16 sm:%s402_s24]   ;;  %v400_v16 = vsel %vm6_vm0, %v2994_v14, %v2993_v12  ;;  %s554_s24 = smov 3  ;;  %v3030_v52 = vld [vmem:[%s6167_s0 + $0x20d] ss:$16 sm:%s567_s2]   ;;  %s577_s30 = smov 3 }
  0x24   :  { %v2996_v17 = vld [vmem:[%s6167_s0 + $0x8e] ss:$16 sm:%s407_s29]   ;;  %v405_v18 = vsel %vm10_vm1, %v2995_v15, %v400_v16  ;;  %s512_s29 = smov 12  ;;  %v3027_v47 = vld [vmem:[%s6167_s0 + $0x20d] ss:$16 sm:%s554_s24]   ;;  %s585_s7 = smov 48 }
  0x25   :  { %v3008_v19 = vld [vmem:[%s6167_s0 + $0x30e] ss:$16 sm:%s463_s3]   ;;  %v410_v21 = vsel %vm14_vm2, %v2996_v17, %v405_v18  ;;  %v3025_v57 = vld [vmem:[%s6167_s0 + $0xd] ss:$16 sm:%s540_s11]   ;;  %s590_s12 = smov 192  ;;  %s659_s22 = smov 192 }
  0x26   :  { %366 = vrot.lane.b32.xlu0 %v365_v7, %s3546_s15  ;;  %434 = vrot.lane.b32.xlu1 %v433_v13, %s3546_s15  ;;  %v3009_v20 = vld [vmem:[%s6167_s0 + $0x30e] ss:$16 sm:%s466_s4]   ;;  %s626_s2 = smov 12  ;;  %s631_s3 = smov 48 }
  0x27   :  { %v469_v22 = vsel %vm6_vm0, %v3009_v20, %v3008_v19  ;;  %v3010_v23 = vld [vmem:[%s6167_s0 + $0x30e] ss:$16 sm:%s471_s9]   ;;  %s486_s9 = smov 3  ;;  %v3026_v59 = vld [vmem:[%s6167_s0 + $0xd] ss:$16 sm:%s545_s17]   ;;  %s649_s17 = smov 12 }
  0x28   :  { %v3011_v24 = vld [vmem:[%s6167_s0 + $0x30e] ss:$16 sm:%s476_s10]   ;;  %v474_v25 = vsel %vm10_vm1, %v3010_v23, %v469_v22  ;;  %s535_s10 = smov 12  ;;  %v3040_v2 = vld [vmem:[%s6167_s0 + $0x28d] ss:$16 sm:%s613_s26]   ;;  %s636_s8 = smov 192 }
  0x29   :  { %v3003_v26 = vld [vmem:[%s6167_s0 + $0x10e] ss:$16 sm:%s440_s13]   ;;  %v479_v27 = vsel %vm14_vm2, %v3011_v24, %v474_v25  ;;  %v3024_v56 = vld [vmem:[%s6167_s0 + $0xd] ss:$16 sm:%s535_s10]   ;;  %s692_s11 = smov 3  ;;  %s705_s18 = smov 192 }
  0x2a   :  { %411 = vrot.lane.b32.xlu0 %v410_v21, %s3546_s15  ;;  %v3004_v28 = vld [vmem:[%s6167_s0 + $0x10e] ss:$16 sm:%s443_s19]   ;;  %480 = vrot.lane.b32.xlu1 %v479_v27, %s3546_s15  ;;  %s600_s19 = smov 3  ;;  %s672_s26 = smov 12 }
  0x2b   :  { %v3005_v29 = vld [vmem:[%s6167_s0 + $0x10e] ss:$16 sm:%s448_s20]   ;;  %v446_v30 = vsel %vm6_vm0, %v3004_v28, %v3003_v26  ;;  %s603_s20 = smov 12  ;;  %v3037_v61 = vld [vmem:[%s6167_s0 + $0x28d] ss:$16 sm:%s600_s19]   ;;  %s682_s4 = smov 192 }
  0x2c   :  { %v3006_v31 = vld [vmem:[%s6167_s0 + $0x10e] ss:$16 sm:%s453_s25]   ;;  %v451_v32 = vsel %vm10_vm1, %v3005_v29, %v446_v30  ;;  %s557_s25 = smov 12  ;;  %v3038_v62 = vld [vmem:[%s6167_s0 + $0x28d] ss:$16 sm:%s603_s20]   ;;  %s745_s13 = smov 48 }
  0x2d   :  { %v3018_v33 = vld [vmem:[%s6167_s0 + $0x38e] ss:$16 sm:%s509_s28]   ;;  %v456_v35 = vsel %vm14_vm2, %v3006_v31, %v451_v32  ;;  %v3028_v48 = vld [vmem:[%s6167_s0 + $0x20d] ss:$16 sm:%s557_s25]   ;;  %s608_s25 = smov 48  ;;  %v606_v0 = vsel %vm6_vm0, %v3038_v62, %v3037_v61  ;;  %s677_s28 = smov 48 }
  0x2e   :  { %v3019_v34 = vld [vmem:[%s6167_s0 + $0x38e] ss:$16 sm:%s512_s29]   ;;  %457 = vrot.lane.b32.xlu0 %v456_v35, %s3546_s15  ;;  %v560_v50 = vsel %vm6_vm0, %v3028_v48, %v3027_v47  ;;  %s723_s23 = smov 48  ;;  %s728_s29 = smov 192 }
  0x2f   :  { %v515_v36 = vsel %vm6_vm0, %v3019_v34, %v3018_v33  ;;  %v3020_v37 = vld [vmem:[%s6167_s0 + $0x38e] ss:$16 sm:%s517_s6]   ;;  %s532_s6 = smov 3  ;;  %v565_v53 = vsel %vm10_vm1, %v3029_v51, %v560_v50  ;;  %v3039_v1 = vld [vmem:[%s6167_s0 + $0x28d] ss:$16 sm:%s608_s25]   ;;  %s623_s25 = smov 3 }
  0x30   :  { %v3021_v38 = vld [vmem:[%s6167_s0 + $0x38e] ss:$16 sm:%s522_s5]   ;;  %v520_v39 = vsel %vm10_vm1, %v3020_v37, %v515_v36  ;;  %v3023_v54 = vld [vmem:[%s6167_s0 + $0xd] ss:$16 sm:%s532_s6]   ;;  %v570_v55 = vsel %vm14_vm2, %v3030_v52, %v565_v53  ;;  %s580_s5 = smov 12  ;;  %v611_v3 = vsel %vm10_vm1, %v3039_v1, %v606_v0  ;;  %s3548_s10 = smov 48  }
  0x31   :  { %v3013_v40 = vld [vmem:[%s6167_s0 + $0x18e] ss:$16 sm:%s486_s9]   ;;  %v525_v41 = vsel %vm14_vm2, %v3021_v38, %v520_v39  ;;  %v538_v58 = vsel %vm6_vm0, %v3024_v56, %v3023_v54  ;;  %v3032_v4 = vld [vmem:[%s6167_s0 + $0x8d] ss:$16 sm:%s577_s30]   ;;  %v616_v5 = vsel %vm14_vm2, %v3040_v2, %v611_v3  ;;  %s796_s9 = smov 192  ;;  %s768_s19 = smov 48 }
  0x32   :  { %v3014_v42 = vld [vmem:[%s6167_s0 + $0x18e] ss:$16 sm:%s489_s14]   ;;  %526 = vrot.lane.b32.xlu1 %v525_v41, %s3546_s15  ;;  %v543_v60 = vsel %vm10_vm1, %v3025_v57, %v538_v58  ;;  %s750_s14 = smov 192  ;;  %s773_s24 = smov 192 }
  0x33   :  { %v3015_v43 = vld [vmem:[%s6167_s0 + $0x18e] ss:$16 sm:%s494_s16]   ;;  %v492_v44 = vsel %vm6_vm0, %v3014_v42, %v3013_v40  ;;  %v548_v63 = vsel %vm14_vm2, %v3026_v59, %v543_v60  ;;  %s646_s16 = smov 3  ;;  %v3033_v6 = vld [vmem:[%s6167_s0 + $0x8d] ss:$16 sm:%s580_s5]   ;;  %s842_s6 = smov 192 }
  0x34   :  { %v3016_v45 = vld [vmem:[%s6167_s0 + $0x18e] ss:$16 sm:%s499_s21]   ;;  %v497_v46 = vsel %vm10_vm1, %v3015_v43, %v492_v44  ;;  %v3034_v7 = vld [vmem:[%s6167_s0 + $0x8d] ss:$16 sm:%s585_s7]   ;;  %s654_s21 = smov 48  ;;  %v583_v8 = vsel %vm6_vm0, %v3033_v6, %v3032_v4  ;;  %s737_s7 = smov 3 }
  0x35   :  { %v502_v49 = vsel %vm14_vm2, %v3016_v45, %v497_v46  ;;  %v3035_v9 = vld [vmem:[%s6167_s0 + $0x8d] ss:$16 sm:%s590_s12]   ;;  %v588_v10 = vsel %vm10_vm1, %v3034_v7, %v583_v8  ;;  %s695_s12 = smov 12  ;;  %v3066_v39 = vld [vmem:[%s6167_s0 + $0x20c] ss:$16 sm:%s737_s7]   ;;  %s819_s20 = smov 192 }
  0x36   :  { %503 = vrot.lane.b32.xlu0 %v502_v49, %s3546_s15  ;;  %571 = vrot.lane.b32.xlu1 %v570_v55, %s3547_s27  ;;  %v3047_v11 = vld [vmem:[%s6167_s0 + $0x30d] ss:$16 sm:%s646_s16]   ;;  %v593_v13 = vsel %vm14_vm2, %v3035_v9, %v588_v10  ;;  %s700_s15 = smov 48  ;;  %s814_s16 = smov 48 }
  0x37   :  { %v3048_v12 = vld [vmem:[%s6167_s0 + $0x30d] ss:$16 sm:%s649_s17]   ;;  %v3068_v43 = vld [vmem:[%s6167_s0 + $0x20c] ss:$16 sm:%s745_s13]   ;;  %s760_s13 = smov 3  ;;  %s888_s30 = smov 192 }
  0x38   :  { %v652_v14 = vsel %vm6_vm0, %v3048_v12, %v3047_v11  ;;  %v3049_v15 = vld [vmem:[%s6167_s0 + $0x30d] ss:$16 sm:%s654_s21]   ;;  %s669_s21 = smov 3  ;;  %v3069_v44 = vld [vmem:[%s6167_s0 + $0x20c] ss:$16 sm:%s750_s14]   ;;  %s809_s14 = smov 12 }
  0x39   :  { %v3050_v16 = vld [vmem:[%s6167_s0 + $0x30d] ss:$16 sm:%s659_s22]   ;;  %v657_v17 = vsel %vm10_vm1, %v3049_v15, %v652_v14  ;;  %s718_s22 = smov 12  ;;  %v3064_v49 = vld [vmem:[%s6167_s0 + $0xc] ss:$16 sm:%s723_s23]   ;;  %s875_s23 = smov 3 }
  0x3a   :  { %549 = vrot.lane.b32.xlu0 %v548_v63, %s3547_s27  ;;  %617 = vrot.lane.b32.xlu1 %v616_v5, %s3547_s27  ;;  %v3042_v18 = vld [vmem:[%s6167_s0 + $0x10d] ss:$16 sm:%s623_s25]   ;;  %v662_v19 = vsel %vm14_vm2, %v3050_v16, %v657_v17  ;;  %s865_s17 = smov 192  ;;  %s928_s25 = smov 48 }
  0x3b   :  { %v3043_v20 = vld [vmem:[%s6167_s0 + $0x10d] ss:$16 sm:%s626_s2]   ;;  %s783_s2 = smov 3  ;;  %v3063_v48 = vld [vmem:[%s6167_s0 + $0xc] ss:$16 sm:%s718_s22]   ;;  %s906_s5 = smov 48 }
  0x3c   :  { %v3044_v21 = vld [vmem:[%s6167_s0 + $0x10d] ss:$16 sm:%s631_s3]   ;;  %v629_v22 = vsel %vm6_vm0, %v3043_v20, %v3042_v18  ;;  %s786_s3 = smov 12  ;;  %v3065_v51 = vld [vmem:[%s6167_s0 + $0xc] ss:$16 sm:%s728_s29]   ;;  %s832_s29 = smov 12 }
  0x3d   :  { %v3045_v23 = vld [vmem:[%s6167_s0 + $0x10d] ss:$16 sm:%s636_s8]   ;;  %v634_v24 = vsel %vm10_vm1, %v3044_v21, %v629_v22  ;;  %s740_s8 = smov 12  ;;  %v3076_v53 = vld [vmem:[%s6167_s0 + $0x28c] ss:$16 sm:%s783_s2]   ;;  %s3549_s22 = smov 44  }
  0x3e   :  { %594 = vrot.lane.b32.xlu0 %v593_v13, %s3547_s27  ;;  %663 = vrot.lane.b32.xlu1 %v662_v19, %s3547_s27  ;;  %v3057_v25 = vld [vmem:[%s6167_s0 + $0x38d] ss:$16 sm:%s692_s11]   ;;  %v639_v27 = vsel %vm14_vm2, %v3045_v23, %v634_v24  ;;  %s860_s11 = smov 48  ;;  %s951_s2 = smov 48 }
  0x3f   :  { %v3058_v26 = vld [vmem:[%s6167_s0 + $0x38d] ss:$16 sm:%s695_s12]   ;;  %v3067_v40 = vld [vmem:[%s6167_s0 + $0x20c] ss:$16 sm:%s740_s8]   ;;  %s791_s8 = smov 48  ;;  %s911_s12 = smov 192 }
  0x40   :  { %v698_v28 = vsel %vm6_vm0, %v3058_v26, %v3057_v25  ;;  %v3059_v29 = vld [vmem:[%s6167_s0 + $0x38d] ss:$16 sm:%s700_s15]   ;;  %s715_s15 = smov 3  ;;  %v743_v42 = vsel %vm6_vm0, %v3067_v40, %v3066_v39  ;;  %v3077_v54 = vld [vmem:[%s6167_s0 + $0x28c] ss:$16 sm:%s786_s3]   ;;  %s956_s7 = smov 192 }
  0x41   :  { %v3060_v30 = vld [vmem:[%s6167_s0 + $0x38d] ss:$16 sm:%s705_s18]   ;;  %v703_v31 = vsel %vm10_vm1, %v3059_v29, %v698_v28  ;;  %v748_v45 = vsel %vm10_vm1, %v3068_v43, %v743_v42  ;;  %v3062_v46 = vld [vmem:[%s6167_s0 + $0xc] ss:$16 sm:%s715_s15]   ;;  %s763_s18 = smov 12  ;;  %v789_v56 = vsel %vm6_vm0, %v3077_v54, %v3076_v53  ;;  %s1025_s15 = smov 192 }
  0x42   :  { %640 = vrot.lane.b32.xlu0 %v639_v27, %s3547_s27  ;;  %v3052_v32 = vld [vmem:[%s6167_s0 + $0x18d] ss:$16 sm:%s669_s21]   ;;  %v708_v33 = vsel %vm14_vm2, %v3060_v30, %v703_v31  ;;  %v753_v47 = vsel %vm14_vm2, %v3069_v44, %v748_v45  ;;  %v721_v50 = vsel %vm6_vm0, %v3063_v48, %v3062_v46  ;;  %s979_s21 = smov 192  ;;  %s1002_s3 = smov 192 }
  0x43   :  { %v3053_v34 = vld [vmem:[%s6167_s0 + $0x18d] ss:$16 sm:%s672_s26]   ;;  %709 = vrot.lane.b32.xlu1 %v708_v33, %s3547_s27  ;;  %v726_v52 = vsel %vm10_vm1, %v3064_v49, %v721_v50  ;;  %s933_s26 = smov 192 }
  0x44   :  { %v3054_v35 = vld [vmem:[%s6167_s0 + $0x18d] ss:$16 sm:%s677_s28]   ;;  %v675_v36 = vsel %vm6_vm0, %v3053_v34, %v3052_v32  ;;  %v731_v55 = vsel %vm14_vm2, %v3065_v51, %v726_v52  ;;  %v3078_v57 = vld [vmem:[%s6167_s0 + $0x28c] ss:$16 sm:%s791_s8]   ;;  %s829_s28 = smov 3  ;;  %s806_s8 = smov 3 }
  0x45   :  { %v3055_v37 = vld [vmem:[%s6167_s0 + $0x18d] ss:$16 sm:%s682_s4]   ;;  %v680_v38 = vsel %vm10_vm1, %v3054_v35, %v675_v36  ;;  %v3079_v58 = vld [vmem:[%s6167_s0 + $0x28c] ss:$16 sm:%s796_s9]   ;;  %v794_v59 = vsel %vm10_vm1, %v3078_v57, %v789_v56  ;;  %s837_s4 = smov 48  ;;  %s855_s9 = smov 12 }
  0x46   :  { %v685_v41 = vsel %vm14_vm2, %v3055_v37, %v680_v38  ;;  %v3071_v60 = vld [vmem:[%s6167_s0 + $0x8c] ss:$16 sm:%s760_s13]   ;;  %v799_v61 = vsel %vm14_vm2, %v3079_v58, %v794_v59  ;;  %v3107_v35 = vld [vmem:[%s6167_s0 + $0x20b] ss:$16 sm:%s928_s25]   ;;  %s943_s25 = smov 3  ;;  %s1071_s13 = smov 192 }
  0x47   :  { %686 = vrot.lane.b32.xlu0 %v685_v41, %s3547_s27  ;;  %754 = vrot.lane.b32.xlu1 %v753_v47, %s3548_s10  ;;  %v3072_v62 = vld [vmem:[%s6167_s0 + $0x8c] ss:$16 sm:%s763_s18]   ;;  %s883_s27 = smov 48  ;;  %s1089_s18 = smov 48 }
  0x48   :  { %v3073_v63 = vld [vmem:[%s6167_s0 + $0x8c] ss:$16 sm:%s768_s19]   ;;  %v766_v0 = vsel %vm6_vm0, %v3072_v62, %v3071_v60  ;;  %s920_s19 = smov 3  ;;  %v3108_v36 = vld [vmem:[%s6167_s0 + $0x20b] ss:$16 sm:%s933_s26]   ;;  %s992_s26 = smov 12 }
  0x49   :  { %v3074_v1 = vld [vmem:[%s6167_s0 + $0x8c] ss:$16 sm:%s773_s24]   ;;  %v771_v2 = vsel %vm10_vm1, %v3073_v63, %v766_v0  ;;  %s878_s24 = smov 12  ;;  %v3105_v31 = vld [vmem:[%s6167_s0 + $0x20b] ss:$16 sm:%s920_s19]   ;;  %s1139_s19 = smov 192 }
  0x4a   :  { %v3086_v3 = vld [vmem:[%s6167_s0 + $0x30c] ss:$16 sm:%s829_s28]   ;;  %v776_v5 = vsel %vm14_vm2, %v3074_v1, %v771_v2  ;;  %v3103_v41 = vld [vmem:[%s6167_s0 + $0xb] ss:$16 sm:%s906_s5]   ;;  %s997_s28 = smov 48  ;;  %s1058_s5 = smov 3 }
  0x4b   :  { %732 = vrot.lane.b32.xlu0 %v731_v55, %s3548_s10  ;;  %800 = vrot.lane.b32.xlu1 %v799_v61, %s3548_s10  ;;  %v3087_v4 = vld [vmem:[%s6167_s0 + $0x30c] ss:$16 sm:%s832_s29]   ;;  %s1048_s29 = smov 192 }
  0x4c   :  { %v835_v6 = vsel %vm6_vm0, %v3087_v4, %v3086_v3  ;;  %v3088_v7 = vld [vmem:[%s6167_s0 + $0x30c] ss:$16 sm:%s837_s4]   ;;  %s852_s4 = smov 3  ;;  %v3104_v43 = vld [vmem:[%s6167_s0 + $0xb] ss:$16 sm:%s911_s12]   ;;  %s1015_s12 = smov 12 }
  0x4d   :  { %v3089_v8 = vld [vmem:[%s6167_s0 + $0x30c] ss:$16 sm:%s842_s6]   ;;  %v840_v9 = vsel %vm10_vm1, %v3088_v7, %v835_v6  ;;  %s901_s6 = smov 12  ;;  %v3118_v50 = vld [vmem:[%s6167_s0 + $0x28b] ss:$16 sm:%s979_s21]   ;;  %s1038_s21 = smov 12 }
  0x4e   :  { %v3081_v10 = vld [vmem:[%s6167_s0 + $0x10c] ss:$16 sm:%s806_s8]   ;;  %v845_v11 = vsel %vm14_vm2, %v3089_v8, %v840_v9  ;;  %v3102_v40 = vld [vmem:[%s6167_s0 + $0xb] ss:$16 sm:%s901_s6]   ;;  %s1111_s8 = smov 48  ;;  %s3550_s6 = smov 40  }
  0x4f   :  { %777 = vrot.lane.b32.xlu0 %v776_v5, %s3548_s10  ;;  %v3082_v12 = vld [vmem:[%s6167_s0 + $0x10c] ss:$16 sm:%s809_s14]   ;;  %846 = vrot.lane.b32.xlu1 %v845_v11, %s3548_s10  ;;  %s966_s14 = smov 3 }
  0x50   :  { %v3083_v13 = vld [vmem:[%s6167_s0 + $0x10c] ss:$16 sm:%s814_s16]   ;;  %v812_v14 = vsel %vm6_vm0, %v3082_v12, %v3081_v10  ;;  %s969_s16 = smov 12  ;;  %v3115_v45 = vld [vmem:[%s6167_s0 + $0x28b] ss:$16 sm:%s966_s14]   ;;  %s1134_s14 = smov 48 }
  0x51   :  { %v3084_v15 = vld [vmem:[%s6167_s0 + $0x10c] ss:$16 sm:%s819_s20]   ;;  %v817_v16 = vsel %vm10_vm1, %v3083_v13, %v812_v14  ;;  %s923_s20 = smov 12  ;;  %v3116_v46 = vld [vmem:[%s6167_s0 + $0x28b] ss:$16 sm:%s969_s16]   ;;  %s1185_s16 = smov 192 }
  0x52   :  { %v3096_v17 = vld [vmem:[%s6167_s0 + $0x38c] ss:$16 sm:%s875_s23]   ;;  %v822_v19 = vsel %vm14_vm2, %v3084_v15, %v817_v16  ;;  %v3106_v32 = vld [vmem:[%s6167_s0 + $0x20b] ss:$16 sm:%s923_s20]   ;;  %s974_s20 = smov 48  ;;  %v972_v48 = vsel %vm6_vm0, %v3116_v46, %v3115_v45  ;;  %s1043_s23 = smov 48 }
  0x53   :  { %v3097_v18 = vld [vmem:[%s6167_s0 + $0x38c] ss:$16 sm:%s878_s24]   ;;  %823 = vrot.lane.b32.xlu0 %v822_v19, %s3548_s10  ;;  %v926_v34 = vsel %vm6_vm0, %v3106_v32, %v3105_v31  ;;  %s1094_s24 = smov 192 }
  0x54   :  { %v881_v20 = vsel %vm6_vm0, %v3097_v18, %v3096_v17  ;;  %v3098_v21 = vld [vmem:[%s6167_s0 + $0x38c] ss:$16 sm:%s883_s27]   ;;  %s898_s27 = smov 3  ;;  %v931_v37 = vsel %vm10_vm1, %v3107_v35, %v926_v34  ;;  %v3117_v49 = vld [vmem:[%s6167_s0 + $0x28b] ss:$16 sm:%s974_s20]   ;;  %s989_s20 = smov 3 }
  0x55   :  { %v3099_v22 = vld [vmem:[%s6167_s0 + $0x38c] ss:$16 sm:%s888_s30]   ;;  %v886_v23 = vsel %vm10_vm1, %v3098_v21, %v881_v20  ;;  %v3101_v38 = vld [vmem:[%s6167_s0 + $0xb] ss:$16 sm:%s898_s27]   ;;  %v936_v39 = vsel %vm14_vm2, %v3108_v36, %v931_v37  ;;  %s946_s30 = smov 12  ;;  %v977_v51 = vsel %vm10_vm1, %v3117_v49, %v972_v48  ;;  %s1208_s27 = smov 192 }
  0x56   :  { %v3091_v24 = vld [vmem:[%s6167_s0 + $0x18c] ss:$16 sm:%s852_s4]   ;;  %v891_v25 = vsel %vm14_vm2, %v3099_v22, %v886_v23  ;;  %v904_v42 = vsel %vm6_vm0, %v3102_v40, %v3101_v38  ;;  %v3110_v52 = vld [vmem:[%s6167_s0 + $0x8b] ss:$16 sm:%s943_s25]   ;;  %v982_v53 = vsel %vm14_vm2, %v3118_v50, %v977_v51  ;;  %s1162_s4 = smov 192  ;;  %s1254_s25 = smov 192 }
  0x57   :  { %v3092_v26 = vld [vmem:[%s6167_s0 + $0x18c] ss:$16 sm:%s855_s9]   ;;  %892 = vrot.lane.b32.xlu1 %v891_v25, %s3548_s10  ;;  %v909_v44 = vsel %vm10_vm1, %v3103_v41, %v904_v42  ;;  %s1116_s9 = smov 192 }
  0x58   :  { %v3093_v27 = vld [vmem:[%s6167_s0 + $0x18c] ss:$16 sm:%s860_s11]   ;;  %v858_v28 = vsel %vm6_vm0, %v3092_v26, %v3091_v24  ;;  %v914_v47 = vsel %vm14_vm2, %v3104_v43, %v909_v44  ;;  %s1012_s11 = smov 3  ;;  %v3111_v54 = vld [vmem:[%s6167_s0 + $0x8b] ss:$16 sm:%s946_s30]   ;;  %s1272_s30 = smov 48 }
  0x59   :  { %v3094_v29 = vld [vmem:[%s6167_s0 + $0x18c] ss:$16 sm:%s865_s17]   ;;  %v863_v30 = vsel %vm10_vm1, %v3093_v27, %v858_v28  ;;  %v3112_v55 = vld [vmem:[%s6167_s0 + $0x8b] ss:$16 sm:%s951_s2]   ;;  %s1020_s17 = smov 48  ;;  %v949_v56 = vsel %vm6_vm0, %v3111_v54, %v3110_v52  ;;  %s1103_s2 = smov 3 }
  0x5a   :  { %v868_v33 = vsel %vm14_vm2, %v3094_v29, %v863_v30  ;;  %v3113_v57 = vld [vmem:[%s6167_s0 + $0x8b] ss:$16 sm:%s956_s7]   ;;  %v954_v58 = vsel %vm10_vm1, %v3112_v55, %v949_v56  ;;  %s1061_s7 = smov 12  ;;  %v3144_v23 = vld [vmem:[%s6167_s0 + $0x20a] ss:$16 sm:%s1103_s2]   ;;  %s1322_s2 = smov 192 }
  0x5b   :  { %869 = vrot.lane.b32.xlu0 %v868_v33, %s3548_s10  ;;  %937 = vrot.lane.b32.xlu1 %v936_v39, %s3549_s22  ;;  %v3125_v59 = vld [vmem:[%s6167_s0 + $0x30b] ss:$16 sm:%s1012_s11]   ;;  %v959_v61 = vsel %vm14_vm2, %v3113_v57, %v954_v58  ;;  %s1066_s10 = smov 48  ;;  %s1180_s11 = smov 48 }
  0x5c   :  { %v3126_v60 = vld [vmem:[%s6167_s0 + $0x30b] ss:$16 sm:%s1015_s12]   ;;  %v3146_v27 = vld [vmem:[%s6167_s0 + $0x20a] ss:$16 sm:%s1111_s8]   ;;  %s1126_s8 = smov 3  ;;  %s1231_s12 = smov 192 }
  0x5d   :  { %v1018_v62 = vsel %vm6_vm0, %v3126_v60, %v3125_v59  ;;  %v3127_v63 = vld [vmem:[%s6167_s0 + $0x30b] ss:$16 sm:%s1020_s17]   ;;  %s1035_s17 = smov 3  ;;  %v3147_v28 = vld [vmem:[%s6167_s0 + $0x20a] ss:$16 sm:%s1116_s9]   ;;  %s1175_s9 = smov 12 }
  0x5e   :  { %v3128_v0 = vld [vmem:[%s6167_s0 + $0x30b] ss:$16 sm:%s1025_s15]   ;;  %v1023_v1 = vsel %vm10_vm1, %v3127_v63, %v1018_v62  ;;  %s1084_s15 = smov 12  ;;  %v3142_v33 = vld [vmem:[%s6167_s0 + $0xa] ss:$16 sm:%s1089_s18]   ;;  %s1241_s18 = smov 3 }
  0x5f   :  { %915 = vrot.lane.b32.xlu0 %v914_v47, %s3549_s22  ;;  %983 = vrot.lane.b32.xlu1 %v982_v53, %s3549_s22  ;;  %v3120_v2 = vld [vmem:[%s6167_s0 + $0x10b] ss:$16 sm:%s989_s20]   ;;  %v1028_v3 = vsel %vm14_vm2, %v3128_v0, %v1023_v1  ;;  %s1294_s20 = smov 48 }
  0x60   :  { %v3121_v4 = vld [vmem:[%s6167_s0 + $0x10b] ss:$16 sm:%s992_s26]   ;;  %s1149_s26 = smov 3  ;;  %v3141_v32 = vld [vmem:[%s6167_s0 + $0xa] ss:$16 sm:%s1084_s15]   ;;  %s3551_s15 = smov 36  }
  0x61   :  { %v3122_v5 = vld [vmem:[%s6167_s0 + $0x10b] ss:$16 sm:%s997_s28]   ;;  %v995_v6 = vsel %vm6_vm0, %v3121_v4, %v3120_v2  ;;  %s1152_s28 = smov 12  ;;  %v3143_v35 = vld [vmem:[%s6167_s0 + $0xa] ss:$16 sm:%s1094_s24]   ;;  %s1198_s24 = smov 12 }
  0x62   :  { %v3123_v7 = vld [vmem:[%s6167_s0 + $0x10b] ss:$16 sm:%s1002_s3]   ;;  %v1000_v8 = vsel %vm10_vm1, %v3122_v5, %v995_v6  ;;  %s1106_s3 = smov 12  ;;  %v3154_v37 = vld [vmem:[%s6167_s0 + $0x28a] ss:$16 sm:%s1149_s26]   ;;  %s1317_s26 = smov 48 }
  0x63   :  { %960 = vrot.lane.b32.xlu0 %v959_v61, %s3549_s22  ;;  %1029 = vrot.lane.b32.xlu1 %v1028_v3, %s3549_s22  ;;  %v3135_v9 = vld [vmem:[%s6167_s0 + $0x38b] ss:$16 sm:%s1058_s5]   ;;  %v1005_v11 = vsel %vm14_vm2, %v3123_v7, %v1000_v8  ;;  %s1226_s5 = smov 48 }
  0x64   :  { %v3136_v10 = vld [vmem:[%s6167_s0 + $0x38b] ss:$16 sm:%s1061_s7]   ;;  %v3145_v24 = vld [vmem:[%s6167_s0 + $0x20a] ss:$16 sm:%s1106_s3]   ;;  %s1157_s3 = smov 48  ;;  %s1277_s7 = smov 192 }
  0x65   :  { %v1064_v12 = vsel %vm6_vm0, %v3136_v10, %v3135_v9  ;;  %v3137_v13 = vld [vmem:[%s6167_s0 + $0x38b] ss:$16 sm:%s1066_s10]   ;;  %s1081_s10 = smov 3  ;;  %v1109_v26 = vsel %vm6_vm0, %v3145_v24, %v3144_v23  ;;  %v3155_v38 = vld [vmem:[%s6167_s0 + $0x28a] ss:$16 sm:%s1152_s28]   ;;  %s1368_s28 = smov 192 }
  0x66   :  { %v3138_v14 = vld [vmem:[%s6167_s0 + $0x38b] ss:$16 sm:%s1071_s13]   ;;  %v1069_v15 = vsel %vm10_vm1, %v3137_v13, %v1064_v12  ;;  %v1114_v29 = vsel %vm10_vm1, %v3146_v27, %v1109_v26  ;;  %v3140_v30 = vld [vmem:[%s6167_s0 + $0xa] ss:$16 sm:%s1081_s10]   ;;  %s1129_s13 = smov 12  ;;  %v1155_v40 = vsel %vm6_vm0, %v3155_v38, %v3154_v37  ;;  %s1391_s10 = smov 192 }
  0x67   :  { %1006 = vrot.lane.b32.xlu0 %v1005_v11, %s3549_s22  ;;  %v3130_v16 = vld [vmem:[%s6167_s0 + $0x18b] ss:$16 sm:%s1035_s17]   ;;  %v1074_v17 = vsel %vm14_vm2, %v3138_v14, %v1069_v15  ;;  %v1119_v31 = vsel %vm14_vm2, %v3147_v28, %v1114_v29  ;;  %v1087_v34 = vsel %vm6_vm0, %v3141_v32, %v3140_v30  ;;  %s1345_s17 = smov 192 }
  0x68   :  { %v3131_v18 = vld [vmem:[%s6167_s0 + $0x18b] ss:$16 sm:%s1038_s21]   ;;  %1075 = vrot.lane.b32.xlu1 %v1074_v17, %s3549_s22  ;;  %v1092_v36 = vsel %vm10_vm1, %v3142_v33, %v1087_v34  ;;  %s1299_s21 = smov 192 }
  0x69   :  { %v3132_v19 = vld [vmem:[%s6167_s0 + $0x18b] ss:$16 sm:%s1043_s23]   ;;  %v1041_v20 = vsel %vm6_vm0, %v3131_v18, %v3130_v16  ;;  %v1097_v39 = vsel %vm14_vm2, %v3143_v35, %v1092_v36  ;;  %v3156_v41 = vld [vmem:[%s6167_s0 + $0x28a] ss:$16 sm:%s1157_s3]   ;;  %s1195_s23 = smov 3  ;;  %s1172_s3 = smov 3 }
  0x6a   :  { %v3133_v21 = vld [vmem:[%s6167_s0 + $0x18b] ss:$16 sm:%s1048_s29]   ;;  %v1046_v22 = vsel %vm10_vm1, %v3132_v19, %v1041_v20  ;;  %v3157_v42 = vld [vmem:[%s6167_s0 + $0x28a] ss:$16 sm:%s1162_s4]   ;;  %v1160_v43 = vsel %vm10_vm1, %v3156_v41, %v1155_v40  ;;  %s1203_s29 = smov 48  ;;  %s1221_s4 = smov 12 }
  0x6b   :  { %v1051_v25 = vsel %vm14_vm2, %v3133_v21, %v1046_v22  ;;  %v3149_v44 = vld [vmem:[%s6167_s0 + $0x8a] ss:$16 sm:%s1126_s8]   ;;  %v1165_v45 = vsel %vm14_vm2, %v3157_v42, %v1160_v43  ;;  %v3185_v20 = vld [vmem:[%s6167_s0 + $0x209] ss:$16 sm:%s1294_s20]   ;;  %s1309_s20 = smov 3  ;;  %s1437_s8 = smov 192 }
  0x6c   :  { %1052 = vrot.lane.b32.xlu0 %v1051_v25, %s3549_s22  ;;  %1120 = vrot.lane.b32.xlu1 %v1119_v31, %s3550_s6  ;;  %v3150_v46 = vld [vmem:[%s6167_s0 + $0x8a] ss:$16 sm:%s1129_s13]   ;;  %s1249_s22 = smov 48  ;;  %s1455_s13 = smov 48 }
  0x6d   :  { %v3151_v47 = vld [vmem:[%s6167_s0 + $0x8a] ss:$16 sm:%s1134_s14]   ;;  %v1132_v48 = vsel %vm6_vm0, %v3150_v46, %v3149_v44  ;;  %s1286_s14 = smov 3  ;;  %v3186_v21 = vld [vmem:[%s6167_s0 + $0x209] ss:$16 sm:%s1299_s21]   ;;  %s1358_s21 = smov 12 }
  0x6e   :  { %v3152_v49 = vld [vmem:[%s6167_s0 + $0x8a] ss:$16 sm:%s1139_s19]   ;;  %v1137_v50 = vsel %vm10_vm1, %v3151_v47, %v1132_v48  ;;  %s1244_s19 = smov 12  ;;  %v3183_v16 = vld [vmem:[%s6167_s0 + $0x209] ss:$16 sm:%s1286_s14]   ;;  %s12_s14 = smov 192 }
  0x6f   :  { %v3164_v51 = vld [vmem:[%s6167_s0 + $0x30a] ss:$16 sm:%s1195_s23]   ;;  %v1142_v53 = vsel %vm14_vm2, %v3152_v49, %v1137_v50  ;;  %v3181_v27 = vld [vmem:[%s6167_s0 + $0x9] ss:$16 sm:%s1272_s30]   ;;  %s1363_s23 = smov 48  ;;  %s1424_s30 = smov 3 }
  0x70   :  { %1098 = vrot.lane.b32.xlu0 %v1097_v39, %s3550_s6  ;;  %1166 = vrot.lane.b32.xlu1 %v1165_v45, %s3550_s6  ;;  %v3165_v52 = vld [vmem:[%s6167_s0 + $0x30a] ss:$16 sm:%s1198_s24]   ;;  %s1414_s24 = smov 192 }
  0x71   :  { %v1201_v54 = vsel %vm6_vm0, %v3165_v52, %v3164_v51  ;;  %v3166_v55 = vld [vmem:[%s6167_s0 + $0x30a] ss:$16 sm:%s1203_s29]   ;;  %s1218_s29 = smov 3  ;;  %v3182_v30 = vld [vmem:[%s6167_s0 + $0x9] ss:$16 sm:%s1277_s7]   ;;  %s1381_s7 = smov 12 }
  0x72   :  { %v3167_v56 = vld [vmem:[%s6167_s0 + $0x30a] ss:$16 sm:%s1208_s27]   ;;  %v1206_v57 = vsel %vm10_vm1, %v3166_v55, %v1201_v54  ;;  %s1267_s27 = smov 12  ;;  %v3196_v37 = vld [vmem:[%s6167_s0 + $0x289] ss:$16 sm:%s1345_s17]   ;;  %s1404_s17 = smov 12 }
  0x73   :  { %v3159_v58 = vld [vmem:[%s6167_s0 + $0x10a] ss:$16 sm:%s1172_s3]   ;;  %v1211_v59 = vsel %vm14_vm2, %v3167_v56, %v1206_v57  ;;  %v3180_v26 = vld [vmem:[%s6167_s0 + $0x9] ss:$16 sm:%s1267_s27]   ;;  %s1477_s3 = smov 48  ;;  %s3552_s27 = smov 32  }
  0x74   :  { %1143 = vrot.lane.b32.xlu0 %v1142_v53, %s3550_s6  ;;  %v3160_v60 = vld [vmem:[%s6167_s0 + $0x10a] ss:$16 sm:%s1175_s9]   ;;  %1212 = vrot.lane.b32.xlu1 %v1211_v59, %s3550_s6  ;;  %s1332_s9 = smov 3 }
  0x75   :  { %v3161_v61 = vld [vmem:[%s6167_s0 + $0x10a] ss:$16 sm:%s1180_s11]   ;;  %v1178_v62 = vsel %vm6_vm0, %v3160_v60, %v3159_v58  ;;  %s1335_s11 = smov 12  ;;  %v3193_v32 = vld [vmem:[%s6167_s0 + $0x289] ss:$16 sm:%s1332_s9]   ;;  %s8_s9 = smov 48 }
  0x76   :  { %v3162_v63 = vld [vmem:[%s6167_s0 + $0x10a] ss:$16 sm:%s1185_s16]   ;;  %v1183_v0 = vsel %vm10_vm1, %v3161_v61, %v1178_v62  ;;  %s1289_s16 = smov 12  ;;  %v3194_v33 = vld [vmem:[%s6167_s0 + $0x289] ss:$16 sm:%s1335_s11]   ;;  %s85_s11 = smov 12 }
  0x77   :  { %v3174_v1 = vld [vmem:[%s6167_s0 + $0x38a] ss:$16 sm:%s1241_s18]   ;;  %v1188_v3 = vsel %vm14_vm2, %v3162_v63, %v1183_v0  ;;  %v3184_v17 = vld [vmem:[%s6167_s0 + $0x209] ss:$16 sm:%s1289_s16]   ;;  %s1340_s16 = smov 48  ;;  %v1338_v35 = vsel %vm6_vm0, %v3194_v33, %v3193_v32  ;;  %s1409_s18 = smov 48 }
  0x78   :  { %v3175_v2 = vld [vmem:[%s6167_s0 + $0x38a] ss:$16 sm:%s1244_s19]   ;;  %1189 = vrot.lane.b32.xlu0 %v1188_v3, %s3550_s6  ;;  %v4335_v14 = vpop.permute.xlu1 %228   ;;  %v1292_v19 = vsel %vm6_vm0, %v3184_v17, %v3183_v16  ;;  %s1460_s19 = smov 192 }
  0x79   :  { %v1247_v4 = vsel %vm6_vm0, %v3175_v2, %v3174_v1  ;;  %v3176_v5 = vld [vmem:[%s6167_s0 + $0x38a] ss:$16 sm:%s1249_s22]   ;;  %s1264_s22 = smov 3  ;;  %v1297_v23 = vsel %vm10_vm1, %v3185_v20, %v1292_v19  ;;  %v3195_v36 = vld [vmem:[%s6167_s0 + $0x289] ss:$16 sm:%s1340_s16]   ;;  %s1355_s16 = smov 3 }
  0x7a   :  { %v3177_v6 = vld [vmem:[%s6167_s0 + $0x38a] ss:$16 sm:%s1254_s25]   ;;  %v1252_v7 = vsel %vm10_vm1, %v3176_v5, %v1247_v4  ;;  %v3179_v24 = vld [vmem:[%s6167_s0 + $0x9] ss:$16 sm:%s1264_s22]   ;;  %v1302_v25 = vsel %vm14_vm2, %v3186_v21, %v1297_v23  ;;  %s1312_s25 = smov 12  ;;  %v1343_v39 = vsel %vm10_vm1, %v3195_v36, %v1338_v35  ;;  %s1528_s22 = smov 192 }
  0x7b   :  { %v3169_v8 = vld [vmem:[%s6167_s0 + $0x18a] ss:$16 sm:%s1218_s29]   ;;  %v1257_v9 = vsel %vm14_vm2, %v3177_v6, %v1252_v7  ;;  %v1270_v29 = vsel %vm6_vm0, %v3180_v26, %v3179_v24  ;;  %v3188_v40 = vld [vmem:[%s6167_s0 + $0x89] ss:$16 sm:%s1309_s20]   ;;  %v1348_v41 = vsel %vm14_vm2, %v3196_v37, %v1343_v39  ;;  %s32_s29 = smov 192  ;;  %s1630_s20 = smov 3 }
  0x7c   :  { %v3170_v10 = vld [vmem:[%s6167_s0 + $0x18a] ss:$16 sm:%s1221_s4]   ;;  %1258 = vrot.lane.b32.xlu1 %v1257_v9, %s3550_s6  ;;  %v4352_v22 = vpop.permute.xlu0 %183   ;;  %v1275_v31 = vsel %vm10_vm1, %v3181_v27, %v1270_v29  ;;  %s1482_s4 = smov 192 }
  0x7d   :  { %v3171_v11 = vld [vmem:[%s6167_s0 + $0x18a] ss:$16 sm:%s1226_s5]   ;;  %v1224_v12 = vsel %vm6_vm0, %v3170_v10, %v3169_v8  ;;  %v1280_v34 = vsel %vm14_vm2, %v3182_v30, %v1275_v31  ;;  %s1378_s5 = smov 3  ;;  %v3189_v42 = vld [vmem:[%s6167_s0 + $0x89] ss:$16 sm:%s1312_s25]   ;;  %s1492_s25 = smov 3 }
  0x7e   :  { %v3172_v13 = vld [vmem:[%s6167_s0 + $0x18a] ss:$16 sm:%s1231_s12]   ;;  %v1229_v15 = vsel %vm10_vm1, %v3171_v11, %v1224_v12  ;;  %v3190_v43 = vld [vmem:[%s6167_s0 + $0x89] ss:$16 sm:%s1317_s26]   ;;  %s1386_s12 = smov 48  ;;  %v1315_v45 = vsel %vm6_vm0, %v3189_v42, %v3188_v40  ;;  %s1469_s26 = smov 3 }
  0x7f   :  { %v1234_v18 = vsel %vm14_vm2, %v3172_v13, %v1229_v15  ;;  %v3191_v46 = vld [vmem:[%s6167_s0 + $0x89] ss:$16 sm:%s1322_s2]   ;;  %v1320_v47 = vsel %vm10_vm1, %v3190_v43, %v1315_v45  ;;  %s1427_s2 = smov 12  ;;  %v3222_v17 = vld [vmem:[%s6167_s0 + $0x208] ss:$16 sm:%s1469_s26]   ;;  %s2255_s26 = smov 48 }
  0x80   :  { %1235 = vrot.lane.b32.xlu0 %v1234_v18, %s3550_s6  ;;  %v4366_v28 = vpop.permute.xlu1 %251   ;;  %1303 = vrot.lane.b32.xlu1 %v1302_v25, %s3551_s15  ;;  %v3203_v48 = vld [vmem:[%s6167_s0 + $0x309] ss:$16 sm:%s1378_s5]   ;;  %v1325_v50 = vsel %vm14_vm2, %v3191_v46, %v1320_v47  ;;  %s1432_s6 = smov 48  ;;  %s1500_s5 = smov 48 }
  0x81   :  { %v3204_v49 = vld [vmem:[%s6167_s0 + $0x309] ss:$16 sm:%s1381_s7]   ;;  %v3224_v21 = vld [vmem:[%s6167_s0 + $0x208] ss:$16 sm:%s1477_s3]   ;;  %s2_s3 = smov 3  ;;  %s148_s7 = smov 12 }
  0x82   :  { %v1384_v51 = vsel %vm6_vm0, %v3204_v49, %v3203_v48  ;;  %v3205_v52 = vld [vmem:[%s6167_s0 + $0x309] ss:$16 sm:%s1386_s12]   ;;  %s1401_s12 = smov 3  ;;  %v3225_v23 = vld [vmem:[%s6167_s0 + $0x208] ss:$16 sm:%s1482_s4]   ;;  %s1495_s4 = smov 12 }
  0x83   :  { %v3206_v53 = vld [vmem:[%s6167_s0 + $0x309] ss:$16 sm:%s1391_s10]   ;;  %v1389_v55 = vsel %vm10_vm1, %v3205_v52, %v1384_v51  ;;  %s1450_s10 = smov 12  ;;  %v3220_v30 = vld [vmem:[%s6167_s0 + $0x8] ss:$16 sm:%s1455_s13]   ;;  %s103_s13 = smov 3 }
  0x84   :  { %v4388_v38 = vpop.permute.xlu0 %205   ;;  %1281 = vrot.lane.b32.xlu0 %v1280_v34, %s3551_s15  ;;  %1349 = vrot.lane.b32.xlu1 %v1348_v41, %s3551_s15  ;;  %v3198_v56 = vld [vmem:[%s6167_s0 + $0x109] ss:$16 sm:%s1355_s16]   ;;  %v1394_v57 = vsel %vm14_vm2, %v3206_v53, %v1389_v55  ;;  %s1515_s16 = smov 3 }
  0x85   :  { %v3199_v58 = vld [vmem:[%s6167_s0 + $0x109] ss:$16 sm:%s1358_s21]   ;;  %s19_s21 = smov 3  ;;  %v3219_v29 = vld [vmem:[%s6167_s0 + $0x8] ss:$16 sm:%s1450_s10]   ;;  %s1505_s10 = smov 192 }
  0x86   :  { %v3200_v59 = vld [vmem:[%s6167_s0 + $0x109] ss:$16 sm:%s1363_s23]   ;;  %v1361_v61 = vsel %vm6_vm0, %v3199_v58, %v3198_v56  ;;  %s22_s23 = smov 12  ;;  %v3221_v33 = vld [vmem:[%s6167_s0 + $0x8] ss:$16 sm:%s1460_s19]   ;;  %s1518_s19 = smov 12 }
  0x87   :  { %v3201_v62 = vld [vmem:[%s6167_s0 + $0x109] ss:$16 sm:%s1368_s28]   ;;  %v1366_v63 = vsel %vm10_vm1, %v3200_v59, %v1361_v61  ;;  %s1472_s28 = smov 12  ;;  %v2910_v35 = vld [vmem:[%s6167_s0 + $0x80] ss:$16 sm:%s19_s21]   ;;  %s1706_s21 = smov 48 }
  0x88   :  { %v4402_v44 = vpop.permute.xlu1 %297   ;;  %1326 = vrot.lane.b32.xlu0 %v1325_v50, %s3551_s15  ;;  %1395 = vrot.lane.b32.xlu1 %v1394_v57, %s3551_s15  ;;  %v3213_v0 = vld [vmem:[%s6167_s0 + $0x389] ss:$16 sm:%s1424_s30]   ;;  %v1371_v2 = vsel %vm14_vm2, %v3201_v62, %v1366_v63  ;;  %s1538_s30 = smov 3 }
  0x89   :  { %v3214_v1 = vld [vmem:[%s6167_s0 + $0x389] ss:$16 sm:%s1427_s2]   ;;  %v3223_v18 = vld [vmem:[%s6167_s0 + $0x208] ss:$16 sm:%s1472_s28]   ;;  %s27_s28 = smov 48  ;;  %s1757_s2 = smov 192 }
  0x8a   :  { %v1430_v3 = vsel %vm6_vm0, %v3214_v1, %v3213_v0  ;;  %v3215_v4 = vld [vmem:[%s6167_s0 + $0x389] ss:$16 sm:%s1432_s6]   ;;  %s1447_s6 = smov 3  ;;  %v1475_v20 = vsel %vm6_vm0, %v3223_v18, %v3222_v17  ;;  %v2911_v36 = vld [vmem:[%s6167_s0 + $0x80] ss:$16 sm:%s22_s23]   ;;  %s1564_s23 = smov 12 }
  0x8b   :  { %v3216_v5 = vld [vmem:[%s6167_s0 + $0x389] ss:$16 sm:%s1437_s8]   ;;  %v1435_v7 = vsel %vm10_vm1, %v3215_v4, %v1430_v3  ;;  %v1480_v25 = vsel %vm10_vm1, %v3224_v21, %v1475_v20  ;;  %v3218_v26 = vld [vmem:[%s6167_s0 + $0x8] ss:$16 sm:%s1447_s6]   ;;  %s4_s8 = smov 12  ;;  %v25_v39 = vsel %vm6_vm0, %v2911_v36, %v2910_v35  ;;  %s82_s6 = smov 3 }
  0x8c   :  { %v4424_v54 = vpop.permute.xlu0 %274   ;;  %1372 = vrot.lane.b32.xlu0 %v1371_v2, %s3551_s15  ;;  %v3208_v8 = vld [vmem:[%s6167_s0 + $0x189] ss:$16 sm:%s1401_s12]   ;;  %v1440_v9 = vsel %vm14_vm2, %v3216_v5, %v1435_v7  ;;  %v1485_v27 = vsel %vm14_vm2, %v3225_v23, %v1480_v25  ;;  %v1453_v32 = vsel %vm6_vm0, %v3219_v29, %v3218_v26  ;;  %s90_s12 = smov 48 }
  0x8d   :  { %v3209_v10 = vld [vmem:[%s6167_s0 + $0x189] ss:$16 sm:%s1404_s17]   ;;  %1441 = vrot.lane.b32.xlu1 %v1440_v9, %s3551_s15  ;;  %v1458_v34 = vsel %vm10_vm1, %v3220_v30, %v1453_v32  ;;  %s1551_s17 = smov 192 }
  0x8e   :  { %v3210_v11 = vld [vmem:[%s6167_s0 + $0x189] ss:$16 sm:%s1409_s18]   ;;  %v1407_v13 = vsel %vm6_vm0, %v3209_v10, %v3208_v8  ;;  %v1463_v37 = vsel %vm14_vm2, %v3221_v33, %v1458_v34  ;;  %v2912_v40 = vld [vmem:[%s6167_s0 + $0x80] ss:$16 sm:%s27_s28]   ;;  %s111_s28 = smov 48  ;;  %s124_s18 = smov 3 }
  0x8f   :  { %v3211_v15 = vld [vmem:[%s6167_s0 + $0x189] ss:$16 sm:%s1414_s24]   ;;  %v1412_v16 = vsel %vm10_vm1, %v3210_v11, %v1407_v13  ;;  %v2913_v41 = vld [vmem:[%s6167_s0 + $0x80] ss:$16 sm:%s32_s29]   ;;  %v30_v43 = vsel %vm10_vm1, %v2912_v40, %v25_v39  ;;  %s116_s29 = smov 192  ;;  %s1569_s24 = smov 48 }
  0x90   :  { %v4438_v60 = vpop.permute.xlu1 %343   ;;  %v1417_v19 = vsel %vm14_vm2, %v3211_v15, %v1412_v16  ;;  %v3_v45 = vld [vmem:[%s6167_s0] ss:$16 sm:%s2_s3]   ;;  %v35_v46 = vsel %vm14_vm2, %v2913_v41, %v30_v43  ;;  %v3232_v52 = vld [vmem:[%s6167_s0 + $0x288] ss:$16 sm:%s1515_s16]   ;;  %s132_s3 = smov 48  ;;  %s153_s16 = smov 48 }
  0x91   :  { %1418 = vrot.lane.b32.xlu0 %v1417_v19, %s3551_s15  ;;  %1486 = vrot.lane.b32.xlu1 %v1485_v27, %s3552_s27  ;;  %s1523_s15 = smov 48  ;;  %v5_v47 = vld [vmem:[%s6167_s0] ss:$16 sm:%s4_s8]   ;;  %s1541_s8 = smov 12 }
  0x92   :  { %v9_v48 = vld [vmem:[%s6167_s0] ss:$16 sm:%s8_s9]   ;;  %2914 = vst.msk [vmem:[%s6168_s1 + $0x8] sm:$0xff] %vm16_vm3, %v35_v46   ;;  %v7_v50 = vsel %vm6_vm0, %v5_v47, %v3_v45  ;;  %s1546_s9 = smov 48 }
  0x93   :  { %v13_v51 = vld [vmem:[%s6167_s0] ss:$16 sm:%s12_s14]   ;;  %2958 = vst.msk [vmem:[%s6168_s1 + $0x8] sm:$0xff] %vm185_vm4, %v4335_v14   ;;  %v11_v14 = vsel %vm10_vm1, %v9_v48, %v7_v50  ;;  %s1660_s14 = smov 48 }
  0x94   :  { %v4460_v6 = vpop.permute.xlu0 %320   ;;  %v4474_v12 = vpop.permute.xlu1 %388   ;;  %v3233_v53 = vld [vmem:[%s6167_s0 + $0x288] ss:$16 sm:%s1518_s19]   ;;  %v15_v56 = vsel %vm14_vm2, %v13_v51, %v11_v14  ;;  %s106_s19 = smov 12  ;;  %v2930_v3 = vld [vmem:[%s6167_s0 + $0x280] ss:$16 sm:%s103_s13]   ;;  %s1655_s13 = smov 12 }
  0x95   :  { %1464 = vrot.lane.b32.xlu0 %v1463_v37, %s3552_s27  ;;  %v3234_v55 = vld [vmem:[%s6167_s0 + $0x288] ss:$16 sm:%s1523_s15]   ;;  %v1521_v57 = vsel %vm6_vm0, %v3233_v53, %v3232_v52  ;;  %17 = vst.msk [vmem:[%s6168_s1] sm:$0xff] %vm16_vm3, %v15_v56   ;;  %s1561_s15 = smov 3 }
  0x96   :  { %v3235_v58 = vld [vmem:[%s6167_s0 + $0x288] ss:$16 sm:%s1528_s22]   ;;  %v1526_v62 = vsel %vm10_vm1, %v3234_v55, %v1521_v57  ;;  %186 = vst.msk [vmem:[%s6168_s1] sm:$0xff] %vm185_vm4, %v4352_v22   ;;  %s53_s22 = smov 192 }
  0x97   :  { %v3227_v59 = vld [vmem:[%s6167_s0 + $0x88] ss:$16 sm:%s1492_s25]   ;;  %v1531_v22 = vsel %vm14_vm2, %v3235_v58, %v1526_v62  ;;  %v2931_v7 = vld [vmem:[%s6167_s0 + $0x280] ss:$16 sm:%s106_s19]   ;;  %s95_s19 = smov 192  ;;  %s1607_s25 = smov 3 }
  0x98   :  { %v4496_v24 = vpop.permute.xlu0 %366   ;;  %v4510_v31 = vpop.permute.xlu1 %434   ;;  %v3228_v63 = vld [vmem:[%s6167_s0 + $0x88] ss:$16 sm:%s1495_s4]   ;;  %1532 = vrot.lane.b32.xlu1 %v1531_v22, %s3552_s27  ;;  %v109_v9 = vsel %vm6_vm0, %v2931_v7, %v2930_v3  ;;  %s137_s4 = smov 192 }
  0x99   :  { %v3229_v0 = vld [vmem:[%s6167_s0 + $0x88] ss:$16 sm:%s1500_s5]   ;;  %v1498_v1 = vsel %vm6_vm0, %v3228_v63, %v3227_v59  ;;  %369 = vst.msk [vmem:[%s6168_s1] sm:$0xff] %vm368_vm5, %v4496_v24   ;;  %s1615_s5 = smov 48 }
  0x9a   :  { %v3230_v2 = vld [vmem:[%s6167_s0 + $0x88] ss:$16 sm:%s1505_s10]   ;;  %v1503_v5 = vsel %vm10_vm1, %v3229_v0, %v1498_v1  ;;  %v2932_v10 = vld [vmem:[%s6167_s0 + $0x280] ss:$16 sm:%s111_s28]   ;;  %s1633_s28 = smov 12  ;;  %s1701_s10 = smov 12 }
  0x9b   :  { %v1508_v8 = vsel %vm14_vm2, %v3230_v2, %v1503_v5  ;;  %v2933_v11 = vld [vmem:[%s6167_s0 + $0x280] ss:$16 sm:%s116_s29]   ;;  %v114_v13 = vsel %vm10_vm1, %v2932_v10, %v109_v9  ;;  %s1574_s29 = smov 192  ;;  %v3242_v23 = vld [vmem:[%s6167_s0 + $0x308] ss:$16 sm:%s1561_s15]   ;;  %s1592_s15 = smov 48 }
  0x9c   :  { %v412_v42 = vpop.permute.xlu0 %411   ;;  %v4544_v49 = vpop.permute.xlu1 %480   ;;  %1509 = vrot.lane.b32.xlu0 %v1508_v8, %s3552_s27  ;;  %v2925_v15 = vld [vmem:[%s6167_s0 + $0x200] ss:$16 sm:%s82_s6]   ;;  %v119_v17 = vsel %vm14_vm2, %v2933_v11, %v114_v13  ;;  %s1643_s6 = smov 192 }
  0x9d   :  { %2997 = vst.msk [vmem:[%s6168_s1 + $0x8] sm:$0xff] %vm368_vm5, %v412_v42   ;;  %v2926_v18 = vld [vmem:[%s6167_s0 + $0x200] ss:$16 sm:%s85_s11]   ;;  %s1620_s11 = smov 192 }
  0x9e   :  { %v2927_v19 = vld [vmem:[%s6167_s0 + $0x200] ss:$16 sm:%s90_s12]   ;;  %2934 = vst.msk [vmem:[%s6168_s1 + $0x28] sm:$0xff] %vm16_vm3, %v119_v17   ;;  %v88_v20 = vsel %vm6_vm0, %v2926_v18, %v2925_v15  ;;  %s40_s12 = smov 3 }
  0x9f   :  { %v2928_v21 = vld [vmem:[%s6167_s0 + $0x200] ss:$16 sm:%s95_s19]   ;;  %2963 = vst.msk [vmem:[%s6168_s1 + $0x28] sm:$0xff] %vm185_vm4, %v4366_v28   ;;  %v93_v28 = vsel %vm10_vm1, %v2927_v19, %v88_v20  ;;  %s1587_s19 = smov 12 }
  0xa0   :  { %v4581_v61 = vpop.permute.xlu0 %457   ;;  %v3243_v25 = vld [vmem:[%s6167_s0 + $0x308] ss:$16 sm:%s1564_s23]   ;;  %v98_v27 = vsel %vm14_vm2, %v2928_v21, %v93_v28  ;;  %s127_s23 = smov 12  ;;  %3002 = vst.msk [vmem:[%s6168_s1 + $0x28] sm:$0xff] %vm368_vm5, %v4510_v31  }
  0xa1   :  { %v3244_v26 = vld [vmem:[%s6167_s0 + $0x308] ss:$16 sm:%s1569_s24]   ;;  %v1567_v29 = vsel %vm6_vm0, %v3243_v25, %v3242_v23  ;;  %2929 = vst.msk [vmem:[%s6168_s1 + $0x20] sm:$0xff] %vm16_vm3, %v98_v27   ;;  %s1744_s24 = smov 3 }
  0xa2   :  { %v3245_v30 = vld [vmem:[%s6167_s0 + $0x308] ss:$16 sm:%s1574_s29]   ;;  %v1572_v31 = vsel %vm10_vm1, %v3244_v26, %v1567_v29  ;;  %2953 = vst.msk [vmem:[%s6168_s1 + $0x20] sm:$0xff] %vm185_vm4, %v4388_v38   ;;  %s1597_s29 = smov 192 }
  0xa3   :  { %v3237_v32 = vld [vmem:[%s6167_s0 + $0x108] ss:$16 sm:%s1538_s30]   ;;  %v1577_v38 = vsel %vm14_vm2, %v3245_v30, %v1572_v31  ;;  %v2935_v39 = vld [vmem:[%s6167_s0 + $0x300] ss:$16 sm:%s124_s18]   ;;  %s48_s18 = smov 48  ;;  %s145_s30 = smov 3 }
  0xa4   :  { %v4607_v4 = vpop.permute.xlu1 %526   ;;  %v3238_v33 = vld [vmem:[%s6167_s0 + $0x108] ss:$16 sm:%s1541_s8]   ;;  %1578 = vrot.lane.b32.xlu1 %v1577_v38, %s3552_s27  ;;  %2992 = vst.msk [vmem:[%s6168_s1 + $0x20] sm:$0xff] %vm368_vm5, %v4474_v12   ;;  %s74_s8 = smov 192 }
  0xa5   :  { %v3239_v34 = vld [vmem:[%s6167_s0 + $0x108] ss:$16 sm:%s1546_s9]   ;;  %v1544_v36 = vsel %vm6_vm0, %v3238_v33, %v3237_v32  ;;  %v2936_v41 = vld [vmem:[%s6167_s0 + $0x300] ss:$16 sm:%s127_s23]   ;;  %s1652_s9 = smov 3  ;;  %s1711_s23 = smov 192 }
  0xa6   :  { %v3240_v37 = vld [vmem:[%s6167_s0 + $0x108] ss:$16 sm:%s1551_s17]   ;;  %v1549_v40 = vsel %vm10_vm1, %v3239_v34, %v1544_v36  ;;  %s43_s17 = smov 12  ;;  %v130_v43 = vsel %vm6_vm0, %v2936_v41, %v2935_v39  ;;  %v2937_v45 = vld [vmem:[%s6167_s0 + $0x300] ss:$16 sm:%s132_s3]   ;;  %s3555_s3 = smov 20  }
  0xa7   :  { %v1554_v42 = vsel %vm14_vm2, %v3240_v37, %v1549_v40  ;;  %v2938_v46 = vld [vmem:[%s6167_s0 + $0x300] ss:$16 sm:%s137_s4]   ;;  %v135_v47 = vsel %vm10_vm1, %v2937_v45, %v130_v43  ;;  %s1610_s4 = smov 12  ;;  %v3252_v56 = vld [vmem:[%s6167_s0 + $0x388] ss:$16 sm:%s1607_s25]   ;;  %s61_s25 = smov 3 }
  0xa8   :  { %v4632_v16 = vpop.permute.xlu0 %503   ;;  %v572_v24 = vpop.permute.xlu1 %571   ;;  %1555 = vrot.lane.b32.xlu0 %v1554_v42, %s3552_s27  ;;  %v2915_v48 = vld [vmem:[%s6167_s0 + $0x100] ss:$16 sm:%s40_s12]   ;;  %v140_v50 = vsel %vm14_vm2, %v2938_v46, %v135_v47  ;;  %s1584_s12 = smov 3 }
  0xa9   :  { %3031 = vst.msk [vmem:[%s6168_s1 + $0x20] sm:$0xff] %vm551_vm6, %v572_v24   ;;  %v2916_v51 = vld [vmem:[%s6167_s0 + $0x100] ss:$16 sm:%s43_s17]   ;;  %s158_s17 = smov 192 }
  0xaa   :  { %v2917_v52 = vld [vmem:[%s6167_s0 + $0x100] ss:$16 sm:%s48_s18]   ;;  %2939 = vst.msk [vmem:[%s6168_s1 + $0x30] sm:$0xff] %vm16_vm3, %v140_v50   ;;  %v46_v53 = vsel %vm6_vm0, %v2916_v51, %v2915_v48  ;;  %s2763_s18 = smov 192 }
  0xab   :  { %v2918_v55 = vld [vmem:[%s6167_s0 + $0x100] ss:$16 sm:%s53_s22]   ;;  %2973 = vst.msk [vmem:[%s6168_s1 + $0x30] sm:$0xff] %vm185_vm4, %v4402_v44   ;;  %v51_v44 = vsel %vm10_vm1, %v2917_v52, %v46_v53  ;;  %s1747_s22 = smov 12 }
  0xac   :  { %v550_v35 = vpop.permute.xlu0 %549   ;;  %v618_v12 = vpop.permute.xlu1 %617   ;;  %v3253_v57 = vld [vmem:[%s6167_s0 + $0x388] ss:$16 sm:%s1610_s4]   ;;  %v56_v62 = vsel %vm14_vm2, %v2918_v55, %v51_v44  ;;  %3012 = vst.msk [vmem:[%s6168_s1 + $0x30] sm:$0xff] %vm368_vm5, %v4544_v49   ;;  %s3554_s4 = smov 24  }
  0xad   :  { %552 = vst.msk [vmem:[%s6168_s1] sm:$0xff] %vm551_vm6, %v550_v35   ;;  %3041 = vst.msk [vmem:[%s6168_s1 + $0x28] sm:$0xff] %vm551_vm6, %v618_v12   ;;  %v3254_v58 = vld [vmem:[%s6167_s0 + $0x388] ss:$16 sm:%s1615_s5]   ;;  %v1613_v63 = vsel %vm6_vm0, %v3253_v57, %v3252_v56  ;;  %s1675_s5 = smov 3 }
  0xae   :  { %v3255_v0 = vld [vmem:[%s6167_s0 + $0x388] ss:$16 sm:%s1620_s11]   ;;  %2919 = vst.msk [vmem:[%s6168_s1 + $0x10] sm:$0xff] %vm16_vm3, %v56_v62   ;;  %v1618_v49 = vsel %vm10_vm1, %v3254_v58, %v1613_v63  ;;  %s1683_s11 = smov 48 }
  0xaf   :  { %v3247_v22 = vld [vmem:[%s6167_s0 + $0x188] ss:$16 sm:%s1584_s12]   ;;  %2968 = vst.msk [vmem:[%s6168_s1 + $0x10] sm:$0xff] %vm185_vm4, %v4424_v54   ;;  %v1623_v54 = vsel %vm14_vm2, %v3255_v0, %v1618_v49  ;;  %s2456_s12 = smov 12 }
  0xb0   :  { %v595_v14 = vpop.permute.xlu0 %594   ;;  %v664_v59 = vpop.permute.xlu1 %663   ;;  %v3248_v1 = vld [vmem:[%s6167_s0 + $0x188] ss:$16 sm:%s1587_s19]   ;;  %v2940_v7 = vld [vmem:[%s6167_s0 + $0x380] ss:$16 sm:%s145_s30]   ;;  %s69_s30 = smov 48  ;;  %s1734_s19 = smov 192 }
  0xb1   :  { %3036 = vst.msk [vmem:[%s6168_s1 + $0x8] sm:$0xff] %vm551_vm6, %v595_v14   ;;  %v3249_v2 = vld [vmem:[%s6167_s0 + $0x188] ss:$16 sm:%s1592_s15]   ;;  %3051 = vst.msk [vmem:[%s6168_s1 + $0x30] sm:$0xff] %vm551_vm6, %v664_v59   ;;  %v1590_v3 = vsel %vm6_vm0, %v3248_v1, %v3247_v22  ;;  %s1665_s15 = smov 192 }
  0xb2   :  { %v3250_v5 = vld [vmem:[%s6167_s0 + $0x188] ss:$16 sm:%s1597_s29]   ;;  %1624 = vrot.lane.b32.xlu1 %v1623_v54, %s3552_s27  ;;  %v1595_v9 = vsel %vm10_vm1, %v3249_v2, %v1590_v3  ;;  %s64_s29 = smov 12  ;;  %3007 = vst.msk [vmem:[%s6168_s1 + $0x10] sm:$0xff] %vm368_vm5, %v4581_v61  }
  0xb3   :  { %v2941_v10 = vld [vmem:[%s6167_s0 + $0x380] ss:$16 sm:%s148_s7]   ;;  %v1600_v61 = vsel %vm14_vm2, %v3250_v5, %v1595_v9  ;;  %v3261_v25 = vld [vmem:[%s6167_s0 + $0x207] ss:$16 sm:%s1652_s9]   ;;  %s3553_s7 = smov 28   ;;  %s1678_s9 = smov 12 }
  0xb4   :  { %v641_v8 = vpop.permute.xlu0 %640   ;;  %v151_v11 = vsel %vm6_vm0, %v2941_v10, %v2940_v7  ;;  %v2942_v13 = vld [vmem:[%s6167_s0 + $0x380] ss:$16 sm:%s153_s16]   ;;  %1601 = vrot.lane.b32.xlu0 %v1600_v61, %s3552_s27  ;;  %s2461_s27 = smov 48  ;;  %s2616_s16 = smov 12 }
  0xb5   :  { %v2943_v15 = vld [vmem:[%s6167_s0 + $0x380] ss:$16 sm:%s158_s17]   ;;  %3046 = vst.msk [vmem:[%s6168_s1 + $0x10] sm:$0xff] %vm551_vm6, %v641_v8   ;;  %v710_v17 = vpop.permute.xlu1 %709   ;;  %v156_v18 = vsel %vm10_vm1, %v2942_v13, %v151_v11  ;;  %s1688_s17 = smov 192 }
  0xb6   :  { %v2920_v19 = vld [vmem:[%s6167_s0 + $0x180] ss:$16 sm:%s61_s25]   ;;  %v161_v20 = vsel %vm14_vm2, %v2943_v15, %v156_v18  ;;  %v3262_v27 = vld [vmem:[%s6167_s0 + $0x207] ss:$16 sm:%s1655_s13]   ;;  %s1729_s13 = smov 48  ;;  %s2438_s25 = smov 48 }
  0xb7   :  { %v2921_v21 = vld [vmem:[%s6167_s0 + $0x180] ss:$16 sm:%s64_s29]   ;;  %2944 = vst.msk [vmem:[%s6168_s1 + $0x38] sm:$0xff] %vm16_vm3, %v161_v20   ;;  %s1638_s29 = smov 48  ;;  %v1658_v32 = vsel %vm6_vm0, %v3262_v27, %v3261_v25 }
  0xb8   :  { %v2922_v23 = vld [vmem:[%s6167_s0 + $0x180] ss:$16 sm:%s69_s30]   ;;  %v67_v24 = vsel %vm6_vm0, %v2921_v21, %v2920_v19  ;;  %2983 = vst.msk [vmem:[%s6168_s1 + $0x38] sm:$0xff] %vm185_vm4, %v4438_v60   ;;  %s1752_s30 = smov 48 }
  0xb9   :  { %v2923_v28 = vld [vmem:[%s6167_s0 + $0x180] ss:$16 sm:%s74_s8]   ;;  %v687_v26 = vpop.permute.xlu0 %686   ;;  %v72_v60 = vsel %vm10_vm1, %v2922_v23, %v67_v24  ;;  %v3263_v29 = vld [vmem:[%s6167_s0 + $0x207] ss:$16 sm:%s1660_s14]   ;;  %s1698_s8 = smov 3  ;;  %s2613_s14 = smov 3 }
  0xba   :  { %v77_v30 = vsel %vm14_vm2, %v2923_v28, %v72_v60  ;;  %v3264_v31 = vld [vmem:[%s6167_s0 + $0x207] ss:$16 sm:%s1665_s15]   ;;  %3022 = vst.msk [vmem:[%s6168_s1 + $0x38] sm:$0xff] %vm368_vm5, %v4607_v4   ;;  %v755_v4 = vpop.permute.xlu1 %754   ;;  %v1663_v34 = vsel %vm10_vm1, %v3263_v29, %v1658_v32  ;;  %s2522_s15 = smov 3 }
  0xbb   :  { %v3257_v33 = vld [vmem:[%s6167_s0 + $0x7] ss:$16 sm:%s1630_s20]   ;;  %2924 = vst.msk [vmem:[%s6168_s1 + $0x18] sm:$0xff] %vm16_vm3, %v77_v30   ;;  %s2525_s20 = smov 12 }
  0xbc   :  { %v3258_v35 = vld [vmem:[%s6167_s0 + $0x7] ss:$16 sm:%s1633_s28]   ;;  %3061 = vst.msk [vmem:[%s6168_s1 + $0x38] sm:$0xff] %vm551_vm6, %v710_v17   ;;  %s2072_s28 = smov 48 }
  0xbd   :  { %v3259_v38 = vld [vmem:[%s6167_s0 + $0x7] ss:$16 sm:%s1638_s29]   ;;  %3070 = vst.msk [vmem:[%s6168_s1 + $0x20] sm:$0xff] %vm734_vm7, %v755_v4   ;;  %v1636_v36 = vsel %vm6_vm0, %v3258_v35, %v3257_v33  ;;  %s1889_s29 = smov 48 }
  0xbe   :  { %2978 = vst.msk [vmem:[%s6168_s1 + $0x18] sm:$0xff] %vm185_vm4, %v4460_v6   ;;  %v1668_v6 = vsel %vm14_vm2, %v3264_v31, %v1663_v34  ;;  %v3260_v37 = vld [vmem:[%s6167_s0 + $0x7] ss:$16 sm:%s1643_s6]   ;;  %v1641_v40 = vsel %vm10_vm1, %v3259_v38, %v1636_v36  ;;  %v801_v48 = vpop.permute.xlu1 %800   ;;  %s2548_s6 = smov 12 }
  0xbf   :  { %v3271_v39 = vld [vmem:[%s6167_s0 + $0x287] ss:$16 sm:%s1698_s8]   ;;  %1669 = vrot.lane.b32.xlu1 %v1668_v6, %s3553_s7  ;;  %3017 = vst.msk [vmem:[%s6168_s1 + $0x18] sm:$0xff] %vm368_vm5, %v4632_v16   ;;  %v733_v16 = vpop.permute.xlu0 %732   ;;  %v1646_v12 = vsel %vm14_vm2, %v3260_v37, %v1641_v40  ;;  %s1721_s8 = smov 3 }
  0xc0   :  { %v3272_v41 = vld [vmem:[%s6167_s0 + $0x287] ss:$16 sm:%s1701_s10]   ;;  %3056 = vst.msk [vmem:[%s6168_s1 + $0x18] sm:$0xff] %vm551_vm6, %v687_v26   ;;  %1647 = vrot.lane.b32.xlu0 %v1646_v12, %s3553_s7  ;;  %s1724_s10 = smov 12 }
  0xc1   :  { %v1704_v42 = vsel %vm6_vm0, %v3272_v41, %v3271_v39  ;;  %v3273_v43 = vld [vmem:[%s6167_s0 + $0x287] ss:$16 sm:%s1706_s21]   ;;  %735 = vst.msk [vmem:[%s6168_s1] sm:$0xff] %vm734_vm7, %v733_v16   ;;  %3080 = vst.msk [vmem:[%s6168_s1 + $0x28] sm:$0xff] %vm734_vm7, %v801_v48   ;;  %s2064_s21 = smov 3 }
  0xc2   :  { %v3274_v45 = vld [vmem:[%s6167_s0 + $0x287] ss:$16 sm:%s1711_s23]   ;;  %v1709_v46 = vsel %vm10_vm1, %v3273_v43, %v1704_v42  ;;  %v847_v49 = vpop.permute.xlu1 %846   ;;  %s1881_s23 = smov 3  ;;  %v3312_v43 = vld [vmem:[%s6167_s0 + $0x286] ss:$16 sm:%s1889_s29]   ;;  %s1935_s29 = smov 48 }
  0xc3   :  { %v3266_v47 = vld [vmem:[%s6167_s0 + $0x87] ss:$16 sm:%s1675_s5]   ;;  %v1714_v50 = vsel %vm14_vm2, %v3274_v45, %v1709_v46  ;;  %v778_v57 = vpop.permute.xlu0 %777   ;;  %3090 = vst.msk [vmem:[%s6168_s1 + $0x30] sm:$0xff] %vm734_vm7, %v847_v49   ;;  %s2453_s5 = smov 3 }
  0xc4   :  { %v3267_v51 = vld [vmem:[%s6167_s0 + $0x87] ss:$16 sm:%s1678_s9]   ;;  %1715 = vrot.lane.b32.xlu1 %v1714_v50, %s3553_s7  ;;  %3075 = vst.msk [vmem:[%s6168_s1 + $0x8] sm:$0xff] %vm734_vm7, %v778_v57   ;;  %s2502_s9 = smov 12 }
  0xc5   :  { %v3268_v52 = vld [vmem:[%s6167_s0 + $0x87] ss:$16 sm:%s1683_s11]   ;;  %v1681_v14 = vsel %vm6_vm0, %v3267_v51, %v3266_v47  ;;  %v3310_v40 = vld [vmem:[%s6167_s0 + $0x286] ss:$16 sm:%s1881_s23]   ;;  %s1927_s23 = smov 3  ;;  %s2507_s11 = smov 48 }
  0xc6   :  { %v3269_v53 = vld [vmem:[%s6167_s0 + $0x87] ss:$16 sm:%s1688_s17]   ;;  %v1686_v55 = vsel %vm10_vm1, %v3268_v52, %v1681_v14  ;;  %s2466_s17 = smov 192 }
  0xc7   :  { %v3281_v56 = vld [vmem:[%s6167_s0 + $0x307] ss:$16 sm:%s1744_s24]   ;;  %v1691_v58 = vsel %vm14_vm2, %v3269_v53, %v1686_v55  ;;  %s1790_s24 = smov 3  ;;  %v824_v10 = vpop.permute.xlu0 %823  }
  0xc8   :  { %v3282_v44 = vld [vmem:[%s6167_s0 + $0x307] ss:$16 sm:%s1747_s22]   ;;  %1692 = vrot.lane.b32.xlu0 %v1691_v58, %s3553_s7  ;;  %s1793_s22 = smov 12  ;;  %3085 = vst.msk [vmem:[%s6168_s1 + $0x10] sm:$0xff] %vm734_vm7, %v824_v10  }
  0xc9   :  { %v1750_v59 = vsel %vm6_vm0, %v3282_v44, %v3281_v56  ;;  %v3283_v62 = vld [vmem:[%s6167_s0 + $0x307] ss:$16 sm:%s1752_s30]   ;;  %s1798_s30 = smov 48  ;;  %v893_v19 = vpop.permute.xlu1 %892   ;;  %v3320_v56 = vld [vmem:[%s6167_s0 + $0x306] ss:$16 sm:%s1927_s23]   ;;  %s1973_s23 = smov 3 }
  0xca   :  { %v3284_v63 = vld [vmem:[%s6167_s0 + $0x307] ss:$16 sm:%s1757_s2]   ;;  %v1755_v0 = vsel %vm10_vm1, %v3283_v62, %v1750_v59  ;;  %s1803_s2 = smov 192  ;;  %3100 = vst.msk [vmem:[%s6168_s1 + $0x38] sm:$0xff] %vm734_vm7, %v893_v19  }
  0xcb   :  { %v3276_v22 = vld [vmem:[%s6167_s0 + $0x107] ss:$16 sm:%s1721_s8]   ;;  %v1760_v1 = vsel %vm14_vm2, %v3284_v63, %v1755_v0  ;;  %s1767_s8 = smov 3  ;;  %v3322_v62 = vld [vmem:[%s6167_s0 + $0x306] ss:$16 sm:%s1935_s29]   ;;  %s1981_s29 = smov 48 }
  0xcc   :  { %v3277_v2 = vld [vmem:[%s6167_s0 + $0x107] ss:$16 sm:%s1724_s10]   ;;  %1761 = vrot.lane.b32.xlu1 %v1760_v1, %s3553_s7  ;;  %s1770_s10 = smov 12 }
  0xcd   :  { %v3278_v54 = vld [vmem:[%s6167_s0 + $0x107] ss:$16 sm:%s1729_s13]   ;;  %v1727_v3 = vsel %vm6_vm0, %v3277_v2, %v3276_v22  ;;  %s1775_s13 = smov 48  ;;  %v870_v27 = vpop.permute.xlu0 %869   ;;  %v938_v34 = vpop.permute.xlu1 %937  }
  0xce   :  { %v3279_v5 = vld [vmem:[%s6167_s0 + $0x107] ss:$16 sm:%s1734_s19]   ;;  %v1732_v7 = vsel %vm10_vm1, %v3278_v54, %v1727_v3  ;;  %s1780_s19 = smov 192  ;;  %3095 = vst.msk [vmem:[%s6168_s1 + $0x18] sm:$0xff] %vm734_vm7, %v870_v27  }
  0xcf   :  { %v3291_v8 = vld [vmem:[%s6167_s0 + $0x387] ss:$16 sm:%s1790_s24]   ;;  %v1737_v61 = vsel %vm14_vm2, %v3279_v5, %v1732_v7  ;;  %s1835_s24 = smov 3  ;;  %3109 = vst.msk [vmem:[%s6168_s1 + $0x20] sm:$0xff] %vm917_vm8, %v938_v34  }
  0xd0   :  { %v3292_v9 = vld [vmem:[%s6167_s0 + $0x387] ss:$16 sm:%s1793_s22]   ;;  %1738 = vrot.lane.b32.xlu0 %v1737_v61, %s3553_s7  ;;  %s1838_s22 = smov 12 }
  0xd1   :  { %v1796_v11 = vsel %vm6_vm0, %v3292_v9, %v3291_v8  ;;  %v3293_v13 = vld [vmem:[%s6167_s0 + $0x387] ss:$16 sm:%s1798_s30]   ;;  %s1843_s30 = smov 48  ;;  %v3300_v26 = vld [vmem:[%s6167_s0 + $0x206] ss:$16 sm:%s1835_s24]   ;;  %s1884_s24 = smov 12  ;;  %v916_v16 = vpop.permute.xlu0 %915   ;;  %v984_v48 = vpop.permute.xlu1 %983  }
  0xd2   :  { %v3294_v15 = vld [vmem:[%s6167_s0 + $0x387] ss:$16 sm:%s1803_s2]   ;;  %v1801_v17 = vsel %vm10_vm1, %v3293_v13, %v1796_v11  ;;  %s1848_s2 = smov 192  ;;  %v3301_v60 = vld [vmem:[%s6167_s0 + $0x206] ss:$16 sm:%s1838_s22]   ;;  %s2776_s22 = smov 12 }
  0xd3   :  { %v3286_v18 = vld [vmem:[%s6167_s0 + $0x187] ss:$16 sm:%s1767_s8]   ;;  %v1806_v20 = vsel %vm14_vm2, %v3294_v15, %v1801_v17  ;;  %s1813_s8 = smov 3  ;;  %v1841_v30 = vsel %vm6_vm0, %v3301_v60, %v3300_v26  ;;  %v3302_v32 = vld [vmem:[%s6167_s0 + $0x206] ss:$16 sm:%s1843_s30]   ;;  %s1894_s30 = smov 192 }
  0xd4   :  { %v3287_v21 = vld [vmem:[%s6167_s0 + $0x187] ss:$16 sm:%s1770_s10]   ;;  %1807 = vrot.lane.b32.xlu1 %v1806_v20, %s3553_s7  ;;  %s1816_s10 = smov 12  ;;  %v1846_v33 = vsel %vm10_vm1, %v3302_v32, %v1841_v30  ;;  %918 = vst.msk [vmem:[%s6168_s1] sm:$0xff] %vm917_vm8, %v916_v16  }
  0xd5   :  { %v3288_v23 = vld [vmem:[%s6167_s0 + $0x187] ss:$16 sm:%s1775_s13]   ;;  %v1773_v24 = vsel %vm6_vm0, %v3287_v21, %v3286_v18  ;;  %s1821_s13 = smov 48  ;;  %v3303_v31 = vld [vmem:[%s6167_s0 + $0x206] ss:$16 sm:%s1848_s2]   ;;  %v961_v57 = vpop.permute.xlu0 %960   ;;  %v1030_v49 = vpop.permute.xlu1 %1029   ;;  %s3556_s2 = smov 16  }
  0xd6   :  { %v3289_v28 = vld [vmem:[%s6167_s0 + $0x187] ss:$16 sm:%s1780_s19]   ;;  %v1778_v25 = vsel %vm10_vm1, %v3288_v23, %v1773_v24  ;;  %s1826_s19 = smov 192  ;;  %v3296_v4 = vld [vmem:[%s6167_s0 + $0x6] ss:$16 sm:%s1813_s8]   ;;  %v1851_v35 = vsel %vm14_vm2, %v3303_v31, %v1846_v33  ;;  %s1858_s8 = smov 3 }
  0xd7   :  { %v1783_v29 = vsel %vm14_vm2, %v3289_v28, %v1778_v25  ;;  %v3297_v38 = vld [vmem:[%s6167_s0 + $0x6] ss:$16 sm:%s1816_s10]   ;;  %s1861_s10 = smov 12  ;;  %3119 = vst.msk [vmem:[%s6168_s1 + $0x28] sm:$0xff] %vm917_vm8, %v984_v48   ;;  %3114 = vst.msk [vmem:[%s6168_s1 + $0x8] sm:$0xff] %vm917_vm8, %v961_v57  }
  0xd8   :  { %1784 = vrot.lane.b32.xlu0 %v1783_v29, %s3553_s7  ;;  %v3298_v6 = vld [vmem:[%s6167_s0 + $0x6] ss:$16 sm:%s1821_s13]   ;;  %1852 = vrot.lane.b32.xlu1 %v1851_v35, %s3554_s4  ;;  %v1819_v36 = vsel %vm6_vm0, %v3297_v38, %v3296_v4  ;;  %s1866_s13 = smov 48  ;;  %s2247_s7 = smov 3 }
  0xd9   :  { %v3299_v37 = vld [vmem:[%s6167_s0 + $0x6] ss:$16 sm:%s1826_s19]   ;;  %v1824_v39 = vsel %vm10_vm1, %v3298_v6, %v1819_v36  ;;  %s1871_s19 = smov 192  ;;  %3129 = vst.msk [vmem:[%s6168_s1 + $0x30] sm:$0xff] %vm917_vm8, %v1030_v49   ;;  %v1007_v10 = vpop.permute.xlu0 %1006  }
  0xda   :  { %v3311_v41 = vld [vmem:[%s6167_s0 + $0x286] ss:$16 sm:%s1884_s24]   ;;  %v1829_v12 = vsel %vm14_vm2, %v3299_v37, %v1824_v39  ;;  %s1930_s24 = smov 12  ;;  %3124 = vst.msk [vmem:[%s6168_s1 + $0x10] sm:$0xff] %vm917_vm8, %v1007_v10   ;;  %v1076_v19 = vpop.permute.xlu1 %1075  }
  0xdb   :  { %v1887_v42 = vsel %vm6_vm0, %v3311_v41, %v3310_v40  ;;  %v3313_v45 = vld [vmem:[%s6167_s0 + $0x286] ss:$16 sm:%s1894_s30]   ;;  %s1940_s30 = smov 192  ;;  %3139 = vst.msk [vmem:[%s6168_s1 + $0x38] sm:$0xff] %vm917_vm8, %v1076_v19  }
  0xdc   :  { %1830 = vrot.lane.b32.xlu0 %v1829_v12, %s3554_s4  ;;  %v1892_v46 = vsel %vm10_vm1, %v3312_v43, %v1887_v42  ;;  %v3305_v47 = vld [vmem:[%s6167_s0 + $0x86] ss:$16 sm:%s1858_s8]   ;;  %s1904_s8 = smov 3 }
  0xdd   :  { %v1897_v50 = vsel %vm14_vm2, %v3313_v45, %v1892_v46  ;;  %v3306_v51 = vld [vmem:[%s6167_s0 + $0x86] ss:$16 sm:%s1861_s10]   ;;  %s1907_s10 = smov 12  ;;  %v3349_v40 = vld [vmem:[%s6167_s0 + $0x285] ss:$16 sm:%s2064_s21]   ;;  %s2110_s21 = smov 3 }
  0xde   :  { %v3307_v52 = vld [vmem:[%s6167_s0 + $0x86] ss:$16 sm:%s1866_s13]   ;;  %1898 = vrot.lane.b32.xlu1 %v1897_v50, %s3554_s4  ;;  %v1864_v14 = vsel %vm6_vm0, %v3306_v51, %v3305_v47  ;;  %s1912_s13 = smov 48  ;;  %v1053_v27 = vpop.permute.xlu0 %1052   ;;  %v1121_v34 = vpop.permute.xlu1 %1120  }
  0xdf   :  { %v3308_v53 = vld [vmem:[%s6167_s0 + $0x86] ss:$16 sm:%s1871_s19]   ;;  %v1869_v55 = vsel %vm10_vm1, %v3307_v52, %v1864_v14  ;;  %s1917_s19 = smov 192  ;;  %3134 = vst.msk [vmem:[%s6168_s1 + $0x18] sm:$0xff] %vm917_vm8, %v1053_v27  }
  0xe0   :  { %v3321_v44 = vld [vmem:[%s6167_s0 + $0x306] ss:$16 sm:%s1930_s24]   ;;  %v1874_v58 = vsel %vm14_vm2, %v3308_v53, %v1869_v55  ;;  %s1976_s24 = smov 12  ;;  %3148 = vst.msk [vmem:[%s6168_s1 + $0x20] sm:$0xff] %vm1100_vm9, %v1121_v34  }
  0xe1   :  { %v1933_v59 = vsel %vm6_vm0, %v3321_v44, %v3320_v56  ;;  %v3323_v63 = vld [vmem:[%s6167_s0 + $0x306] ss:$16 sm:%s1940_s30]   ;;  %1875 = vrot.lane.b32.xlu0 %v1874_v58, %s3554_s4  ;;  %s1986_s30 = smov 192 }
  0xe2   :  { %v1938_v0 = vsel %vm10_vm1, %v3322_v62, %v1933_v59  ;;  %v3315_v22 = vld [vmem:[%s6167_s0 + $0x106] ss:$16 sm:%s1904_s8]   ;;  %s1950_s8 = smov 3  ;;  %v1099_v16 = vpop.permute.xlu0 %1098   ;;  %v3351_v43 = vld [vmem:[%s6167_s0 + $0x285] ss:$16 sm:%s2072_s28]   ;;  %v1167_v48 = vpop.permute.xlu1 %1166   ;;  %s2118_s28 = smov 48 }
  0xe3   :  { %v1943_v1 = vsel %vm14_vm2, %v3323_v63, %v1938_v0  ;;  %v3316_v2 = vld [vmem:[%s6167_s0 + $0x106] ss:$16 sm:%s1907_s10]   ;;  %s1953_s10 = smov 12  ;;  %1101 = vst.msk [vmem:[%s6168_s1] sm:$0xff] %vm1100_vm9, %v1099_v16   ;;  %3158 = vst.msk [vmem:[%s6168_s1 + $0x28] sm:$0xff] %vm1100_vm9, %v1167_v48  }
  0xe4   :  { %v3317_v54 = vld [vmem:[%s6167_s0 + $0x106] ss:$16 sm:%s1912_s13]   ;;  %1944 = vrot.lane.b32.xlu1 %v1943_v1, %s3554_s4  ;;  %v1910_v3 = vsel %vm6_vm0, %v3316_v2, %v3315_v22  ;;  %s1958_s13 = smov 48 }
  0xe5   :  { %v3318_v5 = vld [vmem:[%s6167_s0 + $0x106] ss:$16 sm:%s1917_s19]   ;;  %v1915_v7 = vsel %vm10_vm1, %v3317_v54, %v1910_v3  ;;  %s1963_s19 = smov 192  ;;  %v3359_v56 = vld [vmem:[%s6167_s0 + $0x305] ss:$16 sm:%s2110_s21]   ;;  %s2156_s21 = smov 3 }
  0xe6   :  { %v3330_v8 = vld [vmem:[%s6167_s0 + $0x386] ss:$16 sm:%s1973_s23]   ;;  %v1920_v61 = vsel %vm14_vm2, %v3318_v5, %v1915_v7  ;;  %s2018_s23 = smov 3  ;;  %v1144_v57 = vpop.permute.xlu0 %1143   ;;  %v3361_v62 = vld [vmem:[%s6167_s0 + $0x305] ss:$16 sm:%s2118_s28]   ;;  %v1213_v49 = vpop.permute.xlu1 %1212   ;;  %s2164_s28 = smov 48 }
  0xe7   :  { %v3331_v9 = vld [vmem:[%s6167_s0 + $0x386] ss:$16 sm:%s1976_s24]   ;;  %1921 = vrot.lane.b32.xlu0 %v1920_v61, %s3554_s4  ;;  %s2021_s24 = smov 12  ;;  %3153 = vst.msk [vmem:[%s6168_s1 + $0x8] sm:$0xff] %vm1100_vm9, %v1144_v57  }
  0xe8   :  { %v1979_v11 = vsel %vm6_vm0, %v3331_v9, %v3330_v8  ;;  %v3332_v13 = vld [vmem:[%s6167_s0 + $0x386] ss:$16 sm:%s1981_s29]   ;;  %s2026_s29 = smov 48  ;;  %v3339_v26 = vld [vmem:[%s6167_s0 + $0x205] ss:$16 sm:%s2018_s23]   ;;  %s2067_s23 = smov 12 }
  0xe9   :  { %v3333_v15 = vld [vmem:[%s6167_s0 + $0x386] ss:$16 sm:%s1986_s30]   ;;  %v1984_v17 = vsel %vm10_vm1, %v3332_v13, %v1979_v11  ;;  %s2031_s30 = smov 192  ;;  %v3340_v60 = vld [vmem:[%s6167_s0 + $0x205] ss:$16 sm:%s2021_s24]   ;;  %s2590_s24 = smov 3 }
  0xea   :  { %v3325_v18 = vld [vmem:[%s6167_s0 + $0x186] ss:$16 sm:%s1950_s8]   ;;  %v1989_v20 = vsel %vm14_vm2, %v3333_v15, %v1984_v17  ;;  %s1996_s8 = smov 3  ;;  %v2024_v30 = vsel %vm6_vm0, %v3340_v60, %v3339_v26  ;;  %v3341_v32 = vld [vmem:[%s6167_s0 + $0x205] ss:$16 sm:%s2026_s29]   ;;  %s2077_s29 = smov 192  ;;  %v1190_v10 = vpop.permute.xlu0 %1189  }
  0xeb   :  { %v3326_v21 = vld [vmem:[%s6167_s0 + $0x186] ss:$16 sm:%s1953_s10]   ;;  %1990 = vrot.lane.b32.xlu1 %v1989_v20, %s3554_s4  ;;  %s1999_s10 = smov 12  ;;  %v2029_v33 = vsel %vm10_vm1, %v3341_v32, %v2024_v30  ;;  %3168 = vst.msk [vmem:[%s6168_s1 + $0x30] sm:$0xff] %vm1100_vm9, %v1213_v49  }
  0xec   :  { %v3327_v23 = vld [vmem:[%s6167_s0 + $0x186] ss:$16 sm:%s1958_s13]   ;;  %v1956_v24 = vsel %vm6_vm0, %v3326_v21, %v3325_v18  ;;  %s2004_s13 = smov 48  ;;  %v3342_v31 = vld [vmem:[%s6167_s0 + $0x205] ss:$16 sm:%s2031_s30]   ;;  %s3557_s30 = smov 12  }
  0xed   :  { %v3328_v28 = vld [vmem:[%s6167_s0 + $0x186] ss:$16 sm:%s1963_s19]   ;;  %v1961_v25 = vsel %vm10_vm1, %v3327_v23, %v1956_v24  ;;  %s2009_s19 = smov 192  ;;  %v3335_v4 = vld [vmem:[%s6167_s0 + $0x5] ss:$16 sm:%s1996_s8]   ;;  %v2034_v35 = vsel %vm14_vm2, %v3342_v31, %v2029_v33  ;;  %s2041_s8 = smov 3 }
  0xee   :  { %v1966_v29 = vsel %vm14_vm2, %v3328_v28, %v1961_v25  ;;  %v3336_v38 = vld [vmem:[%s6167_s0 + $0x5] ss:$16 sm:%s1999_s10]   ;;  %s2044_s10 = smov 12  ;;  %3163 = vst.msk [vmem:[%s6168_s1 + $0x10] sm:$0xff] %vm1100_vm9, %v1190_v10   ;;  %v1259_v19 = vpop.permute.xlu1 %1258  }
  0xef   :  { %1967 = vrot.lane.b32.xlu0 %v1966_v29, %s3554_s4  ;;  %v3337_v6 = vld [vmem:[%s6167_s0 + $0x5] ss:$16 sm:%s2004_s13]   ;;  %2035 = vrot.lane.b32.xlu1 %v2034_v35, %s3555_s3  ;;  %v2002_v36 = vsel %vm6_vm0, %v3336_v38, %v3335_v4  ;;  %s2049_s13 = smov 48  ;;  %s2430_s4 = smov 3 }
  0xf0   :  { %v3338_v37 = vld [vmem:[%s6167_s0 + $0x5] ss:$16 sm:%s2009_s19]   ;;  %v2007_v39 = vsel %vm10_vm1, %v3337_v6, %v2002_v36  ;;  %s2054_s19 = smov 192  ;;  %3178 = vst.msk [vmem:[%s6168_s1 + $0x38] sm:$0xff] %vm1100_vm9, %v1259_v19  }
  0xf1   :  { %v3350_v41 = vld [vmem:[%s6167_s0 + $0x285] ss:$16 sm:%s2067_s23]   ;;  %v2012_v12 = vsel %vm14_vm2, %v3338_v37, %v2007_v39  ;;  %s2113_s23 = smov 12 }
  0xf2   :  { %v2070_v42 = vsel %vm6_vm0, %v3350_v41, %v3349_v40  ;;  %v3352_v45 = vld [vmem:[%s6167_s0 + $0x285] ss:$16 sm:%s2077_s29]   ;;  %s2123_s29 = smov 192  ;;  %v1236_v27 = vpop.permute.xlu0 %1235   ;;  %v1304_v34 = vpop.permute.xlu1 %1303   ;;  %v3388_v40 = vld [vmem:[%s6167_s0 + $0x284] ss:$16 sm:%s2247_s7]   ;;  %s2293_s7 = smov 3 }
  0xf3   :  { %2013 = vrot.lane.b32.xlu0 %v2012_v12, %s3555_s3  ;;  %v2075_v46 = vsel %vm10_vm1, %v3351_v43, %v2070_v42  ;;  %v3344_v47 = vld [vmem:[%s6167_s0 + $0x85] ss:$16 sm:%s2041_s8]   ;;  %s2087_s8 = smov 3  ;;  %3173 = vst.msk [vmem:[%s6168_s1 + $0x18] sm:$0xff] %vm1100_vm9, %v1236_v27  }
  0xf4   :  { %v2080_v50 = vsel %vm14_vm2, %v3352_v45, %v2075_v46  ;;  %v3345_v51 = vld [vmem:[%s6167_s0 + $0x85] ss:$16 sm:%s2044_s10]   ;;  %s2090_s10 = smov 12  ;;  %3187 = vst.msk [vmem:[%s6168_s1 + $0x20] sm:$0xff] %vm1283_vm10, %v1304_v34  }
  0xf5   :  { %v3346_v52 = vld [vmem:[%s6167_s0 + $0x85] ss:$16 sm:%s2049_s13]   ;;  %2081 = vrot.lane.b32.xlu1 %v2080_v50, %s3555_s3  ;;  %v2047_v14 = vsel %vm6_vm0, %v3345_v51, %v3344_v47  ;;  %s2095_s13 = smov 48 }
  0xf6   :  { %v3347_v53 = vld [vmem:[%s6167_s0 + $0x85] ss:$16 sm:%s2054_s19]   ;;  %v2052_v55 = vsel %vm10_vm1, %v3346_v52, %v2047_v14  ;;  %s2100_s19 = smov 192  ;;  %v1282_v16 = vpop.permute.xlu0 %1281   ;;  %v3390_v43 = vld [vmem:[%s6167_s0 + $0x284] ss:$16 sm:%s2255_s26]   ;;  %v1350_v48 = vpop.permute.xlu1 %1349   ;;  %s2301_s26 = smov 48 }
  0xf7   :  { %v3360_v44 = vld [vmem:[%s6167_s0 + $0x305] ss:$16 sm:%s2113_s23]   ;;  %v2057_v58 = vsel %vm14_vm2, %v3347_v53, %v2052_v55  ;;  %s2159_s23 = smov 12  ;;  %1284 = vst.msk [vmem:[%s6168_s1] sm:$0xff] %vm1283_vm10, %v1282_v16   ;;  %3197 = vst.msk [vmem:[%s6168_s1 + $0x28] sm:$0xff] %vm1283_vm10, %v1350_v48  }
  0xf8   :  { %v2116_v59 = vsel %vm6_vm0, %v3360_v44, %v3359_v56  ;;  %v3362_v63 = vld [vmem:[%s6167_s0 + $0x305] ss:$16 sm:%s2123_s29]   ;;  %2058 = vrot.lane.b32.xlu0 %v2057_v58, %s3555_s3  ;;  %s2169_s29 = smov 192 }
  0xf9   :  { %v2121_v0 = vsel %vm10_vm1, %v3361_v62, %v2116_v59  ;;  %v3354_v22 = vld [vmem:[%s6167_s0 + $0x105] ss:$16 sm:%s2087_s8]   ;;  %s2133_s8 = smov 3  ;;  %v3398_v56 = vld [vmem:[%s6167_s0 + $0x304] ss:$16 sm:%s2293_s7]   ;;  %s2339_s7 = smov 3 }
  0xfa   :  { %v2126_v1 = vsel %vm14_vm2, %v3362_v63, %v2121_v0  ;;  %v3355_v2 = vld [vmem:[%s6167_s0 + $0x105] ss:$16 sm:%s2090_s10]   ;;  %s2136_s10 = smov 12  ;;  %v1327_v57 = vpop.permute.xlu0 %1326   ;;  %v3400_v62 = vld [vmem:[%s6167_s0 + $0x304] ss:$16 sm:%s2301_s26]   ;;  %v1396_v49 = vpop.permute.xlu1 %1395   ;;  %s2347_s26 = smov 48 }
  0xfb   :  { %v3356_v54 = vld [vmem:[%s6167_s0 + $0x105] ss:$16 sm:%s2095_s13]   ;;  %2127 = vrot.lane.b32.xlu1 %v2126_v1, %s3555_s3  ;;  %v2093_v3 = vsel %vm6_vm0, %v3355_v2, %v3354_v22  ;;  %s2141_s13 = smov 48  ;;  %3192 = vst.msk [vmem:[%s6168_s1 + $0x8] sm:$0xff] %vm1283_vm10, %v1327_v57  }
  0xfc   :  { %v3357_v5 = vld [vmem:[%s6167_s0 + $0x105] ss:$16 sm:%s2100_s19]   ;;  %v2098_v7 = vsel %vm10_vm1, %v3356_v54, %v2093_v3  ;;  %s2146_s19 = smov 192  ;;  %3207 = vst.msk [vmem:[%s6168_s1 + $0x30] sm:$0xff] %vm1283_vm10, %v1396_v49  }
  0xfd   :  { %v3369_v8 = vld [vmem:[%s6167_s0 + $0x385] ss:$16 sm:%s2156_s21]   ;;  %v2103_v61 = vsel %vm14_vm2, %v3357_v5, %v2098_v7  ;;  %s2201_s21 = smov 3  ;;  %v3433_v49 = vld [vmem:[%s6167_s0 + $0x103] ss:$16 sm:%s2456_s12]  }
  0xfe   :  { %v3370_v9 = vld [vmem:[%s6167_s0 + $0x385] ss:$16 sm:%s2159_s23]   ;;  %2104 = vrot.lane.b32.xlu0 %v2103_v61, %s3555_s3  ;;  %s2204_s23 = smov 12  ;;  %v1373_v10 = vpop.permute.xlu0 %1372  }
  0xff   :  { %v2162_v11 = vsel %vm6_vm0, %v3370_v9, %v3369_v8  ;;  %v3371_v13 = vld [vmem:[%s6167_s0 + $0x385] ss:$16 sm:%s2164_s28]   ;;  %s2209_s28 = smov 48  ;;  %v3378_v26 = vld [vmem:[%s6167_s0 + $0x204] ss:$16 sm:%s2201_s21]   ;;  %s2250_s21 = smov 12  ;;  %v1442_v19 = vpop.permute.xlu1 %1441  }
 0x100   :  { %v3372_v15 = vld [vmem:[%s6167_s0 + $0x385] ss:$16 sm:%s2169_s29]   ;;  %v2167_v17 = vsel %vm10_vm1, %v3371_v13, %v2162_v11  ;;  %s2214_s29 = smov 192  ;;  %v3379_v60 = vld [vmem:[%s6167_s0 + $0x204] ss:$16 sm:%s2204_s23]   ;;  %s2535_s23 = smov 192 }
 0x101   :  { %v3364_v18 = vld [vmem:[%s6167_s0 + $0x185] ss:$16 sm:%s2133_s8]   ;;  %v2172_v20 = vsel %vm14_vm2, %v3372_v15, %v2167_v17  ;;  %s2179_s8 = smov 3  ;;  %v2207_v30 = vsel %vm6_vm0, %v3379_v60, %v3378_v26  ;;  %v3380_v32 = vld [vmem:[%s6167_s0 + $0x204] ss:$16 sm:%s2209_s28]   ;;  %s2260_s28 = smov 192 }
 0x102   :  { %v3365_v21 = vld [vmem:[%s6167_s0 + $0x185] ss:$16 sm:%s2136_s10]   ;;  %2173 = vrot.lane.b32.xlu1 %v2172_v20, %s3555_s3  ;;  %s2182_s10 = smov 12  ;;  %v2212_v33 = vsel %vm10_vm1, %v3380_v32, %v2207_v30  ;;  %3202 = vst.msk [vmem:[%s6168_s1 + $0x10] sm:$0xff] %vm1283_vm10, %v1373_v10  }
 0x103   :  { %v3366_v23 = vld [vmem:[%s6167_s0 + $0x185] ss:$16 sm:%s2141_s13]   ;;  %v2139_v24 = vsel %vm6_vm0, %v3365_v21, %v3364_v18  ;;  %s2187_s13 = smov 48  ;;  %v3381_v31 = vld [vmem:[%s6167_s0 + $0x204] ss:$16 sm:%s2214_s29]   ;;  %v1419_v27 = vpop.permute.xlu0 %1418   ;;  %v1487_v34 = vpop.permute.xlu1 %1486  }
 0x104   :  { %v3367_v28 = vld [vmem:[%s6167_s0 + $0x185] ss:$16 sm:%s2146_s19]   ;;  %v2144_v25 = vsel %vm10_vm1, %v3366_v23, %v2139_v24  ;;  %s2192_s19 = smov 192  ;;  %v3374_v4 = vld [vmem:[%s6167_s0 + $0x4] ss:$16 sm:%s2179_s8]   ;;  %v2217_v35 = vsel %vm14_vm2, %v3381_v31, %v2212_v33  ;;  %s2224_s8 = smov 3 }
 0x105   :  { %v2149_v29 = vsel %vm14_vm2, %v3367_v28, %v2144_v25  ;;  %v3375_v38 = vld [vmem:[%s6167_s0 + $0x4] ss:$16 sm:%s2182_s10]   ;;  %s2227_s10 = smov 12  ;;  %3217 = vst.msk [vmem:[%s6168_s1 + $0x38] sm:$0xff] %vm1283_vm10, %v1442_v19   ;;  %3212 = vst.msk [vmem:[%s6168_s1 + $0x18] sm:$0xff] %vm1283_vm10, %v1419_v27  }
 0x106   :  { %2150 = vrot.lane.b32.xlu0 %v2149_v29, %s3555_s3  ;;  %v3376_v6 = vld [vmem:[%s6167_s0 + $0x4] ss:$16 sm:%s2187_s13]   ;;  %2218 = vrot.lane.b32.xlu1 %v2217_v35, %s3556_s2  ;;  %v2185_v36 = vsel %vm6_vm0, %v3375_v38, %v3374_v4  ;;  %s2232_s13 = smov 48  ;;  %s2621_s3 = smov 48 }
 0x107   :  { %v3377_v37 = vld [vmem:[%s6167_s0 + $0x4] ss:$16 sm:%s2192_s19]   ;;  %v2190_v39 = vsel %vm10_vm1, %v3376_v6, %v2185_v36  ;;  %s2237_s19 = smov 192  ;;  %3226 = vst.msk [vmem:[%s6168_s1 + $0x20] sm:$0xff] %vm1466_vm11, %v1487_v34   ;;  %v1465_v16 = vpop.permute.xlu0 %1464  }
 0x108   :  { %v3389_v41 = vld [vmem:[%s6167_s0 + $0x284] ss:$16 sm:%s2250_s21]   ;;  %v2195_v12 = vsel %vm14_vm2, %v3377_v37, %v2190_v39  ;;  %s2296_s21 = smov 12  ;;  %1467 = vst.msk [vmem:[%s6168_s1] sm:$0xff] %vm1466_vm11, %v1465_v16  }
 0x109   :  { %v2253_v42 = vsel %vm6_vm0, %v3389_v41, %v3388_v40  ;;  %v3391_v45 = vld [vmem:[%s6167_s0 + $0x284] ss:$16 sm:%s2260_s28]   ;;  %s2306_s28 = smov 192  ;;  %v3427_v40 = vld [vmem:[%s6167_s0 + $0x283] ss:$16 sm:%s2430_s4]   ;;  %s2476_s4 = smov 3 }
 0x10a   :  { %2196 = vrot.lane.b32.xlu0 %v2195_v12, %s3556_s2  ;;  %v2258_v46 = vsel %vm10_vm1, %v3390_v43, %v2253_v42  ;;  %v3383_v47 = vld [vmem:[%s6167_s0 + $0x84] ss:$16 sm:%s2224_s8]   ;;  %s2270_s8 = smov 3 }
 0x10b   :  { %v2263_v50 = vsel %vm14_vm2, %v3391_v45, %v2258_v46  ;;  %v3384_v51 = vld [vmem:[%s6167_s0 + $0x84] ss:$16 sm:%s2227_s10]   ;;  %s2273_s10 = smov 12  ;;  %v3429_v43 = vld [vmem:[%s6167_s0 + $0x283] ss:$16 sm:%s2438_s25]   ;;  %s2484_s25 = smov 48 }
 0x10c   :  { %v3385_v52 = vld [vmem:[%s6167_s0 + $0x84] ss:$16 sm:%s2232_s13]   ;;  %2264 = vrot.lane.b32.xlu1 %v2263_v50, %s3556_s2  ;;  %v2230_v14 = vsel %vm6_vm0, %v3384_v51, %v3383_v47  ;;  %s2278_s13 = smov 48 }
 0x10d   :  { %v3386_v53 = vld [vmem:[%s6167_s0 + $0x84] ss:$16 sm:%s2237_s19]   ;;  %v2235_v55 = vsel %vm10_vm1, %v3385_v52, %v2230_v14  ;;  %s2283_s19 = smov 192  ;;  %v3444_v19 = vld [vmem:[%s6167_s0 + $0x183] ss:$16 sm:%s2507_s11]   ;;  %s2799_s11 = smov 12 }
 0x10e   :  { %v3399_v44 = vld [vmem:[%s6167_s0 + $0x304] ss:$16 sm:%s2296_s21]   ;;  %v2240_v58 = vsel %vm14_vm2, %v3386_v53, %v2235_v55  ;;  %s2342_s21 = smov 12  ;;  %v3437_v55 = vld [vmem:[%s6167_s0 + $0x303] ss:$16 sm:%s2476_s4]   ;;  %s2626_s4 = smov 192 }
 0x10f   :  { %v2299_v59 = vsel %vm6_vm0, %v3399_v44, %v3398_v56  ;;  %v3401_v63 = vld [vmem:[%s6167_s0 + $0x304] ss:$16 sm:%s2306_s28]   ;;  %2241 = vrot.lane.b32.xlu0 %v2240_v58, %s3556_s2  ;;  %s2352_s28 = smov 192 }
 0x110   :  { %v2304_v0 = vsel %vm10_vm1, %v3400_v62, %v2299_v59  ;;  %v3393_v22 = vld [vmem:[%s6167_s0 + $0x104] ss:$16 sm:%s2270_s8]   ;;  %s2316_s8 = smov 3  ;;  %v3439_v58 = vld [vmem:[%s6167_s0 + $0x303] ss:$16 sm:%s2484_s25]   ;;  %s2545_s25 = smov 3 }
 0x111   :  { %v2309_v1 = vsel %vm14_vm2, %v3401_v63, %v2304_v0  ;;  %v3394_v2 = vld [vmem:[%s6167_s0 + $0x104] ss:$16 sm:%s2273_s10]   ;;  %s2319_s10 = smov 12  ;;  %v3432_v63 = vld [vmem:[%s6167_s0 + $0x103] ss:$16 sm:%s2453_s5]   ;;  %v1533_v0 = vpop.permute.xlu1 %1532  }
 0x112   :  { %v3395_v54 = vld [vmem:[%s6167_s0 + $0x104] ss:$16 sm:%s2278_s13]   ;;  %2310 = vrot.lane.b32.xlu1 %v2309_v1, %s3556_s2  ;;  %v2276_v3 = vsel %vm6_vm0, %v3394_v2, %v3393_v22  ;;  %s2324_s13 = smov 48  ;;  %3236 = vst.msk [vmem:[%s6168_s1 + $0x28] sm:$0xff] %vm1466_vm11, %v1533_v0   ;;  %v2459_v2 = vsel %vm6_vm0, %v3433_v49, %v3432_v63 }
 0x113   :  { %v3396_v5 = vld [vmem:[%s6167_s0 + $0x104] ss:$16 sm:%s2283_s19]   ;;  %v2281_v7 = vsel %vm10_vm1, %v3395_v54, %v2276_v3  ;;  %s2329_s19 = smov 192  ;;  %v3434_v1 = vld [vmem:[%s6167_s0 + $0x103] ss:$16 sm:%s2461_s27]   ;;  %v1510_v3 = vpop.permute.xlu0 %1509   ;;  %s2750_s27 = smov 3 }
 0x114   :  { %v3408_v8 = vld [vmem:[%s6167_s0 + $0x384] ss:$16 sm:%s2339_s7]   ;;  %v2286_v61 = vsel %vm14_vm2, %v3396_v5, %v2281_v7  ;;  %s2384_s7 = smov 3  ;;  %v3435_v54 = vld [vmem:[%s6167_s0 + $0x103] ss:$16 sm:%s2466_s17]   ;;  %v2464_v5 = vsel %vm10_vm1, %v3434_v1, %v2459_v2  ;;  %s2512_s17 = smov 192 }
 0x115   :  { %v3409_v9 = vld [vmem:[%s6167_s0 + $0x384] ss:$16 sm:%s2342_s21]   ;;  %2287 = vrot.lane.b32.xlu0 %v2286_v61, %s3556_s2  ;;  %s2387_s21 = smov 12  ;;  %3231 = vst.msk [vmem:[%s6168_s1 + $0x8] sm:$0xff] %vm1466_vm11, %v1510_v3  }
 0x116   :  { %v2345_v11 = vsel %vm6_vm0, %v3409_v9, %v3408_v8  ;;  %v3410_v13 = vld [vmem:[%s6167_s0 + $0x384] ss:$16 sm:%s2347_s26]   ;;  %s2392_s26 = smov 48  ;;  %v3417_v26 = vld [vmem:[%s6167_s0 + $0x203] ss:$16 sm:%s2384_s7]   ;;  %s2433_s7 = smov 12  ;;  %v2469_v9 = vsel %vm14_vm2, %v3435_v54, %v2464_v5 }
 0x117   :  { %v3411_v15 = vld [vmem:[%s6167_s0 + $0x384] ss:$16 sm:%s2352_s28]   ;;  %v2350_v17 = vsel %vm10_vm1, %v3410_v13, %v2345_v11  ;;  %s2397_s28 = smov 192  ;;  %v3418_v60 = vld [vmem:[%s6167_s0 + $0x203] ss:$16 sm:%s2387_s21]   ;;  %s2530_s21 = smov 48 }
 0x118   :  { %v3403_v18 = vld [vmem:[%s6167_s0 + $0x184] ss:$16 sm:%s2316_s8]   ;;  %v2355_v20 = vsel %vm14_vm2, %v3411_v15, %v2350_v17  ;;  %s2362_s8 = smov 3  ;;  %v2390_v30 = vsel %vm6_vm0, %v3418_v60, %v3417_v26  ;;  %v3419_v32 = vld [vmem:[%s6167_s0 + $0x203] ss:$16 sm:%s2392_s26]   ;;  %s2443_s26 = smov 192 }
 0x119   :  { %v3404_v21 = vld [vmem:[%s6167_s0 + $0x184] ss:$16 sm:%s2319_s10]   ;;  %2356 = vrot.lane.b32.xlu1 %v2355_v20, %s3556_s2  ;;  %s2365_s10 = smov 12  ;;  %v2395_v33 = vsel %vm10_vm1, %v3419_v32, %v2390_v30 }
 0x11a   :  { %v3405_v23 = vld [vmem:[%s6167_s0 + $0x184] ss:$16 sm:%s2324_s13]   ;;  %v2322_v24 = vsel %vm6_vm0, %v3404_v21, %v3403_v18  ;;  %s2370_s13 = smov 48  ;;  %v3420_v31 = vld [vmem:[%s6167_s0 + $0x203] ss:$16 sm:%s2397_s28]   ;;  %s2499_s28 = smov 3  ;;  %v1556_v34 = vpop.permute.xlu0 %1555  }
 0x11b   :  { %v3406_v28 = vld [vmem:[%s6167_s0 + $0x184] ss:$16 sm:%s2329_s19]   ;;  %v2327_v25 = vsel %vm10_vm1, %v3405_v23, %v2322_v24  ;;  %s2375_s19 = smov 192  ;;  %v3413_v4 = vld [vmem:[%s6167_s0 + $0x3] ss:$16 sm:%s2362_s8]   ;;  %v2400_v35 = vsel %vm14_vm2, %v3420_v31, %v2395_v33  ;;  %s2407_s8 = smov 3 }
 0x11c   :  { %v2332_v29 = vsel %vm14_vm2, %v3406_v28, %v2327_v25  ;;  %v3414_v38 = vld [vmem:[%s6167_s0 + $0x3] ss:$16 sm:%s2365_s10]   ;;  %s2410_s10 = smov 12  ;;  %v3452_v32 = vld [vmem:[%s6167_s0 + $0x2] ss:$16 sm:%s2545_s25]   ;;  %s2781_s25 = smov 48 }
 0x11d   :  { %2333 = vrot.lane.b32.xlu0 %v2332_v29, %s3556_s2  ;;  %v3415_v6 = vld [vmem:[%s6167_s0 + $0x3] ss:$16 sm:%s2370_s13]   ;;  %2401 = vrot.lane.b32.xlu1 %v2400_v35, %s3557_s30  ;;  %v2368_v36 = vsel %vm6_vm0, %v3414_v38, %v3413_v4  ;;  %s2415_s13 = smov 48  ;;  %v1579_v29 = vpop.permute.xlu1 %1578   ;;  %s2672_s2 = smov 192 }
 0x11e   :  { %v3416_v37 = vld [vmem:[%s6167_s0 + $0x3] ss:$16 sm:%s2375_s19]   ;;  %v2373_v39 = vsel %vm10_vm1, %v3415_v6, %v2368_v36  ;;  %s2420_s19 = smov 192  ;;  %3246 = vst.msk [vmem:[%s6168_s1 + $0x30] sm:$0xff] %vm1466_vm11, %v1579_v29   ;;  %3241 = vst.msk [vmem:[%s6168_s1 + $0x10] sm:$0xff] %vm1466_vm11, %v1556_v34  }
 0x11f   :  { %v3428_v41 = vld [vmem:[%s6167_s0 + $0x283] ss:$16 sm:%s2433_s7]   ;;  %v2378_v12 = vsel %vm14_vm2, %v3416_v37, %v2373_v39  ;;  %s2479_s7 = smov 12  ;;  %v3453_v33 = vld [vmem:[%s6167_s0 + $0x2] ss:$16 sm:%s2548_s6]   ;;  %s2593_s6 = smov 12 }
 0x120   :  { %v2436_v42 = vsel %vm6_vm0, %v3428_v41, %v3427_v40  ;;  %v3430_v45 = vld [vmem:[%s6167_s0 + $0x283] ss:$16 sm:%s2443_s26]   ;;  %s2489_s26 = smov 192  ;;  %v2551_v35 = vsel %vm6_vm0, %v3453_v33, %v3452_v32  ;;  %v3466_v36 = vld [vmem:[%s6167_s0 + $0x282] ss:$16 sm:%s2613_s14]   ;;  %s2659_s14 = smov 3 }
 0x121   :  { %2379 = vrot.lane.b32.xlu0 %v2378_v12, %s3557_s30  ;;  %v2441_v46 = vsel %vm10_vm1, %v3429_v43, %v2436_v42  ;;  %v3422_v47 = vld [vmem:[%s6167_s0 + $0x83] ss:$16 sm:%s2407_s8]   ;;  %s2553_s8 = smov 48 }
 0x122   :  { %v2446_v48 = vsel %vm14_vm2, %v3430_v45, %v2441_v46  ;;  %v3423_v50 = vld [vmem:[%s6167_s0 + $0x83] ss:$16 sm:%s2410_s10]   ;;  %s2558_s10 = smov 192  ;;  %v3454_v4 = vld [vmem:[%s6167_s0 + $0x2] ss:$16 sm:%s2553_s8]   ;;  %s2598_s8 = smov 48 }
 0x123   :  { %v3424_v51 = vld [vmem:[%s6167_s0 + $0x83] ss:$16 sm:%s2415_s13]   ;;  %2447 = vrot.lane.b32.xlu1 %v2446_v48, %s3557_s30  ;;  %v2413_v52 = vsel %vm6_vm0, %v3423_v50, %v3422_v47  ;;  %v2556_v6 = vsel %vm10_vm1, %v3454_v4, %v2551_v35  ;;  %s2708_s13 = smov 12 }
 0x124   :  { %v3425_v14 = vld [vmem:[%s6167_s0 + $0x83] ss:$16 sm:%s2420_s19]   ;;  %v2418_v53 = vsel %vm10_vm1, %v3424_v51, %v2413_v52  ;;  %v3455_v38 = vld [vmem:[%s6167_s0 + $0x2] ss:$16 sm:%s2558_s10]   ;;  %s2603_s10 = smov 192  ;;  %s2713_s19 = smov 48 }
 0x125   :  { %v3438_v56 = vld [vmem:[%s6167_s0 + $0x303] ss:$16 sm:%s2479_s7]   ;;  %v2423_v44 = vsel %vm14_vm2, %v3425_v14, %v2418_v53  ;;  %s3558_s7 = smov 8   ;;  %v3467_v37 = vld [vmem:[%s6167_s0 + $0x282] ss:$16 sm:%s2616_s16]   ;;  %v2561_v39 = vsel %vm14_vm2, %v3455_v38, %v2556_v6  ;;  %s2662_s16 = smov 12  ;;  %v1625_v14 = vpop.permute.xlu1 %1624  }
 0x126   :  { %v2482_v57 = vsel %vm6_vm0, %v3438_v56, %v3437_v55  ;;  %v3440_v59 = vld [vmem:[%s6167_s0 + $0x303] ss:$16 sm:%s2489_s26]   ;;  %2424 = vrot.lane.b32.xlu0 %v2423_v44, %s3557_s30  ;;  %v2619_v40 = vsel %vm6_vm0, %v3467_v37, %v3466_v36  ;;  %s2639_s26 = smov 12  ;;  %3256 = vst.msk [vmem:[%s6168_s1 + $0x38] sm:$0xff] %vm1466_vm11, %v1625_v14  }
 0x127   :  { %v2487_v62 = vsel %vm10_vm1, %v3439_v58, %v2482_v57  ;;  %v3447_v7 = vld [vmem:[%s6167_s0 + $0x383] ss:$16 sm:%s2522_s15]   ;;  %s2567_s15 = smov 3  ;;  %v3468_v41 = vld [vmem:[%s6167_s0 + $0x282] ss:$16 sm:%s2621_s3]  }
 0x128   :  { %v2492_v22 = vsel %vm14_vm2, %v3440_v59, %v2487_v62  ;;  %v3448_v8 = vld [vmem:[%s6167_s0 + $0x383] ss:$16 sm:%s2525_s20]   ;;  %s2570_s20 = smov 12  ;;  %v3456_v24 = vld [vmem:[%s6167_s0 + $0x202] ss:$16 sm:%s2567_s15]   ;;  %v2624_v12 = vsel %vm10_vm1, %v3468_v41, %v2619_v40  ;;  %v1602_v59 = vpop.permute.xlu0 %1601   ;;  %s2718_s15 = smov 192 }
 0x129   :  { %2493 = vrot.lane.b32.xlu1 %v2492_v22, %s3557_s30  ;;  %v2528_v10 = vsel %vm6_vm0, %v3448_v8, %v3447_v7  ;;  %v3449_v61 = vld [vmem:[%s6167_s0 + $0x383] ss:$16 sm:%s2530_s21]   ;;  %s2575_s21 = smov 48  ;;  %3251 = vst.msk [vmem:[%s6168_s1 + $0x18] sm:$0xff] %vm1466_vm11, %v1602_v59  }
 0x12a   :  { %v3450_v11 = vld [vmem:[%s6167_s0 + $0x383] ss:$16 sm:%s2535_s23]   ;;  %2470 = vrot.lane.b32.xlu0 %v2469_v9, %s3557_s30  ;;  %v2533_v13 = vsel %vm10_vm1, %v3449_v61, %v2528_v10  ;;  %s2580_s23 = smov 192 }
 0x12b   :  { %v3442_v15 = vld [vmem:[%s6167_s0 + $0x183] ss:$16 sm:%s2499_s28]   ;;  %v2538_v17 = vsel %vm14_vm2, %v3450_v11, %v2533_v13  ;;  %v3457_v28 = vld [vmem:[%s6167_s0 + $0x202] ss:$16 sm:%s2570_s20]   ;;  %s2667_s20 = smov 48  ;;  %s2644_s28 = smov 48 }
 0x12c   :  { %v3443_v18 = vld [vmem:[%s6167_s0 + $0x183] ss:$16 sm:%s2502_s9]   ;;  %v2573_v26 = vsel %vm6_vm0, %v3457_v28, %v3456_v24  ;;  %v3458_v60 = vld [vmem:[%s6167_s0 + $0x202] ss:$16 sm:%s2575_s21]   ;;  %s2636_s21 = smov 3  ;;  %s2649_s9 = smov 192 }
 0x12d   :  { %2539 = vrot.lane.b32.xlu1 %v2538_v17, %s3557_s30  ;;  %v2505_v20 = vsel %vm6_vm0, %v3443_v18, %v3442_v15  ;;  %v3445_v21 = vld [vmem:[%s6167_s0 + $0x183] ss:$16 sm:%s2512_s17]   ;;  %v2578_v30 = vsel %vm10_vm1, %v3458_v60, %v2573_v26  ;;  %s2758_s17 = smov 48 }
 0x12e   :  { %v2510_v23 = vsel %vm10_vm1, %v3444_v19, %v2505_v20  ;;  %v3459_v27 = vld [vmem:[%s6167_s0 + $0x202] ss:$16 sm:%s2580_s23]   ;;  %v3495_v20 = vld [vmem:[%s6167_s0 + $0x201] ss:$16 sm:%s2750_s27]   ;;  %s2731_s23 = smov 12 }
 0x12f   :  { %v2515_v25 = vsel %vm14_vm2, %v3445_v21, %v2510_v23  ;;  %v2583_v31 = vsel %vm14_vm2, %v3459_v27, %v2578_v30  ;;  %v3469_v16 = vld [vmem:[%s6167_s0 + $0x282] ss:$16 sm:%s2626_s4]   ;;  %v3497_v28 = vld [vmem:[%s6167_s0 + $0x201] ss:$16 sm:%s2758_s17]   ;;  %s2809_s17 = smov 192 }
 0x130   :  { %2516 = vrot.lane.b32.xlu0 %v2515_v25, %s3557_s30  ;;  %v3461_v42 = vld [vmem:[%s6167_s0 + $0x82] ss:$16 sm:%s2590_s24]   ;;  %v2629_v43 = vsel %vm14_vm2, %v3469_v16, %v2624_v12  ;;  %s2705_s30 = smov 3  ;;  %s2736_s24 = smov 48 }
 0x131   :  { %2584 = vrot.lane.b32.xlu1 %v2583_v31, %s3558_s7  ;;  %v3462_v45 = vld [vmem:[%s6167_s0 + $0x82] ss:$16 sm:%s2593_s6]   ;;  %v1670_v18 = vpop.permute.xlu1 %1669   ;;  %s2741_s6 = smov 192 }
 0x132   :  { %v3463_v46 = vld [vmem:[%s6167_s0 + $0x82] ss:$16 sm:%s2598_s8]   ;;  %v2596_v47 = vsel %vm6_vm0, %v3462_v45, %v3461_v42  ;;  %3265 = vst.msk [vmem:[%s6168_s1 + $0x20] sm:$0xff] %vm1649_vm12, %v1670_v18   ;;  %v1648_v26 = vpop.permute.xlu0 %1647  }
 0x133   :  { %v3464_v48 = vld [vmem:[%s6167_s0 + $0x82] ss:$16 sm:%s2603_s10]   ;;  %v2601_v50 = vsel %vm10_vm1, %v3463_v46, %v2596_v47  ;;  %s2753_s10 = smov 12  ;;  %v3498_v25 = vld [vmem:[%s6167_s0 + $0x201] ss:$16 sm:%s2763_s18]   ;;  %s3559_s18 = smov 4  }
 0x134   :  { %2562 = vrot.lane.b32.xlu0 %v2561_v39, %s3558_s7  ;;  %v3476_v51 = vld [vmem:[%s6167_s0 + $0x302] ss:$16 sm:%s2659_s14]   ;;  %v2606_v53 = vsel %vm14_vm2, %v3464_v48, %v2601_v50  ;;  %1650 = vst.msk [vmem:[%s6168_s1] sm:$0xff] %vm1649_vm12, %v1648_v26  }
 0x135   :  { %2630 = vrot.lane.b32.xlu1 %v2629_v43, %s3558_s7  ;;  %v3477_v52 = vld [vmem:[%s6167_s0 + $0x302] ss:$16 sm:%s2662_s16]   ;;  %s2804_s16 = smov 48 }
 0x136   :  { %v2665_v55 = vsel %vm6_vm0, %v3477_v52, %v3476_v51  ;;  %v3478_v56 = vld [vmem:[%s6167_s0 + $0x302] ss:$16 sm:%s2667_s20]   ;;  %s2728_s20 = smov 3  ;;  %v3496_v21 = vld [vmem:[%s6167_s0 + $0x201] ss:$16 sm:%s2753_s10]   ;;  %v1716_v31 = vpop.permute.xlu1 %1715  }
 0x137   :  { %v3479_v44 = vld [vmem:[%s6167_s0 + $0x302] ss:$16 sm:%s2672_s2]   ;;  %v2670_v57 = vsel %vm10_vm1, %v3478_v56, %v2665_v55  ;;  %v2756_v24 = vsel %vm6_vm0, %v3496_v21, %v3495_v20  ;;  %v3491_v27 = vld [vmem:[%s6167_s0 + $0x1] ss:$16 sm:%s2728_s20]   ;;  %s2773_s20 = smov 3 }
 0x138   :  { %2607 = vrot.lane.b32.xlu0 %v2606_v53, %s3558_s7  ;;  %v3471_v58 = vld [vmem:[%s6167_s0 + $0x102] ss:$16 sm:%s2636_s21]   ;;  %v2675_v62 = vsel %vm14_vm2, %v3479_v44, %v2670_v57  ;;  %s2682_s21 = smov 3  ;;  %v2761_v60 = vsel %vm10_vm1, %v3497_v28, %v2756_v24  ;;  %3275 = vst.msk [vmem:[%s6168_s1 + $0x28] sm:$0xff] %vm1649_vm12, %v1716_v31  }
 0x139   :  { %v3472_v63 = vld [vmem:[%s6167_s0 + $0x102] ss:$16 sm:%s2639_s26]   ;;  %2676 = vrot.lane.b32.xlu1 %v2675_v62, %s3558_s7  ;;  %s2685_s26 = smov 12  ;;  %v2766_v29 = vsel %vm14_vm2, %v3498_v25, %v2761_v60 }
 0x13a   :  { %v3473_v0 = vld [vmem:[%s6167_s0 + $0x102] ss:$16 sm:%s2644_s28]   ;;  %v2642_v22 = vsel %vm6_vm0, %v3472_v63, %v3471_v58  ;;  %s2690_s28 = smov 48  ;;  %v3492_v30 = vld [vmem:[%s6167_s0 + $0x1] ss:$16 sm:%s2731_s23]   ;;  %v1693_v40 = vpop.permute.xlu0 %1692  }
 0x13b   :  { %v3474_v49 = vld [vmem:[%s6167_s0 + $0x102] ss:$16 sm:%s2649_s9]   ;;  %v2647_v1 = vsel %vm10_vm1, %v3473_v0, %v2642_v22  ;;  %s2695_s9 = smov 192  ;;  %v3493_v32 = vld [vmem:[%s6167_s0 + $0x1] ss:$16 sm:%s2736_s24]   ;;  %v2734_v33 = vsel %vm6_vm0, %v3492_v30, %v3491_v27 }
 0x13c   :  { %v3486_v2 = vld [vmem:[%s6167_s0 + $0x382] ss:$16 sm:%s2705_s30]   ;;  %v2652_v3 = vsel %vm14_vm2, %v3474_v49, %v2647_v1  ;;  %v3494_v4 = vld [vmem:[%s6167_s0 + $0x1] ss:$16 sm:%s2741_s6]   ;;  %v2739_v34 = vsel %vm10_vm1, %v3493_v32, %v2734_v33  ;;  %s2786_s6 = smov 192 }
 0x13d   :  { %v3487_v54 = vld [vmem:[%s6167_s0 + $0x382] ss:$16 sm:%s2708_s13]   ;;  %2653 = vrot.lane.b32.xlu0 %v2652_v3, %s3558_s7  ;;  %v2744_v6 = vsel %vm14_vm2, %v3494_v4, %v2739_v34  ;;  %3270 = vst.msk [vmem:[%s6168_s1 + $0x8] sm:$0xff] %vm1649_vm12, %v1693_v40  }
 0x13e   :  { %v2711_v5 = vsel %vm6_vm0, %v3487_v54, %v3486_v2  ;;  %v3488_v7 = vld [vmem:[%s6167_s0 + $0x382] ss:$16 sm:%s2713_s19]   ;;  %v3506_v38 = vld [vmem:[%s6167_s0 + $0x281] ss:$16 sm:%s2799_s11]   ;;  %s2845_s11 = smov 12  ;;  %v1762_v45 = vpop.permute.xlu1 %1761  }
 0x13f   :  { %v3489_v8 = vld [vmem:[%s6167_s0 + $0x382] ss:$16 sm:%s2718_s15]   ;;  %v2716_v9 = vsel %vm10_vm1, %v3488_v7, %v2711_v5  ;;  %v3507_v37 = vld [vmem:[%s6167_s0 + $0x281] ss:$16 sm:%s2804_s16]   ;;  %s2850_s16 = smov 48 }
 0x140   :  { %v3481_v10 = vld [vmem:[%s6167_s0 + $0x182] ss:$16 sm:%s2682_s21]   ;;  %v2721_v61 = vsel %vm14_vm2, %v3489_v8, %v2716_v9  ;;  %v3508_v39 = vld [vmem:[%s6167_s0 + $0x281] ss:$16 sm:%s2809_s17]   ;;  %s2855_s17 = smov 192 }
 0x141   :  { %v3482_v11 = vld [vmem:[%s6167_s0 + $0x182] ss:$16 sm:%s2685_s26]   ;;  %2722 = vrot.lane.b32.xlu1 %v2721_v61, %s3558_s7  ;;  %3285 = vst.msk [vmem:[%s6168_s1 + $0x30] sm:$0xff] %vm1649_vm12, %v1762_v45  }
 0x142   :  { %v3483_v13 = vld [vmem:[%s6167_s0 + $0x182] ss:$16 sm:%s2690_s28]   ;;  %v2688_v15 = vsel %vm6_vm0, %v3482_v11, %v3481_v10  ;;  %v3500_v16 = vld [vmem:[%s6167_s0 + $0x81] ss:$16 sm:%s2773_s20]   ;;  %s2819_s20 = smov 3  ;;  %v1739_v56 = vpop.permute.xlu0 %1738  }
 0x143   :  { %v3484_v17 = vld [vmem:[%s6167_s0 + $0x182] ss:$16 sm:%s2695_s9]   ;;  %v2693_v19 = vsel %vm10_vm1, %v3483_v13, %v2688_v15  ;;  %s2796_s9 = smov 3  ;;  %v3501_v42 = vld [vmem:[%s6167_s0 + $0x81] ss:$16 sm:%s2776_s22]   ;;  %s2822_s22 = smov 12 }
 0x144   :  { %v2698_v23 = vsel %vm14_vm2, %v3484_v17, %v2693_v19  ;;  %v3505_v35 = vld [vmem:[%s6167_s0 + $0x281] ss:$16 sm:%s2796_s9]   ;;  %s2842_s9 = smov 3  ;;  %v2779_v46 = vsel %vm6_vm0, %v3501_v42, %v3500_v16  ;;  %3280 = vst.msk [vmem:[%s6168_s1 + $0x10] sm:$0xff] %vm1649_vm12, %v1739_v56  }
 0x145   :  { %2699 = vrot.lane.b32.xlu0 %v2698_v23, %s3558_s7  ;;  %2767 = vrot.lane.b32.xlu1 %v2766_v29, %s3559_s18  ;;  %v2802_v36 = vsel %vm6_vm0, %v3506_v38, %v3505_v35  ;;  %v3502_v43 = vld [vmem:[%s6167_s0 + $0x81] ss:$16 sm:%s2781_s25]   ;;  %s2827_s25 = smov 48 }
 0x146   :  { %v2807_v41 = vsel %vm10_vm1, %v3507_v37, %v2802_v36  ;;  %v3503_v47 = vld [vmem:[%s6167_s0 + $0x81] ss:$16 sm:%s2786_s6]   ;;  %v2784_v48 = vsel %vm10_vm1, %v3502_v43, %v2779_v46  ;;  %s2832_s6 = smov 192  ;;  %v1808_v63 = vpop.permute.xlu1 %1807  }
 0x147   :  { %v2812_v12 = vsel %vm14_vm2, %v3508_v39, %v2807_v41  ;;  %v3515_v50 = vld [vmem:[%s6167_s0 + $0x301] ss:$16 sm:%s2842_s9]   ;;  %v2789_v52 = vsel %vm14_vm2, %v3503_v47, %v2784_v48  ;;  %s2888_s9 = smov 3  ;;  %3295 = vst.msk [vmem:[%s6168_s1 + $0x38] sm:$0xff] %vm1649_vm12, %v1808_v63  }
 0x148   :  { %v3516_v51 = vld [vmem:[%s6167_s0 + $0x301] ss:$16 sm:%s2845_s11]   ;;  %s2891_s11 = smov 12 }
 0x149   :  { %2745 = vrot.lane.b32.xlu0 %v2744_v6, %s3559_s18  ;;  %2813 = vrot.lane.b32.xlu1 %v2812_v12, %s3559_s18  ;;  %v2848_v14 = vsel %vm6_vm0, %v3516_v51, %v3515_v50  ;;  %v3517_v53 = vld [vmem:[%s6167_s0 + $0x301] ss:$16 sm:%s2850_s16]   ;;  %s2896_s16 = smov 48 }
 0x14a   :  { %v3518_v55 = vld [vmem:[%s6167_s0 + $0x301] ss:$16 sm:%s2855_s17]   ;;  %v2853_v44 = vsel %vm10_vm1, %v3517_v53, %v2848_v14  ;;  %s2901_s17 = smov 192  ;;  %v1785_v8 = vpop.permute.xlu0 %1784   ;;  %v1853_v15 = vpop.permute.xlu1 %1852  }
 0x14b   :  { %v3510_v57 = vld [vmem:[%s6167_s0 + $0x101] ss:$16 sm:%s2819_s20]   ;;  %v2858_v58 = vsel %vm14_vm2, %v3518_v55, %v2853_v44  ;;  %s2865_s20 = smov 3  ;;  %3290 = vst.msk [vmem:[%s6168_s1 + $0x18] sm:$0xff] %vm1649_vm12, %v1785_v8  }
 0x14c   :  { %v3511_v59 = vld [vmem:[%s6167_s0 + $0x101] ss:$16 sm:%s2822_s22]   ;;  %s2868_s22 = smov 12  ;;  %3304 = vst.msk [vmem:[%s6168_s1 + $0x20] sm:$0xff] %vm1832_vm13, %v1853_v15  }
 0x14d   :  { %2790 = vrot.lane.b32.xlu0 %v2789_v52, %s3559_s18  ;;  %v3512_v62 = vld [vmem:[%s6167_s0 + $0x101] ss:$16 sm:%s2827_s25]   ;;  %2859 = vrot.lane.b32.xlu1 %v2858_v58, %s3559_s18  ;;  %v2825_v0 = vsel %vm6_vm0, %v3511_v59, %v3510_v57  ;;  %s2873_s25 = smov 48 }
 0x14e   :  { %v3513_v22 = vld [vmem:[%s6167_s0 + $0x101] ss:$16 sm:%s2832_s6]   ;;  %v2830_v49 = vsel %vm10_vm1, %v3512_v62, %v2825_v0  ;;  %s2878_s6 = smov 192  ;;  %v1831_v21 = vpop.permute.xlu0 %1830  }
 0x14f   :  { %v3525_v1 = vld [vmem:[%s6167_s0 + $0x381] ss:$16 sm:%s2888_s9]   ;;  %v2835_v54 = vsel %vm14_vm2, %v3513_v22, %v2830_v49  ;;  %1833 = vst.msk [vmem:[%s6168_s1] sm:$0xff] %vm1832_vm13, %v1831_v21  }
 0x150   :  { %v3526_v2 = vld [vmem:[%s6167_s0 + $0x381] ss:$16 sm:%s2891_s11]   ;;  %v1899_v23 = vpop.permute.xlu1 %1898  }
 0x151   :  { %v2894_v3 = vsel %vm6_vm0, %v3526_v2, %v3525_v1  ;;  %v3527_v5 = vld [vmem:[%s6167_s0 + $0x381] ss:$16 sm:%s2896_s16]   ;;  %2836 = vrot.lane.b32.xlu0 %v2835_v54, %s3559_s18  ;;  %3314 = vst.msk [vmem:[%s6168_s1 + $0x28] sm:$0xff] %vm1832_vm13, %v1899_v23  }
 0x152   :  { %v3528_v7 = vld [vmem:[%s6167_s0 + $0x381] ss:$16 sm:%s2901_s17]   ;;  %v2899_v9 = vsel %vm10_vm1, %v3527_v5, %v2894_v3 }
 0x153   :  { %v3520_v10 = vld [vmem:[%s6167_s0 + $0x181] ss:$16 sm:%s2865_s20]   ;;  %v2904_v61 = vsel %vm14_vm2, %v3528_v7, %v2899_v9  ;;  %v1876_v24 = vpop.permute.xlu0 %1875  }
 0x154   :  { %v3521_v11 = vld [vmem:[%s6167_s0 + $0x181] ss:$16 sm:%s2868_s22]   ;;  %2905 = vrot.lane.b32.xlu1 %v2904_v61, %s3559_s18  ;;  %3309 = vst.msk [vmem:[%s6168_s1 + $0x8] sm:$0xff] %vm1832_vm13, %v1876_v24  }
 0x155   :  { %v3522_v13 = vld [vmem:[%s6167_s0 + $0x181] ss:$16 sm:%s2873_s25]   ;;  %v2871_v17 = vsel %vm6_vm0, %v3521_v11, %v3520_v10  ;;  %vm2381_vm0 = vcmask 130144  }
 0x156   :  { %v3523_v18 = vld [vmem:[%s6167_s0 + $0x181] ss:$16 sm:%s2878_s6]   ;;  %v2876_v19 = vsel %vm10_vm1, %v3522_v13, %v2871_v17  ;;  %v1945_v28 = vpop.permute.xlu1 %1944   ;;  %vm2564_vm1 = vcmask 97344  }
 0x157   :  { %v2881_v20 = vsel %vm14_vm2, %v3523_v18, %v2876_v19  ;;  %3324 = vst.msk [vmem:[%s6168_s1 + $0x30] sm:$0xff] %vm1832_vm13, %v1945_v28   ;;  %vm2747_vm2 = vcmask 64544  }
 0x158   :  { %2882 = vrot.lane.b32.xlu0 %v2881_v20, %s3559_s18 }
 0x159   :  { %v1922_v25 = vpop.permute.xlu0 %1921  }
 0x15a   :  { %3319 = vst.msk [vmem:[%s6168_s1 + $0x10] sm:$0xff] %vm1832_vm13, %v1922_v25  }
 0x15d   :  { %v1991_v26 = vpop.permute.xlu1 %1990  }
 0x15e   :  { %3334 = vst.msk [vmem:[%s6168_s1 + $0x38] sm:$0xff] %vm1832_vm13, %v1991_v26  }
 0x161   :  { %v1968_v60 = vpop.permute.xlu0 %1967   ;;  %v2036_v27 = vpop.permute.xlu1 %2035  }
 0x162   :  { %3329 = vst.msk [vmem:[%s6168_s1 + $0x18] sm:$0xff] %vm1832_vm13, %v1968_v60  }
 0x163   :  { %3343 = vst.msk [vmem:[%s6168_s1 + $0x20] sm:$0xff] %vm2015_vm14, %v2036_v27  }
 0x165   :  { %v2014_v29 = vpop.permute.xlu0 %2013  }
 0x166   :  { %2016 = vst.msk [vmem:[%s6168_s1] sm:$0xff] %vm2015_vm14, %v2014_v29  }
 0x167   :  { %v2082_v30 = vpop.permute.xlu1 %2081  }
 0x168   :  { %3353 = vst.msk [vmem:[%s6168_s1 + $0x28] sm:$0xff] %vm2015_vm14, %v2082_v30  }
 0x16a   :  { %v2059_v32 = vpop.permute.xlu0 %2058  }
 0x16b   :  { %3348 = vst.msk [vmem:[%s6168_s1 + $0x8] sm:$0xff] %vm2015_vm14, %v2059_v32  }
 0x16d   :  { %v2128_v31 = vpop.permute.xlu1 %2127  }
 0x16e   :  { %3363 = vst.msk [vmem:[%s6168_s1 + $0x30] sm:$0xff] %vm2015_vm14, %v2128_v31  }
 0x170   :  { %v2105_v33 = vpop.permute.xlu0 %2104  }
 0x171   :  { %3358 = vst.msk [vmem:[%s6168_s1 + $0x10] sm:$0xff] %vm2015_vm14, %v2105_v33  }
 0x174   :  { %v2174_v4 = vpop.permute.xlu1 %2173  }
 0x175   :  { %3373 = vst.msk [vmem:[%s6168_s1 + $0x38] sm:$0xff] %vm2015_vm14, %v2174_v4  }
 0x178   :  { %v2151_v34 = vpop.permute.xlu0 %2150   ;;  %v2219_v35 = vpop.permute.xlu1 %2218  }
 0x179   :  { %3368 = vst.msk [vmem:[%s6168_s1 + $0x18] sm:$0xff] %vm2015_vm14, %v2151_v34  }
 0x17a   :  { %3382 = vst.msk [vmem:[%s6168_s1 + $0x20] sm:$0xff] %vm2198_vm15, %v2219_v35  }
 0x17c   :  { %v2197_v38 = vpop.permute.xlu0 %2196  }
 0x17d   :  { %2199 = vst.msk [vmem:[%s6168_s1] sm:$0xff] %vm2198_vm15, %v2197_v38  }
 0x17e   :  { %v2265_v6 = vpop.permute.xlu1 %2264  }
 0x17f   :  { %3392 = vst.msk [vmem:[%s6168_s1 + $0x28] sm:$0xff] %vm2198_vm15, %v2265_v6  }
 0x181   :  { %v2242_v36 = vpop.permute.xlu0 %2241  }
 0x182   :  { %3387 = vst.msk [vmem:[%s6168_s1 + $0x8] sm:$0xff] %vm2198_vm15, %v2242_v36  }
 0x184   :  { %v2311_v37 = vpop.permute.xlu1 %2310  }
 0x185   :  { %3402 = vst.msk [vmem:[%s6168_s1 + $0x30] sm:$0xff] %vm2198_vm15, %v2311_v37  }
 0x187   :  { %v2288_v39 = vpop.permute.xlu0 %2287  }
 0x188   :  { %3397 = vst.msk [vmem:[%s6168_s1 + $0x10] sm:$0xff] %vm2198_vm15, %v2288_v39  }
 0x18b   :  { %v2357_v40 = vpop.permute.xlu1 %2356  }
 0x18c   :  { %3412 = vst.msk [vmem:[%s6168_s1 + $0x38] sm:$0xff] %vm2198_vm15, %v2357_v40  }
 0x18f   :  { %v2334_v41 = vpop.permute.xlu0 %2333   ;;  %v2402_v16 = vpop.permute.xlu1 %2401  }
 0x190   :  { %3407 = vst.msk [vmem:[%s6168_s1 + $0x18] sm:$0xff] %vm2198_vm15, %v2334_v41  }
 0x191   :  { %3421 = vst.msk [vmem:[%s6168_s1 + $0x20] sm:$0xff] %vm2381_vm0, %v2402_v16  }
 0x193   :  { %v2380_v12 = vpop.permute.xlu0 %2379  }
 0x194   :  { %2382 = vst.msk [vmem:[%s6168_s1] sm:$0xff] %vm2381_vm0, %v2380_v12  }
 0x195   :  { %v2448_v42 = vpop.permute.xlu1 %2447  }
 0x196   :  { %3431 = vst.msk [vmem:[%s6168_s1 + $0x28] sm:$0xff] %vm2381_vm0, %v2448_v42  }
 0x198   :  { %v2425_v43 = vpop.permute.xlu0 %2424  }
 0x199   :  { %3426 = vst.msk [vmem:[%s6168_s1 + $0x8] sm:$0xff] %vm2381_vm0, %v2425_v43  }
 0x19b   :  { %v2494_v45 = vpop.permute.xlu1 %2493  }
 0x19c   :  { %3441 = vst.msk [vmem:[%s6168_s1 + $0x30] sm:$0xff] %vm2381_vm0, %v2494_v45   ;;  %v2471_v46 = vpop.permute.xlu0 %2470  }
 0x19d   :  { %3436 = vst.msk [vmem:[%s6168_s1 + $0x10] sm:$0xff] %vm2381_vm0, %v2471_v46  }
 0x19f   :  { %v2540_v47 = vpop.permute.xlu1 %2539  }
 0x1a0   :  { %3451 = vst.msk [vmem:[%s6168_s1 + $0x38] sm:$0xff] %vm2381_vm0, %v2540_v47  }
 0x1a2   :  { %v2517_v48 = vpop.permute.xlu0 %2516  }
 0x1a3   :  { %3446 = vst.msk [vmem:[%s6168_s1 + $0x18] sm:$0xff] %vm2381_vm0, %v2517_v48   ;;  %v2585_v50 = vpop.permute.xlu1 %2584  }
 0x1a4   :  { %3460 = vst.msk [vmem:[%s6168_s1 + $0x20] sm:$0xff] %vm2564_vm1, %v2585_v50  }
 0x1a6   :  { %v2563_v51 = vpop.permute.xlu0 %2562  }
 0x1a7   :  { %2565 = vst.msk [vmem:[%s6168_s1] sm:$0xff] %vm2564_vm1, %v2563_v51   ;;  %v2631_v52 = vpop.permute.xlu1 %2630  }
 0x1a8   :  { %3470 = vst.msk [vmem:[%s6168_s1 + $0x28] sm:$0xff] %vm2564_vm1, %v2631_v52  }
 0x1aa   :  { %v2608_v14 = vpop.permute.xlu0 %2607  }
 0x1ab   :  { %3465 = vst.msk [vmem:[%s6168_s1 + $0x8] sm:$0xff] %vm2564_vm1, %v2608_v14   ;;  %v2677_v53 = vpop.permute.xlu1 %2676  }
 0x1ac   :  { %3480 = vst.msk [vmem:[%s6168_s1 + $0x30] sm:$0xff] %vm2564_vm1, %v2677_v53  }
 0x1af   :  { %v2654_v55 = vpop.permute.xlu0 %2653  }
 0x1b0   :  { %3475 = vst.msk [vmem:[%s6168_s1 + $0x10] sm:$0xff] %vm2564_vm1, %v2654_v55  }
 0x1b3   :  { %v2723_v56 = vpop.permute.xlu1 %2722  }
 0x1b4   :  { %3490 = vst.msk [vmem:[%s6168_s1 + $0x38] sm:$0xff] %vm2564_vm1, %v2723_v56  }
 0x1b7   :  { %v2700_v44 = vpop.permute.xlu0 %2699   ;;  %v2768_v57 = vpop.permute.xlu1 %2767  }
 0x1b8   :  { %3485 = vst.msk [vmem:[%s6168_s1 + $0x18] sm:$0xff] %vm2564_vm1, %v2700_v44  }
 0x1b9   :  { %3499 = vst.msk [vmem:[%s6168_s1 + $0x20] sm:$0xff] %vm2747_vm2, %v2768_v57  }
 0x1bb   :  { %v2746_v58 = vpop.permute.xlu0 %2745   ;;  %v2814_v59 = vpop.permute.xlu1 %2813  }
 0x1bc   :  { %2748 = vst.msk [vmem:[%s6168_s1] sm:$0xff] %vm2747_vm2, %v2746_v58   ;;  %3509 = vst.msk [vmem:[%s6168_s1 + $0x28] sm:$0xff] %vm2747_vm2, %v2814_v59  }
 0x1bf   :  { %v2791_v62 = vpop.permute.xlu0 %2790   ;;  %v2860_v63 = vpop.permute.xlu1 %2859  }
 0x1c0   :  { %3504 = vst.msk [vmem:[%s6168_s1 + $0x8] sm:$0xff] %vm2747_vm2, %v2791_v62   ;;  %3519 = vst.msk [vmem:[%s6168_s1 + $0x30] sm:$0xff] %vm2747_vm2, %v2860_v63  }
 0x1c3   :  { %v2837_v0 = vpop.permute.xlu0 %2836  }
 0x1c4   :  { %3514 = vst.msk [vmem:[%s6168_s1 + $0x10] sm:$0xff] %vm2747_vm2, %v2837_v0  }
 0x1c6   :  { %v2906_v22 = vpop.permute.xlu1 %2905  }
 0x1c7   :  { %3529 = vst.msk [vmem:[%s6168_s1 + $0x38] sm:$0xff] %vm2747_vm2, %v2906_v22  }
 0x1ca   :  { %v2883_v49 = vpop.permute.xlu0 %2882  }
 0x1cb   :  { %3524 = vst.msk [vmem:[%s6168_s1 + $0x18] sm:$0xff] %vm2747_vm2, %v2883_v49  }

// kernel: mul.18
= control target key start
LH: loop header
LB: loop body
LE: loop exit
PB: predicated region body
PF: predicated region fallthrough
CT: control target
= control target key end

     0   :  { %vm6_vm0 = vcmask 1043458   ;;  %s211_s6 = smov 3  ;;  %vm10_vm1 = vcmask 1045508   ;;  %vm14_vm2 = vcmask 1047558   ;;  %s214_s9 = smov 12  ;;  %vm16_vm3 = vcmask 64512   ;;  %s5015_s0 = inlined_call_operand.vmem [shape: f32[13,8,16,4], index: 0, kind: input, shape index: {}]   ;;  %s5016_s1 = inlined_call_operand.vmem [shape: f32[104,64], index: 1, kind: output, shape index: {}]  }
   0x1   :  { %v2405_v0 = vld [vmem:[%s5015_s0 + $0x8c] ss:$16 sm:%s211_s6]   ;;  %s219_s10 = smov 48  ;;  %s224_s15 = smov 192  ;;  %vm185_vm4 = vcmask 851712   ;;  %vm368_vm5 = vcmask 786112  }
   0x2   :  { %v2406_v1 = vld [vmem:[%s5015_s0 + $0x8c] ss:$16 sm:%s214_s9]   ;;  %s166_s16 = smov 3  ;;  %s169_s21 = smov 12  ;;  %vm551_vm6 = vcmask 720512   ;;  %vm734_vm7 = vcmask 654912  }
   0x3   :  { %v2407_v2 = vld [vmem:[%s5015_s0 + $0x8c] ss:$16 sm:%s219_s10]   ;;  %v217_v3 = vsel %vm6_vm0, %v2406_v1, %v2405_v0  ;;  %s174_s22 = smov 48  ;;  %s179_s27 = smov 192  ;;  %vm917_vm8 = vcmask 589312   ;;  %vm1100_vm9 = vcmask 523712  }
   0x4   :  { %v2408_v4 = vld [vmem:[%s5015_s0 + $0x8c] ss:$16 sm:%s224_s15]   ;;  %v222_v6 = vsel %vm10_vm1, %v2407_v2, %v217_v3  ;;  %s234_s28 = smov 3  ;;  %s237_s4 = smov 12  ;;  %vm1283_vm10 = vcmask 458112   ;;  %vm1466_vm11 = vcmask 392512  }
   0x5   :  { %v2396_v5 = vld [vmem:[%s5015_s0 + $0xc] ss:$16 sm:%s166_s16]   ;;  %v227_v9 = vsel %vm14_vm2, %v2408_v4, %v222_v6  ;;  %s242_s5 = smov 48  ;;  %s2876_s6 = smov 96   ;;  %vm1649_vm12 = vcmask 326912   ;;  %vm1832_vm13 = vcmask 261312  }
   0x6   :  { %v2397_v7 = vld [vmem:[%s5015_s0 + $0xc] ss:$16 sm:%s169_s21]   ;;  %228 = vrot.lane.b32.xlu1 %v227_v9, %s2876_s6  ;;  %s247_s9 = smov 192  ;;  %s188_s10 = smov 3  ;;  %vm2015_vm14 = vcmask 195712   ;;  %vm2198_vm15 = vcmask 130112  }
   0x7   :  { %v2398_v8 = vld [vmem:[%s5015_s0 + $0xc] ss:$16 sm:%s174_s22]   ;;  %v172_v10 = vsel %vm6_vm0, %v2397_v7, %v2396_v5  ;;  %s191_s15 = smov 12  ;;  %s196_s16 = smov 48 }
   0x8   :  { %v2399_v11 = vld [vmem:[%s5015_s0 + $0xc] ss:$16 sm:%s179_s27]   ;;  %v177_v13 = vsel %vm10_vm1, %v2398_v8, %v172_v10  ;;  %s201_s19 = smov 192  ;;  %s280_s20 = smov 3 }
   0x9   :  { %v2410_v12 = vld [vmem:[%s5015_s0 + $0x28c] ss:$16 sm:%s234_s28]   ;;  %v182_v15 = vsel %vm14_vm2, %v2399_v11, %v177_v13  ;;  %s283_s25 = smov 12  ;;  %s288_s26 = smov 48 }
   0xa   :  { %v2411_v14 = vld [vmem:[%s5015_s0 + $0x28c] ss:$16 sm:%s237_s4]   ;;  %183 = vrot.lane.b32.xlu0 %v182_v15, %s2876_s6  ;;  %s293_s29 = smov 192  ;;  %s257_s30 = smov 3 }
   0xb   :  { %v240_v16 = vsel %vm6_vm0, %v2411_v14, %v2410_v12  ;;  %v2412_v17 = vld [vmem:[%s5015_s0 + $0x28c] ss:$16 sm:%s242_s5]   ;;  %s260_s7 = smov 12  ;;  %s265_s8 = smov 48 }
   0xc   :  { %v2413_v18 = vld [vmem:[%s5015_s0 + $0x28c] ss:$16 sm:%s247_s9]   ;;  %v245_v19 = vsel %vm10_vm1, %v2412_v17, %v240_v16  ;;  %s270_s13 = smov 192  ;;  %s329_s17 = smov 12 }
   0xd   :  { %v2400_v20 = vld [vmem:[%s5015_s0 + $0x20c] ss:$16 sm:%s188_s10]   ;;  %v250_v21 = vsel %vm14_vm2, %v2413_v18, %v245_v19  ;;  %s334_s22 = smov 48  ;;  %s339_s23 = smov 192 }
   0xe   :  { %v2401_v22 = vld [vmem:[%s5015_s0 + $0x20c] ss:$16 sm:%s191_s15]   ;;  %251 = vrot.lane.b32.xlu1 %v250_v21, %s2876_s6  ;;  %s306_s2 = smov 12  ;;  %s311_s3 = smov 48 }
   0xf   :  { %v2402_v23 = vld [vmem:[%s5015_s0 + $0x20c] ss:$16 sm:%s196_s16]   ;;  %v194_v24 = vsel %vm6_vm0, %v2401_v22, %v2400_v20  ;;  %s326_s16 = smov 3  ;;  %s316_s9 = smov 192 }
  0x10   :  { %v2403_v25 = vld [vmem:[%s5015_s0 + $0x20c] ss:$16 sm:%s201_s19]   ;;  %v199_v26 = vsel %vm10_vm1, %v2402_v23, %v194_v24  ;;  %s371_s12 = smov 3  ;;  %s379_s18 = smov 48 }
  0x11   :  { %v2420_v27 = vld [vmem:[%s5015_s0 + $0x30c] ss:$16 sm:%s280_s20]   ;;  %v204_v29 = vsel %vm14_vm2, %v2403_v25, %v199_v26  ;;  %s384_s19 = smov 192  ;;  %v2439_v55 = vld [vmem:[%s5015_s0 + $0x20b] ss:$16 sm:%s371_s12]   ;;  %s352_s27 = smov 12 }
  0x12   :  { %v2421_v28 = vld [vmem:[%s5015_s0 + $0x30c] ss:$16 sm:%s283_s25]   ;;  %205 = vrot.lane.b32.xlu0 %v204_v29, %s2876_s6  ;;  %s357_s28 = smov 48  ;;  %s362_s4 = smov 192 }
  0x13   :  { %v286_v30 = vsel %vm6_vm0, %v2421_v28, %v2420_v27  ;;  %v2422_v31 = vld [vmem:[%s5015_s0 + $0x30c] ss:$16 sm:%s288_s26]   ;;  %s303_s26 = smov 3  ;;  %v2441_v59 = vld [vmem:[%s5015_s0 + $0x20b] ss:$16 sm:%s379_s18]   ;;  %s430_s14 = smov 192 }
  0x14   :  { %v2423_v32 = vld [vmem:[%s5015_s0 + $0x30c] ss:$16 sm:%s293_s29]   ;;  %v291_v33 = vsel %vm10_vm1, %v2422_v31, %v286_v30  ;;  %v2442_v60 = vld [vmem:[%s5015_s0 + $0x20b] ss:$16 sm:%s384_s19]   ;;  %s2877_s15 = smov 88   ;;  %s394_s18 = smov 3 }
  0x15   :  { %v2415_v34 = vld [vmem:[%s5015_s0 + $0x10c] ss:$16 sm:%s257_s30]   ;;  %v296_v35 = vsel %vm14_vm2, %v2423_v32, %v291_v33  ;;  %v2436_v0 = vld [vmem:[%s5015_s0 + $0xb] ss:$16 sm:%s352_s27]   ;;  %s402_s24 = smov 48  ;;  %s407_s29 = smov 192 }
  0x16   :  { %v2416_v36 = vld [vmem:[%s5015_s0 + $0x10c] ss:$16 sm:%s260_s7]   ;;  %297 = vrot.lane.b32.xlu1 %v296_v35, %s2876_s6  ;;  %s417_s7 = smov 3  ;;  %s476_s10 = smov 192 }
  0x17   :  { %v2417_v37 = vld [vmem:[%s5015_s0 + $0x10c] ss:$16 sm:%s265_s8]   ;;  %v263_v38 = vsel %vm6_vm0, %v2416_v36, %v2415_v34  ;;  %s420_s8 = smov 12  ;;  %v2437_v1 = vld [vmem:[%s5015_s0 + $0xb] ss:$16 sm:%s357_s28]   ;;  %s443_s19 = smov 12 }
  0x18   :  { %v2418_v39 = vld [vmem:[%s5015_s0 + $0x10c] ss:$16 sm:%s270_s13]   ;;  %v268_v40 = vsel %vm10_vm1, %v2417_v37, %v263_v38  ;;  %s374_s13 = smov 12  ;;  %v2438_v3 = vld [vmem:[%s5015_s0 + $0xb] ss:$16 sm:%s362_s4]   ;;  %s466_s4 = smov 12 }
  0x19   :  { %v2430_v41 = vld [vmem:[%s5015_s0 + $0x38c] ss:$16 sm:%s326_s16]   ;;  %v273_v43 = vsel %vm14_vm2, %v2418_v39, %v268_v40  ;;  %v2440_v56 = vld [vmem:[%s5015_s0 + $0x20b] ss:$16 sm:%s374_s13]   ;;  %s425_s13 = smov 48  ;;  %s448_s20 = smov 48 }
  0x1a   :  { %v2431_v42 = vld [vmem:[%s5015_s0 + $0x38c] ss:$16 sm:%s329_s17]   ;;  %274 = vrot.lane.b32.xlu0 %v273_v43, %s2876_s6  ;;  %v377_v58 = vsel %vm6_vm0, %v2440_v56, %v2439_v55  ;;  %s453_s25 = smov 192  ;;  %s509_s28 = smov 3 }
  0x1b   :  { %v332_v44 = vsel %vm6_vm0, %v2431_v42, %v2430_v41  ;;  %v2432_v45 = vld [vmem:[%s5015_s0 + $0x38c] ss:$16 sm:%s334_s22]   ;;  %s349_s22 = smov 3  ;;  %v382_v61 = vsel %vm10_vm1, %v2441_v59, %v377_v58  ;;  %v2449_v5 = vld [vmem:[%s5015_s0 + $0x28b] ss:$16 sm:%s417_s7]   ;;  %s522_s5 = smov 192 }
  0x1c   :  { %v2433_v46 = vld [vmem:[%s5015_s0 + $0x38c] ss:$16 sm:%s339_s23]   ;;  %v337_v47 = vsel %vm10_vm1, %v2432_v45, %v332_v44  ;;  %v2435_v62 = vld [vmem:[%s5015_s0 + $0xb] ss:$16 sm:%s349_s22]   ;;  %v387_v63 = vsel %vm14_vm2, %v2442_v60, %v382_v61  ;;  %s397_s23 = smov 12  ;;  %s494_s16 = smov 48 }
  0x1d   :  { %v2425_v48 = vld [vmem:[%s5015_s0 + $0x18c] ss:$16 sm:%s303_s26]   ;;  %v342_v49 = vsel %vm14_vm2, %v2433_v46, %v337_v47  ;;  %v355_v2 = vsel %vm6_vm0, %v2436_v0, %v2435_v62  ;;  %v2450_v6 = vld [vmem:[%s5015_s0 + $0x28b] ss:$16 sm:%s420_s8]   ;;  %s499_s21 = smov 192  ;;  %s562_s30 = smov 48 }
  0x1e   :  { %v2426_v50 = vld [vmem:[%s5015_s0 + $0x18c] ss:$16 sm:%s306_s2]   ;;  %343 = vrot.lane.b32.xlu1 %v342_v49, %s2876_s6  ;;  %v360_v4 = vsel %vm10_vm1, %v2437_v1, %v355_v2  ;;  %v423_v8 = vsel %vm6_vm0, %v2450_v6, %v2449_v5  ;;  %s567_s2 = smov 192  ;;  %s540_s11 = smov 48 }
  0x1f   :  { %v2427_v51 = vld [vmem:[%s5015_s0 + $0x18c] ss:$16 sm:%s311_s3]   ;;  %v309_v52 = vsel %vm6_vm0, %v2426_v50, %v2425_v48  ;;  %v365_v7 = vsel %vm14_vm2, %v2438_v3, %v360_v4  ;;  %v2451_v9 = vld [vmem:[%s5015_s0 + $0x28b] ss:$16 sm:%s425_s13]   ;;  %s463_s3 = smov 3  ;;  %s440_s13 = smov 3 }
  0x20   :  { %v2428_v53 = vld [vmem:[%s5015_s0 + $0x18c] ss:$16 sm:%s316_s9]   ;;  %v314_v54 = vsel %vm10_vm1, %v2427_v51, %v309_v52  ;;  %v2452_v10 = vld [vmem:[%s5015_s0 + $0x28b] ss:$16 sm:%s430_s14]   ;;  %v428_v11 = vsel %vm10_vm1, %v2451_v9, %v423_v8  ;;  %s471_s9 = smov 48  ;;  %s489_s14 = smov 12 }
  0x21   :  { %v319_v57 = vsel %vm14_vm2, %v2428_v53, %v314_v54  ;;  %v2444_v12 = vld [vmem:[%s5015_s0 + $0x8b] ss:$16 sm:%s394_s18]   ;;  %v433_v13 = vsel %vm14_vm2, %v2452_v10, %v428_v11  ;;  %v2480_v51 = vld [vmem:[%s5015_s0 + $0x20a] ss:$16 sm:%s562_s30]   ;;  %s545_s17 = smov 192  ;;  %s613_s26 = smov 192 }
  0x22   :  { %320 = vrot.lane.b32.xlu0 %v319_v57, %s2876_s6  ;;  %388 = vrot.lane.b32.xlu1 %v387_v63, %s2877_s15  ;;  %v2445_v14 = vld [vmem:[%s5015_s0 + $0x8b] ss:$16 sm:%s397_s23]   ;;  %s517_s6 = smov 48  ;;  %s2878_s27 = smov 80  }
  0x23   :  { %v2446_v15 = vld [vmem:[%s5015_s0 + $0x8b] ss:$16 sm:%s402_s24]   ;;  %v400_v16 = vsel %vm6_vm0, %v2445_v14, %v2444_v12  ;;  %s554_s24 = smov 3  ;;  %v2481_v52 = vld [vmem:[%s5015_s0 + $0x20a] ss:$16 sm:%s567_s2]   ;;  %s577_s30 = smov 3 }
  0x24   :  { %v2447_v17 = vld [vmem:[%s5015_s0 + $0x8b] ss:$16 sm:%s407_s29]   ;;  %v405_v18 = vsel %vm10_vm1, %v2446_v15, %v400_v16  ;;  %s512_s29 = smov 12  ;;  %v2478_v47 = vld [vmem:[%s5015_s0 + $0x20a] ss:$16 sm:%s554_s24]   ;;  %s585_s7 = smov 48 }
  0x25   :  { %v2459_v19 = vld [vmem:[%s5015_s0 + $0x30b] ss:$16 sm:%s463_s3]   ;;  %v410_v21 = vsel %vm14_vm2, %v2447_v17, %v405_v18  ;;  %v2476_v57 = vld [vmem:[%s5015_s0 + $0xa] ss:$16 sm:%s540_s11]   ;;  %s590_s12 = smov 192  ;;  %s659_s22 = smov 192 }
  0x26   :  { %366 = vrot.lane.b32.xlu0 %v365_v7, %s2877_s15  ;;  %434 = vrot.lane.b32.xlu1 %v433_v13, %s2877_s15  ;;  %v2460_v20 = vld [vmem:[%s5015_s0 + $0x30b] ss:$16 sm:%s466_s4]   ;;  %s626_s2 = smov 12  ;;  %s631_s3 = smov 48 }
  0x27   :  { %v469_v22 = vsel %vm6_vm0, %v2460_v20, %v2459_v19  ;;  %v2461_v23 = vld [vmem:[%s5015_s0 + $0x30b] ss:$16 sm:%s471_s9]   ;;  %s486_s9 = smov 3  ;;  %v2477_v59 = vld [vmem:[%s5015_s0 + $0xa] ss:$16 sm:%s545_s17]   ;;  %s649_s17 = smov 12 }
  0x28   :  { %v2462_v24 = vld [vmem:[%s5015_s0 + $0x30b] ss:$16 sm:%s476_s10]   ;;  %v474_v25 = vsel %vm10_vm1, %v2461_v23, %v469_v22  ;;  %s535_s10 = smov 12  ;;  %v2491_v2 = vld [vmem:[%s5015_s0 + $0x28a] ss:$16 sm:%s613_s26]   ;;  %s636_s8 = smov 192 }
  0x29   :  { %v2454_v26 = vld [vmem:[%s5015_s0 + $0x10b] ss:$16 sm:%s440_s13]   ;;  %v479_v27 = vsel %vm14_vm2, %v2462_v24, %v474_v25  ;;  %v2475_v56 = vld [vmem:[%s5015_s0 + $0xa] ss:$16 sm:%s535_s10]   ;;  %s692_s11 = smov 3  ;;  %s705_s18 = smov 192 }
  0x2a   :  { %411 = vrot.lane.b32.xlu0 %v410_v21, %s2877_s15  ;;  %v2455_v28 = vld [vmem:[%s5015_s0 + $0x10b] ss:$16 sm:%s443_s19]   ;;  %480 = vrot.lane.b32.xlu1 %v479_v27, %s2877_s15  ;;  %s600_s19 = smov 3  ;;  %s672_s26 = smov 12 }
  0x2b   :  { %v2456_v29 = vld [vmem:[%s5015_s0 + $0x10b] ss:$16 sm:%s448_s20]   ;;  %v446_v30 = vsel %vm6_vm0, %v2455_v28, %v2454_v26  ;;  %s603_s20 = smov 12  ;;  %v2488_v61 = vld [vmem:[%s5015_s0 + $0x28a] ss:$16 sm:%s600_s19]   ;;  %s682_s4 = smov 192 }
  0x2c   :  { %v2457_v31 = vld [vmem:[%s5015_s0 + $0x10b] ss:$16 sm:%s453_s25]   ;;  %v451_v32 = vsel %vm10_vm1, %v2456_v29, %v446_v30  ;;  %s557_s25 = smov 12  ;;  %v2489_v62 = vld [vmem:[%s5015_s0 + $0x28a] ss:$16 sm:%s603_s20]   ;;  %s745_s13 = smov 48 }
  0x2d   :  { %v2469_v33 = vld [vmem:[%s5015_s0 + $0x38b] ss:$16 sm:%s509_s28]   ;;  %v456_v35 = vsel %vm14_vm2, %v2457_v31, %v451_v32  ;;  %v2479_v48 = vld [vmem:[%s5015_s0 + $0x20a] ss:$16 sm:%s557_s25]   ;;  %s608_s25 = smov 48  ;;  %v606_v0 = vsel %vm6_vm0, %v2489_v62, %v2488_v61  ;;  %s677_s28 = smov 48 }
  0x2e   :  { %v2470_v34 = vld [vmem:[%s5015_s0 + $0x38b] ss:$16 sm:%s512_s29]   ;;  %457 = vrot.lane.b32.xlu0 %v456_v35, %s2877_s15  ;;  %v560_v50 = vsel %vm6_vm0, %v2479_v48, %v2478_v47  ;;  %s723_s23 = smov 48  ;;  %s728_s29 = smov 192 }
  0x2f   :  { %v515_v36 = vsel %vm6_vm0, %v2470_v34, %v2469_v33  ;;  %v2471_v37 = vld [vmem:[%s5015_s0 + $0x38b] ss:$16 sm:%s517_s6]   ;;  %s532_s6 = smov 3  ;;  %v565_v53 = vsel %vm10_vm1, %v2480_v51, %v560_v50  ;;  %v2490_v1 = vld [vmem:[%s5015_s0 + $0x28a] ss:$16 sm:%s608_s25]   ;;  %s623_s25 = smov 3 }
  0x30   :  { %v2472_v38 = vld [vmem:[%s5015_s0 + $0x38b] ss:$16 sm:%s522_s5]   ;;  %v520_v39 = vsel %vm10_vm1, %v2471_v37, %v515_v36  ;;  %v2474_v54 = vld [vmem:[%s5015_s0 + $0xa] ss:$16 sm:%s532_s6]   ;;  %v570_v55 = vsel %vm14_vm2, %v2481_v52, %v565_v53  ;;  %s580_s5 = smov 12  ;;  %v611_v3 = vsel %vm10_vm1, %v2490_v1, %v606_v0  ;;  %s2879_s10 = smov 72  }
  0x31   :  { %v2464_v40 = vld [vmem:[%s5015_s0 + $0x18b] ss:$16 sm:%s486_s9]   ;;  %v525_v41 = vsel %vm14_vm2, %v2472_v38, %v520_v39  ;;  %v538_v58 = vsel %vm6_vm0, %v2475_v56, %v2474_v54  ;;  %v2483_v4 = vld [vmem:[%s5015_s0 + $0x8a] ss:$16 sm:%s577_s30]   ;;  %v616_v5 = vsel %vm14_vm2, %v2491_v2, %v611_v3  ;;  %s796_s9 = smov 192  ;;  %s768_s19 = smov 48 }
  0x32   :  { %v2465_v42 = vld [vmem:[%s5015_s0 + $0x18b] ss:$16 sm:%s489_s14]   ;;  %526 = vrot.lane.b32.xlu1 %v525_v41, %s2877_s15  ;;  %v543_v60 = vsel %vm10_vm1, %v2476_v57, %v538_v58  ;;  %s750_s14 = smov 192  ;;  %s773_s24 = smov 192 }
  0x33   :  { %v2466_v43 = vld [vmem:[%s5015_s0 + $0x18b] ss:$16 sm:%s494_s16]   ;;  %v492_v44 = vsel %vm6_vm0, %v2465_v42, %v2464_v40  ;;  %v548_v63 = vsel %vm14_vm2, %v2477_v59, %v543_v60  ;;  %s646_s16 = smov 3  ;;  %v2484_v6 = vld [vmem:[%s5015_s0 + $0x8a] ss:$16 sm:%s580_s5]   ;;  %s842_s6 = smov 192 }
  0x34   :  { %v2467_v45 = vld [vmem:[%s5015_s0 + $0x18b] ss:$16 sm:%s499_s21]   ;;  %v497_v46 = vsel %vm10_vm1, %v2466_v43, %v492_v44  ;;  %v2485_v7 = vld [vmem:[%s5015_s0 + $0x8a] ss:$16 sm:%s585_s7]   ;;  %s654_s21 = smov 48  ;;  %v583_v8 = vsel %vm6_vm0, %v2484_v6, %v2483_v4  ;;  %s737_s7 = smov 3 }
  0x35   :  { %v502_v49 = vsel %vm14_vm2, %v2467_v45, %v497_v46  ;;  %v2486_v9 = vld [vmem:[%s5015_s0 + $0x8a] ss:$16 sm:%s590_s12]   ;;  %v588_v10 = vsel %vm10_vm1, %v2485_v7, %v583_v8  ;;  %s695_s12 = smov 12  ;;  %v2517_v39 = vld [vmem:[%s5015_s0 + $0x209] ss:$16 sm:%s737_s7]   ;;  %s819_s20 = smov 192 }
  0x36   :  { %503 = vrot.lane.b32.xlu0 %v502_v49, %s2877_s15  ;;  %571 = vrot.lane.b32.xlu1 %v570_v55, %s2878_s27  ;;  %v2498_v11 = vld [vmem:[%s5015_s0 + $0x30a] ss:$16 sm:%s646_s16]   ;;  %v593_v13 = vsel %vm14_vm2, %v2486_v9, %v588_v10  ;;  %s700_s15 = smov 48  ;;  %s814_s16 = smov 48 }
  0x37   :  { %v2499_v12 = vld [vmem:[%s5015_s0 + $0x30a] ss:$16 sm:%s649_s17]   ;;  %v2519_v43 = vld [vmem:[%s5015_s0 + $0x209] ss:$16 sm:%s745_s13]   ;;  %s760_s13 = smov 3  ;;  %s888_s30 = smov 192 }
  0x38   :  { %v652_v14 = vsel %vm6_vm0, %v2499_v12, %v2498_v11  ;;  %v2500_v15 = vld [vmem:[%s5015_s0 + $0x30a] ss:$16 sm:%s654_s21]   ;;  %s669_s21 = smov 3  ;;  %v2520_v44 = vld [vmem:[%s5015_s0 + $0x209] ss:$16 sm:%s750_s14]   ;;  %s809_s14 = smov 12 }
  0x39   :  { %v2501_v16 = vld [vmem:[%s5015_s0 + $0x30a] ss:$16 sm:%s659_s22]   ;;  %v657_v17 = vsel %vm10_vm1, %v2500_v15, %v652_v14  ;;  %s718_s22 = smov 12  ;;  %v2515_v49 = vld [vmem:[%s5015_s0 + $0x9] ss:$16 sm:%s723_s23]   ;;  %s875_s23 = smov 3 }
  0x3a   :  { %549 = vrot.lane.b32.xlu0 %v548_v63, %s2878_s27  ;;  %617 = vrot.lane.b32.xlu1 %v616_v5, %s2878_s27  ;;  %v2493_v18 = vld [vmem:[%s5015_s0 + $0x10a] ss:$16 sm:%s623_s25]   ;;  %v662_v19 = vsel %vm14_vm2, %v2501_v16, %v657_v17  ;;  %s865_s17 = smov 192  ;;  %s928_s25 = smov 48 }
  0x3b   :  { %v2494_v20 = vld [vmem:[%s5015_s0 + $0x10a] ss:$16 sm:%s626_s2]   ;;  %s783_s2 = smov 3  ;;  %v2514_v48 = vld [vmem:[%s5015_s0 + $0x9] ss:$16 sm:%s718_s22]   ;;  %s906_s5 = smov 48 }
  0x3c   :  { %v2495_v21 = vld [vmem:[%s5015_s0 + $0x10a] ss:$16 sm:%s631_s3]   ;;  %v629_v22 = vsel %vm6_vm0, %v2494_v20, %v2493_v18  ;;  %s786_s3 = smov 12  ;;  %v2516_v51 = vld [vmem:[%s5015_s0 + $0x9] ss:$16 sm:%s728_s29]   ;;  %s832_s29 = smov 12 }
  0x3d   :  { %v2496_v23 = vld [vmem:[%s5015_s0 + $0x10a] ss:$16 sm:%s636_s8]   ;;  %v634_v24 = vsel %vm10_vm1, %v2495_v21, %v629_v22  ;;  %s740_s8 = smov 12  ;;  %v2527_v53 = vld [vmem:[%s5015_s0 + $0x289] ss:$16 sm:%s783_s2]   ;;  %s2880_s22 = smov 64  }
  0x3e   :  { %594 = vrot.lane.b32.xlu0 %v593_v13, %s2878_s27  ;;  %663 = vrot.lane.b32.xlu1 %v662_v19, %s2878_s27  ;;  %v2508_v25 = vld [vmem:[%s5015_s0 + $0x38a] ss:$16 sm:%s692_s11]   ;;  %v639_v27 = vsel %vm14_vm2, %v2496_v23, %v634_v24  ;;  %s860_s11 = smov 48  ;;  %s951_s2 = smov 48 }
  0x3f   :  { %v2509_v26 = vld [vmem:[%s5015_s0 + $0x38a] ss:$16 sm:%s695_s12]   ;;  %v2518_v40 = vld [vmem:[%s5015_s0 + $0x209] ss:$16 sm:%s740_s8]   ;;  %s791_s8 = smov 48  ;;  %s911_s12 = smov 192 }
  0x40   :  { %v698_v28 = vsel %vm6_vm0, %v2509_v26, %v2508_v25  ;;  %v2510_v29 = vld [vmem:[%s5015_s0 + $0x38a] ss:$16 sm:%s700_s15]   ;;  %s715_s15 = smov 3  ;;  %v743_v42 = vsel %vm6_vm0, %v2518_v40, %v2517_v39  ;;  %v2528_v54 = vld [vmem:[%s5015_s0 + $0x289] ss:$16 sm:%s786_s3]   ;;  %s956_s7 = smov 192 }
  0x41   :  { %v2511_v30 = vld [vmem:[%s5015_s0 + $0x38a] ss:$16 sm:%s705_s18]   ;;  %v703_v31 = vsel %vm10_vm1, %v2510_v29, %v698_v28  ;;  %v748_v45 = vsel %vm10_vm1, %v2519_v43, %v743_v42  ;;  %v2513_v46 = vld [vmem:[%s5015_s0 + $0x9] ss:$16 sm:%s715_s15]   ;;  %s763_s18 = smov 12  ;;  %v789_v56 = vsel %vm6_vm0, %v2528_v54, %v2527_v53  ;;  %s1025_s15 = smov 192 }
  0x42   :  { %640 = vrot.lane.b32.xlu0 %v639_v27, %s2878_s27  ;;  %v2503_v32 = vld [vmem:[%s5015_s0 + $0x18a] ss:$16 sm:%s669_s21]   ;;  %v708_v33 = vsel %vm14_vm2, %v2511_v30, %v703_v31  ;;  %v753_v47 = vsel %vm14_vm2, %v2520_v44, %v748_v45  ;;  %v721_v50 = vsel %vm6_vm0, %v2514_v48, %v2513_v46  ;;  %s979_s21 = smov 192  ;;  %s1002_s3 = smov 192 }
  0x43   :  { %v2504_v34 = vld [vmem:[%s5015_s0 + $0x18a] ss:$16 sm:%s672_s26]   ;;  %709 = vrot.lane.b32.xlu1 %v708_v33, %s2878_s27  ;;  %v726_v52 = vsel %vm10_vm1, %v2515_v49, %v721_v50  ;;  %s933_s26 = smov 192 }
  0x44   :  { %v2505_v35 = vld [vmem:[%s5015_s0 + $0x18a] ss:$16 sm:%s677_s28]   ;;  %v675_v36 = vsel %vm6_vm0, %v2504_v34, %v2503_v32  ;;  %v731_v55 = vsel %vm14_vm2, %v2516_v51, %v726_v52  ;;  %v2529_v57 = vld [vmem:[%s5015_s0 + $0x289] ss:$16 sm:%s791_s8]   ;;  %s829_s28 = smov 3  ;;  %s806_s8 = smov 3 }
  0x45   :  { %v2506_v37 = vld [vmem:[%s5015_s0 + $0x18a] ss:$16 sm:%s682_s4]   ;;  %v680_v38 = vsel %vm10_vm1, %v2505_v35, %v675_v36  ;;  %v2530_v58 = vld [vmem:[%s5015_s0 + $0x289] ss:$16 sm:%s796_s9]   ;;  %v794_v59 = vsel %vm10_vm1, %v2529_v57, %v789_v56  ;;  %s837_s4 = smov 48  ;;  %s855_s9 = smov 12 }
  0x46   :  { %v685_v41 = vsel %vm14_vm2, %v2506_v37, %v680_v38  ;;  %v2522_v60 = vld [vmem:[%s5015_s0 + $0x89] ss:$16 sm:%s760_s13]   ;;  %v799_v61 = vsel %vm14_vm2, %v2530_v58, %v794_v59  ;;  %v2558_v35 = vld [vmem:[%s5015_s0 + $0x208] ss:$16 sm:%s928_s25]   ;;  %s943_s25 = smov 3  ;;  %s1071_s13 = smov 192 }
  0x47   :  { %686 = vrot.lane.b32.xlu0 %v685_v41, %s2878_s27  ;;  %754 = vrot.lane.b32.xlu1 %v753_v47, %s2879_s10  ;;  %v2523_v62 = vld [vmem:[%s5015_s0 + $0x89] ss:$16 sm:%s763_s18]   ;;  %s883_s27 = smov 48  ;;  %s1089_s18 = smov 48 }
  0x48   :  { %v2524_v63 = vld [vmem:[%s5015_s0 + $0x89] ss:$16 sm:%s768_s19]   ;;  %v766_v0 = vsel %vm6_vm0, %v2523_v62, %v2522_v60  ;;  %s920_s19 = smov 3  ;;  %v2559_v36 = vld [vmem:[%s5015_s0 + $0x208] ss:$16 sm:%s933_s26]   ;;  %s992_s26 = smov 12 }
  0x49   :  { %v2525_v1 = vld [vmem:[%s5015_s0 + $0x89] ss:$16 sm:%s773_s24]   ;;  %v771_v2 = vsel %vm10_vm1, %v2524_v63, %v766_v0  ;;  %s878_s24 = smov 12  ;;  %v2556_v31 = vld [vmem:[%s5015_s0 + $0x208] ss:$16 sm:%s920_s19]   ;;  %s1139_s19 = smov 192 }
  0x4a   :  { %v2537_v3 = vld [vmem:[%s5015_s0 + $0x309] ss:$16 sm:%s829_s28]   ;;  %v776_v5 = vsel %vm14_vm2, %v2525_v1, %v771_v2  ;;  %v2554_v41 = vld [vmem:[%s5015_s0 + $0x8] ss:$16 sm:%s906_s5]   ;;  %s997_s28 = smov 48  ;;  %s1058_s5 = smov 3 }
  0x4b   :  { %732 = vrot.lane.b32.xlu0 %v731_v55, %s2879_s10  ;;  %800 = vrot.lane.b32.xlu1 %v799_v61, %s2879_s10  ;;  %v2538_v4 = vld [vmem:[%s5015_s0 + $0x309] ss:$16 sm:%s832_s29]   ;;  %s1048_s29 = smov 192 }
  0x4c   :  { %v835_v6 = vsel %vm6_vm0, %v2538_v4, %v2537_v3  ;;  %v2539_v7 = vld [vmem:[%s5015_s0 + $0x309] ss:$16 sm:%s837_s4]   ;;  %s852_s4 = smov 3  ;;  %v2555_v43 = vld [vmem:[%s5015_s0 + $0x8] ss:$16 sm:%s911_s12]   ;;  %s1015_s12 = smov 12 }
  0x4d   :  { %v2540_v8 = vld [vmem:[%s5015_s0 + $0x309] ss:$16 sm:%s842_s6]   ;;  %v840_v9 = vsel %vm10_vm1, %v2539_v7, %v835_v6  ;;  %s901_s6 = smov 12  ;;  %v2569_v50 = vld [vmem:[%s5015_s0 + $0x288] ss:$16 sm:%s979_s21]   ;;  %s1038_s21 = smov 12 }
  0x4e   :  { %v2532_v10 = vld [vmem:[%s5015_s0 + $0x109] ss:$16 sm:%s806_s8]   ;;  %v845_v11 = vsel %vm14_vm2, %v2540_v8, %v840_v9  ;;  %v2553_v40 = vld [vmem:[%s5015_s0 + $0x8] ss:$16 sm:%s901_s6]   ;;  %s1111_s8 = smov 48  ;;  %s2881_s6 = smov 56  }
  0x4f   :  { %777 = vrot.lane.b32.xlu0 %v776_v5, %s2879_s10  ;;  %v2533_v12 = vld [vmem:[%s5015_s0 + $0x109] ss:$16 sm:%s809_s14]   ;;  %846 = vrot.lane.b32.xlu1 %v845_v11, %s2879_s10  ;;  %s966_s14 = smov 3 }
  0x50   :  { %v2534_v13 = vld [vmem:[%s5015_s0 + $0x109] ss:$16 sm:%s814_s16]   ;;  %v812_v14 = vsel %vm6_vm0, %v2533_v12, %v2532_v10  ;;  %s969_s16 = smov 12  ;;  %v2566_v45 = vld [vmem:[%s5015_s0 + $0x288] ss:$16 sm:%s966_s14]   ;;  %s1134_s14 = smov 48 }
  0x51   :  { %v2535_v15 = vld [vmem:[%s5015_s0 + $0x109] ss:$16 sm:%s819_s20]   ;;  %v817_v16 = vsel %vm10_vm1, %v2534_v13, %v812_v14  ;;  %s923_s20 = smov 12  ;;  %v2567_v46 = vld [vmem:[%s5015_s0 + $0x288] ss:$16 sm:%s969_s16]   ;;  %s1185_s16 = smov 192 }
  0x52   :  { %v2547_v17 = vld [vmem:[%s5015_s0 + $0x389] ss:$16 sm:%s875_s23]   ;;  %v822_v19 = vsel %vm14_vm2, %v2535_v15, %v817_v16  ;;  %v2557_v32 = vld [vmem:[%s5015_s0 + $0x208] ss:$16 sm:%s923_s20]   ;;  %s974_s20 = smov 48  ;;  %v972_v48 = vsel %vm6_vm0, %v2567_v46, %v2566_v45  ;;  %s1043_s23 = smov 48 }
  0x53   :  { %v2548_v18 = vld [vmem:[%s5015_s0 + $0x389] ss:$16 sm:%s878_s24]   ;;  %823 = vrot.lane.b32.xlu0 %v822_v19, %s2879_s10  ;;  %v926_v34 = vsel %vm6_vm0, %v2557_v32, %v2556_v31  ;;  %s1094_s24 = smov 192 }
  0x54   :  { %v881_v20 = vsel %vm6_vm0, %v2548_v18, %v2547_v17  ;;  %v2549_v21 = vld [vmem:[%s5015_s0 + $0x389] ss:$16 sm:%s883_s27]   ;;  %s898_s27 = smov 3  ;;  %v931_v37 = vsel %vm10_vm1, %v2558_v35, %v926_v34  ;;  %v2568_v49 = vld [vmem:[%s5015_s0 + $0x288] ss:$16 sm:%s974_s20]   ;;  %s989_s20 = smov 3 }
  0x55   :  { %v2550_v22 = vld [vmem:[%s5015_s0 + $0x389] ss:$16 sm:%s888_s30]   ;;  %v886_v23 = vsel %vm10_vm1, %v2549_v21, %v881_v20  ;;  %v2552_v38 = vld [vmem:[%s5015_s0 + $0x8] ss:$16 sm:%s898_s27]   ;;  %v936_v39 = vsel %vm14_vm2, %v2559_v36, %v931_v37  ;;  %s946_s30 = smov 12  ;;  %v977_v51 = vsel %vm10_vm1, %v2568_v49, %v972_v48  ;;  %s1208_s27 = smov 192 }
  0x56   :  { %v2542_v24 = vld [vmem:[%s5015_s0 + $0x189] ss:$16 sm:%s852_s4]   ;;  %v891_v25 = vsel %vm14_vm2, %v2550_v22, %v886_v23  ;;  %v904_v42 = vsel %vm6_vm0, %v2553_v40, %v2552_v38  ;;  %v2561_v52 = vld [vmem:[%s5015_s0 + $0x88] ss:$16 sm:%s943_s25]   ;;  %v982_v53 = vsel %vm14_vm2, %v2569_v50, %v977_v51  ;;  %s1162_s4 = smov 192  ;;  %s1254_s25 = smov 192 }
  0x57   :  { %v2543_v26 = vld [vmem:[%s5015_s0 + $0x189] ss:$16 sm:%s855_s9]   ;;  %892 = vrot.lane.b32.xlu1 %v891_v25, %s2879_s10  ;;  %v909_v44 = vsel %vm10_vm1, %v2554_v41, %v904_v42  ;;  %s1116_s9 = smov 192 }
  0x58   :  { %v2544_v27 = vld [vmem:[%s5015_s0 + $0x189] ss:$16 sm:%s860_s11]   ;;  %v858_v28 = vsel %vm6_vm0, %v2543_v26, %v2542_v24  ;;  %v914_v47 = vsel %vm14_vm2, %v2555_v43, %v909_v44  ;;  %s1012_s11 = smov 3  ;;  %v2562_v54 = vld [vmem:[%s5015_s0 + $0x88] ss:$16 sm:%s946_s30]   ;;  %s1272_s30 = smov 48 }
  0x59   :  { %v2545_v29 = vld [vmem:[%s5015_s0 + $0x189] ss:$16 sm:%s865_s17]   ;;  %v863_v30 = vsel %vm10_vm1, %v2544_v27, %v858_v28  ;;  %v2563_v55 = vld [vmem:[%s5015_s0 + $0x88] ss:$16 sm:%s951_s2]   ;;  %s1020_s17 = smov 48  ;;  %v949_v56 = vsel %vm6_vm0, %v2562_v54, %v2561_v52  ;;  %s1103_s2 = smov 3 }
  0x5a   :  { %v868_v33 = vsel %vm14_vm2, %v2545_v29, %v863_v30  ;;  %v2564_v57 = vld [vmem:[%s5015_s0 + $0x88] ss:$16 sm:%s956_s7]   ;;  %v954_v58 = vsel %vm10_vm1, %v2563_v55, %v949_v56  ;;  %s1061_s7 = smov 12  ;;  %v2595_v23 = vld [vmem:[%s5015_s0 + $0x207] ss:$16 sm:%s1103_s2]   ;;  %s1322_s2 = smov 192 }
  0x5b   :  { %869 = vrot.lane.b32.xlu0 %v868_v33, %s2879_s10  ;;  %937 = vrot.lane.b32.xlu1 %v936_v39, %s2880_s22  ;;  %v2576_v59 = vld [vmem:[%s5015_s0 + $0x308] ss:$16 sm:%s1012_s11]   ;;  %v959_v61 = vsel %vm14_vm2, %v2564_v57, %v954_v58  ;;  %s1066_s10 = smov 48  ;;  %s1180_s11 = smov 48 }
  0x5c   :  { %v2577_v60 = vld [vmem:[%s5015_s0 + $0x308] ss:$16 sm:%s1015_s12]   ;;  %v2597_v27 = vld [vmem:[%s5015_s0 + $0x207] ss:$16 sm:%s1111_s8]   ;;  %s1126_s8 = smov 3  ;;  %s1231_s12 = smov 192 }
  0x5d   :  { %v1018_v62 = vsel %vm6_vm0, %v2577_v60, %v2576_v59  ;;  %v2578_v63 = vld [vmem:[%s5015_s0 + $0x308] ss:$16 sm:%s1020_s17]   ;;  %s1035_s17 = smov 3  ;;  %v2598_v28 = vld [vmem:[%s5015_s0 + $0x207] ss:$16 sm:%s1116_s9]   ;;  %s1175_s9 = smov 12 }
  0x5e   :  { %v2579_v0 = vld [vmem:[%s5015_s0 + $0x308] ss:$16 sm:%s1025_s15]   ;;  %v1023_v1 = vsel %vm10_vm1, %v2578_v63, %v1018_v62  ;;  %s1084_s15 = smov 12  ;;  %v2593_v33 = vld [vmem:[%s5015_s0 + $0x7] ss:$16 sm:%s1089_s18]   ;;  %s1241_s18 = smov 3 }
  0x5f   :  { %915 = vrot.lane.b32.xlu0 %v914_v47, %s2880_s22  ;;  %983 = vrot.lane.b32.xlu1 %v982_v53, %s2880_s22  ;;  %v2571_v2 = vld [vmem:[%s5015_s0 + $0x108] ss:$16 sm:%s989_s20]   ;;  %v1028_v3 = vsel %vm14_vm2, %v2579_v0, %v1023_v1  ;;  %s1294_s20 = smov 48 }
  0x60   :  { %v2572_v4 = vld [vmem:[%s5015_s0 + $0x108] ss:$16 sm:%s992_s26]   ;;  %s1149_s26 = smov 3  ;;  %v2592_v32 = vld [vmem:[%s5015_s0 + $0x7] ss:$16 sm:%s1084_s15]   ;;  %s2882_s15 = smov 48  }
  0x61   :  { %v2573_v5 = vld [vmem:[%s5015_s0 + $0x108] ss:$16 sm:%s997_s28]   ;;  %v995_v6 = vsel %vm6_vm0, %v2572_v4, %v2571_v2  ;;  %s1152_s28 = smov 12  ;;  %v2594_v35 = vld [vmem:[%s5015_s0 + $0x7] ss:$16 sm:%s1094_s24]   ;;  %s1198_s24 = smov 12 }
  0x62   :  { %v2574_v7 = vld [vmem:[%s5015_s0 + $0x108] ss:$16 sm:%s1002_s3]   ;;  %v1000_v8 = vsel %vm10_vm1, %v2573_v5, %v995_v6  ;;  %s1106_s3 = smov 12  ;;  %v2605_v37 = vld [vmem:[%s5015_s0 + $0x287] ss:$16 sm:%s1149_s26]   ;;  %s1317_s26 = smov 48 }
  0x63   :  { %960 = vrot.lane.b32.xlu0 %v959_v61, %s2880_s22  ;;  %1029 = vrot.lane.b32.xlu1 %v1028_v3, %s2880_s22  ;;  %v2586_v9 = vld [vmem:[%s5015_s0 + $0x388] ss:$16 sm:%s1058_s5]   ;;  %v1005_v11 = vsel %vm14_vm2, %v2574_v7, %v1000_v8  ;;  %s1226_s5 = smov 48 }
  0x64   :  { %v2587_v10 = vld [vmem:[%s5015_s0 + $0x388] ss:$16 sm:%s1061_s7]   ;;  %v2596_v24 = vld [vmem:[%s5015_s0 + $0x207] ss:$16 sm:%s1106_s3]   ;;  %s1157_s3 = smov 48  ;;  %s1277_s7 = smov 192 }
  0x65   :  { %v1064_v12 = vsel %vm6_vm0, %v2587_v10, %v2586_v9  ;;  %v2588_v13 = vld [vmem:[%s5015_s0 + $0x388] ss:$16 sm:%s1066_s10]   ;;  %s1081_s10 = smov 3  ;;  %v1109_v26 = vsel %vm6_vm0, %v2596_v24, %v2595_v23  ;;  %v2606_v38 = vld [vmem:[%s5015_s0 + $0x287] ss:$16 sm:%s1152_s28]   ;;  %s1368_s28 = smov 192 }
  0x66   :  { %v2589_v14 = vld [vmem:[%s5015_s0 + $0x388] ss:$16 sm:%s1071_s13]   ;;  %v1069_v15 = vsel %vm10_vm1, %v2588_v13, %v1064_v12  ;;  %v1114_v29 = vsel %vm10_vm1, %v2597_v27, %v1109_v26  ;;  %v2591_v30 = vld [vmem:[%s5015_s0 + $0x7] ss:$16 sm:%s1081_s10]   ;;  %s1129_s13 = smov 12  ;;  %v1155_v40 = vsel %vm6_vm0, %v2606_v38, %v2605_v37  ;;  %s1391_s10 = smov 192 }
  0x67   :  { %1006 = vrot.lane.b32.xlu0 %v1005_v11, %s2880_s22  ;;  %v2581_v16 = vld [vmem:[%s5015_s0 + $0x188] ss:$16 sm:%s1035_s17]   ;;  %v1074_v17 = vsel %vm14_vm2, %v2589_v14, %v1069_v15  ;;  %v1119_v31 = vsel %vm14_vm2, %v2598_v28, %v1114_v29  ;;  %v1087_v34 = vsel %vm6_vm0, %v2592_v32, %v2591_v30  ;;  %s1345_s17 = smov 192 }
  0x68   :  { %v2582_v18 = vld [vmem:[%s5015_s0 + $0x188] ss:$16 sm:%s1038_s21]   ;;  %1075 = vrot.lane.b32.xlu1 %v1074_v17, %s2880_s22  ;;  %v1092_v36 = vsel %vm10_vm1, %v2593_v33, %v1087_v34  ;;  %s1299_s21 = smov 192 }
  0x69   :  { %v2583_v19 = vld [vmem:[%s5015_s0 + $0x188] ss:$16 sm:%s1043_s23]   ;;  %v1041_v20 = vsel %vm6_vm0, %v2582_v18, %v2581_v16  ;;  %v1097_v39 = vsel %vm14_vm2, %v2594_v35, %v1092_v36  ;;  %v2607_v41 = vld [vmem:[%s5015_s0 + $0x287] ss:$16 sm:%s1157_s3]   ;;  %s1195_s23 = smov 3  ;;  %s1172_s3 = smov 3 }
  0x6a   :  { %v2584_v21 = vld [vmem:[%s5015_s0 + $0x188] ss:$16 sm:%s1048_s29]   ;;  %v1046_v22 = vsel %vm10_vm1, %v2583_v19, %v1041_v20  ;;  %v2608_v42 = vld [vmem:[%s5015_s0 + $0x287] ss:$16 sm:%s1162_s4]   ;;  %v1160_v43 = vsel %vm10_vm1, %v2607_v41, %v1155_v40  ;;  %s1203_s29 = smov 48  ;;  %s1221_s4 = smov 12 }
  0x6b   :  { %v1051_v25 = vsel %vm14_vm2, %v2584_v21, %v1046_v22  ;;  %v2600_v44 = vld [vmem:[%s5015_s0 + $0x87] ss:$16 sm:%s1126_s8]   ;;  %v1165_v45 = vsel %vm14_vm2, %v2608_v42, %v1160_v43  ;;  %v2636_v20 = vld [vmem:[%s5015_s0 + $0x206] ss:$16 sm:%s1294_s20]   ;;  %s1309_s20 = smov 3  ;;  %s1437_s8 = smov 192 }
  0x6c   :  { %1052 = vrot.lane.b32.xlu0 %v1051_v25, %s2880_s22  ;;  %1120 = vrot.lane.b32.xlu1 %v1119_v31, %s2881_s6  ;;  %v2601_v46 = vld [vmem:[%s5015_s0 + $0x87] ss:$16 sm:%s1129_s13]   ;;  %s1249_s22 = smov 48  ;;  %s1455_s13 = smov 48 }
  0x6d   :  { %v2602_v47 = vld [vmem:[%s5015_s0 + $0x87] ss:$16 sm:%s1134_s14]   ;;  %v1132_v48 = vsel %vm6_vm0, %v2601_v46, %v2600_v44  ;;  %s1286_s14 = smov 3  ;;  %v2637_v21 = vld [vmem:[%s5015_s0 + $0x206] ss:$16 sm:%s1299_s21]   ;;  %s1358_s21 = smov 12 }
  0x6e   :  { %v2603_v49 = vld [vmem:[%s5015_s0 + $0x87] ss:$16 sm:%s1139_s19]   ;;  %v1137_v50 = vsel %vm10_vm1, %v2602_v47, %v1132_v48  ;;  %s1244_s19 = smov 12  ;;  %v2634_v16 = vld [vmem:[%s5015_s0 + $0x206] ss:$16 sm:%s1286_s14]   ;;  %s12_s14 = smov 192 }
  0x6f   :  { %v2615_v51 = vld [vmem:[%s5015_s0 + $0x307] ss:$16 sm:%s1195_s23]   ;;  %v1142_v53 = vsel %vm14_vm2, %v2603_v49, %v1137_v50  ;;  %v2632_v27 = vld [vmem:[%s5015_s0 + $0x6] ss:$16 sm:%s1272_s30]   ;;  %s1363_s23 = smov 48  ;;  %s1424_s30 = smov 3 }
  0x70   :  { %1098 = vrot.lane.b32.xlu0 %v1097_v39, %s2881_s6  ;;  %1166 = vrot.lane.b32.xlu1 %v1165_v45, %s2881_s6  ;;  %v2616_v52 = vld [vmem:[%s5015_s0 + $0x307] ss:$16 sm:%s1198_s24]   ;;  %s1414_s24 = smov 192 }
  0x71   :  { %v1201_v54 = vsel %vm6_vm0, %v2616_v52, %v2615_v51  ;;  %v2617_v55 = vld [vmem:[%s5015_s0 + $0x307] ss:$16 sm:%s1203_s29]   ;;  %s1218_s29 = smov 3  ;;  %v2633_v30 = vld [vmem:[%s5015_s0 + $0x6] ss:$16 sm:%s1277_s7]   ;;  %s1381_s7 = smov 12 }
  0x72   :  { %v2618_v56 = vld [vmem:[%s5015_s0 + $0x307] ss:$16 sm:%s1208_s27]   ;;  %v1206_v57 = vsel %vm10_vm1, %v2617_v55, %v1201_v54  ;;  %s1267_s27 = smov 12  ;;  %v2647_v37 = vld [vmem:[%s5015_s0 + $0x286] ss:$16 sm:%s1345_s17]   ;;  %s1404_s17 = smov 12 }
  0x73   :  { %v2610_v58 = vld [vmem:[%s5015_s0 + $0x107] ss:$16 sm:%s1172_s3]   ;;  %v1211_v59 = vsel %vm14_vm2, %v2618_v56, %v1206_v57  ;;  %v2631_v26 = vld [vmem:[%s5015_s0 + $0x6] ss:$16 sm:%s1267_s27]   ;;  %s1477_s3 = smov 48  ;;  %s2883_s27 = smov 40  }
  0x74   :  { %1143 = vrot.lane.b32.xlu0 %v1142_v53, %s2881_s6  ;;  %v2611_v60 = vld [vmem:[%s5015_s0 + $0x107] ss:$16 sm:%s1175_s9]   ;;  %1212 = vrot.lane.b32.xlu1 %v1211_v59, %s2881_s6  ;;  %s1332_s9 = smov 3 }
  0x75   :  { %v2612_v61 = vld [vmem:[%s5015_s0 + $0x107] ss:$16 sm:%s1180_s11]   ;;  %v1178_v62 = vsel %vm6_vm0, %v2611_v60, %v2610_v58  ;;  %s1335_s11 = smov 12  ;;  %v2644_v32 = vld [vmem:[%s5015_s0 + $0x286] ss:$16 sm:%s1332_s9]   ;;  %s8_s9 = smov 48 }
  0x76   :  { %v2613_v63 = vld [vmem:[%s5015_s0 + $0x107] ss:$16 sm:%s1185_s16]   ;;  %v1183_v0 = vsel %vm10_vm1, %v2612_v61, %v1178_v62  ;;  %s1289_s16 = smov 12  ;;  %v2645_v33 = vld [vmem:[%s5015_s0 + $0x286] ss:$16 sm:%s1335_s11]   ;;  %s85_s11 = smov 12 }
  0x77   :  { %v2625_v1 = vld [vmem:[%s5015_s0 + $0x387] ss:$16 sm:%s1241_s18]   ;;  %v1188_v3 = vsel %vm14_vm2, %v2613_v63, %v1183_v0  ;;  %v2635_v17 = vld [vmem:[%s5015_s0 + $0x206] ss:$16 sm:%s1289_s16]   ;;  %s1340_s16 = smov 48  ;;  %v1338_v35 = vsel %vm6_vm0, %v2645_v33, %v2644_v32  ;;  %s1409_s18 = smov 48 }
  0x78   :  { %v2626_v2 = vld [vmem:[%s5015_s0 + $0x387] ss:$16 sm:%s1244_s19]   ;;  %1189 = vrot.lane.b32.xlu0 %v1188_v3, %s2881_s6  ;;  %v3663_v14 = vpop.permute.xlu1 %228   ;;  %v1292_v19 = vsel %vm6_vm0, %v2635_v17, %v2634_v16  ;;  %s1460_s19 = smov 192 }
  0x79   :  { %v1247_v4 = vsel %vm6_vm0, %v2626_v2, %v2625_v1  ;;  %v2627_v5 = vld [vmem:[%s5015_s0 + $0x387] ss:$16 sm:%s1249_s22]   ;;  %s1264_s22 = smov 3  ;;  %v1297_v23 = vsel %vm10_vm1, %v2636_v20, %v1292_v19  ;;  %v2646_v36 = vld [vmem:[%s5015_s0 + $0x286] ss:$16 sm:%s1340_s16]   ;;  %s1355_s16 = smov 3 }
  0x7a   :  { %v2628_v6 = vld [vmem:[%s5015_s0 + $0x387] ss:$16 sm:%s1254_s25]   ;;  %v1252_v7 = vsel %vm10_vm1, %v2627_v5, %v1247_v4  ;;  %v2630_v24 = vld [vmem:[%s5015_s0 + $0x6] ss:$16 sm:%s1264_s22]   ;;  %v1302_v25 = vsel %vm14_vm2, %v2637_v21, %v1297_v23  ;;  %s1312_s25 = smov 12  ;;  %v1343_v39 = vsel %vm10_vm1, %v2646_v36, %v1338_v35  ;;  %s1528_s22 = smov 192 }
  0x7b   :  { %v2620_v8 = vld [vmem:[%s5015_s0 + $0x187] ss:$16 sm:%s1218_s29]   ;;  %v1257_v9 = vsel %vm14_vm2, %v2628_v6, %v1252_v7  ;;  %v1270_v29 = vsel %vm6_vm0, %v2631_v26, %v2630_v24  ;;  %v2639_v40 = vld [vmem:[%s5015_s0 + $0x86] ss:$16 sm:%s1309_s20]   ;;  %v1348_v41 = vsel %vm14_vm2, %v2647_v37, %v1343_v39  ;;  %s32_s29 = smov 192  ;;  %s1630_s20 = smov 3 }
  0x7c   :  { %v2621_v10 = vld [vmem:[%s5015_s0 + $0x187] ss:$16 sm:%s1221_s4]   ;;  %1258 = vrot.lane.b32.xlu1 %v1257_v9, %s2881_s6  ;;  %v3680_v22 = vpop.permute.xlu0 %183   ;;  %v1275_v31 = vsel %vm10_vm1, %v2632_v27, %v1270_v29  ;;  %s1482_s4 = smov 192 }
  0x7d   :  { %v2622_v11 = vld [vmem:[%s5015_s0 + $0x187] ss:$16 sm:%s1226_s5]   ;;  %v1224_v12 = vsel %vm6_vm0, %v2621_v10, %v2620_v8  ;;  %v1280_v34 = vsel %vm14_vm2, %v2633_v30, %v1275_v31  ;;  %s1378_s5 = smov 3  ;;  %v2640_v42 = vld [vmem:[%s5015_s0 + $0x86] ss:$16 sm:%s1312_s25]   ;;  %s1492_s25 = smov 3 }
  0x7e   :  { %v2623_v13 = vld [vmem:[%s5015_s0 + $0x187] ss:$16 sm:%s1231_s12]   ;;  %v1229_v15 = vsel %vm10_vm1, %v2622_v11, %v1224_v12  ;;  %v2641_v43 = vld [vmem:[%s5015_s0 + $0x86] ss:$16 sm:%s1317_s26]   ;;  %s1386_s12 = smov 48  ;;  %v1315_v45 = vsel %vm6_vm0, %v2640_v42, %v2639_v40  ;;  %s1469_s26 = smov 3 }
  0x7f   :  { %v1234_v18 = vsel %vm14_vm2, %v2623_v13, %v1229_v15  ;;  %v2642_v46 = vld [vmem:[%s5015_s0 + $0x86] ss:$16 sm:%s1322_s2]   ;;  %v1320_v47 = vsel %vm10_vm1, %v2641_v43, %v1315_v45  ;;  %s1427_s2 = smov 12  ;;  %v2673_v17 = vld [vmem:[%s5015_s0 + $0x205] ss:$16 sm:%s1469_s26]   ;;  %s2255_s26 = smov 48 }
  0x80   :  { %1235 = vrot.lane.b32.xlu0 %v1234_v18, %s2881_s6  ;;  %v3694_v28 = vpop.permute.xlu1 %251   ;;  %1303 = vrot.lane.b32.xlu1 %v1302_v25, %s2882_s15  ;;  %v2654_v48 = vld [vmem:[%s5015_s0 + $0x306] ss:$16 sm:%s1378_s5]   ;;  %v1325_v50 = vsel %vm14_vm2, %v2642_v46, %v1320_v47  ;;  %s1432_s6 = smov 48  ;;  %s1500_s5 = smov 48 }
  0x81   :  { %v2655_v49 = vld [vmem:[%s5015_s0 + $0x306] ss:$16 sm:%s1381_s7]   ;;  %v2675_v21 = vld [vmem:[%s5015_s0 + $0x205] ss:$16 sm:%s1477_s3]   ;;  %s2_s3 = smov 3  ;;  %s148_s7 = smov 12 }
  0x82   :  { %v1384_v51 = vsel %vm6_vm0, %v2655_v49, %v2654_v48  ;;  %v2656_v52 = vld [vmem:[%s5015_s0 + $0x306] ss:$16 sm:%s1386_s12]   ;;  %s1401_s12 = smov 3  ;;  %v2676_v23 = vld [vmem:[%s5015_s0 + $0x205] ss:$16 sm:%s1482_s4]   ;;  %s1495_s4 = smov 12 }
  0x83   :  { %v2657_v53 = vld [vmem:[%s5015_s0 + $0x306] ss:$16 sm:%s1391_s10]   ;;  %v1389_v55 = vsel %vm10_vm1, %v2656_v52, %v1384_v51  ;;  %s1450_s10 = smov 12  ;;  %v2671_v30 = vld [vmem:[%s5015_s0 + $0x5] ss:$16 sm:%s1455_s13]   ;;  %s103_s13 = smov 3 }
  0x84   :  { %v3716_v38 = vpop.permute.xlu0 %205   ;;  %1281 = vrot.lane.b32.xlu0 %v1280_v34, %s2882_s15  ;;  %1349 = vrot.lane.b32.xlu1 %v1348_v41, %s2882_s15  ;;  %v2649_v56 = vld [vmem:[%s5015_s0 + $0x106] ss:$16 sm:%s1355_s16]   ;;  %v1394_v57 = vsel %vm14_vm2, %v2657_v53, %v1389_v55  ;;  %s1515_s16 = smov 3 }
  0x85   :  { %v2650_v58 = vld [vmem:[%s5015_s0 + $0x106] ss:$16 sm:%s1358_s21]   ;;  %s19_s21 = smov 3  ;;  %v2670_v29 = vld [vmem:[%s5015_s0 + $0x5] ss:$16 sm:%s1450_s10]   ;;  %s1505_s10 = smov 192 }
  0x86   :  { %v2651_v59 = vld [vmem:[%s5015_s0 + $0x106] ss:$16 sm:%s1363_s23]   ;;  %v1361_v61 = vsel %vm6_vm0, %v2650_v58, %v2649_v56  ;;  %s22_s23 = smov 12  ;;  %v2672_v33 = vld [vmem:[%s5015_s0 + $0x5] ss:$16 sm:%s1460_s19]   ;;  %s1518_s19 = smov 12 }
  0x87   :  { %v2652_v62 = vld [vmem:[%s5015_s0 + $0x106] ss:$16 sm:%s1368_s28]   ;;  %v1366_v63 = vsel %vm10_vm1, %v2651_v59, %v1361_v61  ;;  %s1472_s28 = smov 12  ;;  %v2361_v35 = vld [vmem:[%s5015_s0 + $0x80] ss:$16 sm:%s19_s21]   ;;  %s1706_s21 = smov 48 }
  0x88   :  { %v3730_v44 = vpop.permute.xlu1 %297   ;;  %1326 = vrot.lane.b32.xlu0 %v1325_v50, %s2882_s15  ;;  %1395 = vrot.lane.b32.xlu1 %v1394_v57, %s2882_s15  ;;  %v2664_v0 = vld [vmem:[%s5015_s0 + $0x386] ss:$16 sm:%s1424_s30]   ;;  %v1371_v2 = vsel %vm14_vm2, %v2652_v62, %v1366_v63  ;;  %s1538_s30 = smov 3 }
  0x89   :  { %v2665_v1 = vld [vmem:[%s5015_s0 + $0x386] ss:$16 sm:%s1427_s2]   ;;  %v2674_v18 = vld [vmem:[%s5015_s0 + $0x205] ss:$16 sm:%s1472_s28]   ;;  %s27_s28 = smov 48  ;;  %s1757_s2 = smov 192 }
  0x8a   :  { %v1430_v3 = vsel %vm6_vm0, %v2665_v1, %v2664_v0  ;;  %v2666_v4 = vld [vmem:[%s5015_s0 + $0x386] ss:$16 sm:%s1432_s6]   ;;  %s1447_s6 = smov 3  ;;  %v1475_v20 = vsel %vm6_vm0, %v2674_v18, %v2673_v17  ;;  %v2362_v36 = vld [vmem:[%s5015_s0 + $0x80] ss:$16 sm:%s22_s23]   ;;  %s1564_s23 = smov 12 }
  0x8b   :  { %v2667_v5 = vld [vmem:[%s5015_s0 + $0x386] ss:$16 sm:%s1437_s8]   ;;  %v1435_v7 = vsel %vm10_vm1, %v2666_v4, %v1430_v3  ;;  %v1480_v25 = vsel %vm10_vm1, %v2675_v21, %v1475_v20  ;;  %v2669_v26 = vld [vmem:[%s5015_s0 + $0x5] ss:$16 sm:%s1447_s6]   ;;  %s4_s8 = smov 12  ;;  %v25_v39 = vsel %vm6_vm0, %v2362_v36, %v2361_v35  ;;  %s82_s6 = smov 3 }
  0x8c   :  { %v3752_v54 = vpop.permute.xlu0 %274   ;;  %1372 = vrot.lane.b32.xlu0 %v1371_v2, %s2882_s15  ;;  %v2659_v8 = vld [vmem:[%s5015_s0 + $0x186] ss:$16 sm:%s1401_s12]   ;;  %v1440_v9 = vsel %vm14_vm2, %v2667_v5, %v1435_v7  ;;  %v1485_v27 = vsel %vm14_vm2, %v2676_v23, %v1480_v25  ;;  %v1453_v32 = vsel %vm6_vm0, %v2670_v29, %v2669_v26  ;;  %s90_s12 = smov 48 }
  0x8d   :  { %v2660_v10 = vld [vmem:[%s5015_s0 + $0x186] ss:$16 sm:%s1404_s17]   ;;  %1441 = vrot.lane.b32.xlu1 %v1440_v9, %s2882_s15  ;;  %v1458_v34 = vsel %vm10_vm1, %v2671_v30, %v1453_v32  ;;  %s1551_s17 = smov 192 }
  0x8e   :  { %v2661_v11 = vld [vmem:[%s5015_s0 + $0x186] ss:$16 sm:%s1409_s18]   ;;  %v1407_v13 = vsel %vm6_vm0, %v2660_v10, %v2659_v8  ;;  %v1463_v37 = vsel %vm14_vm2, %v2672_v33, %v1458_v34  ;;  %v2363_v40 = vld [vmem:[%s5015_s0 + $0x80] ss:$16 sm:%s27_s28]   ;;  %s111_s28 = smov 48  ;;  %s124_s18 = smov 3 }
  0x8f   :  { %v2662_v15 = vld [vmem:[%s5015_s0 + $0x186] ss:$16 sm:%s1414_s24]   ;;  %v1412_v16 = vsel %vm10_vm1, %v2661_v11, %v1407_v13  ;;  %v2364_v41 = vld [vmem:[%s5015_s0 + $0x80] ss:$16 sm:%s32_s29]   ;;  %v30_v43 = vsel %vm10_vm1, %v2363_v40, %v25_v39  ;;  %s116_s29 = smov 192  ;;  %s1569_s24 = smov 48 }
  0x90   :  { %v3766_v60 = vpop.permute.xlu1 %343   ;;  %v1417_v19 = vsel %vm14_vm2, %v2662_v15, %v1412_v16  ;;  %v3_v45 = vld [vmem:[%s5015_s0] ss:$16 sm:%s2_s3]   ;;  %v35_v46 = vsel %vm14_vm2, %v2364_v41, %v30_v43  ;;  %v2683_v52 = vld [vmem:[%s5015_s0 + $0x285] ss:$16 sm:%s1515_s16]   ;;  %s132_s3 = smov 48  ;;  %s153_s16 = smov 48 }
  0x91   :  { %1418 = vrot.lane.b32.xlu0 %v1417_v19, %s2882_s15  ;;  %1486 = vrot.lane.b32.xlu1 %v1485_v27, %s2883_s27  ;;  %s1523_s15 = smov 48  ;;  %v5_v47 = vld [vmem:[%s5015_s0] ss:$16 sm:%s4_s8]   ;;  %s1541_s8 = smov 12 }
  0x92   :  { %v9_v48 = vld [vmem:[%s5015_s0] ss:$16 sm:%s8_s9]   ;;  %2365 = vst.msk [vmem:[%s5016_s1 + $0x8] sm:$0xff] %vm16_vm3, %v35_v46   ;;  %v7_v50 = vsel %vm6_vm0, %v5_v47, %v3_v45  ;;  %s1546_s9 = smov 48 }
  0x93   :  { %v13_v51 = vld [vmem:[%s5015_s0] ss:$16 sm:%s12_s14]   ;;  %2409 = vst.msk [vmem:[%s5016_s1 + $0x8] sm:$0xff] %vm185_vm4, %v3663_v14   ;;  %v11_v14 = vsel %vm10_vm1, %v9_v48, %v7_v50  ;;  %s1660_s14 = smov 48 }
  0x94   :  { %v3788_v6 = vpop.permute.xlu0 %320   ;;  %v3802_v12 = vpop.permute.xlu1 %388   ;;  %v2684_v53 = vld [vmem:[%s5015_s0 + $0x285] ss:$16 sm:%s1518_s19]   ;;  %v15_v56 = vsel %vm14_vm2, %v13_v51, %v11_v14  ;;  %s106_s19 = smov 12  ;;  %v2381_v3 = vld [vmem:[%s5015_s0 + $0x280] ss:$16 sm:%s103_s13]   ;;  %s1655_s13 = smov 12 }
  0x95   :  { %1464 = vrot.lane.b32.xlu0 %v1463_v37, %s2883_s27  ;;  %v2685_v55 = vld [vmem:[%s5015_s0 + $0x285] ss:$16 sm:%s1523_s15]   ;;  %v1521_v57 = vsel %vm6_vm0, %v2684_v53, %v2683_v52  ;;  %17 = vst.msk [vmem:[%s5016_s1] sm:$0xff] %vm16_vm3, %v15_v56   ;;  %s1561_s15 = smov 3 }
  0x96   :  { %v2686_v58 = vld [vmem:[%s5015_s0 + $0x285] ss:$16 sm:%s1528_s22]   ;;  %v1526_v62 = vsel %vm10_vm1, %v2685_v55, %v1521_v57  ;;  %186 = vst.msk [vmem:[%s5016_s1] sm:$0xff] %vm185_vm4, %v3680_v22   ;;  %s53_s22 = smov 192 }
  0x97   :  { %v2678_v59 = vld [vmem:[%s5015_s0 + $0x85] ss:$16 sm:%s1492_s25]   ;;  %v1531_v22 = vsel %vm14_vm2, %v2686_v58, %v1526_v62  ;;  %v2382_v7 = vld [vmem:[%s5015_s0 + $0x280] ss:$16 sm:%s106_s19]   ;;  %s95_s19 = smov 192  ;;  %s1607_s25 = smov 3 }
  0x98   :  { %v3824_v24 = vpop.permute.xlu0 %366   ;;  %v3838_v31 = vpop.permute.xlu1 %434   ;;  %v2679_v63 = vld [vmem:[%s5015_s0 + $0x85] ss:$16 sm:%s1495_s4]   ;;  %1532 = vrot.lane.b32.xlu1 %v1531_v22, %s2883_s27  ;;  %v109_v9 = vsel %vm6_vm0, %v2382_v7, %v2381_v3  ;;  %s137_s4 = smov 192 }
  0x99   :  { %v2680_v0 = vld [vmem:[%s5015_s0 + $0x85] ss:$16 sm:%s1500_s5]   ;;  %v1498_v1 = vsel %vm6_vm0, %v2679_v63, %v2678_v59  ;;  %369 = vst.msk [vmem:[%s5016_s1] sm:$0xff] %vm368_vm5, %v3824_v24   ;;  %s1615_s5 = smov 48 }
  0x9a   :  { %v2681_v2 = vld [vmem:[%s5015_s0 + $0x85] ss:$16 sm:%s1505_s10]   ;;  %v1503_v5 = vsel %vm10_vm1, %v2680_v0, %v1498_v1  ;;  %v2383_v10 = vld [vmem:[%s5015_s0 + $0x280] ss:$16 sm:%s111_s28]   ;;  %s1633_s28 = smov 12  ;;  %s1701_s10 = smov 12 }
  0x9b   :  { %v1508_v8 = vsel %vm14_vm2, %v2681_v2, %v1503_v5  ;;  %v2384_v11 = vld [vmem:[%s5015_s0 + $0x280] ss:$16 sm:%s116_s29]   ;;  %v114_v13 = vsel %vm10_vm1, %v2383_v10, %v109_v9  ;;  %s1574_s29 = smov 192  ;;  %v2693_v23 = vld [vmem:[%s5015_s0 + $0x305] ss:$16 sm:%s1561_s15]   ;;  %s1592_s15 = smov 48 }
  0x9c   :  { %v412_v42 = vpop.permute.xlu0 %411   ;;  %v3872_v49 = vpop.permute.xlu1 %480   ;;  %1509 = vrot.lane.b32.xlu0 %v1508_v8, %s2883_s27  ;;  %v2376_v15 = vld [vmem:[%s5015_s0 + $0x200] ss:$16 sm:%s82_s6]   ;;  %v119_v17 = vsel %vm14_vm2, %v2384_v11, %v114_v13  ;;  %s1643_s6 = smov 192 }
  0x9d   :  { %2448 = vst.msk [vmem:[%s5016_s1 + $0x8] sm:$0xff] %vm368_vm5, %v412_v42   ;;  %v2377_v18 = vld [vmem:[%s5015_s0 + $0x200] ss:$16 sm:%s85_s11]   ;;  %s1620_s11 = smov 192 }
  0x9e   :  { %v2378_v19 = vld [vmem:[%s5015_s0 + $0x200] ss:$16 sm:%s90_s12]   ;;  %2385 = vst.msk [vmem:[%s5016_s1 + $0x28] sm:$0xff] %vm16_vm3, %v119_v17   ;;  %v88_v20 = vsel %vm6_vm0, %v2377_v18, %v2376_v15  ;;  %s40_s12 = smov 3 }
  0x9f   :  { %v2379_v21 = vld [vmem:[%s5015_s0 + $0x200] ss:$16 sm:%s95_s19]   ;;  %2414 = vst.msk [vmem:[%s5016_s1 + $0x28] sm:$0xff] %vm185_vm4, %v3694_v28   ;;  %v93_v28 = vsel %vm10_vm1, %v2378_v19, %v88_v20  ;;  %s1587_s19 = smov 12 }
  0xa0   :  { %v3909_v61 = vpop.permute.xlu0 %457   ;;  %v2694_v25 = vld [vmem:[%s5015_s0 + $0x305] ss:$16 sm:%s1564_s23]   ;;  %v98_v27 = vsel %vm14_vm2, %v2379_v21, %v93_v28  ;;  %s127_s23 = smov 12  ;;  %2453 = vst.msk [vmem:[%s5016_s1 + $0x28] sm:$0xff] %vm368_vm5, %v3838_v31  }
  0xa1   :  { %v2695_v26 = vld [vmem:[%s5015_s0 + $0x305] ss:$16 sm:%s1569_s24]   ;;  %v1567_v29 = vsel %vm6_vm0, %v2694_v25, %v2693_v23  ;;  %2380 = vst.msk [vmem:[%s5016_s1 + $0x20] sm:$0xff] %vm16_vm3, %v98_v27   ;;  %s1744_s24 = smov 3 }
  0xa2   :  { %v2696_v30 = vld [vmem:[%s5015_s0 + $0x305] ss:$16 sm:%s1574_s29]   ;;  %v1572_v31 = vsel %vm10_vm1, %v2695_v26, %v1567_v29  ;;  %2404 = vst.msk [vmem:[%s5016_s1 + $0x20] sm:$0xff] %vm185_vm4, %v3716_v38   ;;  %s1597_s29 = smov 192 }
  0xa3   :  { %v2688_v32 = vld [vmem:[%s5015_s0 + $0x105] ss:$16 sm:%s1538_s30]   ;;  %v1577_v38 = vsel %vm14_vm2, %v2696_v30, %v1572_v31  ;;  %v2386_v39 = vld [vmem:[%s5015_s0 + $0x300] ss:$16 sm:%s124_s18]   ;;  %s48_s18 = smov 48  ;;  %s145_s30 = smov 3 }
  0xa4   :  { %v3935_v4 = vpop.permute.xlu1 %526   ;;  %v2689_v33 = vld [vmem:[%s5015_s0 + $0x105] ss:$16 sm:%s1541_s8]   ;;  %1578 = vrot.lane.b32.xlu1 %v1577_v38, %s2883_s27  ;;  %2443 = vst.msk [vmem:[%s5016_s1 + $0x20] sm:$0xff] %vm368_vm5, %v3802_v12   ;;  %s74_s8 = smov 192 }
  0xa5   :  { %v2690_v34 = vld [vmem:[%s5015_s0 + $0x105] ss:$16 sm:%s1546_s9]   ;;  %v1544_v36 = vsel %vm6_vm0, %v2689_v33, %v2688_v32  ;;  %v2387_v41 = vld [vmem:[%s5015_s0 + $0x300] ss:$16 sm:%s127_s23]   ;;  %s1652_s9 = smov 3  ;;  %s1711_s23 = smov 192 }
  0xa6   :  { %v2691_v37 = vld [vmem:[%s5015_s0 + $0x105] ss:$16 sm:%s1551_s17]   ;;  %v1549_v40 = vsel %vm10_vm1, %v2690_v34, %v1544_v36  ;;  %s43_s17 = smov 12  ;;  %v130_v43 = vsel %vm6_vm0, %v2387_v41, %v2386_v39  ;;  %v2388_v45 = vld [vmem:[%s5015_s0 + $0x300] ss:$16 sm:%s132_s3]   ;;  %s2886_s3 = smov 16  }
  0xa7   :  { %v1554_v42 = vsel %vm14_vm2, %v2691_v37, %v1549_v40  ;;  %v2389_v46 = vld [vmem:[%s5015_s0 + $0x300] ss:$16 sm:%s137_s4]   ;;  %v135_v47 = vsel %vm10_vm1, %v2388_v45, %v130_v43  ;;  %s1610_s4 = smov 12  ;;  %v2703_v56 = vld [vmem:[%s5015_s0 + $0x385] ss:$16 sm:%s1607_s25]   ;;  %s61_s25 = smov 3 }
  0xa8   :  { %v3960_v16 = vpop.permute.xlu0 %503   ;;  %v572_v24 = vpop.permute.xlu1 %571   ;;  %1555 = vrot.lane.b32.xlu0 %v1554_v42, %s2883_s27  ;;  %v2366_v48 = vld [vmem:[%s5015_s0 + $0x100] ss:$16 sm:%s40_s12]   ;;  %v140_v50 = vsel %vm14_vm2, %v2389_v46, %v135_v47  ;;  %s1584_s12 = smov 3 }
  0xa9   :  { %2482 = vst.msk [vmem:[%s5016_s1 + $0x20] sm:$0xff] %vm551_vm6, %v572_v24   ;;  %v2367_v51 = vld [vmem:[%s5015_s0 + $0x100] ss:$16 sm:%s43_s17]   ;;  %s158_s17 = smov 192 }
  0xaa   :  { %v2368_v52 = vld [vmem:[%s5015_s0 + $0x100] ss:$16 sm:%s48_s18]   ;;  %2390 = vst.msk [vmem:[%s5016_s1 + $0x30] sm:$0xff] %vm16_vm3, %v140_v50   ;;  %v46_v53 = vsel %vm6_vm0, %v2367_v51, %v2366_v48 }
  0xab   :  { %v2369_v55 = vld [vmem:[%s5015_s0 + $0x100] ss:$16 sm:%s53_s22]   ;;  %2424 = vst.msk [vmem:[%s5016_s1 + $0x30] sm:$0xff] %vm185_vm4, %v3730_v44   ;;  %v51_v44 = vsel %vm10_vm1, %v2368_v52, %v46_v53  ;;  %s1747_s22 = smov 12 }
  0xac   :  { %v550_v35 = vpop.permute.xlu0 %549   ;;  %v618_v12 = vpop.permute.xlu1 %617   ;;  %v2704_v57 = vld [vmem:[%s5015_s0 + $0x385] ss:$16 sm:%s1610_s4]   ;;  %v56_v62 = vsel %vm14_vm2, %v2369_v55, %v51_v44  ;;  %2463 = vst.msk [vmem:[%s5016_s1 + $0x30] sm:$0xff] %vm368_vm5, %v3872_v49   ;;  %s2885_s4 = smov 24  }
  0xad   :  { %552 = vst.msk [vmem:[%s5016_s1] sm:$0xff] %vm551_vm6, %v550_v35   ;;  %2492 = vst.msk [vmem:[%s5016_s1 + $0x28] sm:$0xff] %vm551_vm6, %v618_v12   ;;  %v2705_v58 = vld [vmem:[%s5015_s0 + $0x385] ss:$16 sm:%s1615_s5]   ;;  %v1613_v63 = vsel %vm6_vm0, %v2704_v57, %v2703_v56  ;;  %s1675_s5 = smov 3 }
  0xae   :  { %v2706_v0 = vld [vmem:[%s5015_s0 + $0x385] ss:$16 sm:%s1620_s11]   ;;  %2370 = vst.msk [vmem:[%s5016_s1 + $0x10] sm:$0xff] %vm16_vm3, %v56_v62   ;;  %v1618_v49 = vsel %vm10_vm1, %v2705_v58, %v1613_v63  ;;  %s1683_s11 = smov 48 }
  0xaf   :  { %v2698_v22 = vld [vmem:[%s5015_s0 + $0x185] ss:$16 sm:%s1584_s12]   ;;  %2419 = vst.msk [vmem:[%s5016_s1 + $0x10] sm:$0xff] %vm185_vm4, %v3752_v54   ;;  %v1623_v54 = vsel %vm14_vm2, %v2706_v0, %v1618_v49 }
  0xb0   :  { %v595_v14 = vpop.permute.xlu0 %594   ;;  %v664_v59 = vpop.permute.xlu1 %663   ;;  %v2699_v1 = vld [vmem:[%s5015_s0 + $0x185] ss:$16 sm:%s1587_s19]   ;;  %v2391_v7 = vld [vmem:[%s5015_s0 + $0x380] ss:$16 sm:%s145_s30]   ;;  %s69_s30 = smov 48  ;;  %s1734_s19 = smov 192 }
  0xb1   :  { %2487 = vst.msk [vmem:[%s5016_s1 + $0x8] sm:$0xff] %vm551_vm6, %v595_v14   ;;  %v2700_v2 = vld [vmem:[%s5015_s0 + $0x185] ss:$16 sm:%s1592_s15]   ;;  %2502 = vst.msk [vmem:[%s5016_s1 + $0x30] sm:$0xff] %vm551_vm6, %v664_v59   ;;  %v1590_v3 = vsel %vm6_vm0, %v2699_v1, %v2698_v22  ;;  %s1665_s15 = smov 192 }
  0xb2   :  { %v2701_v5 = vld [vmem:[%s5015_s0 + $0x185] ss:$16 sm:%s1597_s29]   ;;  %1624 = vrot.lane.b32.xlu1 %v1623_v54, %s2883_s27  ;;  %v1595_v9 = vsel %vm10_vm1, %v2700_v2, %v1590_v3  ;;  %s64_s29 = smov 12  ;;  %2458 = vst.msk [vmem:[%s5016_s1 + $0x10] sm:$0xff] %vm368_vm5, %v3909_v61  }
  0xb3   :  { %v2392_v10 = vld [vmem:[%s5015_s0 + $0x380] ss:$16 sm:%s148_s7]   ;;  %v1600_v61 = vsel %vm14_vm2, %v2701_v5, %v1595_v9  ;;  %v2712_v25 = vld [vmem:[%s5015_s0 + $0x204] ss:$16 sm:%s1652_s9]   ;;  %s2884_s7 = smov 32   ;;  %s1678_s9 = smov 12 }
  0xb4   :  { %v641_v8 = vpop.permute.xlu0 %640   ;;  %v151_v11 = vsel %vm6_vm0, %v2392_v10, %v2391_v7  ;;  %v2393_v13 = vld [vmem:[%s5015_s0 + $0x380] ss:$16 sm:%s153_s16]   ;;  %1601 = vrot.lane.b32.xlu0 %v1600_v61, %s2883_s27 }
  0xb5   :  { %v2394_v15 = vld [vmem:[%s5015_s0 + $0x380] ss:$16 sm:%s158_s17]   ;;  %2497 = vst.msk [vmem:[%s5016_s1 + $0x10] sm:$0xff] %vm551_vm6, %v641_v8   ;;  %v710_v17 = vpop.permute.xlu1 %709   ;;  %v156_v18 = vsel %vm10_vm1, %v2393_v13, %v151_v11  ;;  %s1688_s17 = smov 192 }
  0xb6   :  { %v2371_v19 = vld [vmem:[%s5015_s0 + $0x180] ss:$16 sm:%s61_s25]   ;;  %v161_v20 = vsel %vm14_vm2, %v2394_v15, %v156_v18  ;;  %v2713_v27 = vld [vmem:[%s5015_s0 + $0x204] ss:$16 sm:%s1655_s13]   ;;  %s1729_s13 = smov 48 }
  0xb7   :  { %v2372_v21 = vld [vmem:[%s5015_s0 + $0x180] ss:$16 sm:%s64_s29]   ;;  %2395 = vst.msk [vmem:[%s5016_s1 + $0x38] sm:$0xff] %vm16_vm3, %v161_v20   ;;  %s1638_s29 = smov 48  ;;  %v1658_v32 = vsel %vm6_vm0, %v2713_v27, %v2712_v25 }
  0xb8   :  { %v2373_v23 = vld [vmem:[%s5015_s0 + $0x180] ss:$16 sm:%s69_s30]   ;;  %v67_v24 = vsel %vm6_vm0, %v2372_v21, %v2371_v19  ;;  %2434 = vst.msk [vmem:[%s5016_s1 + $0x38] sm:$0xff] %vm185_vm4, %v3766_v60   ;;  %s1752_s30 = smov 48 }
  0xb9   :  { %v2374_v28 = vld [vmem:[%s5015_s0 + $0x180] ss:$16 sm:%s74_s8]   ;;  %v687_v26 = vpop.permute.xlu0 %686   ;;  %v72_v60 = vsel %vm10_vm1, %v2373_v23, %v67_v24  ;;  %v2714_v29 = vld [vmem:[%s5015_s0 + $0x204] ss:$16 sm:%s1660_s14]   ;;  %s1698_s8 = smov 3 }
  0xba   :  { %v77_v30 = vsel %vm14_vm2, %v2374_v28, %v72_v60  ;;  %v2715_v31 = vld [vmem:[%s5015_s0 + $0x204] ss:$16 sm:%s1665_s15]   ;;  %2473 = vst.msk [vmem:[%s5016_s1 + $0x38] sm:$0xff] %vm368_vm5, %v3935_v4   ;;  %v755_v4 = vpop.permute.xlu1 %754   ;;  %v1663_v34 = vsel %vm10_vm1, %v2714_v29, %v1658_v32 }
  0xbb   :  { %v2708_v33 = vld [vmem:[%s5015_s0 + $0x4] ss:$16 sm:%s1630_s20]   ;;  %2375 = vst.msk [vmem:[%s5016_s1 + $0x18] sm:$0xff] %vm16_vm3, %v77_v30  }
  0xbc   :  { %v2709_v35 = vld [vmem:[%s5015_s0 + $0x4] ss:$16 sm:%s1633_s28]   ;;  %2512 = vst.msk [vmem:[%s5016_s1 + $0x38] sm:$0xff] %vm551_vm6, %v710_v17   ;;  %s2072_s28 = smov 48 }
  0xbd   :  { %v2710_v38 = vld [vmem:[%s5015_s0 + $0x4] ss:$16 sm:%s1638_s29]   ;;  %2521 = vst.msk [vmem:[%s5016_s1 + $0x20] sm:$0xff] %vm734_vm7, %v755_v4   ;;  %v1636_v36 = vsel %vm6_vm0, %v2709_v35, %v2708_v33  ;;  %s1889_s29 = smov 48 }
  0xbe   :  { %2429 = vst.msk [vmem:[%s5016_s1 + $0x18] sm:$0xff] %vm185_vm4, %v3788_v6   ;;  %v1668_v6 = vsel %vm14_vm2, %v2715_v31, %v1663_v34  ;;  %v2711_v37 = vld [vmem:[%s5015_s0 + $0x4] ss:$16 sm:%s1643_s6]   ;;  %v1641_v40 = vsel %vm10_vm1, %v2710_v38, %v1636_v36  ;;  %v801_v48 = vpop.permute.xlu1 %800  }
  0xbf   :  { %v2722_v39 = vld [vmem:[%s5015_s0 + $0x284] ss:$16 sm:%s1698_s8]   ;;  %1669 = vrot.lane.b32.xlu1 %v1668_v6, %s2884_s7  ;;  %2468 = vst.msk [vmem:[%s5016_s1 + $0x18] sm:$0xff] %vm368_vm5, %v3960_v16   ;;  %v733_v16 = vpop.permute.xlu0 %732   ;;  %v1646_v12 = vsel %vm14_vm2, %v2711_v37, %v1641_v40  ;;  %s1721_s8 = smov 3 }
  0xc0   :  { %v2723_v41 = vld [vmem:[%s5015_s0 + $0x284] ss:$16 sm:%s1701_s10]   ;;  %2507 = vst.msk [vmem:[%s5016_s1 + $0x18] sm:$0xff] %vm551_vm6, %v687_v26   ;;  %1647 = vrot.lane.b32.xlu0 %v1646_v12, %s2884_s7  ;;  %s1724_s10 = smov 12 }
  0xc1   :  { %v1704_v42 = vsel %vm6_vm0, %v2723_v41, %v2722_v39  ;;  %v2724_v43 = vld [vmem:[%s5015_s0 + $0x284] ss:$16 sm:%s1706_s21]   ;;  %735 = vst.msk [vmem:[%s5016_s1] sm:$0xff] %vm734_vm7, %v733_v16   ;;  %2531 = vst.msk [vmem:[%s5016_s1 + $0x28] sm:$0xff] %vm734_vm7, %v801_v48   ;;  %s2064_s21 = smov 3 }
  0xc2   :  { %v2725_v45 = vld [vmem:[%s5015_s0 + $0x284] ss:$16 sm:%s1711_s23]   ;;  %v1709_v46 = vsel %vm10_vm1, %v2724_v43, %v1704_v42  ;;  %v847_v49 = vpop.permute.xlu1 %846   ;;  %s1881_s23 = smov 3  ;;  %v2763_v43 = vld [vmem:[%s5015_s0 + $0x283] ss:$16 sm:%s1889_s29]   ;;  %s1935_s29 = smov 48 }
  0xc3   :  { %v2717_v47 = vld [vmem:[%s5015_s0 + $0x84] ss:$16 sm:%s1675_s5]   ;;  %v1714_v50 = vsel %vm14_vm2, %v2725_v45, %v1709_v46  ;;  %v778_v57 = vpop.permute.xlu0 %777   ;;  %2541 = vst.msk [vmem:[%s5016_s1 + $0x30] sm:$0xff] %vm734_vm7, %v847_v49  }
  0xc4   :  { %v2718_v51 = vld [vmem:[%s5015_s0 + $0x84] ss:$16 sm:%s1678_s9]   ;;  %1715 = vrot.lane.b32.xlu1 %v1714_v50, %s2884_s7  ;;  %2526 = vst.msk [vmem:[%s5016_s1 + $0x8] sm:$0xff] %vm734_vm7, %v778_v57  }
  0xc5   :  { %v2719_v52 = vld [vmem:[%s5015_s0 + $0x84] ss:$16 sm:%s1683_s11]   ;;  %v1681_v14 = vsel %vm6_vm0, %v2718_v51, %v2717_v47  ;;  %v2761_v40 = vld [vmem:[%s5015_s0 + $0x283] ss:$16 sm:%s1881_s23]   ;;  %s1927_s23 = smov 3 }
  0xc6   :  { %v2720_v53 = vld [vmem:[%s5015_s0 + $0x84] ss:$16 sm:%s1688_s17]   ;;  %v1686_v55 = vsel %vm10_vm1, %v2719_v52, %v1681_v14 }
  0xc7   :  { %v2732_v56 = vld [vmem:[%s5015_s0 + $0x304] ss:$16 sm:%s1744_s24]   ;;  %v1691_v58 = vsel %vm14_vm2, %v2720_v53, %v1686_v55  ;;  %s1790_s24 = smov 3  ;;  %v824_v10 = vpop.permute.xlu0 %823  }
  0xc8   :  { %v2733_v44 = vld [vmem:[%s5015_s0 + $0x304] ss:$16 sm:%s1747_s22]   ;;  %1692 = vrot.lane.b32.xlu0 %v1691_v58, %s2884_s7  ;;  %s1793_s22 = smov 12  ;;  %2536 = vst.msk [vmem:[%s5016_s1 + $0x10] sm:$0xff] %vm734_vm7, %v824_v10  }
  0xc9   :  { %v1750_v59 = vsel %vm6_vm0, %v2733_v44, %v2732_v56  ;;  %v2734_v62 = vld [vmem:[%s5015_s0 + $0x304] ss:$16 sm:%s1752_s30]   ;;  %s1798_s30 = smov 48  ;;  %v893_v19 = vpop.permute.xlu1 %892   ;;  %v2771_v56 = vld [vmem:[%s5015_s0 + $0x303] ss:$16 sm:%s1927_s23]   ;;  %s1973_s23 = smov 3 }
  0xca   :  { %v2735_v63 = vld [vmem:[%s5015_s0 + $0x304] ss:$16 sm:%s1757_s2]   ;;  %v1755_v0 = vsel %vm10_vm1, %v2734_v62, %v1750_v59  ;;  %s1803_s2 = smov 192  ;;  %2551 = vst.msk [vmem:[%s5016_s1 + $0x38] sm:$0xff] %vm734_vm7, %v893_v19  }
  0xcb   :  { %v2727_v22 = vld [vmem:[%s5015_s0 + $0x104] ss:$16 sm:%s1721_s8]   ;;  %v1760_v1 = vsel %vm14_vm2, %v2735_v63, %v1755_v0  ;;  %s1767_s8 = smov 3  ;;  %v2773_v62 = vld [vmem:[%s5015_s0 + $0x303] ss:$16 sm:%s1935_s29]   ;;  %s1981_s29 = smov 48 }
  0xcc   :  { %v2728_v2 = vld [vmem:[%s5015_s0 + $0x104] ss:$16 sm:%s1724_s10]   ;;  %1761 = vrot.lane.b32.xlu1 %v1760_v1, %s2884_s7  ;;  %s1770_s10 = smov 12 }
  0xcd   :  { %v2729_v54 = vld [vmem:[%s5015_s0 + $0x104] ss:$16 sm:%s1729_s13]   ;;  %v1727_v3 = vsel %vm6_vm0, %v2728_v2, %v2727_v22  ;;  %s1775_s13 = smov 48  ;;  %v870_v27 = vpop.permute.xlu0 %869   ;;  %v938_v34 = vpop.permute.xlu1 %937  }
  0xce   :  { %v2730_v5 = vld [vmem:[%s5015_s0 + $0x104] ss:$16 sm:%s1734_s19]   ;;  %v1732_v7 = vsel %vm10_vm1, %v2729_v54, %v1727_v3  ;;  %s1780_s19 = smov 192  ;;  %2546 = vst.msk [vmem:[%s5016_s1 + $0x18] sm:$0xff] %vm734_vm7, %v870_v27  }
  0xcf   :  { %v2742_v8 = vld [vmem:[%s5015_s0 + $0x384] ss:$16 sm:%s1790_s24]   ;;  %v1737_v61 = vsel %vm14_vm2, %v2730_v5, %v1732_v7  ;;  %s1835_s24 = smov 3  ;;  %2560 = vst.msk [vmem:[%s5016_s1 + $0x20] sm:$0xff] %vm917_vm8, %v938_v34  }
  0xd0   :  { %v2743_v9 = vld [vmem:[%s5015_s0 + $0x384] ss:$16 sm:%s1793_s22]   ;;  %1738 = vrot.lane.b32.xlu0 %v1737_v61, %s2884_s7  ;;  %s1838_s22 = smov 12 }
  0xd1   :  { %v1796_v11 = vsel %vm6_vm0, %v2743_v9, %v2742_v8  ;;  %v2744_v13 = vld [vmem:[%s5015_s0 + $0x384] ss:$16 sm:%s1798_s30]   ;;  %s1843_s30 = smov 48  ;;  %v2751_v26 = vld [vmem:[%s5015_s0 + $0x203] ss:$16 sm:%s1835_s24]   ;;  %s1884_s24 = smov 12  ;;  %v916_v16 = vpop.permute.xlu0 %915   ;;  %v984_v48 = vpop.permute.xlu1 %983  }
  0xd2   :  { %v2745_v15 = vld [vmem:[%s5015_s0 + $0x384] ss:$16 sm:%s1803_s2]   ;;  %v1801_v17 = vsel %vm10_vm1, %v2744_v13, %v1796_v11  ;;  %s1848_s2 = smov 192  ;;  %v2752_v60 = vld [vmem:[%s5015_s0 + $0x203] ss:$16 sm:%s1838_s22]  }
  0xd3   :  { %v2737_v18 = vld [vmem:[%s5015_s0 + $0x184] ss:$16 sm:%s1767_s8]   ;;  %v1806_v20 = vsel %vm14_vm2, %v2745_v15, %v1801_v17  ;;  %s1813_s8 = smov 3  ;;  %v1841_v30 = vsel %vm6_vm0, %v2752_v60, %v2751_v26  ;;  %v2753_v32 = vld [vmem:[%s5015_s0 + $0x203] ss:$16 sm:%s1843_s30]   ;;  %s1894_s30 = smov 192 }
  0xd4   :  { %v2738_v21 = vld [vmem:[%s5015_s0 + $0x184] ss:$16 sm:%s1770_s10]   ;;  %1807 = vrot.lane.b32.xlu1 %v1806_v20, %s2884_s7  ;;  %s1816_s10 = smov 12  ;;  %v1846_v33 = vsel %vm10_vm1, %v2753_v32, %v1841_v30  ;;  %918 = vst.msk [vmem:[%s5016_s1] sm:$0xff] %vm917_vm8, %v916_v16  }
  0xd5   :  { %v2739_v23 = vld [vmem:[%s5015_s0 + $0x184] ss:$16 sm:%s1775_s13]   ;;  %v1773_v24 = vsel %vm6_vm0, %v2738_v21, %v2737_v18  ;;  %s1821_s13 = smov 48  ;;  %v2754_v31 = vld [vmem:[%s5015_s0 + $0x203] ss:$16 sm:%s1848_s2]   ;;  %v961_v57 = vpop.permute.xlu0 %960   ;;  %v1030_v49 = vpop.permute.xlu1 %1029   ;;  %s2887_s2 = smov 8  }
  0xd6   :  { %v2740_v28 = vld [vmem:[%s5015_s0 + $0x184] ss:$16 sm:%s1780_s19]   ;;  %v1778_v25 = vsel %vm10_vm1, %v2739_v23, %v1773_v24  ;;  %s1826_s19 = smov 192  ;;  %v2747_v4 = vld [vmem:[%s5015_s0 + $0x3] ss:$16 sm:%s1813_s8]   ;;  %v1851_v35 = vsel %vm14_vm2, %v2754_v31, %v1846_v33  ;;  %s1858_s8 = smov 3 }
  0xd7   :  { %v1783_v29 = vsel %vm14_vm2, %v2740_v28, %v1778_v25  ;;  %v2748_v38 = vld [vmem:[%s5015_s0 + $0x3] ss:$16 sm:%s1816_s10]   ;;  %s1861_s10 = smov 12  ;;  %2570 = vst.msk [vmem:[%s5016_s1 + $0x28] sm:$0xff] %vm917_vm8, %v984_v48   ;;  %2565 = vst.msk [vmem:[%s5016_s1 + $0x8] sm:$0xff] %vm917_vm8, %v961_v57  }
  0xd8   :  { %1784 = vrot.lane.b32.xlu0 %v1783_v29, %s2884_s7  ;;  %v2749_v6 = vld [vmem:[%s5015_s0 + $0x3] ss:$16 sm:%s1821_s13]   ;;  %1852 = vrot.lane.b32.xlu1 %v1851_v35, %s2885_s4  ;;  %v1819_v36 = vsel %vm6_vm0, %v2748_v38, %v2747_v4  ;;  %s1866_s13 = smov 48  ;;  %s2247_s7 = smov 3 }
  0xd9   :  { %v2750_v37 = vld [vmem:[%s5015_s0 + $0x3] ss:$16 sm:%s1826_s19]   ;;  %v1824_v39 = vsel %vm10_vm1, %v2749_v6, %v1819_v36  ;;  %s1871_s19 = smov 192  ;;  %2580 = vst.msk [vmem:[%s5016_s1 + $0x30] sm:$0xff] %vm917_vm8, %v1030_v49   ;;  %v1007_v10 = vpop.permute.xlu0 %1006  }
  0xda   :  { %v2762_v41 = vld [vmem:[%s5015_s0 + $0x283] ss:$16 sm:%s1884_s24]   ;;  %v1829_v12 = vsel %vm14_vm2, %v2750_v37, %v1824_v39  ;;  %s1930_s24 = smov 12  ;;  %2575 = vst.msk [vmem:[%s5016_s1 + $0x10] sm:$0xff] %vm917_vm8, %v1007_v10   ;;  %v1076_v19 = vpop.permute.xlu1 %1075  }
  0xdb   :  { %v1887_v42 = vsel %vm6_vm0, %v2762_v41, %v2761_v40  ;;  %v2764_v45 = vld [vmem:[%s5015_s0 + $0x283] ss:$16 sm:%s1894_s30]   ;;  %s1940_s30 = smov 192  ;;  %2590 = vst.msk [vmem:[%s5016_s1 + $0x38] sm:$0xff] %vm917_vm8, %v1076_v19  }
  0xdc   :  { %1830 = vrot.lane.b32.xlu0 %v1829_v12, %s2885_s4  ;;  %v1892_v46 = vsel %vm10_vm1, %v2763_v43, %v1887_v42  ;;  %v2756_v47 = vld [vmem:[%s5015_s0 + $0x83] ss:$16 sm:%s1858_s8]   ;;  %s1904_s8 = smov 3 }
  0xdd   :  { %v1897_v50 = vsel %vm14_vm2, %v2764_v45, %v1892_v46  ;;  %v2757_v51 = vld [vmem:[%s5015_s0 + $0x83] ss:$16 sm:%s1861_s10]   ;;  %s1907_s10 = smov 12  ;;  %v2800_v40 = vld [vmem:[%s5015_s0 + $0x282] ss:$16 sm:%s2064_s21]   ;;  %s2110_s21 = smov 3 }
  0xde   :  { %v2758_v52 = vld [vmem:[%s5015_s0 + $0x83] ss:$16 sm:%s1866_s13]   ;;  %1898 = vrot.lane.b32.xlu1 %v1897_v50, %s2885_s4  ;;  %v1864_v14 = vsel %vm6_vm0, %v2757_v51, %v2756_v47  ;;  %s1912_s13 = smov 48  ;;  %v1053_v27 = vpop.permute.xlu0 %1052   ;;  %v1121_v34 = vpop.permute.xlu1 %1120  }
  0xdf   :  { %v2759_v53 = vld [vmem:[%s5015_s0 + $0x83] ss:$16 sm:%s1871_s19]   ;;  %v1869_v55 = vsel %vm10_vm1, %v2758_v52, %v1864_v14  ;;  %s1917_s19 = smov 192  ;;  %2585 = vst.msk [vmem:[%s5016_s1 + $0x18] sm:$0xff] %vm917_vm8, %v1053_v27  }
  0xe0   :  { %v2772_v44 = vld [vmem:[%s5015_s0 + $0x303] ss:$16 sm:%s1930_s24]   ;;  %v1874_v58 = vsel %vm14_vm2, %v2759_v53, %v1869_v55  ;;  %s1976_s24 = smov 12  ;;  %2599 = vst.msk [vmem:[%s5016_s1 + $0x20] sm:$0xff] %vm1100_vm9, %v1121_v34  }
  0xe1   :  { %v1933_v59 = vsel %vm6_vm0, %v2772_v44, %v2771_v56  ;;  %v2774_v63 = vld [vmem:[%s5015_s0 + $0x303] ss:$16 sm:%s1940_s30]   ;;  %1875 = vrot.lane.b32.xlu0 %v1874_v58, %s2885_s4  ;;  %s1986_s30 = smov 192 }
  0xe2   :  { %v1938_v0 = vsel %vm10_vm1, %v2773_v62, %v1933_v59  ;;  %v2766_v22 = vld [vmem:[%s5015_s0 + $0x103] ss:$16 sm:%s1904_s8]   ;;  %s1950_s8 = smov 3  ;;  %v1099_v16 = vpop.permute.xlu0 %1098   ;;  %v2802_v43 = vld [vmem:[%s5015_s0 + $0x282] ss:$16 sm:%s2072_s28]   ;;  %v1167_v48 = vpop.permute.xlu1 %1166   ;;  %s2118_s28 = smov 48 }
  0xe3   :  { %v1943_v1 = vsel %vm14_vm2, %v2774_v63, %v1938_v0  ;;  %v2767_v2 = vld [vmem:[%s5015_s0 + $0x103] ss:$16 sm:%s1907_s10]   ;;  %s1953_s10 = smov 12  ;;  %1101 = vst.msk [vmem:[%s5016_s1] sm:$0xff] %vm1100_vm9, %v1099_v16   ;;  %2609 = vst.msk [vmem:[%s5016_s1 + $0x28] sm:$0xff] %vm1100_vm9, %v1167_v48  }
  0xe4   :  { %v2768_v54 = vld [vmem:[%s5015_s0 + $0x103] ss:$16 sm:%s1912_s13]   ;;  %1944 = vrot.lane.b32.xlu1 %v1943_v1, %s2885_s4  ;;  %v1910_v3 = vsel %vm6_vm0, %v2767_v2, %v2766_v22  ;;  %s1958_s13 = smov 48 }
  0xe5   :  { %v2769_v5 = vld [vmem:[%s5015_s0 + $0x103] ss:$16 sm:%s1917_s19]   ;;  %v1915_v7 = vsel %vm10_vm1, %v2768_v54, %v1910_v3  ;;  %s1963_s19 = smov 192  ;;  %v2810_v56 = vld [vmem:[%s5015_s0 + $0x302] ss:$16 sm:%s2110_s21]   ;;  %s2156_s21 = smov 3 }
  0xe6   :  { %v2781_v8 = vld [vmem:[%s5015_s0 + $0x383] ss:$16 sm:%s1973_s23]   ;;  %v1920_v61 = vsel %vm14_vm2, %v2769_v5, %v1915_v7  ;;  %s2018_s23 = smov 3  ;;  %v1144_v57 = vpop.permute.xlu0 %1143   ;;  %v2812_v62 = vld [vmem:[%s5015_s0 + $0x302] ss:$16 sm:%s2118_s28]   ;;  %v1213_v49 = vpop.permute.xlu1 %1212   ;;  %s2164_s28 = smov 48 }
  0xe7   :  { %v2782_v9 = vld [vmem:[%s5015_s0 + $0x383] ss:$16 sm:%s1976_s24]   ;;  %1921 = vrot.lane.b32.xlu0 %v1920_v61, %s2885_s4  ;;  %s2021_s24 = smov 12  ;;  %2604 = vst.msk [vmem:[%s5016_s1 + $0x8] sm:$0xff] %vm1100_vm9, %v1144_v57  }
  0xe8   :  { %v1979_v11 = vsel %vm6_vm0, %v2782_v9, %v2781_v8  ;;  %v2783_v13 = vld [vmem:[%s5015_s0 + $0x383] ss:$16 sm:%s1981_s29]   ;;  %s2026_s29 = smov 48  ;;  %v2790_v26 = vld [vmem:[%s5015_s0 + $0x202] ss:$16 sm:%s2018_s23]   ;;  %s2067_s23 = smov 12 }
  0xe9   :  { %v2784_v15 = vld [vmem:[%s5015_s0 + $0x383] ss:$16 sm:%s1986_s30]   ;;  %v1984_v17 = vsel %vm10_vm1, %v2783_v13, %v1979_v11  ;;  %s2031_s30 = smov 192  ;;  %v2791_v60 = vld [vmem:[%s5015_s0 + $0x202] ss:$16 sm:%s2021_s24]  }
  0xea   :  { %v2776_v18 = vld [vmem:[%s5015_s0 + $0x183] ss:$16 sm:%s1950_s8]   ;;  %v1989_v20 = vsel %vm14_vm2, %v2784_v15, %v1984_v17  ;;  %s1996_s8 = smov 3  ;;  %v2024_v30 = vsel %vm6_vm0, %v2791_v60, %v2790_v26  ;;  %v2792_v32 = vld [vmem:[%s5015_s0 + $0x202] ss:$16 sm:%s2026_s29]   ;;  %s2077_s29 = smov 192  ;;  %v1190_v10 = vpop.permute.xlu0 %1189  }
  0xeb   :  { %v2777_v21 = vld [vmem:[%s5015_s0 + $0x183] ss:$16 sm:%s1953_s10]   ;;  %1990 = vrot.lane.b32.xlu1 %v1989_v20, %s2885_s4  ;;  %s1999_s10 = smov 12  ;;  %v2029_v33 = vsel %vm10_vm1, %v2792_v32, %v2024_v30  ;;  %2619 = vst.msk [vmem:[%s5016_s1 + $0x30] sm:$0xff] %vm1100_vm9, %v1213_v49  }
  0xec   :  { %v2778_v23 = vld [vmem:[%s5015_s0 + $0x183] ss:$16 sm:%s1958_s13]   ;;  %v1956_v24 = vsel %vm6_vm0, %v2777_v21, %v2776_v18  ;;  %s2004_s13 = smov 48  ;;  %v2793_v31 = vld [vmem:[%s5015_s0 + $0x202] ss:$16 sm:%s2031_s30]  }
  0xed   :  { %v2779_v28 = vld [vmem:[%s5015_s0 + $0x183] ss:$16 sm:%s1963_s19]   ;;  %v1961_v25 = vsel %vm10_vm1, %v2778_v23, %v1956_v24  ;;  %s2009_s19 = smov 192  ;;  %v2786_v4 = vld [vmem:[%s5015_s0 + $0x2] ss:$16 sm:%s1996_s8]   ;;  %v2034_v35 = vsel %vm14_vm2, %v2793_v31, %v2029_v33  ;;  %s2041_s8 = smov 3 }
  0xee   :  { %v1966_v29 = vsel %vm14_vm2, %v2779_v28, %v1961_v25  ;;  %v2787_v38 = vld [vmem:[%s5015_s0 + $0x2] ss:$16 sm:%s1999_s10]   ;;  %s2044_s10 = smov 12  ;;  %2614 = vst.msk [vmem:[%s5016_s1 + $0x10] sm:$0xff] %vm1100_vm9, %v1190_v10   ;;  %v1259_v19 = vpop.permute.xlu1 %1258  }
  0xef   :  { %1967 = vrot.lane.b32.xlu0 %v1966_v29, %s2885_s4  ;;  %v2788_v6 = vld [vmem:[%s5015_s0 + $0x2] ss:$16 sm:%s2004_s13]   ;;  %2035 = vrot.lane.b32.xlu1 %v2034_v35, %s2886_s3  ;;  %v2002_v36 = vsel %vm6_vm0, %v2787_v38, %v2786_v4  ;;  %s2049_s13 = smov 48 }
  0xf0   :  { %v2789_v37 = vld [vmem:[%s5015_s0 + $0x2] ss:$16 sm:%s2009_s19]   ;;  %v2007_v39 = vsel %vm10_vm1, %v2788_v6, %v2002_v36  ;;  %s2054_s19 = smov 192  ;;  %2629 = vst.msk [vmem:[%s5016_s1 + $0x38] sm:$0xff] %vm1100_vm9, %v1259_v19  }
  0xf1   :  { %v2801_v41 = vld [vmem:[%s5015_s0 + $0x282] ss:$16 sm:%s2067_s23]   ;;  %v2012_v12 = vsel %vm14_vm2, %v2789_v37, %v2007_v39  ;;  %s2113_s23 = smov 12 }
  0xf2   :  { %v2070_v42 = vsel %vm6_vm0, %v2801_v41, %v2800_v40  ;;  %v2803_v45 = vld [vmem:[%s5015_s0 + $0x282] ss:$16 sm:%s2077_s29]   ;;  %s2123_s29 = smov 192  ;;  %v1236_v27 = vpop.permute.xlu0 %1235   ;;  %v1304_v34 = vpop.permute.xlu1 %1303   ;;  %v2839_v40 = vld [vmem:[%s5015_s0 + $0x281] ss:$16 sm:%s2247_s7]   ;;  %s2293_s7 = smov 3 }
  0xf3   :  { %2013 = vrot.lane.b32.xlu0 %v2012_v12, %s2886_s3  ;;  %v2075_v46 = vsel %vm10_vm1, %v2802_v43, %v2070_v42  ;;  %v2795_v47 = vld [vmem:[%s5015_s0 + $0x82] ss:$16 sm:%s2041_s8]   ;;  %s2087_s8 = smov 3  ;;  %2624 = vst.msk [vmem:[%s5016_s1 + $0x18] sm:$0xff] %vm1100_vm9, %v1236_v27  }
  0xf4   :  { %v2080_v50 = vsel %vm14_vm2, %v2803_v45, %v2075_v46  ;;  %v2796_v51 = vld [vmem:[%s5015_s0 + $0x82] ss:$16 sm:%s2044_s10]   ;;  %s2090_s10 = smov 12  ;;  %2638 = vst.msk [vmem:[%s5016_s1 + $0x20] sm:$0xff] %vm1283_vm10, %v1304_v34  }
  0xf5   :  { %v2797_v52 = vld [vmem:[%s5015_s0 + $0x82] ss:$16 sm:%s2049_s13]   ;;  %2081 = vrot.lane.b32.xlu1 %v2080_v50, %s2886_s3  ;;  %v2047_v14 = vsel %vm6_vm0, %v2796_v51, %v2795_v47  ;;  %s2095_s13 = smov 48 }
  0xf6   :  { %v2798_v53 = vld [vmem:[%s5015_s0 + $0x82] ss:$16 sm:%s2054_s19]   ;;  %v2052_v55 = vsel %vm10_vm1, %v2797_v52, %v2047_v14  ;;  %s2100_s19 = smov 192  ;;  %v1282_v16 = vpop.permute.xlu0 %1281   ;;  %v2841_v43 = vld [vmem:[%s5015_s0 + $0x281] ss:$16 sm:%s2255_s26]   ;;  %v1350_v48 = vpop.permute.xlu1 %1349   ;;  %s2301_s26 = smov 48 }
  0xf7   :  { %v2811_v44 = vld [vmem:[%s5015_s0 + $0x302] ss:$16 sm:%s2113_s23]   ;;  %v2057_v58 = vsel %vm14_vm2, %v2798_v53, %v2052_v55  ;;  %s2159_s23 = smov 12  ;;  %1284 = vst.msk [vmem:[%s5016_s1] sm:$0xff] %vm1283_vm10, %v1282_v16   ;;  %2648 = vst.msk [vmem:[%s5016_s1 + $0x28] sm:$0xff] %vm1283_vm10, %v1350_v48  }
  0xf8   :  { %v2116_v59 = vsel %vm6_vm0, %v2811_v44, %v2810_v56  ;;  %v2813_v63 = vld [vmem:[%s5015_s0 + $0x302] ss:$16 sm:%s2123_s29]   ;;  %2058 = vrot.lane.b32.xlu0 %v2057_v58, %s2886_s3  ;;  %s2169_s29 = smov 192 }
  0xf9   :  { %v2121_v0 = vsel %vm10_vm1, %v2812_v62, %v2116_v59  ;;  %v2805_v22 = vld [vmem:[%s5015_s0 + $0x102] ss:$16 sm:%s2087_s8]   ;;  %s2133_s8 = smov 3  ;;  %v2849_v56 = vld [vmem:[%s5015_s0 + $0x301] ss:$16 sm:%s2293_s7]   ;;  %s2339_s7 = smov 3 }
  0xfa   :  { %v2126_v1 = vsel %vm14_vm2, %v2813_v63, %v2121_v0  ;;  %v2806_v2 = vld [vmem:[%s5015_s0 + $0x102] ss:$16 sm:%s2090_s10]   ;;  %s2136_s10 = smov 12  ;;  %v1327_v57 = vpop.permute.xlu0 %1326   ;;  %v2851_v62 = vld [vmem:[%s5015_s0 + $0x301] ss:$16 sm:%s2301_s26]   ;;  %v1396_v49 = vpop.permute.xlu1 %1395   ;;  %s2347_s26 = smov 48 }
  0xfb   :  { %v2807_v54 = vld [vmem:[%s5015_s0 + $0x102] ss:$16 sm:%s2095_s13]   ;;  %2127 = vrot.lane.b32.xlu1 %v2126_v1, %s2886_s3  ;;  %v2093_v3 = vsel %vm6_vm0, %v2806_v2, %v2805_v22  ;;  %s2141_s13 = smov 48  ;;  %2643 = vst.msk [vmem:[%s5016_s1 + $0x8] sm:$0xff] %vm1283_vm10, %v1327_v57  }
  0xfc   :  { %v2808_v5 = vld [vmem:[%s5015_s0 + $0x102] ss:$16 sm:%s2100_s19]   ;;  %v2098_v7 = vsel %vm10_vm1, %v2807_v54, %v2093_v3  ;;  %s2146_s19 = smov 192  ;;  %2658 = vst.msk [vmem:[%s5016_s1 + $0x30] sm:$0xff] %vm1283_vm10, %v1396_v49  }
  0xfd   :  { %v2820_v8 = vld [vmem:[%s5015_s0 + $0x382] ss:$16 sm:%s2156_s21]   ;;  %v2103_v61 = vsel %vm14_vm2, %v2808_v5, %v2098_v7  ;;  %s2201_s21 = smov 3 }
  0xfe   :  { %v2821_v9 = vld [vmem:[%s5015_s0 + $0x382] ss:$16 sm:%s2159_s23]   ;;  %2104 = vrot.lane.b32.xlu0 %v2103_v61, %s2886_s3  ;;  %s2204_s23 = smov 12  ;;  %v1373_v10 = vpop.permute.xlu0 %1372  }
  0xff   :  { %v2162_v11 = vsel %vm6_vm0, %v2821_v9, %v2820_v8  ;;  %v2822_v13 = vld [vmem:[%s5015_s0 + $0x382] ss:$16 sm:%s2164_s28]   ;;  %s2209_s28 = smov 48  ;;  %v2829_v26 = vld [vmem:[%s5015_s0 + $0x201] ss:$16 sm:%s2201_s21]   ;;  %s2250_s21 = smov 12  ;;  %v1442_v19 = vpop.permute.xlu1 %1441  }
 0x100   :  { %v2823_v15 = vld [vmem:[%s5015_s0 + $0x382] ss:$16 sm:%s2169_s29]   ;;  %v2167_v17 = vsel %vm10_vm1, %v2822_v13, %v2162_v11  ;;  %s2214_s29 = smov 192  ;;  %v2830_v60 = vld [vmem:[%s5015_s0 + $0x201] ss:$16 sm:%s2204_s23]  }
 0x101   :  { %v2815_v18 = vld [vmem:[%s5015_s0 + $0x182] ss:$16 sm:%s2133_s8]   ;;  %v2172_v20 = vsel %vm14_vm2, %v2823_v15, %v2167_v17  ;;  %s2179_s8 = smov 3  ;;  %v2207_v30 = vsel %vm6_vm0, %v2830_v60, %v2829_v26  ;;  %v2831_v32 = vld [vmem:[%s5015_s0 + $0x201] ss:$16 sm:%s2209_s28]   ;;  %s2260_s28 = smov 192 }
 0x102   :  { %v2816_v21 = vld [vmem:[%s5015_s0 + $0x182] ss:$16 sm:%s2136_s10]   ;;  %2173 = vrot.lane.b32.xlu1 %v2172_v20, %s2886_s3  ;;  %s2182_s10 = smov 12  ;;  %v2212_v33 = vsel %vm10_vm1, %v2831_v32, %v2207_v30  ;;  %2653 = vst.msk [vmem:[%s5016_s1 + $0x10] sm:$0xff] %vm1283_vm10, %v1373_v10  }
 0x103   :  { %v2817_v23 = vld [vmem:[%s5015_s0 + $0x182] ss:$16 sm:%s2141_s13]   ;;  %v2139_v24 = vsel %vm6_vm0, %v2816_v21, %v2815_v18  ;;  %s2187_s13 = smov 48  ;;  %v2832_v31 = vld [vmem:[%s5015_s0 + $0x201] ss:$16 sm:%s2214_s29]   ;;  %v1419_v26 = vpop.permute.xlu0 %1418   ;;  %v1487_v27 = vpop.permute.xlu1 %1486  }
 0x104   :  { %v2818_v28 = vld [vmem:[%s5015_s0 + $0x182] ss:$16 sm:%s2146_s19]   ;;  %v2144_v25 = vsel %vm10_vm1, %v2817_v23, %v2139_v24  ;;  %s2192_s19 = smov 192  ;;  %v2825_v4 = vld [vmem:[%s5015_s0 + $0x1] ss:$16 sm:%s2179_s8]   ;;  %v2217_v35 = vsel %vm14_vm2, %v2832_v31, %v2212_v33  ;;  %s2224_s8 = smov 3 }
 0x105   :  { %v2149_v29 = vsel %vm14_vm2, %v2818_v28, %v2144_v25  ;;  %v2826_v38 = vld [vmem:[%s5015_s0 + $0x1] ss:$16 sm:%s2182_s10]   ;;  %s2227_s10 = smov 12  ;;  %2668 = vst.msk [vmem:[%s5016_s1 + $0x38] sm:$0xff] %vm1283_vm10, %v1442_v19   ;;  %2663 = vst.msk [vmem:[%s5016_s1 + $0x18] sm:$0xff] %vm1283_vm10, %v1419_v26  }
 0x106   :  { %2150 = vrot.lane.b32.xlu0 %v2149_v29, %s2886_s3  ;;  %v2827_v6 = vld [vmem:[%s5015_s0 + $0x1] ss:$16 sm:%s2187_s13]   ;;  %2218 = vrot.lane.b32.xlu1 %v2217_v35, %s2887_s2  ;;  %v2185_v36 = vsel %vm6_vm0, %v2826_v38, %v2825_v4  ;;  %s2232_s13 = smov 48 }
 0x107   :  { %v2828_v37 = vld [vmem:[%s5015_s0 + $0x1] ss:$16 sm:%s2192_s19]   ;;  %v2190_v39 = vsel %vm10_vm1, %v2827_v6, %v2185_v36  ;;  %s2237_s19 = smov 192  ;;  %2677 = vst.msk [vmem:[%s5016_s1 + $0x20] sm:$0xff] %vm1466_vm11, %v1487_v27   ;;  %v1465_v29 = vpop.permute.xlu0 %1464  }
 0x108   :  { %v2840_v41 = vld [vmem:[%s5015_s0 + $0x281] ss:$16 sm:%s2250_s21]   ;;  %v2195_v12 = vsel %vm14_vm2, %v2828_v37, %v2190_v39  ;;  %s2296_s21 = smov 12  ;;  %1467 = vst.msk [vmem:[%s5016_s1] sm:$0xff] %vm1466_vm11, %v1465_v29  }
 0x109   :  { %v2253_v42 = vsel %vm6_vm0, %v2840_v41, %v2839_v40  ;;  %v2842_v45 = vld [vmem:[%s5015_s0 + $0x281] ss:$16 sm:%s2260_s28]   ;;  %s2306_s28 = smov 192 }
 0x10a   :  { %2196 = vrot.lane.b32.xlu0 %v2195_v12, %s2887_s2  ;;  %v2258_v46 = vsel %vm10_vm1, %v2841_v43, %v2253_v42  ;;  %v2834_v47 = vld [vmem:[%s5015_s0 + $0x81] ss:$16 sm:%s2224_s8]   ;;  %s2270_s8 = smov 3  ;;  %v1533_v30 = vpop.permute.xlu1 %1532  }
 0x10b   :  { %v2263_v50 = vsel %vm14_vm2, %v2842_v45, %v2258_v46  ;;  %v2835_v51 = vld [vmem:[%s5015_s0 + $0x81] ss:$16 sm:%s2227_s10]   ;;  %s2273_s10 = smov 12  ;;  %2687 = vst.msk [vmem:[%s5016_s1 + $0x28] sm:$0xff] %vm1466_vm11, %v1533_v30  }
 0x10c   :  { %v2836_v52 = vld [vmem:[%s5015_s0 + $0x81] ss:$16 sm:%s2232_s13]   ;;  %2264 = vrot.lane.b32.xlu1 %v2263_v50, %s2887_s2  ;;  %v2230_v14 = vsel %vm6_vm0, %v2835_v51, %v2834_v47  ;;  %s2278_s13 = smov 48 }
 0x10d   :  { %v2837_v53 = vld [vmem:[%s5015_s0 + $0x81] ss:$16 sm:%s2237_s19]   ;;  %v2235_v55 = vsel %vm10_vm1, %v2836_v52, %v2230_v14  ;;  %s2283_s19 = smov 192 }
 0x10e   :  { %v2850_v44 = vld [vmem:[%s5015_s0 + $0x301] ss:$16 sm:%s2296_s21]   ;;  %v2240_v58 = vsel %vm14_vm2, %v2837_v53, %v2235_v55  ;;  %s2342_s21 = smov 12  ;;  %v1510_v32 = vpop.permute.xlu0 %1509  }
 0x10f   :  { %v2299_v59 = vsel %vm6_vm0, %v2850_v44, %v2849_v56  ;;  %v2852_v63 = vld [vmem:[%s5015_s0 + $0x301] ss:$16 sm:%s2306_s28]   ;;  %2241 = vrot.lane.b32.xlu0 %v2240_v58, %s2887_s2  ;;  %s2352_s28 = smov 192  ;;  %2682 = vst.msk [vmem:[%s5016_s1 + $0x8] sm:$0xff] %vm1466_vm11, %v1510_v32  }
 0x110   :  { %v2304_v0 = vsel %vm10_vm1, %v2851_v62, %v2299_v59  ;;  %v2844_v22 = vld [vmem:[%s5015_s0 + $0x101] ss:$16 sm:%s2270_s8]   ;;  %s2316_s8 = smov 3 }
 0x111   :  { %v2309_v1 = vsel %vm14_vm2, %v2852_v63, %v2304_v0  ;;  %v2845_v2 = vld [vmem:[%s5015_s0 + $0x101] ss:$16 sm:%s2273_s10]   ;;  %s2319_s10 = smov 12 }
 0x112   :  { %v2846_v54 = vld [vmem:[%s5015_s0 + $0x101] ss:$16 sm:%s2278_s13]   ;;  %2310 = vrot.lane.b32.xlu1 %v2309_v1, %s2887_s2  ;;  %v2276_v3 = vsel %vm6_vm0, %v2845_v2, %v2844_v22  ;;  %s2324_s13 = smov 48 }
 0x113   :  { %v2847_v5 = vld [vmem:[%s5015_s0 + $0x101] ss:$16 sm:%s2283_s19]   ;;  %v2281_v7 = vsel %vm10_vm1, %v2846_v54, %v2276_v3  ;;  %s2329_s19 = smov 192 }
 0x114   :  { %v2859_v8 = vld [vmem:[%s5015_s0 + $0x381] ss:$16 sm:%s2339_s7]   ;;  %v2286_v61 = vsel %vm14_vm2, %v2847_v5, %v2281_v7 }
 0x115   :  { %v2860_v9 = vld [vmem:[%s5015_s0 + $0x381] ss:$16 sm:%s2342_s21]   ;;  %2287 = vrot.lane.b32.xlu0 %v2286_v61, %s2887_s2 }
 0x116   :  { %v2345_v11 = vsel %vm6_vm0, %v2860_v9, %v2859_v8  ;;  %v2861_v13 = vld [vmem:[%s5015_s0 + $0x381] ss:$16 sm:%s2347_s26]   ;;  %v1579_v31 = vpop.permute.xlu1 %1578  }
 0x117   :  { %v2862_v15 = vld [vmem:[%s5015_s0 + $0x381] ss:$16 sm:%s2352_s28]   ;;  %v2350_v17 = vsel %vm10_vm1, %v2861_v13, %v2345_v11  ;;  %2697 = vst.msk [vmem:[%s5016_s1 + $0x30] sm:$0xff] %vm1466_vm11, %v1579_v31  }
 0x118   :  { %v2854_v18 = vld [vmem:[%s5015_s0 + $0x181] ss:$16 sm:%s2316_s8]   ;;  %v2355_v20 = vsel %vm14_vm2, %v2862_v15, %v2350_v17 }
 0x119   :  { %v2855_v21 = vld [vmem:[%s5015_s0 + $0x181] ss:$16 sm:%s2319_s10]   ;;  %2356 = vrot.lane.b32.xlu1 %v2355_v20, %s2887_s2 }
 0x11a   :  { %v2856_v23 = vld [vmem:[%s5015_s0 + $0x181] ss:$16 sm:%s2324_s13]   ;;  %v2322_v24 = vsel %vm6_vm0, %v2855_v21, %v2854_v18  ;;  %v1556_v33 = vpop.permute.xlu0 %1555  }
 0x11b   :  { %v2857_v28 = vld [vmem:[%s5015_s0 + $0x181] ss:$16 sm:%s2329_s19]   ;;  %v2327_v25 = vsel %vm10_vm1, %v2856_v23, %v2322_v24  ;;  %2692 = vst.msk [vmem:[%s5016_s1 + $0x10] sm:$0xff] %vm1466_vm11, %v1556_v33  }
 0x11c   :  { %v2332_v60 = vsel %vm14_vm2, %v2857_v28, %v2327_v25 }
 0x11d   :  { %2333 = vrot.lane.b32.xlu0 %v2332_v60, %s2887_s2 }
 0x124   :  { %v1625_v4 = vpop.permute.xlu1 %1624  }
 0x125   :  { %2707 = vst.msk [vmem:[%s5016_s1 + $0x38] sm:$0xff] %vm1466_vm11, %v1625_v4  }
 0x126   :  { %v1602_v34 = vpop.permute.xlu0 %1601  }
 0x127   :  { %2702 = vst.msk [vmem:[%s5016_s1 + $0x18] sm:$0xff] %vm1466_vm11, %v1602_v34  }
 0x131   :  { %v1670_v35 = vpop.permute.xlu1 %1669  }
 0x132   :  { %2716 = vst.msk [vmem:[%s5016_s1 + $0x20] sm:$0xff] %vm1649_vm12, %v1670_v35   ;;  %v1648_v38 = vpop.permute.xlu0 %1647  }
 0x133   :  { %1650 = vst.msk [vmem:[%s5016_s1] sm:$0xff] %vm1649_vm12, %v1648_v38  }
 0x136   :  { %v1716_v6 = vpop.permute.xlu1 %1715  }
 0x137   :  { %2726 = vst.msk [vmem:[%s5016_s1 + $0x28] sm:$0xff] %vm1649_vm12, %v1716_v6  }
 0x13a   :  { %v1693_v36 = vpop.permute.xlu0 %1692  }
 0x13b   :  { %2721 = vst.msk [vmem:[%s5016_s1 + $0x8] sm:$0xff] %vm1649_vm12, %v1693_v36  }
 0x13e   :  { %v1762_v37 = vpop.permute.xlu1 %1761  }
 0x13f   :  { %2736 = vst.msk [vmem:[%s5016_s1 + $0x30] sm:$0xff] %vm1649_vm12, %v1762_v37  }
 0x142   :  { %v1739_v39 = vpop.permute.xlu0 %1738  }
 0x143   :  { %2731 = vst.msk [vmem:[%s5016_s1 + $0x10] sm:$0xff] %vm1649_vm12, %v1739_v39  }
 0x146   :  { %v1808_v40 = vpop.permute.xlu1 %1807  }
 0x147   :  { %2746 = vst.msk [vmem:[%s5016_s1 + $0x38] sm:$0xff] %vm1649_vm12, %v1808_v40  }
 0x14a   :  { %v1785_v41 = vpop.permute.xlu0 %1784   ;;  %v1853_v16 = vpop.permute.xlu1 %1852  }
 0x14b   :  { %2741 = vst.msk [vmem:[%s5016_s1 + $0x18] sm:$0xff] %vm1649_vm12, %v1785_v41  }
 0x14c   :  { %2755 = vst.msk [vmem:[%s5016_s1 + $0x20] sm:$0xff] %vm1832_vm13, %v1853_v16  }
 0x14e   :  { %v1831_v12 = vpop.permute.xlu0 %1830  }
 0x14f   :  { %1833 = vst.msk [vmem:[%s5016_s1] sm:$0xff] %vm1832_vm13, %v1831_v12  }
 0x150   :  { %v1899_v42 = vpop.permute.xlu1 %1898  }
 0x151   :  { %2765 = vst.msk [vmem:[%s5016_s1 + $0x28] sm:$0xff] %vm1832_vm13, %v1899_v42  }
 0x153   :  { %v1876_v43 = vpop.permute.xlu0 %1875  }
 0x154   :  { %2760 = vst.msk [vmem:[%s5016_s1 + $0x8] sm:$0xff] %vm1832_vm13, %v1876_v43  }
 0x156   :  { %v1945_v45 = vpop.permute.xlu1 %1944  }
 0x157   :  { %2775 = vst.msk [vmem:[%s5016_s1 + $0x30] sm:$0xff] %vm1832_vm13, %v1945_v45  }
 0x159   :  { %v1922_v46 = vpop.permute.xlu0 %1921  }
 0x15a   :  { %2770 = vst.msk [vmem:[%s5016_s1 + $0x10] sm:$0xff] %vm1832_vm13, %v1922_v46  }
 0x15d   :  { %v1991_v47 = vpop.permute.xlu1 %1990  }
 0x15e   :  { %2785 = vst.msk [vmem:[%s5016_s1 + $0x38] sm:$0xff] %vm1832_vm13, %v1991_v47  }
 0x161   :  { %v1968_v48 = vpop.permute.xlu0 %1967   ;;  %v2036_v50 = vpop.permute.xlu1 %2035  }
 0x162   :  { %2780 = vst.msk [vmem:[%s5016_s1 + $0x18] sm:$0xff] %vm1832_vm13, %v1968_v48  }
 0x163   :  { %2794 = vst.msk [vmem:[%s5016_s1 + $0x20] sm:$0xff] %vm2015_vm14, %v2036_v50  }
 0x165   :  { %v2014_v51 = vpop.permute.xlu0 %2013  }
 0x166   :  { %2016 = vst.msk [vmem:[%s5016_s1] sm:$0xff] %vm2015_vm14, %v2014_v51  }
 0x167   :  { %v2082_v52 = vpop.permute.xlu1 %2081  }
 0x168   :  { %2804 = vst.msk [vmem:[%s5016_s1 + $0x28] sm:$0xff] %vm2015_vm14, %v2082_v52  }
 0x16a   :  { %v2059_v14 = vpop.permute.xlu0 %2058  }
 0x16b   :  { %2799 = vst.msk [vmem:[%s5016_s1 + $0x8] sm:$0xff] %vm2015_vm14, %v2059_v14  }
 0x16d   :  { %v2128_v53 = vpop.permute.xlu1 %2127  }
 0x16e   :  { %2814 = vst.msk [vmem:[%s5016_s1 + $0x30] sm:$0xff] %vm2015_vm14, %v2128_v53  }
 0x170   :  { %v2105_v55 = vpop.permute.xlu0 %2104  }
 0x171   :  { %2809 = vst.msk [vmem:[%s5016_s1 + $0x10] sm:$0xff] %vm2015_vm14, %v2105_v55  }
 0x174   :  { %v2174_v56 = vpop.permute.xlu1 %2173  }
 0x175   :  { %2824 = vst.msk [vmem:[%s5016_s1 + $0x38] sm:$0xff] %vm2015_vm14, %v2174_v56  }
 0x178   :  { %v2151_v44 = vpop.permute.xlu0 %2150   ;;  %v2219_v57 = vpop.permute.xlu1 %2218  }
 0x179   :  { %2819 = vst.msk [vmem:[%s5016_s1 + $0x18] sm:$0xff] %vm2015_vm14, %v2151_v44  }
 0x17a   :  { %2833 = vst.msk [vmem:[%s5016_s1 + $0x20] sm:$0xff] %vm2198_vm15, %v2219_v57  }
 0x17c   :  { %v2197_v58 = vpop.permute.xlu0 %2196  }
 0x17d   :  { %2199 = vst.msk [vmem:[%s5016_s1] sm:$0xff] %vm2198_vm15, %v2197_v58  }
 0x17e   :  { %v2265_v59 = vpop.permute.xlu1 %2264  }
 0x17f   :  { %2843 = vst.msk [vmem:[%s5016_s1 + $0x28] sm:$0xff] %vm2198_vm15, %v2265_v59  }
 0x181   :  { %v2242_v62 = vpop.permute.xlu0 %2241  }
 0x182   :  { %2838 = vst.msk [vmem:[%s5016_s1 + $0x8] sm:$0xff] %vm2198_vm15, %v2242_v62  }
 0x184   :  { %v2311_v63 = vpop.permute.xlu1 %2310  }
 0x185   :  { %2853 = vst.msk [vmem:[%s5016_s1 + $0x30] sm:$0xff] %vm2198_vm15, %v2311_v63  }
 0x187   :  { %v2288_v0 = vpop.permute.xlu0 %2287  }
 0x188   :  { %2848 = vst.msk [vmem:[%s5016_s1 + $0x10] sm:$0xff] %vm2198_vm15, %v2288_v0  }
 0x18b   :  { %v2357_v22 = vpop.permute.xlu1 %2356  }
 0x18c   :  { %2863 = vst.msk [vmem:[%s5016_s1 + $0x38] sm:$0xff] %vm2198_vm15, %v2357_v22  }
 0x18f   :  { %v2334_v49 = vpop.permute.xlu0 %2333  }
 0x190   :  { %2858 = vst.msk [vmem:[%s5016_s1 + $0x18] sm:$0xff] %vm2198_vm15, %v2334_v49  }

// kernel: tile.41
= control target key start
LH: loop header
LB: loop body
LE: loop exit
PB: predicated region body
PF: predicated region fallthrough
CT: control target
= control target key end

     0   :  { %s22_s0 = inlined_call_operand.vmem [shape: f32[64], index: 0, kind: input, shape index: {}]   ;;  %s23_s1 = inlined_call_operand.vmem [shape: f32[2,64], index: 1, kind: output, shape index: {}]  }
   0x1   :  { %v4_v0 = vld [vmem:[%s22_s0] ss:$0 sm:$0xff] }
   0x2   :  { %5 = vst [vmem:[%s23_s1] sm:$0x3] %v4_v0 }

// kernel: tile.66
= control target key start
LH: loop header
LB: loop body
LE: loop exit
PB: predicated region body
PF: predicated region fallthrough
CT: control target
= control target key end

     0   :  { %vm7_vm0 = vcmask 523264   ;;  %vm13_vm1 = vcmask 1048064   ;;  %s39_s0 = inlined_call_operand.vmem [shape: f32[2,64], index: 0, kind: input, shape index: {}]   ;;  %s40_s1 = inlined_call_operand.vmem [shape: f32[1,128], index: 1, kind: output, shape index: {}]  }
   0x1   :  { %v4_v0 = vld [vmem:[%s39_s0] sm:$0x3]  ;;  %s22_s0 = smov 64  }
   0x2   :  { %5 = vst [vmem:[#allocation1] sm:$0x3] %v4_v0 }
   0x9   :  { %v10_v1 = vld [vmem:[#allocation1 + $0x1] sm:$0x1]   ;;  %v6_v2 = vld [vmem:[#allocation1] sm:$0x1]  }
   0xa   :  { %11 = vrot.lane.b32.xlu0 %v10_v1, %s22_s0  ;;  %8 = vst.msk [vmem:[#allocation0] sm:$0x1] %vm7_vm0, %v6_v2  }
  0x7c   :  { %v12_v3 = vpop.permute.xlu0 %11  }
  0x7d   :  { %14 = vst.msk [vmem:[#allocation0] sm:$0x1] %vm13_vm1, %v12_v3  }
  0x84   :  { %v18_v4 = vld [vmem:[#allocation0] sm:$0x1] }
  0x85   :  { %20 = vst [vmem:[%s40_s1] sm:$0x1] %v18_v4 }

// kernel: tile.45
= control target key start
LH: loop header
LB: loop body
LE: loop exit
PB: predicated region body
PF: predicated region fallthrough
CT: control target
= control target key end

     0   :  { %s40_s0 = inlined_call_operand.vmem [shape: f32[4], index: 0, kind: input, shape index: {}]   ;;  %s41_s1 = inlined_call_operand.vmem [shape: f32[32,4], index: 1, kind: output, shape index: {}]  }
   0x1   :  { %v4_v0 = vld [vmem:[%s40_s0] ss:$0 sm:$0xff] }
   0x2   :  { %5 = vst [vmem:[%s41_s1] sm:$0xff] %v4_v0  ;;  %12 = vst [vmem:[%s41_s1 + $0x8] sm:$0xff] %v4_v0 }
   0x3   :  { %13 = vst [vmem:[%s41_s1 + $0x10] sm:$0xff] %v4_v0  ;;  %14 = vst [vmem:[%s41_s1 + $0x18] sm:$0xff] %v4_v0 }

// kernel: tile.67
= control target key start
LH: loop header
LB: loop body
LE: loop exit
PB: predicated region body
PF: predicated region fallthrough
CT: control target
= control target key end

     0   :  { %s259_s10 = smov 124   ;;  %s260_s11 = smov 116   ;;  %vm3_vm0 = vcmask 31744   ;;  %vm9_vm1 = vcmask 1048544   ;;  %vm15_vm2 = vcmask 1015744   ;;  %vm21_vm3 = vcmask 982944   ;;  %s399_s0 = inlined_call_operand.vmem [shape: f32[32,4], index: 0, kind: input, shape index: {}]   ;;  %s400_s1 = inlined_call_operand.vmem [shape: f32[1,128], index: 1, kind: output, shape index: {}]  }
   0x1   :  { %v197_v0 = vld [vmem:[%s399_s0 + $0x1f] sm:$0x1]   ;;  %v199_v1 = vld [vmem:[%s399_s0 + $0x1d] sm:$0x1]   ;;  %v198_v2 = vld [vmem:[%s399_s0 + $0x1e] sm:$0x1]  }
   0x2   :  { %7 = vrot.lane.b32.xlu0 %v197_v0, %s259_s10  ;;  %19 = vrot.lane.b32.xlu1 %v199_v1, %s260_s11  ;;  %v200_v3 = vld [vmem:[%s399_s0 + $0x1c] sm:$0x1]   ;;  %s261_s16 = smov 120   ;;  %s262_s17 = smov 112   ;;  %v201_v4 = vld [vmem:[%s399_s0 + $0x1b] sm:$0x1]  }
   0x3   :  { %v202_v5 = vld [vmem:[%s399_s0 + $0x1a] sm:$0x1]   ;;  %s263_s22 = smov 108   ;;  %s264_s23 = smov 104   ;;  %v203_v6 = vld [vmem:[%s399_s0 + $0x19] sm:$0x1]  }
   0x4   :  { %v204_v7 = vld [vmem:[%s399_s0 + $0x18] sm:$0x1]   ;;  %s265_s28 = smov 100   ;;  %s266_s29 = smov 96   ;;  %v205_v8 = vld [vmem:[%s399_s0 + $0x17] sm:$0x1]  }
   0x5   :  { %v206_v9 = vld [vmem:[%s399_s0 + $0x16] sm:$0x1]   ;;  %v2_v10 = vld [vmem:[%s399_s0] sm:$0x1]   ;;  %s267_s7 = smov 92   ;;  %s268_s8 = smov 88  }
   0x6   :  { %13 = vrot.lane.b32.xlu0 %v198_v2, %s261_s16  ;;  %25 = vrot.lane.b32.xlu1 %v200_v3, %s262_s17  ;;  %4 = vst.msk [vmem:[#allocation0] sm:$0x1] %vm3_vm0, %v2_v10   ;;  %v207_v11 = vld [vmem:[%s399_s0 + $0x15] sm:$0x1]   ;;  %v208_v12 = vld [vmem:[%s399_s0 + $0x14] sm:$0x1]  }
   0x7   :  { %s269_s13 = smov 84   ;;  %s270_s14 = smov 80   ;;  %v209_v13 = vld [vmem:[%s399_s0 + $0x13] sm:$0x1]   ;;  %v210_v14 = vld [vmem:[%s399_s0 + $0x12] sm:$0x1]  }
   0x8   :  { %s271_s19 = smov 76   ;;  %s272_s20 = smov 72   ;;  %v211_v15 = vld [vmem:[%s399_s0 + $0x11] sm:$0x1]   ;;  %v212_v16 = vld [vmem:[%s399_s0 + $0x10] sm:$0x1]  }
   0x9   :  { %s273_s25 = smov 68   ;;  %s274_s26 = smov 64   ;;  %v213_v17 = vld [vmem:[%s399_s0 + $0xf] sm:$0x1]   ;;  %v214_v18 = vld [vmem:[%s399_s0 + $0xe] sm:$0x1]  }
   0xa   :  { %31 = vrot.lane.b32.xlu0 %v201_v4, %s263_s22  ;;  %37 = vrot.lane.b32.xlu1 %v202_v5, %s264_s23  ;;  %s275_s2 = smov 60   ;;  %s276_s3 = smov 56   ;;  %v215_v19 = vld [vmem:[%s399_s0 + $0xd] sm:$0x1]   ;;  %v216_v20 = vld [vmem:[%s399_s0 + $0xc] sm:$0x1]  }
   0xb   :  { %s278_s9 = smov 48   ;;  %v217_v21 = vld [vmem:[%s399_s0 + $0xb] sm:$0x1]   ;;  %v218_v22 = vld [vmem:[%s399_s0 + $0xa] sm:$0x1]   ;;  %s280_s15 = smov 40  }
   0xc   :  { %v219_v23 = vld [vmem:[%s399_s0 + $0x9] sm:$0x1]   ;;  %v220_v24 = vld [vmem:[%s399_s0 + $0x8] sm:$0x1]   ;;  %s282_s21 = smov 32   ;;  %s284_s27 = smov 24  }
   0xd   :  { %v221_v25 = vld [vmem:[%s399_s0 + $0x7] sm:$0x1]   ;;  %v222_v26 = vld [vmem:[%s399_s0 + $0x6] sm:$0x1]   ;;  %v223_v27 = vld [vmem:[%s399_s0 + $0x5] sm:$0x1]  }
   0xe   :  { %43 = vrot.lane.b32.xlu0 %v203_v6, %s265_s28  ;;  %49 = vrot.lane.b32.xlu1 %v204_v7, %s266_s29  ;;  %v224_v28 = vld [vmem:[%s399_s0 + $0x4] sm:$0x1]   ;;  %s286_s4 = smov 16   ;;  %v225_v29 = vld [vmem:[%s399_s0 + $0x3] sm:$0x1]   ;;  %s288_s10 = smov 8  }
   0xf   :  { %v226_v30 = vld [vmem:[%s399_s0 + $0x2] sm:$0x1]   ;;  %v227_v31 = vld [vmem:[%s399_s0 + $0x1] sm:$0x1]   ;;  %s289_s0 = smov 4   ;;  %vm27_vm4 = vcmask 950144  }
  0x10   :  { %vm33_vm5 = vcmask 917344   ;;  %vm39_vm6 = vcmask 884544   ;;  %vm45_vm7 = vcmask 851744   ;;  %vm51_vm8 = vcmask 818944  }
  0x11   :  { %vm57_vm9 = vcmask 786144   ;;  %vm63_vm10 = vcmask 753344   ;;  %vm69_vm11 = vcmask 720544   ;;  %vm75_vm12 = vcmask 687744  }
  0x12   :  { %55 = vrot.lane.b32.xlu0 %v205_v8, %s267_s7  ;;  %61 = vrot.lane.b32.xlu1 %v206_v9, %s268_s8  ;;  %s277_s8 = smov 52   ;;  %vm81_vm13 = vcmask 654944   ;;  %vm87_vm14 = vcmask 622144   ;;  %vm93_vm15 = vcmask 589344   ;;  %vm99_vm0 = vcmask 556544  }
  0x16   :  { %67 = vrot.lane.b32.xlu0 %v207_v11, %s269_s13  ;;  %73 = vrot.lane.b32.xlu1 %v208_v12, %s270_s14  ;;  %s279_s14 = smov 44  }
  0x1a   :  { %79 = vrot.lane.b32.xlu0 %v209_v13, %s271_s19  ;;  %85 = vrot.lane.b32.xlu1 %v210_v14, %s272_s20  ;;  %s281_s20 = smov 36  }
  0x1e   :  { %91 = vrot.lane.b32.xlu0 %v211_v15, %s273_s25  ;;  %97 = vrot.lane.b32.xlu1 %v212_v16, %s274_s26  ;;  %s283_s26 = smov 28  }
  0x22   :  { %103 = vrot.lane.b32.xlu0 %v213_v17, %s275_s2  ;;  %109 = vrot.lane.b32.xlu1 %v214_v18, %s276_s3  ;;  %s285_s3 = smov 20  }
  0x26   :  { %115 = vrot.lane.b32.xlu0 %v215_v19, %s277_s8  ;;  %121 = vrot.lane.b32.xlu1 %v216_v20, %s278_s9  ;;  %s287_s9 = smov 12  }
  0x2a   :  { %127 = vrot.lane.b32.xlu0 %v217_v21, %s279_s14  ;;  %133 = vrot.lane.b32.xlu1 %v218_v22, %s280_s15 }
  0x2e   :  { %139 = vrot.lane.b32.xlu0 %v219_v23, %s281_s20  ;;  %145 = vrot.lane.b32.xlu1 %v220_v24, %s282_s21 }
  0x32   :  { %151 = vrot.lane.b32.xlu0 %v221_v25, %s283_s26  ;;  %157 = vrot.lane.b32.xlu1 %v222_v26, %s284_s27 }
  0x36   :  { %163 = vrot.lane.b32.xlu0 %v223_v27, %s285_s3  ;;  %169 = vrot.lane.b32.xlu1 %v224_v28, %s286_s4 }
  0x3a   :  { %175 = vrot.lane.b32.xlu0 %v225_v29, %s287_s9  ;;  %181 = vrot.lane.b32.xlu1 %v226_v30, %s288_s10 }
  0x3e   :  { %187 = vrot.lane.b32.xlu0 %v227_v31, %s289_s0 }
  0x74   :  { %v8_v32 = vpop.permute.xlu0 %7   ;;  %v20_v33 = vpop.permute.xlu1 %19  }
  0x75   :  { %10 = vst.msk [vmem:[#allocation0] sm:$0x1] %vm9_vm1, %v8_v32   ;;  %vm105_vm1 = vcmask 523744  }
  0x78   :  { %v14_v34 = vpop.permute.xlu0 %13   ;;  %v26_v35 = vpop.permute.xlu1 %25  }
  0x79   :  { %16 = vst.msk [vmem:[#allocation0] sm:$0x1] %vm15_vm2, %v14_v34   ;;  %vm111_vm2 = vcmask 490944  }
  0x7a   :  { %22 = vst.msk [vmem:[#allocation0] sm:$0x1] %vm21_vm3, %v20_v33   ;;  %vm117_vm3 = vcmask 458144  }
  0x7b   :  { %28 = vst.msk [vmem:[#allocation0] sm:$0x1] %vm27_vm4, %v26_v35   ;;  %vm123_vm4 = vcmask 425344  }
  0x7c   :  { %v32_v36 = vpop.permute.xlu0 %31   ;;  %v38_v37 = vpop.permute.xlu1 %37  }
  0x7d   :  { %34 = vst.msk [vmem:[#allocation0] sm:$0x1] %vm33_vm5, %v32_v36   ;;  %vm129_vm5 = vcmask 392544  }
  0x7e   :  { %40 = vst.msk [vmem:[#allocation0] sm:$0x1] %vm39_vm6, %v38_v37   ;;  %vm135_vm6 = vcmask 359744  }
  0x80   :  { %v44_v38 = vpop.permute.xlu0 %43   ;;  %v50_v39 = vpop.permute.xlu1 %49  }
  0x81   :  { %46 = vst.msk [vmem:[#allocation0] sm:$0x1] %vm45_vm7, %v44_v38   ;;  %vm141_vm7 = vcmask 326944  }
  0x82   :  { %52 = vst.msk [vmem:[#allocation0] sm:$0x1] %vm51_vm8, %v50_v39   ;;  %vm147_vm8 = vcmask 294144  }
  0x84   :  { %v56_v40 = vpop.permute.xlu0 %55   ;;  %v62_v41 = vpop.permute.xlu1 %61  }
  0x85   :  { %58 = vst.msk [vmem:[#allocation0] sm:$0x1] %vm57_vm9, %v56_v40   ;;  %vm153_vm9 = vcmask 261344  }
  0x86   :  { %64 = vst.msk [vmem:[#allocation0] sm:$0x1] %vm63_vm10, %v62_v41   ;;  %vm159_vm10 = vcmask 228544  }
  0x88   :  { %v68_v42 = vpop.permute.xlu0 %67   ;;  %v74_v43 = vpop.permute.xlu1 %73  }
  0x89   :  { %70 = vst.msk [vmem:[#allocation0] sm:$0x1] %vm69_vm11, %v68_v42   ;;  %vm165_vm11 = vcmask 195744  }
  0x8a   :  { %76 = vst.msk [vmem:[#allocation0] sm:$0x1] %vm75_vm12, %v74_v43   ;;  %vm171_vm12 = vcmask 162944  }
  0x8c   :  { %v80_v44 = vpop.permute.xlu0 %79   ;;  %v86_v45 = vpop.permute.xlu1 %85  }
  0x8d   :  { %82 = vst.msk [vmem:[#allocation0] sm:$0x1] %vm81_vm13, %v80_v44   ;;  %vm177_vm13 = vcmask 130144  }
  0x8e   :  { %88 = vst.msk [vmem:[#allocation0] sm:$0x1] %vm87_vm14, %v86_v45   ;;  %vm183_vm14 = vcmask 97344  }
  0x90   :  { %v92_v46 = vpop.permute.xlu0 %91   ;;  %v98_v47 = vpop.permute.xlu1 %97  }
  0x91   :  { %94 = vst.msk [vmem:[#allocation0] sm:$0x1] %vm93_vm15, %v92_v46   ;;  %vm189_vm15 = vcmask 64544  }
  0x92   :  { %100 = vst.msk [vmem:[#allocation0] sm:$0x1] %vm99_vm0, %v98_v47  }
  0x94   :  { %v104_v48 = vpop.permute.xlu0 %103   ;;  %v110_v49 = vpop.permute.xlu1 %109  }
  0x95   :  { %106 = vst.msk [vmem:[#allocation0] sm:$0x1] %vm105_vm1, %v104_v48  }
  0x96   :  { %112 = vst.msk [vmem:[#allocation0] sm:$0x1] %vm111_vm2, %v110_v49  }
  0x98   :  { %v116_v50 = vpop.permute.xlu0 %115   ;;  %v122_v51 = vpop.permute.xlu1 %121  }
  0x99   :  { %118 = vst.msk [vmem:[#allocation0] sm:$0x1] %vm117_vm3, %v116_v50  }
  0x9a   :  { %124 = vst.msk [vmem:[#allocation0] sm:$0x1] %vm123_vm4, %v122_v51  }
  0x9c   :  { %v128_v52 = vpop.permute.xlu0 %127   ;;  %v134_v53 = vpop.permute.xlu1 %133  }
  0x9d   :  { %130 = vst.msk [vmem:[#allocation0] sm:$0x1] %vm129_vm5, %v128_v52  }
  0x9e   :  { %136 = vst.msk [vmem:[#allocation0] sm:$0x1] %vm135_vm6, %v134_v53  }
  0xa0   :  { %v140_v54 = vpop.permute.xlu0 %139   ;;  %v146_v55 = vpop.permute.xlu1 %145  }
  0xa1   :  { %142 = vst.msk [vmem:[#allocation0] sm:$0x1] %vm141_vm7, %v140_v54  }
  0xa2   :  { %148 = vst.msk [vmem:[#allocation0] sm:$0x1] %vm147_vm8, %v146_v55  }
  0xa4   :  { %v152_v56 = vpop.permute.xlu0 %151   ;;  %v158_v57 = vpop.permute.xlu1 %157  }
  0xa5   :  { %154 = vst.msk [vmem:[#allocation0] sm:$0x1] %vm153_vm9, %v152_v56  }
  0xa6   :  { %160 = vst.msk [vmem:[#allocation0] sm:$0x1] %vm159_vm10, %v158_v57  }
  0xa8   :  { %v164_v58 = vpop.permute.xlu0 %163   ;;  %v170_v59 = vpop.permute.xlu1 %169  }
  0xa9   :  { %166 = vst.msk [vmem:[#allocation0] sm:$0x1] %vm165_vm11, %v164_v58  }
  0xaa   :  { %172 = vst.msk [vmem:[#allocation0] sm:$0x1] %vm171_vm12, %v170_v59  }
  0xac   :  { %v176_v60 = vpop.permute.xlu0 %175   ;;  %v182_v61 = vpop.permute.xlu1 %181  }
  0xad   :  { %178 = vst.msk [vmem:[#allocation0] sm:$0x1] %vm177_vm13, %v176_v60  }
  0xae   :  { %184 = vst.msk [vmem:[#allocation0] sm:$0x1] %vm183_vm14, %v182_v61  }
  0xb0   :  { %v188_v62 = vpop.permute.xlu0 %187  }
  0xb1   :  { %190 = vst.msk [vmem:[#allocation0] sm:$0x1] %vm189_vm15, %v188_v62  }
  0xb8   :  { %v194_v63 = vld [vmem:[#allocation0] sm:$0x1] }
  0xb9   :  { %196 = vst [vmem:[%s400_s1] sm:$0x1] %v194_v63 }

// kernel: upsample_block_forward.1
= control target key start
LH: loop header
LB: loop body
LE: loop exit
PB: predicated region body
PF: predicated region fallthrough
CT: control target
= control target key end

     0   :  { %vm48_vm0 = vcmask 648192   ;;  %v2065_v3 = vmov 0.0   ;;  %vm66_vm1 = vcmask 654338   ;;  %s2066_s30 = smov 32   ;;  %s2067_s16 = smov 80   ;;  %vm81_vm2 = vcmask 1040384   ;;  %s3025_s0 = inlined_call_operand.vmem [shape: f32[13,208], index: 0, kind: input, shape index: {}]   ;;  %s3026_s2 = inlined_call_operand.vmem [shape: f32[624,128], index: 2, kind: input, shape index: {}]   ;;  %s3027_s3 = inlined_call_operand.vmem [shape: f32[768,128], index: 3, kind: input, shape index: {}]   ;;  %s3028_s1 = inlined_call_operand.vmem [shape: f32[16,128], index: 1, kind: input, shape index: {}]   ;;  %s3029_s6 = inlined_call_operand.vmem [shape: f32[8,128], index: 6, kind: input, shape index: {}]   ;;  %s3030_s5 = inlined_call_operand.vmem [shape: f32[128,128], index: 5, kind: input, shape index: {}]   ;;  %s3031_s4 = inlined_call_operand.vmem [shape: f32[384,128], index: 4, kind: input, shape index: {}]   ;;  %s3032_s7 = inlined_call_operand.vmem [shape: f32[16,128], index: 7, kind: output, shape index: {}]  }
   0x1   :  { %v2113_v0 = vld [vmem:[%s3025_s0] sm:$0xff]  ;;  %v2118_v1 = vld [vmem:[%s3025_s0 + $0x8] sm:$0xff]  ;;  %v2123_v2 = vld [vmem:[%s3025_s0 + $0x18] sm:$0x1f]  ;;  %49 = vst.msk [vmem:[#allocation2 + $0x8] sm:$0x3] %vm48_vm0, %v2065_v3  ;;  %v71_v62 = vlaneseq }
   0x2   :  { %47 = vst [vmem:[#allocation2] sm:$0x3] %v2065_v3  ;;  %467 = vst [vmem:[#allocation3] sm:$0x1] %v2065_v3  ;;  %v82_v4 = vrot.slane %v2113_v0, 7  ;;  %v55_v5 = vrot.slane %v2113_v0, 6  ;;  %119 = vrot.lane.b32.xlu1 %v2113_v0, %s2066_s30 }
   0x3   :  { %479 = vst [vmem:[#allocation3 + $0x47] sm:$0x1] %v2065_v3  ;;  %488 = vst [vmem:[#allocation3 + $0x18] sm:$0x1] %v2065_v3  ;;  %v56_v6 = vrot.slane %v2118_v1, 6  ;;  %v168_v9 = vld [vmem:[%s3026_s2 + $0x80] sm:$0xff] }
   0x4   :  { %498 = vst [vmem:[#allocation3 + $0x57] sm:$0x1] %v2065_v3  ;;  %501 = vst [vmem:[#allocation3 + $0x58] sm:$0xc0] %v2065_v3  ;;  %v45_v7 = vld [vmem:[%s3025_s0 + $0x10] sm:$0x1f]  ;;  %88 = vrot.lane.b32.xlu0 %v82_v4, %s2067_s16 }
   0x5   :  { %967 = vst [vmem:[#allocation4] sm:$0x1] %v2065_v3  ;;  %979 = vst [vmem:[#allocation4 + $0x2f] sm:$0x1] %v2065_v3  ;;  %v84_v8 = vrot.slane %v45_v7, 7  ;;  %v169_v10 = vld [vmem:[%s3026_s2 + $0x88] sm:$0xff] }
   0x6   :  { %v152_v11 = vld [vmem:[%s3026_s2] sm:$0xff]  ;;  %65 = vst [vmem:[#allocation2] sm:$0xfc] %v55_v5  ;;  %v83_v12 = vrot.slane %v2118_v1, 7  ;;  %v86_v13 = vrot.slane %v2123_v2, 7  ;;  %v1756_v14 = vpack.c.bf16 %v169_v10, %v168_v9  ;;  %v153_v15 = vld [vmem:[%s3026_s2 + $0x8] sm:$0xff] }
   0x7   :  { %v170_v16 = vld [vmem:[%s3026_s2 + $0x90] sm:$0xff]  ;;  %v171_v17 = vld [vmem:[%s3026_s2 + $0x98] sm:$0xff]  ;;  %67 = vst.msk [vmem:[#allocation2 + $0x8] sm:$0xfc] %vm66_vm1, %v56_v6  ;;  %v57_v18 = vrot.slane %v45_v7, 6  ;;  %v85_v19 = vsel %vm81_vm2, %v82_v4, %v84_v8  ;;  %v1758_v20 = vpack.c.bf16 %v153_v15, %v152_v11  ;;  %v200_v24 = vld [vmem:[%s3026_s2 + $0x180] sm:$0xff] }
   0x8   :  { %v1760_v21 = vpack.c.bf16 %v171_v17, %v170_v16  ;;  %v154_v22 = vld [vmem:[%s3026_s2 + $0x10] sm:$0xff]  ;;  %v155_v23 = vld [vmem:[%s3026_s2 + $0x18] sm:$0xff]  ;;  %92 = vrot.lane.b32.xlu1 %v85_v19, %s2067_s16  ;;  %1757 = vmatprep.subr.bf16.mxu0 %v1756_v14  ;;  %v201_v26 = vld [vmem:[%s3026_s2 + $0x188] sm:$0xff]  ;;  %vm54_vm3 = vcmask 1041408   ;;  %v59_v34 = vrot.slane %v2123_v2, 6  ;;  %vm69_vm4 = vcmask 653312  }
   0x9   :  { %v1762_v25 = vpack.c.bf16 %v155_v23, %v154_v22  ;;  %v184_v27 = vld [vmem:[%s3026_s2 + $0x100] sm:$0xff]  ;;  %v185_v28 = vld [vmem:[%s3026_s2 + $0x108] sm:$0xff]  ;;  %1759 = vmatpush3.bf16.msra.mxu0 %v1758_v20  ;;  %v1788_v29 = vpack.c.bf16 %v201_v26, %v200_v24  ;;  %90 = vrot.lane.b32.xlu0 %v83_v12, %s2067_s16  ;;  %v202_v37 = vld [vmem:[%s3026_s2 + $0x190] sm:$0xff]  ;;  %v87_v39 = vsel %vm81_vm2, %v83_v12, %v86_v13  ;;  %vm117_vm5 = vcmask 915461  }
   0xa   :  { %v1790_v30 = vpack.c.bf16 %v185_v28, %v184_v27  ;;  %v172_v31 = vld [vmem:[%s3026_s2 + $0xa0] sm:$0xff]  ;;  %v173_v32 = vld [vmem:[%s3026_s2 + $0xa8] sm:$0xff]  ;;  %1761 = vmatprep.subr.bf16.mxu0 %v1760_v21  ;;  %v203_v38 = vld [vmem:[%s3026_s2 + $0x198] sm:$0xff]  ;;  %v60_v44 = vsel %vm54_vm3, %v56_v6, %v59_v34  ;;  %v58_v45 = vsel %vm54_vm3, %v55_v5, %v57_v18  ;;  %118 = vst.msk [vmem:[#allocation2 + $0x48] sm:$0x60] %vm117_vm5, %v2065_v3  ;;  %vm2281_vm6 = vcmp.ge.s32.totalorder %v71_v62, 80 }
   0xb   :  { %v156_v33 = vld [vmem:[%s3026_s2 + $0x20] sm:$0xff]  ;;  %v1764_v35 = vpack.c.bf16 %v173_v32, %v172_v31  ;;  %v157_v36 = vld [vmem:[%s3026_s2 + $0x28] sm:$0xff]  ;;  %1789 = vmatprep.subr.bf16.mxu1 %v1788_v29  ;;  %v1792_v40 = vpack.c.bf16 %v203_v38, %v202_v37  ;;  %v186_v41 = vld [vmem:[%s3026_s2 + $0x110] sm:$0xff]  ;;  %70 = vst.msk [vmem:[#allocation2 + $0x30] sm:$0x7f] %vm69_vm4, %v60_v44  ;;  %vm2286_vm7 = vcmp.lt.s32.totalorder %v71_v62, 288 }
   0xc   :  { %v187_v42 = vld [vmem:[%s3026_s2 + $0x118] sm:$0xff]  ;;  %v174_v43 = vld [vmem:[%s3026_s2 + $0xb0] sm:$0xff]  ;;  %123 = vrot.lane.b32.xlu1 %v45_v7, %s2066_s30  ;;  %1791 = vmatpush3.bf16.msra.mxu1 %v1790_v30  ;;  %68 = vst [vmem:[#allocation2 + $0x28] sm:$0x7f] %v58_v45  ;;  %v1766_v48 = vpack.c.bf16 %v157_v36, %v156_v33  ;;  %v204_v49 = vld [vmem:[%s3026_s2 + $0x1a0] sm:$0xff]  ;;  %vm105_vm9 = vcmask 1048193  }
   0xd   :  { %v1794_v46 = vpack.c.bf16 %v187_v42, %v186_v41  ;;  %v175_v47 = vld [vmem:[%s3026_s2 + $0xb8] sm:$0xff]  ;;  %1763 = vmatpush3.bf16.msra.mxu0 %v1762_v25  ;;  %1793 = vmatprep.subr.bf16.mxu1 %v1792_v40  ;;  %v205_v50 = vld [vmem:[%s3026_s2 + $0x1a8] sm:$0xff]  ;;  %v188_v51 = vld [vmem:[%s3026_s2 + $0x120] sm:$0xff]  ;;  %vm110_vm10 = vcmask 1046144   ;;  %vm96_vm11 = vcmask 654336   ;;  %vm108_vm12 = vcmask 261121  }
   0xe   :  { %94 = vrot.lane.b32.xlu0 %v87_v39, %s2067_s16  ;;  %1765 = vmatprep.subr.bf16.mxu0 %v1764_v35  ;;  %v1768_v52 = vpack.c.bf16 %v175_v47, %v174_v43  ;;  %v158_v53 = vld [vmem:[%s3026_s2 + $0x30] sm:$0xff]  ;;  %v159_v54 = vld [vmem:[%s3026_s2 + $0x38] sm:$0xff]  ;;  %v1796_v55 = vpack.c.bf16 %v205_v50, %v204_v49  ;;  %v189_v56 = vld [vmem:[%s3026_s2 + $0x128] sm:$0xff]  ;;  %vm134_vm13 = vcmask 1047808   ;;  %vm113_vm14 = vcmask 259072  }
   0xf   :  { %v176_v57 = vld [vmem:[%s3026_s2 + $0xc0] sm:$0xff]  ;;  %v177_v58 = vld [vmem:[%s3026_s2 + $0xc8] sm:$0xff]  ;;  %v206_v59 = vld [vmem:[%s3026_s2 + $0x1b0] sm:$0xff]  ;;  %v1798_v60 = vpack.c.bf16 %v189_v56, %v188_v51  ;;  %v1770_v63 = vpack.c.bf16 %v159_v54, %v158_v53  ;;  %vm115_vm15 = vcmask 1046789   ;;  %vm138_vm0 = vcmask 1044736  }
  0x10   :  { %125 = vrot.lane.b32.xlu1 %v2123_v2, %s2066_s30  ;;  %1795 = vmatpush3.bf16.msra.mxu1 %v1794_v46  ;;  %v207_v61 = vld [vmem:[%s3026_s2 + $0x1b8] sm:$0xff]  ;;  %v160_v0 = vld [vmem:[%s3026_s2 + $0x40] sm:$0xff]  ;;  %v190_v5 = vld [vmem:[%s3026_s2 + $0x130] sm:$0xff]  ;;  %v1772_v6 = vpack.c.bf16 %v177_v58, %v176_v57  ;;  %vm140_vm1 = vcmask 913408   ;;  %vm127_vm3 = vcmask 261120   ;;  %vm136_vm4 = vcmask 916480  }
  0x11   :  { %1767 = vmatpush3.bf16.msra.mxu0 %v1766_v48  ;;  %1797 = vmatprep.subr.bf16.mxu1 %v1796_v55  ;;  %v1800_v4 = vpack.c.bf16 %v207_v61, %v206_v59  ;;  %v191_v2 = vld [vmem:[%s3026_s2 + $0x138] sm:$0xff]  ;;  %v161_v7 = vld [vmem:[%s3026_s2 + $0x48] sm:$0xff]  ;;  %v208_v8 = vld [vmem:[%s3026_s2 + $0x1c0] sm:$0xff]  ;;  %vm480_vm5 = vcmask 1046528  }
  0x12   :  { %121 = vrot.lane.b32.xlu0 %v2118_v1, %s2066_s30  ;;  %1769 = vmatprep.subr.bf16.mxu0 %v1768_v52  ;;  %v209_v9 = vld [vmem:[%s3026_s2 + $0x1c8] sm:$0xff]  ;;  %v178_v1 = vld [vmem:[%s3026_s2 + $0xd0] sm:$0xff]  ;;  %v179_v10 = vld [vmem:[%s3026_s2 + $0xd8] sm:$0xff]  ;;  %v1802_v11 = vpack.c.bf16 %v191_v2, %v190_v5  ;;  %v1774_v14 = vpack.c.bf16 %v161_v7, %v160_v0 }
  0x13   :  { %v162_v15 = vld [vmem:[%s3026_s2 + $0x50] sm:$0xff]  ;;  %v1804_v16 = vpack.c.bf16 %v209_v9, %v208_v8  ;;  %v192_v17 = vld [vmem:[%s3026_s2 + $0x140] sm:$0xff]  ;;  %v193_v18 = vld [vmem:[%s3026_s2 + $0x148] sm:$0xff]  ;;  %v1776_v19 = vpack.c.bf16 %v179_v10, %v178_v1 }
  0x14   :  { %1799 = vmatpush3.bf16.msra.mxu1 %v1798_v60  ;;  %v163_v20 = vld [vmem:[%s3026_s2 + $0x58] sm:$0xff]  ;;  %v210_v21 = vld [vmem:[%s3026_s2 + $0x1d0] sm:$0xff]  ;;  %v180_v23 = vld [vmem:[%s3026_s2 + $0xe0] sm:$0xff]  ;;  %v1806_v25 = vpack.c.bf16 %v193_v18, %v192_v17 }
  0x15   :  { %1771 = vmatpush3.bf16.msra.mxu0 %v1770_v63  ;;  %1801 = vmatprep.subr.bf16.mxu1 %v1800_v4  ;;  %v211_v22 = vld [vmem:[%s3026_s2 + $0x1d8] sm:$0xff]  ;;  %v181_v24 = vld [vmem:[%s3026_s2 + $0xe8] sm:$0xff]  ;;  %vm74_vm8 = vmand %vm2281_vm6, %vm2286_vm7  ;;  %v1778_v26 = vpack.c.bf16 %v163_v20, %v162_v15  ;;  %vm2069_vm6 = vmmov 0  }
  0x16   :  { %1773 = vmatprep.subr.bf16.mxu0 %v1772_v6  ;;  %76 = vst.msk [vmem:[#allocation2 + $0x8] ss:$8 sm:$0x7] %vm74_vm8, %v2065_v3  ;;  %79 = vst.msk [vmem:[#allocation2 + $0x36] ss:$8 sm:$0x7] %vm74_vm8, %v2065_v3  ;;  %v1808_v28 = vpack.c.bf16 %v211_v22, %v210_v21  ;;  %v1780_v31 = vpack.c.bf16 %v181_v24, %v180_v23 }
  0x17   :  { %v164_v27 = vld [vmem:[%s3026_s2 + $0x60] sm:$0xff]  ;;  %v194_v29 = vld [vmem:[%s3026_s2 + $0x150] sm:$0xff]  ;;  %v195_v30 = vld [vmem:[%s3026_s2 + $0x158] sm:$0xff] }
  0x18   :  { %1803 = vmatpush3.bf16.msra.mxu1 %v1802_v11  ;;  %v165_v32 = vld [vmem:[%s3026_s2 + $0x68] sm:$0xff]  ;;  %v212_v33 = vld [vmem:[%s3026_s2 + $0x1e0] sm:$0xff]  ;;  %v182_v35 = vld [vmem:[%s3026_s2 + $0xf0] sm:$0xff]  ;;  %v1810_v37 = vpack.c.bf16 %v195_v30, %v194_v29 }
  0x19   :  { %1775 = vmatpush3.bf16.msra.mxu0 %v1774_v14  ;;  %1805 = vmatprep.subr.bf16.mxu1 %v1804_v16  ;;  %v213_v34 = vld [vmem:[%s3026_s2 + $0x1e8] sm:$0xff]  ;;  %v183_v36 = vld [vmem:[%s3026_s2 + $0xf8] sm:$0xff]  ;;  %v1782_v38 = vpack.c.bf16 %v165_v32, %v164_v27  ;;  %v166_v39 = vld [vmem:[%s3026_s2 + $0x70] sm:$0xff] }
  0x1a   :  { %1777 = vmatprep.subr.bf16.mxu0 %v1776_v19  ;;  %v1812_v40 = vpack.c.bf16 %v213_v34, %v212_v33  ;;  %v196_v41 = vld [vmem:[%s3026_s2 + $0x160] sm:$0xff]  ;;  %v197_v42 = vld [vmem:[%s3026_s2 + $0x168] sm:$0xff]  ;;  %v1784_v43 = vpack.c.bf16 %v183_v36, %v182_v35  ;;  %v167_v44 = vld [vmem:[%s3026_s2 + $0x78] sm:$0xff] }
  0x1b   :  { %v214_v45 = vld [vmem:[%s3026_s2 + $0x1f0] sm:$0xff]  ;;  %v215_v46 = vld [vmem:[%s3026_s2 + $0x1f8] sm:$0xff]  ;;  %v216_v47 = vld [vmem:[%s3026_s2 + $0x200] sm:$0xff]  ;;  %v1814_v49 = vpack.c.bf16 %v197_v42, %v196_v41  ;;  %v1786_v50 = vpack.c.bf16 %v167_v44, %v166_v39 }
  0x1c   :  { %1807 = vmatpush3.bf16.msra.mxu1 %v1806_v25  ;;  %v217_v48 = vld [vmem:[%s3026_s2 + $0x208] sm:$0xff]  ;;  %v1816_v51 = vpack.c.bf16 %v215_v46, %v214_v45  ;;  %v198_v52 = vld [vmem:[%s3026_s2 + $0x170] sm:$0xff]  ;;  %v199_v53 = vld [vmem:[%s3026_s2 + $0x178] sm:$0xff] }
  0x1d   :  { %1779 = vmatpush3.bf16.msra.mxu0 %v1778_v26  ;;  %1809 = vmatprep.subr.bf16.mxu1 %v1808_v28  ;;  %v1820_v54 = vpack.c.bf16 %v217_v48, %v216_v47  ;;  %v537_v55 = vld [vmem:[%s3027_s3 + $0x80] sm:$0xff]  ;;  %v538_v56 = vld [vmem:[%s3027_s3 + $0x88] sm:$0xff]  ;;  %v1818_v57 = vpack.c.bf16 %v199_v53, %v198_v52  ;;  %v218_v4 = vld [vmem:[%s3026_s2 + $0x210] sm:$0xff] }
  0x1e   :  { %1781 = vmatprep.subr.bf16.mxu0 %v1780_v31  ;;  %v1848_v58 = vpack.c.bf16 %v538_v56, %v537_v55  ;;  %v219_v5 = vld [vmem:[%s3026_s2 + $0x218] sm:$0xff]  ;;  %v142_v6 = vld [vmem:[#allocation2] sm:$0xff]  ;;  %v221_v11 = vld [vmem:[%s3026_s2 + $0x228] sm:$0xff] }
  0x1f   :  { %v1824_v9 = vpack.c.bf16 %v219_v5, %v218_v4  ;;  %v220_v1 = vld [vmem:[%s3026_s2 + $0x220] sm:$0xff]  ;;  %v522_v13 = vld [vmem:[%s3027_s3 + $0x8] sm:$0xff]  ;;  %v539_v16 = vld [vmem:[%s3027_s3 + $0x90] sm:$0xff] }
  0x20   :  { %1811 = vmatpush3.bf16.msra.mxu1 %v1810_v37  ;;  %v521_v12 = vld [vmem:[%s3027_s3] sm:$0xff]  ;;  %v540_v17 = vld [vmem:[%s3027_s3 + $0x98] sm:$0xff]  ;;  %v147_v19 = vld [vmem:[#allocation2 + $0x28] sm:$0x7f]  ;;  %v1828_v21 = vpack.c.bf16 %v221_v11, %v220_v1 }
  0x21   :  { %1783 = vmatpush3.bf16.msra.mxu0 %v1782_v38  ;;  %1813 = vmatprep.subr.bf16.mxu1 %v1812_v40  ;;  %v222_v22 = vld [vmem:[%s3026_s2 + $0x230] sm:$0xff]  ;;  %v223_v23 = vld [vmem:[%s3026_s2 + $0x238] sm:$0xff]  ;;  %v1850_v24 = vpack.c.bf16 %v522_v13, %v521_v12  ;;  %v1852_v29 = vpack.c.bf16 %v540_v17, %v539_v16  ;;  %v541_v31 = vld [vmem:[%s3027_s3 + $0xa0] sm:$0xff] }
  0x22   :  { %1785 = vmatprep.subr.bf16.mxu0 %v1784_v43  ;;  %v523_v25 = vld [vmem:[%s3027_s3 + $0x10] sm:$0xff]  ;;  %v524_v30 = vld [vmem:[%s3027_s3 + $0x18] sm:$0xff]  ;;  %v542_v32 = vld [vmem:[%s3027_s3 + $0xa8] sm:$0xff]  ;;  %v1832_v33 = vpack.c.bf16 %v223_v23, %v222_v22 }
  0x23   :  { %v224_v34 = vld [vmem:[%s3026_s2 + $0x240] sm:$0xff]  ;;  %v225_v35 = vld [vmem:[%s3026_s2 + $0x248] sm:$0xff]  ;;  %v1854_v36 = vpack.c.bf16 %v524_v30, %v523_v25  ;;  %v1856_v40 = vpack.c.bf16 %v542_v32, %v541_v31  ;;  %v543_v42 = vld [vmem:[%s3027_s3 + $0xb0] sm:$0xff] }
  0x24   :  { %1815 = vmatpush3.bf16.msra.mxu1 %v1814_v49  ;;  %v525_v37 = vld [vmem:[%s3027_s3 + $0x20] sm:$0xff]  ;;  %v526_v41 = vld [vmem:[%s3027_s3 + $0x28] sm:$0xff]  ;;  %v544_v43 = vld [vmem:[%s3027_s3 + $0xb8] sm:$0xff]  ;;  %v1836_v44 = vpack.c.bf16 %v225_v35, %v224_v34 }
  0x25   :  { %1787 = vmatpush3.bf16.msra.mxu0 %v1786_v50  ;;  %1817 = vmatprep.subr.bf16.mxu1 %v1816_v51  ;;  %v226_v45 = vld [vmem:[%s3026_s2 + $0x250] sm:$0xff]  ;;  %v227_v46 = vld [vmem:[%s3026_s2 + $0x258] sm:$0xff]  ;;  %v1858_v47 = vpack.c.bf16 %v526_v41, %v525_v37  ;;  %v1860_v49 = vpack.c.bf16 %v544_v43, %v543_v42  ;;  %v545_v52 = vld [vmem:[%s3027_s3 + $0xc0] sm:$0xff] }
  0x26   :  { %1821 = vmatprep.subr.bf16.mxu0 %v1820_v54  ;;  %v527_v50 = vld [vmem:[%s3027_s3 + $0x30] sm:$0xff]  ;;  %v528_v51 = vld [vmem:[%s3027_s3 + $0x38] sm:$0xff]  ;;  %v546_v53 = vld [vmem:[%s3027_s3 + $0xc8] sm:$0xff] }
  0x27   :  { %v228_v55 = vld [vmem:[%s3026_s2 + $0x260] sm:$0xff]  ;;  %v1862_v56 = vpack.c.bf16 %v528_v51, %v527_v50  ;;  %v550_v1 = vld [vmem:[%s3027_s3 + $0xe8] sm:$0xff]  ;;  %v551_v16 = vld [vmem:[%s3027_s3 + $0xf0] sm:$0xff] }
  0x28   :  { %1819 = vmatpush3.bf16.msra.mxu1 %v1818_v57  ;;  %v229_v57 = vld [vmem:[%s3026_s2 + $0x268] sm:$0xff]  ;;  %v533_v11 = vld [vmem:[%s3027_s3 + $0x60] sm:$0xff]  ;;  %v552_v17 = vld [vmem:[%s3027_s3 + $0xf8] sm:$0xff] }
  0x29   :  { %1849 = vmatprep.subr.bf16.mxu1 %v1848_v58  ;;  %v1864_v58 = vpack.c.bf16 %v546_v53, %v545_v52  ;;  %v534_v12 = vld [vmem:[%s3027_s3 + $0x68] sm:$0xff]  ;;  %v2507_v13 = vld [vmem:[%s3028_s1] sm:$0xff]  ;;  %v604_v30 = vld [vmem:[%s3027_s3 + $0x298] sm:$0xff] }
  0x2a   :  { %v601_v22 = vld [vmem:[%s3027_s3 + $0x280] sm:$0xff]  ;;  %v602_v23 = vld [vmem:[%s3027_s3 + $0x288] sm:$0xff]  ;;  %v587_v32 = vld [vmem:[%s3027_s3 + $0x210] sm:$0xff] }
  0x2b   :  { %v585_v25 = vld [vmem:[%s3027_s3 + $0x200] sm:$0xff]  ;;  %v570_v35 = vld [vmem:[%s3027_s3 + $0x188] sm:$0xff]  ;;  %v572_v41 = vld [vmem:[%s3027_s3 + $0x198] sm:$0xff] }
  0x2c   :  { %v569_v34 = vld [vmem:[%s3027_s3 + $0x180] sm:$0xff] }
  0x2d   :  { %v589_v52 = vld [vmem:[%s3027_s3 + $0x220] sm:$0xff] }
  0x74   :  { %v120_v59 = vpop.permute.xlu1 %119 }
  0x76   :  { %v89_v60 = vpop.permute.xlu0 %88 }
  0x77   :  { %106 = vst.msk [vmem:[#allocation2 + $0x8] sm:$0xfe] %vm105_vm9, %v89_v60 }
  0x7a   :  { %v93_v61 = vpop.permute.xlu1 %92 }
  0x7b   :  { %111 = vst.msk [vmem:[#allocation2 + $0x30] sm:$0x3f] %vm110_vm10, %v93_v61  ;;  %v91_v63 = vpop.permute.xlu0 %90 }
  0x7c   :  { %v97_v0 = vsel %vm96_vm11, %v89_v60, %v91_v63  ;;  %109 = vst.msk [vmem:[#allocation2 + $0x18] sm:$0xfe] %vm108_vm12, %v91_v63  ;;  %v530_v60 = vld [vmem:[%s3027_s3 + $0x48] sm:$0xff]  ;;  %v548_v63 = vld [vmem:[%s3027_s3 + $0xd8] sm:$0xff] }
  0x7d   :  { %107 = vst [vmem:[#allocation2 + $0x10] sm:$0xfe] %v97_v0  ;;  %135 = vst.msk [vmem:[#allocation2 + $0x18] sm:$0xff] %vm134_vm13, %v120_v59  ;;  %v1844_v0 = vpack.c.bf16 %v229_v57, %v228_v55  ;;  %v558_v55 = vld [vmem:[%s3027_s3 + $0x128] sm:$0xff] }
  0x7e   :  { %v124_v2 = vpop.permute.xlu1 %123  ;;  %v143_v7 = vld [vmem:[#allocation2 + $0x8] sm:$0xff] }
  0x7f   :  { %304 = vmatprep.mubr.f32.mxu0 %v143_v7  ;;  %v532_v7 = vld [vmem:[%s3027_s3 + $0x58] sm:$0xff] }
  0x80   :  { %v95_v8 = vpop.permute.xlu0 %94  ;;  %305 = vmatmul.mubr.f32.vlgmr.msra.gmra.mrb[0].mxu0 %v142_v6  ;;  %v531_v6 = vld [vmem:[%s3027_s3 + $0x50] sm:$0xff] }
  0x81   :  { %114 = vst.msk [vmem:[#allocation2 + $0x40] sm:$0x3f] %vm113_vm14, %v95_v8  ;;  %v98_v10 = vsel %vm96_vm11, %v93_v61, %v95_v8  ;;  %1823 = vmatpush3.bf16.msra.mxu0 %v1820_v54  ;;  %v1840_v54 = vpack.c.bf16 %v227_v46, %v226_v45  ;;  %v547_v61 = vld [vmem:[%s3027_s3 + $0xd0] sm:$0xff]  ;;  %v1870_v8 = vpack.c.bf16 %v532_v7, %v531_v6  ;;  %v556_v45 = vld [vmem:[%s3027_s3 + $0x118] sm:$0xff]  ;;  %v573_v46 = vld [vmem:[%s3027_s3 + $0x1a0] sm:$0xff] }
  0x82   :  { %116 = vst.msk [vmem:[#allocation2 + $0x40] sm:$0x60] %vm115_vm15, %v2065_v3  ;;  %112 = vst [vmem:[#allocation2 + $0x38] sm:$0x3f] %v98_v10  ;;  %v126_v14 = vpop.permute.xlu1 %125  ;;  %v148_v15 = vld [vmem:[#allocation2 + $0x30] sm:$0x7f]  ;;  %1825 = vmatprep.subr.bf16.mxu0 %v1824_v9  ;;  %v1868_v5 = vpack.c.bf16 %v548_v63, %v547_v61 }
  0x83   :  { %139 = vst.msk [vmem:[#allocation2 + $0x40] sm:$0x1f] %vm138_vm0, %v124_v2  ;;  %v129_v18 = vsel %vm127_vm3, %v124_v2, %v126_v14  ;;  %309 = vmatprep.mubr.f32.mxu0 %v148_v15  ;;  %v1874_v14 = vpack.c.bf16 %v534_v12, %v533_v11  ;;  %v470_v15 = vrot.slane %v2507_v13, 7  ;;  %v608_v61 = vld [vmem:[%s3027_s3 + $0x2b8] sm:$0xff]  ;;  %v591_v63 = vld [vmem:[%s3027_s3 + $0x230] sm:$0xff]  ;;  %v610_v11 = vld [vmem:[%s3027_s3 + $0x2c8] sm:$0xff] }
  0x84   :  { %v122_v20 = vpop.permute.xlu0 %121  ;;  %141 = vst.msk [vmem:[#allocation2 + $0x48] sm:$0x1f] %vm140_vm1, %v129_v18  ;;  %v145_v26 = vld [vmem:[#allocation2 + $0x18] sm:$0xff]  ;;  %v144_v27 = vld [vmem:[#allocation2 + $0x10] sm:$0xff]  ;;  %310 = vmatmul.mubr.f32.gmra.mrb[2].mxu0 %v147_v19  ;;  %v1876_v18 = vpack.c.bf16 %v552_v17, %v551_v16  ;;  %v594_v16 = vld [vmem:[%s3027_s3 + $0x248] sm:$0xff] }
  0x85   :  { %v128_v28 = vsel %vm127_vm3, %v120_v59, %v122_v20  ;;  %379 = vmatprep.mubr.f32.mxu1 %v145_v26  ;;  %1827 = vmatpush3.bf16.msra.mxu0 %v1824_v9  ;;  %v529_v59 = vld [vmem:[%s3027_s3 + $0x40] sm:$0xff]  ;;  %475 = vst [vmem:[#allocation3] sm:$0xfe] %v470_v15  ;;  %v535_v19 = vld [vmem:[%s3027_s3 + $0x70] sm:$0xff]  ;;  %v536_v20 = vld [vmem:[%s3027_s3 + $0x78] sm:$0xff] }
  0x86   :  { %137 = vst.msk [vmem:[#allocation2 + $0x20] sm:$0xff] %vm136_vm4, %v128_v28  ;;  %380 = vmatmul.mubr.f32.vlgmr.msra.gmra.mrb[0].mxu1 %v144_v27  ;;  %1829 = vmatprep.subr.bf16.mxu0 %v1828_v21  ;;  %v1866_v4 = vpack.c.bf16 %v530_v60, %v529_v59  ;;  %v549_v9 = vld [vmem:[%s3027_s3 + $0xe0] sm:$0xff]  ;;  %v586_v26 = vld [vmem:[%s3027_s3 + $0x208] sm:$0xff]  ;;  %v576_v59 = vld [vmem:[%s3027_s3 + $0x1b8] sm:$0xff] }
  0x87   :  { %1851 = vmatpush3.bf16.msra.mxu1 %v1850_v24  ;;  %v1872_v10 = vpack.c.bf16 %v550_v1, %v549_v9  ;;  %v1912_v24 = vpack.c.bf16 %v602_v23, %v601_v22  ;;  %v1914_v27 = vpack.c.bf16 %v586_v26, %v585_v25  ;;  %v607_v60 = vld [vmem:[%s3027_s3 + $0x2b0] sm:$0xff]  ;;  %v577_v9 = vld [vmem:[%s3027_s3 + $0x1c0] sm:$0xff]  ;;  %v578_v1 = vld [vmem:[%s3027_s3 + $0x1c8] sm:$0xff] }
  0x88   :  { %1853 = vmatprep.subr.bf16.mxu1 %v1852_v29  ;;  %v603_v29 = vld [vmem:[%s3027_s3 + $0x290] sm:$0xff]  ;;  %v561_v26 = vld [vmem:[%s3027_s3 + $0x140] sm:$0xff] }
  0x89   :  { %v149_v39 = vld [vmem:[#allocation2 + $0x38] sm:$0x7f]  ;;  %1831 = vmatpush3.bf16.msra.mxu0 %v1828_v21  ;;  %v1878_v21 = vpack.c.bf16 %v536_v20, %v535_v19  ;;  %v1916_v31 = vpack.c.bf16 %v604_v30, %v603_v29  ;;  %v559_v7 = vld [vmem:[%s3027_s3 + $0x130] sm:$0xff]  ;;  %v1896_v19 = vpack.c.bf16 %v578_v1, %v577_v9  ;;  %v614_v30 = vld [vmem:[%s3027_s3 + $0x2e8] sm:$0xff] }
  0x8a   :  { %v150_v38 = vld [vmem:[#allocation2 + $0x40] sm:$0x7f]  ;;  %1833 = vmatprep.subr.bf16.mxu0 %v1832_v33  ;;  %v611_v20 = vld [vmem:[%s3027_s3 + $0x2d0] sm:$0xff] }
  0x8b   :  { %384 = vmatprep.mubr.f32.mxu1 %v150_v38  ;;  %1855 = vmatpush3.bf16.msra.mxu1 %v1854_v36  ;;  %v151_v2 = vld [vmem:[#allocation2 + $0x48] sm:$0x7f]  ;;  %v553_v36 = vld [vmem:[%s3027_s3 + $0x100] sm:$0xff]  ;;  %v1880_v38 = vpack.c.bf16 %v570_v35, %v569_v34  ;;  %v595_v23 = vld [vmem:[%s3027_s3 + $0x250] sm:$0xff] }
  0x8c   :  { %385 = vmatmul.mubr.f32.gmra.mrb[2].mxu1 %v149_v39  ;;  %1857 = vmatprep.subr.bf16.mxu1 %v1856_v40  ;;  %v509_v28 = vld [vmem:[#allocation3] sm:$0xff]  ;;  %v554_v39 = vld [vmem:[%s3027_s3 + $0x108] sm:$0xff] }
  0x8d   :  { %v146_v48 = vld [vmem:[#allocation2 + $0x20] sm:$0xff]  ;;  %1835 = vmatpush3.bf16.msra.mxu0 %v1832_v33  ;;  %685 = vmatprep.mubr.f32.mxu1 %v2507_v13  ;;  %v588_v33 = vld [vmem:[%s3027_s3 + $0x218] sm:$0xff]  ;;  %v571_v40 = vld [vmem:[%s3027_s3 + $0x190] sm:$0xff]  ;;  %v1882_v42 = vpack.c.bf16 %v554_v39, %v553_v36 }
  0x8e   :  { %1648 = vmatprep.mubr.msk.f32.mxu0 %vm136_vm4, %v146_v48  ;;  %1837 = vmatprep.subr.bf16.mxu0 %v1836_v44  ;;  %v1918_v37 = vpack.c.bf16 %v588_v33, %v587_v32  ;;  %v1884_v43 = vpack.c.bf16 %v572_v41, %v571_v40  ;;  %v605_v48 = vld [vmem:[%s3027_s3 + $0x2a0] sm:$0xff]  ;;  %v598_v32 = vld [vmem:[%s3027_s3 + $0x268] sm:$0xff]  ;;  %v579_v36 = vld [vmem:[%s3027_s3 + $0x1d0] sm:$0xff] }
  0x8f   :  { %1859 = vmatpush3.bf16.msra.mxu1 %v1858_v47  ;;  %v574_v47 = vld [vmem:[%s3027_s3 + $0x1a8] sm:$0xff]  ;;  %v563_v40 = vld [vmem:[%s3027_s3 + $0x150] sm:$0xff]  ;;  %v564_v41 = vld [vmem:[%s3027_s3 + $0x158] sm:$0xff] }
  0x90   :  { %1861 = vmatprep.subr.bf16.mxu1 %v1860_v49  ;;  %v606_v49 = vld [vmem:[%s3027_s3 + $0x2a8] sm:$0xff]  ;;  %v1888_v53 = vpack.c.bf16 %v574_v47, %v573_v46  ;;  %v600_v46 = vld [vmem:[%s3027_s3 + $0x278] sm:$0xff] }
  0x91   :  { %1839 = vmatpush3.bf16.msra.mxu0 %v1836_v44  ;;  %v555_v44 = vld [vmem:[%s3027_s3 + $0x110] sm:$0xff]  ;;  %v1920_v51 = vpack.c.bf16 %v606_v49, %v605_v48  ;;  %v466_v35 = vld [vmem:[%s3028_s1 + $0x8] sm:$0xff] }
  0x92   :  { %1841 = vmatprep.subr.bf16.mxu0 %v1840_v54  ;;  %v1886_v50 = vpack.c.bf16 %v556_v45, %v555_v44  ;;  %v616_v44 = vld [vmem:[%s3027_s3 + $0x2f8] sm:$0xff]  ;;  %v599_v45 = vld [vmem:[%s3027_s3 + $0x270] sm:$0xff] }
  0x93   :  { %1863 = vmatpush3.bf16.msra.mxu1 %v1862_v56  ;;  %v590_v56 = vld [vmem:[%s3027_s3 + $0x228] sm:$0xff]  ;;  %v1942_v49 = vpack.c.bf16 %v600_v46, %v599_v45  ;;  %v29_v46 = vld [vmem:[%s3030_s5 + $0x10] sm:$0xff] }
  0x94   :  { %1865 = vmatprep.subr.bf16.mxu1 %v1864_v58  ;;  %v1922_v57 = vpack.c.bf16 %v590_v56, %v589_v52  ;;  %v575_v58 = vld [vmem:[%s3027_s3 + $0x1b0] sm:$0xff]  ;;  %v481_v52 = vrot.slane %v2507_v13, 1 }
  0x95   :  { %1843 = vmatpush3.bf16.msra.mxu0 %v1840_v54  ;;  %v557_v54 = vld [vmem:[%s3027_s3 + $0x120] sm:$0xff]  ;;  %v1892_v6 = vpack.c.bf16 %v576_v59, %v575_v58  ;;  %v583_v13 = vld [vmem:[%s3027_s3 + $0x1f0] sm:$0xff]  ;;  %v584_v58 = vld [vmem:[%s3027_s3 + $0x1f8] sm:$0xff] }
  0x96   :  { %1845 = vmatprep.subr.bf16.mxu0 %v1844_v0  ;;  %v567_v59 = vld [vmem:[%s3027_s3 + $0x170] sm:$0xff] }
  0x97   :  { %1867 = vmatpush3.bf16.msra.mxu1 %v1866_v4  ;;  %v1890_v4 = vpack.c.bf16 %v558_v55, %v557_v54  ;;  %v566_v55 = vld [vmem:[%s3027_s3 + $0x168] sm:$0xff] }
  0x98   :  { %1869 = vmatprep.subr.bf16.mxu1 %v1868_v5  ;;  %v1924_v5 = vpack.c.bf16 %v608_v61, %v607_v60  ;;  %v1908_v60 = vpack.c.bf16 %v584_v58, %v583_v13  ;;  %v568_v61 = vld [vmem:[%s3027_s3 + $0x178] sm:$0xff] }
  0x99   :  { %1847 = vmatpush3.bf16.msra.mxu0 %v1844_v0  ;;  %v592_v0 = vld [vmem:[%s3027_s3 + $0x238] sm:$0xff] }
  0x9a   :  { %1881 = vmatprep.subr.bf16.mxu0 %v1880_v38  ;;  %v471_v38 = vrot.slane %v466_v35, 7  ;;  %v38_v13 = vld [vmem:[%s3030_s5 + $0x58] sm:$0xff] }
  0x9b   :  { %1871 = vmatpush3.bf16.msra.mxu1 %v1870_v8  ;;  %v560_v8 = vld [vmem:[%s3027_s3 + $0x138] sm:$0xff] }
  0x9c   :  { %1649 = vmatmul.mubr.msk.f32.vlgmr.msra.gmra.mrb[4].mxu0 %vm136_vm4, %v151_v2  ;;  %1873 = vmatprep.subr.bf16.mxu1 %v1872_v10  ;;  %v1926_v2 = vpack.c.bf16 %v592_v0, %v591_v63  ;;  %v609_v10 = vld [vmem:[%s3027_s3 + $0x2c0] sm:$0xff]  ;;  %v1894_v17 = vpack.c.bf16 %v560_v8, %v559_v7  ;;  %v472_v47 = vsel %vm81_vm2, %v470_v15, %v471_v38  ;;  %v2068_v0 = vmov 0.0|0.0  }
  0x9d   :  { %1883 = vmatpush3.bf16.msra.mxu0 %v1882_v42  ;;  %v1928_v12 = vpack.c.bf16 %v610_v11, %v609_v10  ;;  %v615_v42 = vld [vmem:[%s3027_s3 + $0x2f0] sm:$0xff]  ;;  %v565_v15 = vld [vmem:[%s3027_s3 + $0x160] sm:$0xff]  ;;  %v1910_v63 = vpack.c.bf16 %v568_v61, %v567_v59 }
  0x9e   :  { %1885 = vmatprep.subr.bf16.mxu0 %v1884_v43  ;;  %v1902_v43 = vpack.c.bf16 %v564_v41, %v563_v40  ;;  %v1940_v48 = vpack.c.bf16 %v616_v44, %v615_v42  ;;  %v1906_v56 = vpack.c.bf16 %v566_v55, %v565_v15  ;;  %v35_v15 = vld [vmem:[%s3030_s5 + $0x40] sm:$0xff]  ;;  %v36_v55 = vld [vmem:[%s3030_s5 + $0x48] sm:$0xff] }
  0x9f   :  { %1875 = vmatpush3.bf16.msra.mxu1 %v1874_v14  ;;  %v593_v14 = vld [vmem:[%s3027_s3 + $0x240] sm:$0xff] }
  0xa0   :  { %1877 = vmatprep.subr.bf16.mxu1 %v1876_v18  ;;  %v1930_v18 = vpack.c.bf16 %v594_v16, %v593_v14  ;;  %v39_v59 = vld [vmem:[%s3030_s5 + $0x60] sm:$0xff] }
  0xa1   :  { %1887 = vmatpush3.bf16.msra.mxu0 %v1886_v50  ;;  %v581_v50 = vld [vmem:[%s3027_s3 + $0x1e0] sm:$0xff] }
  0xa2   :  { %1889 = vmatprep.subr.bf16.mxu0 %v1888_v53  ;;  %v482_v53 = vrot.slane %v466_v35, 1 }
  0xa3   :  { %1879 = vmatpush3.bf16.msra.mxu1 %v1878_v21  ;;  %v612_v21 = vld [vmem:[%s3027_s3 + $0x2d8] sm:$0xff] }
  0xa4   :  { %1913 = vmatprep.subr.bf16.mxu1 %v1912_v24  ;;  %v1932_v22 = vpack.c.bf16 %v612_v21, %v611_v20  ;;  %v596_v24 = vld [vmem:[%s3027_s3 + $0x258] sm:$0xff]  ;;  %487 = vst [vmem:[#allocation3 + $0x40] sm:$0x7f] %v482_v53 }
  0xa5   :  { %1891 = vmatpush3.bf16.msra.mxu0 %v1890_v4  ;;  %v1934_v25 = vpack.c.bf16 %v596_v24, %v595_v23  ;;  %v2727_v4 = vshrl.u32 %v71_v62, 7 }
  0xa6   :  { %686 = vmatmul.mubr.f32.vlgmr.msra.gmra.mrb[4].mxu1 %v509_v28  ;;  %1893 = vmatprep.subr.bf16.mxu0 %v1892_v6  ;;  %v613_v28 = vld [vmem:[%s3027_s3 + $0x2e0] sm:$0xff] }
  0xa7   :  { %1915 = vmatpush3.bf16.msra.mxu1 %v1914_v27  ;;  %v562_v27 = vld [vmem:[%s3027_s3 + $0x148] sm:$0xff]  ;;  %v1936_v33 = vpack.c.bf16 %v614_v30, %v613_v28  ;;  %690 = vmatprep.mubr.f32.mxu1 %v466_v35  ;;  %v2735_v6 = vld [vmem:[%s3029_s6] sm:$0xff] }
  0xa8   :  { %1917 = vmatprep.subr.bf16.mxu1 %v1916_v31  ;;  %v1898_v29 = vpack.c.bf16 %v562_v27, %v561_v26  ;;  %v597_v31 = vld [vmem:[%s3027_s3 + $0x260] sm:$0xff] }
  0xa9   :  { %1895 = vmatpush3.bf16.msra.mxu0 %v1894_v17  ;;  %v1938_v34 = vpack.c.bf16 %v598_v32, %v597_v31 }
  0xaa   :  { %1897 = vmatprep.subr.bf16.mxu0 %v1896_v19  ;;  %691 = vmatmul.mubr.f32.gmra.mrb[6].mxu1 %v472_v47  ;;  %v30_v47 = vld [vmem:[%s3030_s5 + $0x18] sm:$0xff] }
  0xab   :  { %1919 = vmatpush3.bf16.msra.mxu1 %v1918_v37  ;;  %v580_v37 = vld [vmem:[%s3027_s3 + $0x1d8] sm:$0xff] }
  0xac   :  { %1921 = vmatprep.subr.bf16.mxu1 %v1920_v51  ;;  %v1900_v39 = vpack.c.bf16 %v580_v37, %v579_v36  ;;  %v582_v51 = vld [vmem:[%s3027_s3 + $0x1e8] sm:$0xff] }
  0xad   :  { %1899 = vmatpush3.bf16.msra.mxu0 %v1898_v29  ;;  %v1904_v54 = vpack.c.bf16 %v582_v51, %v581_v50  ;;  %v32_v50 = vld [vmem:[%s3030_s5 + $0x28] sm:$0xff] }
  0xae   :  { %1901 = vmatprep.subr.bf16.mxu0 %v1900_v39  ;;  %v517_v39 = vld [vmem:[#allocation3 + $0x40] sm:$0xff] }
  0xaf   :  { %1923 = vmatpush3.bf16.msra.mxu1 %v1922_v57  ;;  %v483_v57 = vsel %vm480_vm5, %v481_v52, %v482_v53  ;;  %v33_v52 = vld [vmem:[%s3030_s5 + $0x30] sm:$0xff]  ;;  %v34_v53 = vld [vmem:[%s3030_s5 + $0x38] sm:$0xff] }
  0xb0   :  { %1925 = vmatprep.subr.bf16.mxu1 %v1924_v5  ;;  %v2730_v5 = vsub.s32 0, %v2727_v4 }
  0xb1   :  { %1903 = vmatpush3.bf16.msra.mxu0 %v1902_v43 }
  0xb2   :  { %1905 = vmatprep.subr.bf16.mxu0 %v1904_v54  ;;  %v233_v9 = vrot.slane %v2735_v6, %v2730_v5  ;;  %v2777_v54 = vpack.c.bf16 %v34_v53, %v33_v52  ;;  %v993_v52 = vld [vmem:[%s3031_s4] sm:$0xff]  ;;  %v994_v53 = vld [vmem:[%s3031_s4 + $0x8] sm:$0xff] }
  0xb3   :  { %1927 = vmatpush3.bf16.msra.mxu1 %v1926_v2 }
  0xb4   :  { %1929 = vmatprep.subr.bf16.mxu1 %v1928_v12 }
  0xb5   :  { %1907 = vmatpush3.bf16.msra.mxu0 %v1906_v56  ;;  %v2787_v56 = vpack.c.bf16 %v36_v55, %v35_v15  ;;  %v1026_v15 = vld [vmem:[%s3031_s4 + $0x108] sm:$0xff]  ;;  %v1970_v55 = vpack.c.bf16 %v994_v53, %v993_v52 }
  0xb6   :  { %1909 = vmatprep.subr.bf16.mxu0 %v1908_v60  ;;  %v40_v60 = vld [vmem:[%s3030_s5 + $0x68] sm:$0xff] }
  0xb7   :  { %1931 = vmatpush3.bf16.msra.mxu1 %v1930_v18  ;;  %v2807_v61 = vpack.c.bf16 %v40_v60, %v39_v59  ;;  %v1012_v59 = vld [vmem:[%s3031_s4 + $0x98] sm:$0xff]  ;;  %v1027_v60 = vld [vmem:[%s3031_s4 + $0x110] sm:$0xff] }
  0xb8   :  { %1933 = vmatprep.subr.bf16.mxu1 %v1932_v22 }
  0xb9   :  { %1911 = vmatpush3.bf16.msra.mxu0 %v1910_v63  ;;  %v41_v63 = vld [vmem:[%s3030_s5 + $0x70] sm:$0xff] }
  0xba   :  { %1944 = vmatprep.subr.bf16.mxu0 %v2068_v0 }
  0xbb   :  { %1935 = vmatpush3.bf16.msra.mxu1 %v1934_v25 }
  0xbc   :  { %1937 = vmatprep.subr.bf16.mxu1 %v1936_v33  ;;  %v27_v33 = vld [vmem:[%s3030_s5] sm:$0xff] }
  0xbf   :  { %1939 = vmatpush3.bf16.msra.mxu1 %v1938_v34  ;;  %v28_v34 = vld [vmem:[%s3030_s5 + $0x8] sm:$0xff] }
  0xc0   :  { %1941 = vmatprep.subr.bf16.mxu1 %v1940_v48  ;;  %v2747_v36 = vpack.c.bf16 %v28_v34, %v27_v33  ;;  %v2757_v48 = vpack.c.bf16 %v30_v47, %v29_v46  ;;  %v1009_v46 = vld [vmem:[%s3031_s4 + $0x80] sm:$0xff]  ;;  %v1010_v47 = vld [vmem:[%s3031_s4 + $0x88] sm:$0xff] }
  0xc3   :  { %1943 = vmatpush3.bf16.msra.mxu1 %v1942_v49  ;;  %v31_v49 = vld [vmem:[%s3030_s5 + $0x20] sm:$0xff] }
  0xc4   :  { %v2767_v51 = vpack.c.bf16 %v32_v50, %v31_v49  ;;  %v1025_v49 = vld [vmem:[%s3031_s4 + $0x100] sm:$0xff]  ;;  %v1968_v50 = vpack.c.bf16 %v1010_v47, %v1009_v46  ;;  %v1003_v47 = vld [vmem:[%s3031_s4 + $0x50] sm:$0xff] }
  0xc6   :  { %1969 = vmatprep.subr.bf16.mxu1 %v1968_v50  ;;  %v1036_v50 = vld [vmem:[%s3031_s4 + $0x158] sm:$0xff] }
 0x153   :  { %v1356_v2 = vpop.f32.mrb[0].mxu0 }
 0x154   :  { %v1357_v7 = vpop.f32.mrb[1].mxu0 }
 0x155   :  { %v1358_v8 = vadd.f32 %v1357_v7, %v1356_v2  ;;  %v42_v2 = vld [vmem:[%s3030_s5 + $0x78] sm:$0xff] }
 0x156   :  { %v2818_v7 = vpack.c.bf16 %v42_v2, %v41_v63  ;;  %v995_v2 = vld [vmem:[%s3031_s4 + $0x10] sm:$0xff] }
 0x157   :  { %v1359_v1 = vpop.f32.mrb[2].mxu0  ;;  %v307_v14 = vadd.f32 %v1358_v8, %v233_v9 }
 0x158   :  { %v1360_v11 = vpop.f32.mrb[3].mxu0 }
 0x159   :  { %v1394_v10 = vpop.f32.mrb[0].mxu1  ;;  %v1361_v62 = vadd.f32 %v1360_v11, %v1359_v1 }
 0x15a   :  { %v1395_v12 = vpop.f32.mrb[1].mxu1 }
 0x15b   :  { %v1396_v16 = vadd.f32 %v1395_v12, %v1394_v10  ;;  %v312_v17 = vadd.f32 %v1361_v62, %v233_v9  ;;  %v2823_v9 = vsub.s32 1, %v2727_v4 }
 0x15d   :  { %v382_v19 = vadd.f32 %v1396_v16, %v307_v14  ;;  %v620_v11 = vrot.slane %v2735_v6, %v2823_v9 }
 0x15f   :  { %v1397_v18 = vpop.f32.mrb[2].mxu1 }
 0x160   :  { %v1398_v20 = vpop.f32.mrb[3].mxu1 }
 0x161   :  { %v1399_v21 = vadd.f32 %v1398_v20, %v1397_v18 }
 0x163   :  { %v387_v22 = vadd.f32 %v1399_v21, %v312_v17 }
 0x16f   :  { %v1650_v23 = vpop.f32.mrb[4].mxu0 }
 0x170   :  { %v462_v24 = vadd.f32 %v1650_v23, %v387_v22  ;;  %v456_v25 = vpop.f32.mrb[5].mxu0 }
 0x171   :  { %v457_v26 = vadd.f32 %v456_v25, %v382_v19 }
 0x172   :  { %v492_v27 = vrot.slane %v462_v24, 7  ;;  %500 = vst [vmem:[#allocation3 + $0x50] sm:$0x7f] %v462_v24  ;;  %v503_v28 = vrot.slane %v462_v24, 1 }
 0x173   :  { %v491_v29 = vrot.slane %v457_v26, 7  ;;  %v502_v30 = vrot.slane %v457_v26, 1 }
 0x174   :  { %508 = vst [vmem:[#allocation3 + $0x58] sm:$0x3f] %v503_v28 }
 0x175   :  { %v493_v31 = vsel %vm81_vm2, %v491_v29, %v492_v27  ;;  %496 = vst [vmem:[#allocation3 + $0x18] sm:$0xfe] %v491_v29  ;;  %v504_v32 = vsel %vm480_vm5, %v502_v30, %v503_v28 }
 0x176   :  { %835 = vmatprep.mubr.f32.mxu1 %v504_v32 }
 0x177   :  { %836 = vmatmul.mubr.f32.vlgmr.msra.gmra.mrb[8].mxu1 %v457_v26 }
 0x178   :  { %1971 = vmatpush3.bf16.msra.mxu1 %v1970_v55  ;;  %v1022_v55 = vld [vmem:[%s3031_s4 + $0xe8] sm:$0xff] }
 0x179   :  { %v519_v38 = vld [vmem:[#allocation3 + $0x50] sm:$0xff]  ;;  %v1448_v40 = vpop.f32.mrb[4].mxu1 }
 0x17a   :  { %v1449_v41 = vpop.f32.mrb[5].mxu1 }
 0x17b   :  { %v520_v35 = vld [vmem:[#allocation3 + $0x58] sm:$0xff]  ;;  %v1450_v42 = vadd.f32 %v1449_v41, %v1448_v40 }
 0x17c   :  { %v512_v37 = vld [vmem:[#allocation3 + $0x18] sm:$0xff]  ;;  %840 = vmatprep.mubr.f32.mxu1 %v520_v35 }
 0x17d   :  { %760 = vmatprep.mubr.f32.mxu0 %v512_v37  ;;  %841 = vmatmul.mubr.f32.gmra.mrb[10].mxu1 %v519_v38  ;;  %v1451_v43 = vpop.f32.mrb[6].mxu1  ;;  %v688_v18 = vadd.f32 %v1450_v42, %v620_v11 }
 0x17e   :  { %761 = vmatmul.mubr.f32.vlgmr.msra.gmra.mrb[6].mxu0 %v483_v57  ;;  %v1452_v44 = vpop.f32.mrb[7].mxu1  ;;  %v37_v57 = vld [vmem:[%s3030_s5 + $0x50] sm:$0xff] }
 0x17f   :  { %765 = vmatprep.mubr.f32.mxu0 %v493_v31  ;;  %1946 = vmatpush3.bf16.msra.mxu0 %v2747_v36  ;;  %v1453_v45 = vadd.f32 %v1452_v44, %v1451_v43  ;;  %v2797_v58 = vpack.c.bf16 %v38_v13, %v37_v57  ;;  %v2000_v57 = vpack.c.bf16 %v1026_v15, %v1025_v49  ;;  %v1011_v13 = vld [vmem:[%s3031_s4 + $0x90] sm:$0xff]  ;;  %v1004_v49 = vld [vmem:[%s3031_s4 + $0x58] sm:$0xff]  ;;  %v1021_v15 = vld [vmem:[%s3031_s4 + $0xe0] sm:$0xff] }
 0x180   :  { %1947 = vmatprep.subr.bf16.mxu0 %v2068_v0  ;;  %v1972_v63 = vpack.c.bf16 %v1012_v59, %v1011_v13  ;;  %v1990_v52 = vpack.c.bf16 %v1004_v49, %v1003_v47  ;;  %v1992_v13 = vpack.c.bf16 %v1022_v55, %v1021_v15  ;;  %v1005_v59 = vld [vmem:[%s3031_s4 + $0x60] sm:$0xff] }
 0x181   :  { %v693_v23 = vadd.f32 %v1453_v45, %v620_v11 }
 0x182   :  { %766 = vmatmul.mubr.f32.gmra.mrb[8].mxu0 %v517_v39  ;;  %1973 = vmatprep.subr.bf16.mxu1 %v1972_v63  ;;  %v1038_v63 = vld [vmem:[%s3031_s4 + $0x168] sm:$0xff] }
 0x183   :  { %1949 = vmatpush3.bf16.msra.mxu0 %v2757_v48  ;;  %1683 = vmatprep.mubr.msk.f32.mxu0 %vm2069_vm6, %v2065_v3 }
 0x184   :  { %1950 = vmatprep.subr.bf16.mxu0 %v2068_v0 }
 0x187   :  { %1952 = vmatpush3.bf16.msra.mxu0 %v2767_v51 }
 0x188   :  { %1953 = vmatprep.subr.bf16.mxu0 %v2068_v0 }
 0x18b   :  { %1955 = vmatpush3.bf16.msra.mxu0 %v2777_v54 }
 0x18c   :  { %1956 = vmatprep.subr.bf16.mxu0 %v2068_v0 }
 0x18f   :  { %1958 = vmatpush3.bf16.msra.mxu0 %v2787_v56 }
 0x190   :  { %1959 = vmatprep.subr.bf16.mxu0 %v2068_v0 }
 0x193   :  { %1961 = vmatpush3.bf16.msra.mxu0 %v2797_v58 }
 0x194   :  { %1962 = vmatprep.subr.bf16.mxu0 %v2068_v0 }
 0x197   :  { %1964 = vmatpush3.bf16.msra.mxu0 %v2807_v61 }
 0x198   :  { %1965 = vmatprep.subr.bf16.mxu0 %v2068_v0 }
 0x19b   :  { %1967 = vmatpush3.bf16.msra.mxu0 %v2818_v7 }
 0x19c   :  { %2001 = vmatprep.subr.bf16.mxu0 %v2000_v57 }
 0x24a   :  { %v1524_v8 = vpop.f32.mrb[8].mxu1 }
 0x24b   :  { %v1525_v1 = vpop.f32.mrb[9].mxu1 }
 0x24c   :  { %v1526_v10 = vadd.f32 %v1525_v1, %v1524_v8  ;;  %v996_v8 = vld [vmem:[%s3031_s4 + $0x18] sm:$0xff] }
 0x24d   :  { %v1028_v1 = vld [vmem:[%s3031_s4 + $0x118] sm:$0xff] }
 0x24e   :  { %v2004_v11 = vpack.c.bf16 %v1028_v1, %v1027_v60  ;;  %v1006_v60 = vld [vmem:[%s3031_s4 + $0x68] sm:$0xff]  ;;  %v1023_v1 = vld [vmem:[%s3031_s4 + $0xf0] sm:$0xff] }
 0x250   :  { %v1527_v12 = vpop.f32.mrb[10].mxu1 }
 0x251   :  { %v1486_v62 = vpop.f32.mrb[6].mxu0  ;;  %v1528_v14 = vpop.f32.mrb[11].mxu1 }
 0x252   :  { %v1487_v16 = vpop.f32.mrb[7].mxu0  ;;  %v1529_v17 = vadd.f32 %v1528_v14, %v1527_v12  ;;  %v1013_v12 = vld [vmem:[%s3031_s4 + $0xa0] sm:$0xff] }
 0x253   :  { %v1488_v19 = vadd.f32 %v1487_v16, %v1486_v62  ;;  %v1014_v62 = vld [vmem:[%s3031_s4 + $0xa8] sm:$0xff]  ;;  %v1029_v14 = vld [vmem:[%s3031_s4 + $0x120] sm:$0xff] }
 0x254   :  { %v1976_v16 = vpack.c.bf16 %v1014_v62, %v1013_v12  ;;  %v1008_v62 = vld [vmem:[%s3031_s4 + $0x78] sm:$0xff] }
 0x255   :  { %v763_v20 = vadd.f32 %v1488_v19, %v688_v18  ;;  %v1489_v21 = vpop.f32.mrb[8].mxu0  ;;  %v998_v18 = vld [vmem:[%s3031_s4 + $0x28] sm:$0xff] }
 0x256   :  { %v1490_v22 = vpop.f32.mrb[9].mxu0  ;;  %v1030_v19 = vld [vmem:[%s3031_s4 + $0x128] sm:$0xff] }
 0x257   :  { %v2827_v24 = vadd.f32 %v1526_v10, %v763_v20  ;;  %v1491_v25 = vadd.f32 %v1490_v22, %v1489_v21  ;;  %v1974_v10 = vpack.c.bf16 %v996_v8, %v995_v2  ;;  %v2008_v21 = vpack.c.bf16 %v1030_v19, %v1029_v14  ;;  %v1015_v22 = vld [vmem:[%s3031_s4 + $0xb0] sm:$0xff] }
 0x258   :  { %v1994_v2 = vpack.c.bf16 %v1006_v60, %v1005_v59  ;;  %v1039_v14 = vld [vmem:[%s3031_s4 + $0x170] sm:$0xff] }
 0x259   :  { %v768_v26 = vadd.f32 %v1491_v25, %v693_v23  ;;  %v853_v28 = vmul.f32 %v2827_v24, %v2827_v24  ;;  %1975 = vmatpush3.bf16.msra.mxu1 %v1974_v10  ;;  %v1016_v23 = vld [vmem:[%s3031_s4 + $0xb8] sm:$0xff]  ;;  %v1031_v25 = vld [vmem:[%s3031_s4 + $0x130] sm:$0xff] }
 0x25a   :  { %1977 = vmatprep.subr.bf16.mxu1 %v1976_v16  ;;  %v1024_v10 = vld [vmem:[%s3031_s4 + $0xf8] sm:$0xff] }
 0x25b   :  { %v2829_v27 = vadd.f32 %v1529_v17, %v768_v26  ;;  %v997_v17 = vld [vmem:[%s3031_s4 + $0x20] sm:$0xff]  ;;  %v1980_v26 = vpack.c.bf16 %v1016_v23, %v1015_v22  ;;  %v1996_v12 = vpack.c.bf16 %v1024_v10, %v1023_v1  ;;  %v1040_v16 = vld [vmem:[%s3031_s4 + $0x178] sm:$0xff] }
 0x25c   :  { %v1978_v20 = vpack.c.bf16 %v998_v18, %v997_v17  ;;  %v2028_v18 = vpack.c.bf16 %v1040_v16, %v1039_v14 }
 0x25d   :  { %v846_v29 = vadd.f32 %v2829_v27, %v2827_v24  ;;  %v854_v30 = vmul.f32 %v2829_v27, %v2829_v27 }
 0x25e   :  { %1979 = vmatpush3.bf16.msra.mxu1 %v1978_v20 }
 0x25f   :  { %v847_v31 = vrot.slane %v846_v29, 4  ;;  %v855_v32 = vadd.f32 %v854_v30, %v853_v28  ;;  %v999_v28 = vld [vmem:[%s3031_s4 + $0x30] sm:$0xff]  ;;  %v1032_v30 = vld [vmem:[%s3031_s4 + $0x138] sm:$0xff]  ;;  %1981 = vmatprep.subr.bf16.mxu1 %v1980_v26 }
 0x261   :  { %v848_v33 = vadd.f32 %v847_v31, %v846_v29  ;;  %v856_v34 = vrot.slane %v855_v32, 4  ;;  %v1000_v29 = vld [vmem:[%s3031_s4 + $0x38] sm:$0xff] }
 0x262   :  { %v1982_v31 = vpack.c.bf16 %v1000_v29, %v999_v28  ;;  %v955_v29 = vsub.s32 2, %v2727_v4 }
 0x263   :  { %v849_v35 = vrot.slane %v848_v33, 2  ;;  %v857_v37 = vadd.f32 %v856_v34, %v855_v32  ;;  %v2012_v32 = vpack.c.bf16 %v1032_v30, %v1031_v25  ;;  %v1018_v34 = vld [vmem:[%s3031_s4 + $0xc8] sm:$0xff]  ;;  %v961_v30 = vsub.s32 3, %v2727_v4 }
 0x264   :  { %1983 = vmatpush3.bf16.msra.mxu1 %v1982_v31 }
 0x265   :  { %v850_v38 = vadd.f32 %v849_v35, %v848_v33  ;;  %v858_v39 = vrot.slane %v857_v37, 2  ;;  %v1017_v33 = vld [vmem:[%s3031_s4 + $0xc0] sm:$0xff] }
 0x266   :  { %v1033_v35 = vld [vmem:[%s3031_s4 + $0x140] sm:$0xff] }
 0x267   :  { %v851_v40 = vrot.slane %v850_v38, 1  ;;  %v859_v41 = vadd.f32 %v858_v39, %v857_v37  ;;  %v1984_v37 = vpack.c.bf16 %v1018_v34, %v1017_v33  ;;  %v1002_v39 = vld [vmem:[%s3031_s4 + $0x48] sm:$0xff] }
 0x269   :  { %v860_v42 = vrot.slane %v859_v41, 1  ;;  %v852_v43 = vadd.f32 %v851_v40, %v850_v38  ;;  %v1001_v38 = vld [vmem:[%s3031_s4 + $0x40] sm:$0xff]  ;;  %v1034_v40 = vld [vmem:[%s3031_s4 + $0x148] sm:$0xff]  ;;  %1985 = vmatprep.subr.bf16.mxu1 %v1984_v37 }
 0x26b   :  { %v861_v44 = vadd.f32 %v860_v42, %v859_v41  ;;  %v1986_v41 = vpack.c.bf16 %v1002_v39, %v1001_v38  ;;  %v2016_v42 = vpack.c.bf16 %v1034_v40, %v1033_v35  ;;  %v956_v35 = vrot.slane %v2735_v6, %v955_v29 }
 0x26c   :  { %v962_v39 = vrot.slane %v2735_v6, %v961_v30 }
 0x26d   :  { %v862_v45 = vsel %vm81_vm2, %v852_v43, %v861_v44  ;;  %1987 = vmatpush3.bf16.msra.mxu1 %v1986_v41  ;;  %v1019_v43 = vld [vmem:[%s3031_s4 + $0xd0] sm:$0xff]  ;;  %v1020_v44 = vld [vmem:[%s3031_s4 + $0xd8] sm:$0xff] }
 0x26e   :  { %1684 = vmatmul.mubr.f32.vlgmr.msra.gmra.mrb[10].mxu0 %v862_v45  ;;  %v1035_v45 = vld [vmem:[%s3031_s4 + $0x150] sm:$0xff]  ;;  %v1988_v46 = vpack.c.bf16 %v1020_v44, %v1019_v43 }
 0x26f   :  { %2003 = vmatpush3.bf16.msra.mxu0 %v2000_v57  ;;  %v2020_v53 = vpack.c.bf16 %v1036_v50, %v1035_v45  ;;  %v1037_v57 = vld [vmem:[%s3031_s4 + $0x160] sm:$0xff] }
 0x270   :  { %2005 = vmatprep.subr.bf16.mxu0 %v2004_v11  ;;  %1989 = vmatprep.subr.bf16.mxu1 %v1988_v46  ;;  %v2024_v8 = vpack.c.bf16 %v1038_v63, %v1037_v57 }
 0x271   :  { %1991 = vmatpush3.bf16.msra.mxu1 %v1990_v52 }
 0x272   :  { %1993 = vmatprep.subr.bf16.mxu1 %v1992_v13 }
 0x273   :  { %2007 = vmatpush3.bf16.msra.mxu0 %v2004_v11  ;;  %v1007_v11 = vld [vmem:[%s3031_s4 + $0x70] sm:$0xff] }
 0x274   :  { %2009 = vmatprep.subr.bf16.mxu0 %v2008_v21  ;;  %v1998_v17 = vpack.c.bf16 %v1008_v62, %v1007_v11 }
 0x275   :  { %1995 = vmatpush3.bf16.msra.mxu1 %v1994_v2 }
 0x276   :  { %1997 = vmatprep.subr.bf16.mxu1 %v1996_v12 }
 0x277   :  { %2011 = vmatpush3.bf16.msra.mxu0 %v2008_v21 }
 0x278   :  { %2013 = vmatprep.subr.bf16.mxu0 %v2012_v32 }
 0x279   :  { %1999 = vmatpush3.bf16.msra.mxu1 %v1998_v17 }
 0x27a   :  { %2032 = vmatprep.subr.bf16.mxu1 %v2068_v0 }
 0x27b   :  { %2015 = vmatpush3.bf16.msra.mxu0 %v2012_v32 }
 0x27c   :  { %2017 = vmatprep.subr.bf16.mxu0 %v2016_v42 }
 0x27f   :  { %2019 = vmatpush3.bf16.msra.mxu0 %v2016_v42 }
 0x280   :  { %2021 = vmatprep.subr.bf16.mxu0 %v2020_v53 }
 0x283   :  { %2023 = vmatpush3.bf16.msra.mxu0 %v2020_v53 }
 0x284   :  { %2025 = vmatprep.subr.bf16.mxu0 %v2024_v8 }
 0x287   :  { %2027 = vmatpush3.bf16.msra.mxu0 %v2024_v8 }
 0x288   :  { %2029 = vmatprep.subr.bf16.mxu0 %v2028_v18 }
 0x28b   :  { %2031 = vmatpush3.bf16.msra.mxu0 %v2028_v18 }
 0x341   :  { %v929_v19 = vpop.f32.mrb[10].mxu0 }
 0x342   :  { %v933_v20 = vmul.f32 %v929_v19, %v929_v19  ;;  %v1685_v21 = vpop.f32.mrb[11].mxu0  ;;  %v942_v28 = vrot.slane %v929_v19, %v2730_v5 }
 0x344   :  { %v935_v22 = vrot.slane %v933_v20, 7  ;;  %v943_v32 = vsub.f32 %v2827_v24, %v942_v28  ;;  %v944_v33 = vsub.f32 %v2829_v27, %v942_v28 }
 0x346   :  { %v937_v23 = vsub.f32 %v929_v19, %v935_v22 }
 0x348   :  { %v938_v25 = vmax.f32 %v937_v23, 0.0 }
 0x34a   :  { %v945_v26 = vadd.f32 1e-05, %v938_v25 }
 0x34c   :  { %2061 = vrsqrt.f32 %v945_v26 }
 0x356   :  { %v2062_v31 = vpop.eup %2061 }
 0x357   :  { %v950_v34 = vrot.slane %v2062_v31, %v2823_v9 }
 0x359   :  { %v951_v37 = vmul.f32 %v950_v34, %v943_v32  ;;  %v952_v38 = vmul.f32 %v950_v34, %v944_v33  ;;  %v1304_v32 = vsub.s32 5, %v2727_v4  ;;  %v1310_v33 = vsub.s32 6, %v2727_v4 }
 0x35b   :  { %v957_v40 = vmul.f32 %v956_v35, %v951_v37  ;;  %v958_v41 = vmul.f32 %v956_v35, %v952_v38 }
 0x35d   :  { %v963_v42 = vadd.f32 %v962_v39, %v957_v40  ;;  %v964_v43 = vadd.f32 %v962_v39, %v958_v41  ;;  %v1305_v39 = vrot.slane %v2735_v6, %v1304_v32 }
 0x35f   :  { %v965_v44 = vmax.f32 %v963_v42, 0.0  ;;  %v966_v45 = vmax.f32 %v964_v43, 0.0  ;;  %v1311_v42 = vrot.slane %v2735_v6, %v1310_v33 }
 0x361   :  { %v970_v46 = vrot.slane %v965_v44, 7  ;;  %v971_v47 = vrot.slane %v966_v45, 7  ;;  %v980_v49 = vrot.slane %v965_v44, 1  ;;  %v981_v24 = vrot.slane %v966_v45, 1  ;;  %1109 = vmatprep.mubr.f32.mxu1 %v965_v44 }
 0x363   :  { %v972_v27 = vsel %vm81_vm2, %v970_v46, %v971_v47  ;;  %975 = vst [vmem:[#allocation4] sm:$0xfe] %v970_v46  ;;  %v982_v50 = vsel %vm480_vm5, %v980_v49, %v981_v24  ;;  %986 = vst [vmem:[#allocation4 + $0x28] sm:$0x7f] %v981_v24 }
 0x364   :  { %1718 = vmatprep.mubr.f32.mxu0 %v982_v50 }
 0x36a   :  { %v987_v52 = vld [vmem:[#allocation4] sm:$0xff]  ;;  %v992_v53 = vld [vmem:[#allocation4 + $0x28] sm:$0xff] }
 0x36b   :  { %1110 = vmatmul.mubr.f32.vlgmr.msra.gmra.mrb[12].mxu1 %v987_v52  ;;  %1719 = vmatmul.mubr.f32.vlgmr.msra.gmra.mrb[12].mxu0 %v992_v53 }
 0x36c   :  { %1114 = vmatprep.mubr.f32.mxu1 %v966_v45  ;;  %2034 = vmatpush3.bf16.msra.mxu1 %v2747_v36 }
 0x36d   :  { %2035 = vmatprep.subr.bf16.mxu1 %v2068_v0 }
 0x36f   :  { %1115 = vmatmul.mubr.f32.gmra.mrb[14].mxu1 %v972_v27 }
 0x370   :  { %2037 = vmatpush3.bf16.msra.mxu1 %v2757_v48  ;;  %1753 = vmatprep.mubr.msk.f32.mxu1 %vm2069_vm6, %v2065_v3  ;;  %v1043_v3 = vsub.s32 4, %v2727_v4 }
 0x371   :  { %2038 = vmatprep.subr.bf16.mxu1 %v2068_v0 }
 0x374   :  { %2040 = vmatpush3.bf16.msra.mxu1 %v2767_v51  ;;  %v1044_v51 = vrot.slane %v2735_v6, %v1043_v3 }
 0x375   :  { %2041 = vmatprep.subr.bf16.mxu1 %v2068_v0 }
 0x378   :  { %2043 = vmatpush3.bf16.msra.mxu1 %v2777_v54 }
 0x379   :  { %2044 = vmatprep.subr.bf16.mxu1 %v2068_v0 }
 0x37c   :  { %2046 = vmatpush3.bf16.msra.mxu1 %v2787_v56 }
 0x37d   :  { %2047 = vmatprep.subr.bf16.mxu1 %v2068_v0 }
 0x380   :  { %2049 = vmatpush3.bf16.msra.mxu1 %v2797_v58 }
 0x381   :  { %2050 = vmatprep.subr.bf16.mxu1 %v2068_v0 }
 0x384   :  { %2052 = vmatpush3.bf16.msra.mxu1 %v2807_v61 }
 0x385   :  { %2053 = vmatprep.subr.bf16.mxu1 %v2068_v0 }
 0x388   :  { %2055 = vmatpush3.bf16.msra.mxu1 %v2818_v7 }
 0x43e   :  { %v1579_v36 = vpop.f32.mrb[12].mxu1  ;;  %v1720_v48 = vpop.f32.mrb[12].mxu0 }
 0x43f   :  { %v1580_v54 = vpop.f32.mrb[13].mxu1  ;;  %v1186_v56 = vpop.f32.mrb[13].mxu0 }
 0x440   :  { %v1581_v15 = vadd.f32 %v1580_v54, %v1579_v36 }
 0x442   :  { %v1112_v55 = vadd.f32 %v1581_v15, %v1044_v51  ;;  %v1582_v57 = vpop.f32.mrb[14].mxu1 }
 0x443   :  { %v1583_v58 = vpop.f32.mrb[15].mxu1 }
 0x444   :  { %v1187_v13 = vadd.f32 %v1186_v56, %v1112_v55  ;;  %v1584_v59 = vadd.f32 %v1583_v58, %v1582_v57 }
 0x446   :  { %v1117_v60 = vadd.f32 %v1584_v59, %v1044_v51  ;;  %v1202_v63 = vmul.f32 %v1187_v13, %v1187_v13 }
 0x448   :  { %v1192_v61 = vadd.f32 %v1720_v48, %v1117_v60 }
 0x44a   :  { %v1195_v0 = vadd.f32 %v1192_v61, %v1187_v13  ;;  %v1203_v2 = vmul.f32 %v1192_v61, %v1192_v61 }
 0x44c   :  { %v1196_v7 = vrot.slane %v1195_v0, 4  ;;  %v1204_v8 = vadd.f32 %v1203_v2, %v1202_v63 }
 0x44e   :  { %v1197_v1 = vadd.f32 %v1196_v7, %v1195_v0  ;;  %v1205_v10 = vrot.slane %v1204_v8, 4 }
 0x450   :  { %v1198_v11 = vrot.slane %v1197_v1, 2  ;;  %v1206_v12 = vadd.f32 %v1205_v10, %v1204_v8 }
 0x452   :  { %v1199_v62 = vadd.f32 %v1198_v11, %v1197_v1  ;;  %v1207_v14 = vrot.slane %v1206_v12, 2 }
 0x454   :  { %v1200_v16 = vrot.slane %v1199_v62, 1  ;;  %v1208_v17 = vadd.f32 %v1207_v14, %v1206_v12 }
 0x456   :  { %v1209_v18 = vrot.slane %v1208_v17, 1  ;;  %v1201_v19 = vadd.f32 %v1200_v16, %v1199_v62 }
 0x458   :  { %v1210_v20 = vadd.f32 %v1209_v18, %v1208_v17 }
 0x45a   :  { %v1211_v21 = vsel %vm81_vm2, %v1201_v19, %v1210_v20 }
 0x45b   :  { %1754 = vmatmul.mubr.f32.vlgmr.msra.gmra.mrb[16].mxu1 %v1211_v21 }
 0x52e   :  { %v1278_v22 = vpop.f32.mrb[16].mxu1 }
 0x52f   :  { %v1282_v23 = vmul.f32 %v1278_v22, %v1278_v22  ;;  %v1755_v25 = vpop.f32.mrb[17].mxu1  ;;  %v1291_v31 = vrot.slane %v1278_v22, %v2730_v5 }
 0x531   :  { %v1284_v26 = vrot.slane %v1282_v23, 7  ;;  %v1292_v35 = vsub.f32 %v1187_v13, %v1291_v31  ;;  %v1293_v37 = vsub.f32 %v1192_v61, %v1291_v31 }
 0x533   :  { %v1286_v28 = vsub.f32 %v1278_v22, %v1284_v26 }
 0x535   :  { %v1287_v29 = vmax.f32 %v1286_v28, 0.0 }
 0x537   :  { %v1294_v30 = vadd.f32 1e-05, %v1287_v29 }
 0x539   :  { %2063 = vrsqrt.f32 %v1294_v30 }
 0x543   :  { %v2064_v34 = vpop.eup %2063 }
 0x544   :  { %v1299_v38 = vrot.slane %v2064_v34, %v2823_v9 }
 0x546   :  { %v1300_v40 = vmul.f32 %v1299_v38, %v1292_v35  ;;  %v1301_v41 = vmul.f32 %v1299_v38, %v1293_v37 }
 0x548   :  { %v1306_v43 = vmul.f32 %v1305_v39, %v1300_v40  ;;  %v1307_v44 = vmul.f32 %v1305_v39, %v1301_v41 }
 0x54a   :  { %v1312_v45 = vadd.f32 %v1311_v42, %v1306_v43  ;;  %v1313_v46 = vadd.f32 %v1311_v42, %v1307_v44 }
 0x54c   :  { %v1314_v5 = vmax.f32 %v1312_v45, 0.0  ;;  %v1315_v47 = vmax.f32 %v1313_v46, 0.0 }
 0x54e   :  { %1316 = vst [vmem:[%s3032_s7] sm:$0xff] %v1314_v5  ;;  %1317 = vst [vmem:[%s3032_s7 + $0x8] sm:$0xff] %v1315_v47 }

</bundles_post_ra>
